<compile_context>
chip_gen: v7x
topology: tpu7x:2x2x1
jax: 0.10.0
libtpu: 0.0.40
codegen_flags: <defaults>
</compile_context>

<pallas_src>
import functools

import jax
import jax.numpy as jnp
from jax.experimental import pallas as pl
from jax.experimental.pallas import tpu as pltpu

QBITS = 8
QMAX = float(2 ** (QBITS - 1) - 1)  # 127

C1_OUT = 20        # conv1 output channels
C2_OUT = 50        # conv2 output channels
C2_PAD = 128       # conv2 channels padded to a full lane tile
FC1_OUT = 500
FC1_PAD = 512      # fc1 outputs padded to full lane tiles
OUT_PAD = 128      # classifier logits padded to a full lane tile
C1_CHUNK = 72      # conv1 M-tile (divides 144*bb for every bb) -> 9-vreg acc
C2_CHUNK = 64      # conv2 M-tile -> (64,128) f32 accumulator = 8 vregs


# ----------------------------------------------------------------------------
# One-time weight preparation (fake-quant + layout) — outside the hot path
# ----------------------------------------------------------------------------
def _fake_quant_per_out_channel(w):
    """Symmetric 8-bit fake quantization, one scale per output channel (dim 0)."""
    flat = w.reshape(w.shape[0], -1)
    amax = jnp.max(jnp.abs(flat), axis=1, keepdims=True)
    scale = jnp.maximum(amax, 1e-8) / QMAX
    q = jnp.clip(jnp.round(flat / scale), -QMAX, QMAX) * scale
    return q.reshape(w.shape)


def prepare_params(params):
    w1q = _fake_quant_per_out_channel(params["conv1_w"])   # (20, C, 5, 5)
    w2q = _fake_quant_per_out_channel(params["conv2_w"])   # (50, 20, 5, 5)
    f1q = _fake_quant_per_out_channel(params["fc1_w"])     # (500, 800)
    f2q = _fake_quant_per_out_channel(params["fc2_w"])     # (nc, 500)

    cin = w1q.shape[1]
    # conv1: (out, cin, kh, kw) -> (kh*kw*cin, out); matches patch column order.
    w1 = jnp.transpose(w1q, (2, 3, 1, 0)).reshape(25 * cin, C1_OUT)
    # conv2: one (cin=20, out) slab per 5x5 tap, out channels padded 50 -> 128.
    w2 = jnp.transpose(w2q, (2, 3, 1, 0)).reshape(25, C1_OUT, C2_OUT)
    w2 = jnp.pad(w2, ((0, 0), (0, 0), (0, C2_PAD - C2_OUT)))
    # fc1: PyTorch flattens NCHW, feature f = c*16 + (py*4 + px).  The kernel
    # accumulates fc1 as 16 per-pool-slot matmuls over (batch, 128ch) tiles, so
    # lay the weights out as (slot p, padded channel, padded out) slabs.
    f1 = f1q.T.reshape(C2_OUT, 16, FC1_OUT)                    # (c, p, out)
    f1 = jnp.transpose(f1, (1, 0, 2))                          # (p, c, out)
    f1 = jnp.pad(f1, ((0, 0), (0, C2_PAD - C2_OUT), (0, FC1_PAD - FC1_OUT)))
    # fc2: (nc, 500) -> (512, 128) with zero padding; logits sliced outside.
    num_classes = f2q.shape[0]
    f2 = jnp.pad(f2q.T, ((0, FC1_PAD - FC1_OUT), (0, OUT_PAD - num_classes)))

    return {
        "w1": w1.astype(jnp.bfloat16),
        "b1": params["conv1_b"].reshape(1, C1_OUT).astype(jnp.float32),
        "w2": w2.astype(jnp.bfloat16),
        "b2": jnp.pad(params["conv2_b"], (0, C2_PAD - C2_OUT))
                 .reshape(1, C2_PAD).astype(jnp.float32),
        "wfc1": f1.astype(jnp.bfloat16),                        # (16, 128, 512)
        "bfc1": jnp.pad(params["fc1_b"], (0, FC1_PAD - FC1_OUT))
                   .reshape(1, FC1_PAD).astype(jnp.float32),
        "wfc2": f2.astype(jnp.bfloat16),                        # (512, 128)
        "bfc2": jnp.pad(params["fc2_b"], (0, OUT_PAD - num_classes))
                   .reshape(1, OUT_PAD).astype(jnp.float32),
    }


# ----------------------------------------------------------------------------
# Fused Pallas kernel: the whole network, intermediates resident in VMEM
# ----------------------------------------------------------------------------
def _lenet5_fused_kernel(p1_ref, w1_ref, b1_ref, w2_ref, b2_ref,
                         wfc1_ref, bfc1_ref, wfc2_ref, bfc2_ref,
                         o_ref, pool1_ref, c2_ref, *, bb):
    n_pool1 = 144 * bb     # pooled 12x12 rows per batch block, ordered (y, x, b)
    n_c2 = 92 * bb         # conv2 rows actually consumed by pool2 / fc1

    # ---- conv1 (im2col GEMM) + MaxPool(2,2) + bias + ReLU, M-tiled ----------
    # p1 rows are ordered (pool-window slot q, y, x, b): pooling is an
    # elementwise max over the four q blocks.  Row chunks keep each (72,20) f32
    # accumulator in vregs; the result is stored once as bf16.
    for r0 in range(0, n_pool1, C1_CHUNK):
        m = None
        for q in range(4):
            s0 = q * n_pool1 + r0
            d = jnp.dot(p1_ref[s0:s0 + C1_CHUNK, :], w1_ref[...],
                        preferred_element_type=jnp.float32)
            m = d if m is None else jnp.maximum(m, d)
        m = jnp.maximum(m + b1_ref[...], 0.0)
        pool1_ref[r0:r0 + C1_CHUNK, :] = m.astype(pool1_ref.dtype)

    # ---- conv2: every 5x5 tap is a constant row offset into the pooled map --
    # 25 small MXU matmuls per 64-row chunk, accumulated as a straight chain
    # into a (chunk, 128) f32 register accumulator, then one store per chunk.
    # Tap reads for the consumed rows never cross an image (batch is the
    # innermost, stride-1 row index).
    for r0 in range(0, n_c2, C2_CHUNK):
        rows = min(C2_CHUNK, n_c2 - r0)
        acc = jnp.zeros((rows, C2_PAD), jnp.float32)
        for t in range(25):
            off = ((t // 5) * 12 + (t % 5)) * bb
            tap = pool1_ref[r0 + off:r0 + off + rows, :]
            acc = acc + jnp.dot(tap, w2_ref[t],
                                preferred_element_type=jnp.float32)
        c2_ref[r0:r0 + rows, :] = acc

    # ---- MaxPool(2,2) + bias + ReLU fused with fc1: 16 pool-2 slots, each is
    # 4 contiguous (bb,128) slices -> max -> relu -> one matmul accumulated
    # into h1.  (PyTorch's NCHW flatten order is folded into wfc1's layout.)
    h1 = jnp.zeros((bb, wfc1_ref.shape[2]), jnp.float32)
    for p in range(16):
        py, px = p // 4, p % 4
        base = (24 * py + 2 * px) * bb
        s = jnp.maximum(
            jnp.maximum(c2_ref[base:base + bb, :],
                        c2_ref[base + bb:base + 2 * bb, :]),
            jnp.maximum(c2_ref[base + 12 * bb:base + 13 * bb, :],
                        c2_ref[base + 13 * bb:base + 14 * bb, :]))
        s = jnp.maximum(s + b2_ref[...], 0.0).astype(jnp.bfloat16)
        h1 = h1 + jnp.dot(s, wfc1_ref[p], preferred_element_type=jnp.float32)

    # ---- classifier tail: fc1 bias + ReLU, fc2 (lane-padded 128-wide output) -
    h1 = jnp.maximum(h1 + bfc1_ref[...], 0.0).astype(jnp.bfloat16)
    out = jnp.dot(h1, wfc2_ref[...], preferred_element_type=jnp.float32)
    o_ref[...] = (out + bfc2_ref[...]).astype(o_ref.dtype)


# ----------------------------------------------------------------------------
# Wrapper / glue
# ----------------------------------------------------------------------------
def _build_conv1_patches(x, bb):
    """im2col for conv1.  Rows are ordered (batch-block, pool-slot q, y, x,
    in-block batch b) over the 12x12 pooled grid, so MaxPool2d(2,2) is a max of
    contiguous blocks and each pool-2 slot is a contiguous (bb, ch) slice later
    on.  Tiny XLA gather on the raw input; runs once before the fused kernel."""
    B, C, H, W = x.shape
    assert H == 28 and W == 28, "LeNet5 classifier requires 28x28 inputs"
    q = jnp.arange(4)
    yv = jnp.arange(12)
    dv = jnp.arange(5)
    hi = 2 * yv[None, :, None] + (q // 2)[:, None, None] + dv[None, None, :]  # (4,12,5)
    wi = 2 * yv[None, :, None] + (q % 2)[:, None, None] + dv[None, None, :]   # (4,12,5)
    patches = x[
        jnp.arange(B)[:, None, None, None, None, None, None],
        jnp.arange(C)[None, None, None, None, None, None, :],
        hi[None, :, :, None, :, None, None],
        wi[None, :, None, :, None, :, None],
    ]                                                   # (B, 4, 12, 12, 5, 5, C)
    K = 25 * C
    bg = B // bb
    p = patches.reshape(bg, bb, 4, 12, 12, K)
    p = jnp.transpose(p, (0, 2, 3, 4, 1, 5))            # (bg, 4, 12, 12, bb, K)
    return p.reshape(bg * 4 * 144 * bb, K).astype(jnp.bfloat16)


def lenet5_quantized_forward(qparams, x, *, num_classes=10, batch_block=None):
    """Forward of LeNet5_quantized_granularity_kernel as one fused pallas_call
    (1-D parallel grid over batch blocks)."""
    B = x.shape[0]
    if batch_block is None:
        # Keep blocks either == B (single grid step) or a multiple of 8 so the
        # batch-blocked output tile stays sublane-aligned when the grid > 1.
        if B % 16 == 0 and B > 16:
            batch_block = 16
        elif B % 8 == 0 and B > 8:
            batch_block = 8
        else:
            batch_block = B
    assert B % batch_block == 0
    bb = batch_block
    bg = B // bb

    p1 = _build_conv1_patches(x, bb)
    K = p1.shape[1]

    n_pool1 = 144 * bb
    n_c2 = 92 * bb            # last conv2 tap read lands exactly on row 144*bb-1

    kernel = functools.partial(_lenet5_fused_kernel, bb=bb)
    grid_spec = pltpu.PrefetchScalarGridSpec(
        num_scalar_prefetch=0,
        grid=(bg,),
        in_specs=[
            pl.BlockSpec((4 * n_pool1, K), lambda i: (i, 0)),       # conv1 patches
            pl.BlockSpec(tuple(qparams["w1"].shape), lambda i: (0, 0)),
            pl.BlockSpec(tuple(qparams["b1"].shape), lambda i: (0, 0)),
            pl.BlockSpec(tuple(qparams["w2"].shape), lambda i: (0, 0, 0)),
            pl.BlockSpec(tuple(qparams["b2"].shape), lambda i: (0, 0)),
            pl.BlockSpec(tuple(qparams["wfc1"].shape), lambda i: (0, 0, 0)),
            pl.BlockSpec(tuple(qparams["bfc1"].shape), lambda i: (0, 0)),
            pl.BlockSpec(tuple(qparams["wfc2"].shape), lambda i: (0, 0)),
            pl.BlockSpec(tuple(qparams["bfc2"].shape), lambda i: (0, 0)),
        ],
        out_specs=pl.BlockSpec((bb, OUT_PAD), lambda i: (i, 0)),
        scratch_shapes=[
            pltpu.VMEM((n_pool1, C1_OUT), jnp.bfloat16),   # pooled conv1 map (bf16, cast once)
            pltpu.VMEM((n_c2, C2_PAD), jnp.float32),       # conv2 rows consumed by pool2/fc1
        ],
    )
    out = pl.pallas_call(
        kernel,
        out_shape=jax.ShapeDtypeStruct((B, OUT_PAD), jnp.float32),
        grid_spec=grid_spec,
        compiler_params=pltpu.CompilerParams(
            dimension_semantics=("parallel",)),
    )(p1, qparams["w1"], qparams["b1"], qparams["w2"], qparams["b2"],
      qparams["wfc1"], qparams["bfc1"], qparams["wfc2"], qparams["bfc2"])
    return out[:, :num_classes]


# ----------------------------------------------------------------------------
# Parameters (deterministic, kaiming-normal like the reference normal_init)
# ----------------------------------------------------------------------------
def init_params(key, in_channels=1, num_classes=10):
    ks = jax.random.split(key, 8)

    def kaiming(k_, shape, fan_in):
        return jax.random.normal(k_, shape, jnp.float32) * jnp.sqrt(2.0 / fan_in)

    return {
        "conv1_w": kaiming(ks[0], (C1_OUT, in_channels, 5, 5), in_channels * 25),
        "conv1_b": jax.random.uniform(ks[1], (C1_OUT,), jnp.float32, -0.1, 0.1),
        "conv2_w": kaiming(ks[2], (C2_OUT, C1_OUT, 5, 5), C1_OUT * 25),
        "conv2_b": jax.random.uniform(ks[3], (C2_OUT,), jnp.float32, -0.1, 0.1),
        "fc1_w": kaiming(ks[4], (FC1_OUT, 4 * 4 * C2_OUT), 4 * 4 * C2_OUT),
        "fc1_b": jax.random.uniform(ks[5], (FC1_OUT,), jnp.float32, -0.1, 0.1),
        "fc2_w": kaiming(ks[6], (num_classes, FC1_OUT), FC1_OUT),
        "fc2_b": jax.random.uniform(ks[7], (num_classes,), jnp.float32, -0.1, 0.1),
    }


if __name__ == "__main__":
    key = jax.random.PRNGKey(0)
    pkey, xkey = jax.random.split(key)
    params = init_params(pkey)
    qparams = prepare_params(params)          # one-time: fake-quant + weight layout
    # Input shape implied by the module: 28x28 so the feature map flattens to 4*4*50.
    x = jax.random.normal(xkey, (2, 1, 28, 28), jnp.float32)
    fwd = jax.jit(lenet5_quantized_forward,
                  static_argnames=("num_classes", "batch_block"))
    out = jax.block_until_ready(fwd(qparams, x))
    assert out.shape == (2, 10) and out.dtype == jnp.float32
    assert bool(jnp.all(jnp.isfinite(out)))
    print("KERNEL_OK")
</pallas_src>

<mosaic_0001>
module attributes {stable_mosaic.version = 11 : i64} {
  func.func @_lenet5_fused_kernel(%arg0: i32, %arg1: memref<1152x25xbf16, #tpu.memory_space<vmem>>, %arg2: memref<25x20xbf16, #tpu.memory_space<vmem>>, %arg3: memref<1x20xf32, #tpu.memory_space<vmem>>, %arg4: memref<25x20x128xbf16, #tpu.memory_space<vmem>>, %arg5: memref<1x128xf32, #tpu.memory_space<vmem>>, %arg6: memref<16x128x512xbf16, #tpu.memory_space<vmem>>, %arg7: memref<1x512xf32, #tpu.memory_space<vmem>>, %arg8: memref<512x128xbf16, #tpu.memory_space<vmem>>, %arg9: memref<1x128xf32, #tpu.memory_space<vmem>>, %arg10: memref<2x128xf32, #tpu.memory_space<vmem>>, %arg11: memref<288x20xbf16, #tpu.memory_space<vmem>>, %arg12: memref<184x128xf32, #tpu.memory_space<vmem>>) attributes {dimension_semantics = [#tpu.dimension_semantics<parallel>], iteration_bounds = array<i64: 1>, scalar_prefetch = 0 : i64, scratch_operands = 2 : i64, tpu.core_type = #tpu.core_type<tc>, window_params = [{transform_indices = @transform_0, window_bounds = array<i64: 1152, 25>}, {pipeline_mode = #tpu.pipeline_mode<synchronous>, transform_indices = @transform_1, window_bounds = array<i64: 25, 20>}, {pipeline_mode = #tpu.pipeline_mode<synchronous>, transform_indices = @transform_2, window_bounds = array<i64: 1, 20>}, {pipeline_mode = #tpu.pipeline_mode<synchronous>, transform_indices = @transform_3, window_bounds = array<i64: 25, 20, 128>}, {pipeline_mode = #tpu.pipeline_mode<synchronous>, transform_indices = @transform_4, window_bounds = array<i64: 1, 128>}, {pipeline_mode = #tpu.pipeline_mode<synchronous>, transform_indices = @transform_5, window_bounds = array<i64: 16, 128, 512>}, {pipeline_mode = #tpu.pipeline_mode<synchronous>, transform_indices = @transform_6, window_bounds = array<i64: 1, 512>}, {pipeline_mode = #tpu.pipeline_mode<synchronous>, transform_indices = @transform_7, window_bounds = array<i64: 512, 128>}, {pipeline_mode = #tpu.pipeline_mode<synchronous>, transform_indices = @transform_8, window_bounds = array<i64: 1, 128>}, {transform_indices = @transform_9, window_bounds = array<i64: 2, 128>}]} {
    %c0 = arith.constant 0 : index
    %c0_0 = arith.constant 0 : index
    %0 = vector.load %arg1[%c0, %c0_0] : memref<1152x25xbf16, #tpu.memory_space<vmem>>, vector<72x25xbf16>
    %c0_1 = arith.constant 0 : index
    %c0_2 = arith.constant 0 : index
    %1 = vector.load %arg2[%c0_1, %c0_2] : memref<25x20xbf16, #tpu.memory_space<vmem>>, vector<25x20xbf16>
    %cst = arith.constant dense<0.000000e+00> : vector<72x20xf32>
    %2 = tpu.matmul %0, %1, %cst {dimension_numbers = #tpu.dot_dimension_numbers<[1], [0], [0], [1], [0, 0, 1, 1], [], []>} : vector<72x25xbf16>, vector<25x20xbf16>, vector<72x20xf32> -> vector<72x20xf32>
    %c288 = arith.constant 288 : index
    %c0_3 = arith.constant 0 : index
    %3 = vector.load %arg1[%c288, %c0_3] : memref<1152x25xbf16, #tpu.memory_space<vmem>>, vector<72x25xbf16>
    %c0_4 = arith.constant 0 : index
    %c0_5 = arith.constant 0 : index
    %4 = vector.load %arg2[%c0_4, %c0_5] : memref<25x20xbf16, #tpu.memory_space<vmem>>, vector<25x20xbf16>
    %cst_6 = arith.constant dense<0.000000e+00> : vector<72x20xf32>
    %5 = tpu.matmul %3, %4, %cst_6 {dimension_numbers = #tpu.dot_dimension_numbers<[1], [0], [0], [1], [0, 0, 1, 1], [], []>} : vector<72x25xbf16>, vector<25x20xbf16>, vector<72x20xf32> -> vector<72x20xf32>
    %6 = arith.maximumf %2, %5 : vector<72x20xf32>
    %c576 = arith.constant 576 : index
    %c0_7 = arith.constant 0 : index
    %7 = vector.load %arg1[%c576, %c0_7] : memref<1152x25xbf16, #tpu.memory_space<vmem>>, vector<72x25xbf16>
    %c0_8 = arith.constant 0 : index
    %c0_9 = arith.constant 0 : index
    %8 = vector.load %arg2[%c0_8, %c0_9] : memref<25x20xbf16, #tpu.memory_space<vmem>>, vector<25x20xbf16>
    %cst_10 = arith.constant dense<0.000000e+00> : vector<72x20xf32>
    %9 = tpu.matmul %7, %8, %cst_10 {dimension_numbers = #tpu.dot_dimension_numbers<[1], [0], [0], [1], [0, 0, 1, 1], [], []>} : vector<72x25xbf16>, vector<25x20xbf16>, vector<72x20xf32> -> vector<72x20xf32>
    %10 = arith.maximumf %6, %9 : vector<72x20xf32>
    %c864 = arith.constant 864 : index
    %c0_11 = arith.constant 0 : index
    %11 = vector.load %arg1[%c864, %c0_11] : memref<1152x25xbf16, #tpu.memory_space<vmem>>, vector<72x25xbf16>
    %c0_12 = arith.constant 0 : index
    %c0_13 = arith.constant 0 : index
    %12 = vector.load %arg2[%c0_12, %c0_13] : memref<25x20xbf16, #tpu.memory_space<vmem>>, vector<25x20xbf16>
    %cst_14 = arith.constant dense<0.000000e+00> : vector<72x20xf32>
    %13 = tpu.matmul %11, %12, %cst_14 {dimension_numbers = #tpu.dot_dimension_numbers<[1], [0], [0], [1], [0, 0, 1, 1], [], []>} : vector<72x25xbf16>, vector<25x20xbf16>, vector<72x20xf32> -> vector<72x20xf32>
    %14 = arith.maximumf %10, %13 : vector<72x20xf32>
    %c0_15 = arith.constant 0 : index
    %c0_16 = arith.constant 0 : index
    %15 = vector.load %arg3[%c0_15, %c0_16] : memref<1x20xf32, #tpu.memory_space<vmem>>, vector<1x20xf32>
    %16 = vector.broadcast %15 : vector<1x20xf32> to vector<72x20xf32>
    %17 = arith.addf %14, %16 : vector<72x20xf32>
    %cst_17 = arith.constant 0.000000e+00 : f32
    %18 = vector.broadcast %cst_17 : f32 to vector<72x20xf32>
    %19 = arith.maximumf %17, %18 : vector<72x20xf32>
    %20 = arith.truncf %19 : vector<72x20xf32> to vector<72x20xbf16>
    %c0_18 = arith.constant 0 : index
    %c0_19 = arith.constant 0 : index
    %21 = vector.load %arg11[%c0_18, %c0_19] : memref<288x20xbf16, #tpu.memory_space<vmem>>, vector<72x20xbf16>
    tpu.vector_store %arg11[%c0_18, %c0_19], %20 {strides = array<i32>} : memref<288x20xbf16, #tpu.memory_space<vmem>>, vector<72x20xbf16>,
    %c72 = arith.constant 72 : index
    %c0_20 = arith.constant 0 : index
    %22 = vector.load %arg1[%c72, %c0_20] : memref<1152x25xbf16, #tpu.memory_space<vmem>>, vector<72x25xbf16>
    %c0_21 = arith.constant 0 : index
    %c0_22 = arith.constant 0 : index
    %23 = vector.load %arg2[%c0_21, %c0_22] : memref<25x20xbf16, #tpu.memory_space<vmem>>, vector<25x20xbf16>
    %cst_23 = arith.constant dense<0.000000e+00> : vector<72x20xf32>
    %24 = tpu.matmul %22, %23, %cst_23 {dimension_numbers = #tpu.dot_dimension_numbers<[1], [0], [0], [1], [0, 0, 1, 1], [], []>} : vector<72x25xbf16>, vector<25x20xbf16>, vector<72x20xf32> -> vector<72x20xf32>
    %c360 = arith.constant 360 : index
    %c0_24 = arith.constant 0 : index
    %25 = vector.load %arg1[%c360, %c0_24] : memref<1152x25xbf16, #tpu.memory_space<vmem>>, vector<72x25xbf16>
    %c0_25 = arith.constant 0 : index
    %c0_26 = arith.constant 0 : index
    %26 = vector.load %arg2[%c0_25, %c0_26] : memref<25x20xbf16, #tpu.memory_space<vmem>>, vector<25x20xbf16>
    %cst_27 = arith.constant dense<0.000000e+00> : vector<72x20xf32>
    %27 = tpu.matmul %25, %26, %cst_27 {dimension_numbers = #tpu.dot_dimension_numbers<[1], [0], [0], [1], [0, 0, 1, 1], [], []>} : vector<72x25xbf16>, vector<25x20xbf16>, vector<72x20xf32> -> vector<72x20xf32>
    %28 = arith.maximumf %24, %27 : vector<72x20xf32>
    %c648 = arith.constant 648 : index
    %c0_28 = arith.constant 0 : index
    %29 = vector.load %arg1[%c648, %c0_28] : memref<1152x25xbf16, #tpu.memory_space<vmem>>, vector<72x25xbf16>
    %c0_29 = arith.constant 0 : index
    %c0_30 = arith.constant 0 : index
    %30 = vector.load %arg2[%c0_29, %c0_30] : memref<25x20xbf16, #tpu.memory_space<vmem>>, vector<25x20xbf16>
    %cst_31 = arith.constant dense<0.000000e+00> : vector<72x20xf32>
    %31 = tpu.matmul %29, %30, %cst_31 {dimension_numbers = #tpu.dot_dimension_numbers<[1], [0], [0], [1], [0, 0, 1, 1], [], []>} : vector<72x25xbf16>, vector<25x20xbf16>, vector<72x20xf32> -> vector<72x20xf32>
    %32 = arith.maximumf %28, %31 : vector<72x20xf32>
    %c936 = arith.constant 936 : index
    %c0_32 = arith.constant 0 : index
    %33 = vector.load %arg1[%c936, %c0_32] : memref<1152x25xbf16, #tpu.memory_space<vmem>>, vector<72x25xbf16>
    %c0_33 = arith.constant 0 : index
    %c0_34 = arith.constant 0 : index
    %34 = vector.load %arg2[%c0_33, %c0_34] : memref<25x20xbf16, #tpu.memory_space<vmem>>, vector<25x20xbf16>
    %cst_35 = arith.constant dense<0.000000e+00> : vector<72x20xf32>
    %35 = tpu.matmul %33, %34, %cst_35 {dimension_numbers = #tpu.dot_dimension_numbers<[1], [0], [0], [1], [0, 0, 1, 1], [], []>} : vector<72x25xbf16>, vector<25x20xbf16>, vector<72x20xf32> -> vector<72x20xf32>
    %36 = arith.maximumf %32, %35 : vector<72x20xf32>
    %c0_36 = arith.constant 0 : index
    %c0_37 = arith.constant 0 : index
    %37 = vector.load %arg3[%c0_36, %c0_37] : memref<1x20xf32, #tpu.memory_space<vmem>>, vector<1x20xf32>
    %38 = vector.broadcast %37 : vector<1x20xf32> to vector<72x20xf32>
    %39 = arith.addf %36, %38 : vector<72x20xf32>
    %cst_38 = arith.constant 0.000000e+00 : f32
    %40 = vector.broadcast %cst_38 : f32 to vector<72x20xf32>
    %41 = arith.maximumf %39, %40 : vector<72x20xf32>
    %42 = arith.truncf %41 : vector<72x20xf32> to vector<72x20xbf16>
    %c72_39 = arith.constant 72 : index
    %c0_40 = arith.constant 0 : index
    %43 = vector.load %arg11[%c72_39, %c0_40] : memref<288x20xbf16, #tpu.memory_space<vmem>>, vector<72x20xbf16>
    tpu.vector_store %arg11[%c72_39, %c0_40], %42 {strides = array<i32>} : memref<288x20xbf16, #tpu.memory_space<vmem>>, vector<72x20xbf16>,
    %c144 = arith.constant 144 : index
    %c0_41 = arith.constant 0 : index
    %44 = vector.load %arg1[%c144, %c0_41] : memref<1152x25xbf16, #tpu.memory_space<vmem>>, vector<72x25xbf16>
    %c0_42 = arith.constant 0 : index
    %c0_43 = arith.constant 0 : index
    %45 = vector.load %arg2[%c0_42, %c0_43] : memref<25x20xbf16, #tpu.memory_space<vmem>>, vector<25x20xbf16>
    %cst_44 = arith.constant dense<0.000000e+00> : vector<72x20xf32>
    %46 = tpu.matmul %44, %45, %cst_44 {dimension_numbers = #tpu.dot_dimension_numbers<[1], [0], [0], [1], [0, 0, 1, 1], [], []>} : vector<72x25xbf16>, vector<25x20xbf16>, vector<72x20xf32> -> vector<72x20xf32>
    %c432 = arith.constant 432 : index
    %c0_45 = arith.constant 0 : index
    %47 = vector.load %arg1[%c432, %c0_45] : memref<1152x25xbf16, #tpu.memory_space<vmem>>, vector<72x25xbf16>
    %c0_46 = arith.constant 0 : index
    %c0_47 = arith.constant 0 : index
    %48 = vector.load %arg2[%c0_46, %c0_47] : memref<25x20xbf16, #tpu.memory_space<vmem>>, vector<25x20xbf16>
    %cst_48 = arith.constant dense<0.000000e+00> : vector<72x20xf32>
    %49 = tpu.matmul %47, %48, %cst_48 {dimension_numbers = #tpu.dot_dimension_numbers<[1], [0], [0], [1], [0, 0, 1, 1], [], []>} : vector<72x25xbf16>, vector<25x20xbf16>, vector<72x20xf32> -> vector<72x20xf32>
    %50 = arith.maximumf %46, %49 : vector<72x20xf32>
    %c720 = arith.constant 720 : index
    %c0_49 = arith.constant 0 : index
    %51 = vector.load %arg1[%c720, %c0_49] : memref<1152x25xbf16, #tpu.memory_space<vmem>>, vector<72x25xbf16>
    %c0_50 = arith.constant 0 : index
    %c0_51 = arith.constant 0 : index
    %52 = vector.load %arg2[%c0_50, %c0_51] : memref<25x20xbf16, #tpu.memory_space<vmem>>, vector<25x20xbf16>
    %cst_52 = arith.constant dense<0.000000e+00> : vector<72x20xf32>
    %53 = tpu.matmul %51, %52, %cst_52 {dimension_numbers = #tpu.dot_dimension_numbers<[1], [0], [0], [1], [0, 0, 1, 1], [], []>} : vector<72x25xbf16>, vector<25x20xbf16>, vector<72x20xf32> -> vector<72x20xf32>
    %54 = arith.maximumf %50, %53 : vector<72x20xf32>
    %c1008 = arith.constant 1008 : index
    %c0_53 = arith.constant 0 : index
    %55 = vector.load %arg1[%c1008, %c0_53] : memref<1152x25xbf16, #tpu.memory_space<vmem>>, vector<72x25xbf16>
    %c0_54 = arith.constant 0 : index
    %c0_55 = arith.constant 0 : index
    %56 = vector.load %arg2[%c0_54, %c0_55] : memref<25x20xbf16, #tpu.memory_space<vmem>>, vector<25x20xbf16>
    %cst_56 = arith.constant dense<0.000000e+00> : vector<72x20xf32>
    %57 = tpu.matmul %55, %56, %cst_56 {dimension_numbers = #tpu.dot_dimension_numbers<[1], [0], [0], [1], [0, 0, 1, 1], [], []>} : vector<72x25xbf16>, vector<25x20xbf16>, vector<72x20xf32> -> vector<72x20xf32>
    %58 = arith.maximumf %54, %57 : vector<72x20xf32>
    %c0_57 = arith.constant 0 : index
    %c0_58 = arith.constant 0 : index
    %59 = vector.load %arg3[%c0_57, %c0_58] : memref<1x20xf32, #tpu.memory_space<vmem>>, vector<1x20xf32>
    %60 = vector.broadcast %59 : vector<1x20xf32> to vector<72x20xf32>
    %61 = arith.addf %58, %60 : vector<72x20xf32>
    %cst_59 = arith.constant 0.000000e+00 : f32
    %62 = vector.broadcast %cst_59 : f32 to vector<72x20xf32>
    %63 = arith.maximumf %61, %62 : vector<72x20xf32>
    %64 = arith.truncf %63 : vector<72x20xf32> to vector<72x20xbf16>
    %c144_60 = arith.constant 144 : index
    %c0_61 = arith.constant 0 : index
    %65 = vector.load %arg11[%c144_60, %c0_61] : memref<288x20xbf16, #tpu.memory_space<vmem>>, vector<72x20xbf16>
    tpu.vector_store %arg11[%c144_60, %c0_61], %64 {strides = array<i32>} : memref<288x20xbf16, #tpu.memory_space<vmem>>, vector<72x20xbf16>,
    %c216 = arith.constant 216 : index
    %c0_62 = arith.constant 0 : index
    %66 = vector.load %arg1[%c216, %c0_62] : memref<1152x25xbf16, #tpu.memory_space<vmem>>, vector<72x25xbf16>
    %c0_63 = arith.constant 0 : index
    %c0_64 = arith.constant 0 : index
    %67 = vector.load %arg2[%c0_63, %c0_64] : memref<25x20xbf16, #tpu.memory_space<vmem>>, vector<25x20xbf16>
    %cst_65 = arith.constant dense<0.000000e+00> : vector<72x20xf32>
    %68 = tpu.matmul %66, %67, %cst_65 {dimension_numbers = #tpu.dot_dimension_numbers<[1], [0], [0], [1], [0, 0, 1, 1], [], []>} : vector<72x25xbf16>, vector<25x20xbf16>, vector<72x20xf32> -> vector<72x20xf32>
    %c504 = arith.constant 504 : index
    %c0_66 = arith.constant 0 : index
    %69 = vector.load %arg1[%c504, %c0_66] : memref<1152x25xbf16, #tpu.memory_space<vmem>>, vector<72x25xbf16>
    %c0_67 = arith.constant 0 : index
    %c0_68 = arith.constant 0 : index
    %70 = vector.load %arg2[%c0_67, %c0_68] : memref<25x20xbf16, #tpu.memory_space<vmem>>, vector<25x20xbf16>
    %cst_69 = arith.constant dense<0.000000e+00> : vector<72x20xf32>
    %71 = tpu.matmul %69, %70, %cst_69 {dimension_numbers = #tpu.dot_dimension_numbers<[1], [0], [0], [1], [0, 0, 1, 1], [], []>} : vector<72x25xbf16>, vector<25x20xbf16>, vector<72x20xf32> -> vector<72x20xf32>
    %72 = arith.maximumf %68, %71 : vector<72x20xf32>
    %c792 = arith.constant 792 : index
    %c0_70 = arith.constant 0 : index
    %73 = vector.load %arg1[%c792, %c0_70] : memref<1152x25xbf16, #tpu.memory_space<vmem>>, vector<72x25xbf16>
    %c0_71 = arith.constant 0 : index
    %c0_72 = arith.constant 0 : index
    %74 = vector.load %arg2[%c0_71, %c0_72] : memref<25x20xbf16, #tpu.memory_space<vmem>>, vector<25x20xbf16>
    %cst_73 = arith.constant dense<0.000000e+00> : vector<72x20xf32>
    %75 = tpu.matmul %73, %74, %cst_73 {dimension_numbers = #tpu.dot_dimension_numbers<[1], [0], [0], [1], [0, 0, 1, 1], [], []>} : vector<72x25xbf16>, vector<25x20xbf16>, vector<72x20xf32> -> vector<72x20xf32>
    %76 = arith.maximumf %72, %75 : vector<72x20xf32>
    %c1080 = arith.constant 1080 : index
    %c0_74 = arith.constant 0 : index
    %77 = vector.load %arg1[%c1080, %c0_74] : memref<1152x25xbf16, #tpu.memory_space<vmem>>, vector<72x25xbf16>
    %c0_75 = arith.constant 0 : index
    %c0_76 = arith.constant 0 : index
    %78 = vector.load %arg2[%c0_75, %c0_76] : memref<25x20xbf16, #tpu.memory_space<vmem>>, vector<25x20xbf16>
    %cst_77 = arith.constant dense<0.000000e+00> : vector<72x20xf32>
    %79 = tpu.matmul %77, %78, %cst_77 {dimension_numbers = #tpu.dot_dimension_numbers<[1], [0], [0], [1], [0, 0, 1, 1], [], []>} : vector<72x25xbf16>, vector<25x20xbf16>, vector<72x20xf32> -> vector<72x20xf32>
    %80 = arith.maximumf %76, %79 : vector<72x20xf32>
    %c0_78 = arith.constant 0 : index
    %c0_79 = arith.constant 0 : index
    %81 = vector.load %arg3[%c0_78, %c0_79] : memref<1x20xf32, #tpu.memory_space<vmem>>, vector<1x20xf32>
    %82 = vector.broadcast %81 : vector<1x20xf32> to vector<72x20xf32>
    %83 = arith.addf %80, %82 : vector<72x20xf32>
    %cst_80 = arith.constant 0.000000e+00 : f32
    %84 = vector.broadcast %cst_80 : f32 to vector<72x20xf32>
    %85 = arith.maximumf %83, %84 : vector<72x20xf32>
    %86 = arith.truncf %85 : vector<72x20xf32> to vector<72x20xbf16>
    %c216_81 = arith.constant 216 : index
    %c0_82 = arith.constant 0 : index
    %87 = vector.load %arg11[%c216_81, %c0_82] : memref<288x20xbf16, #tpu.memory_space<vmem>>, vector<72x20xbf16>
    tpu.vector_store %arg11[%c216_81, %c0_82], %86 {strides = array<i32>} : memref<288x20xbf16, #tpu.memory_space<vmem>>, vector<72x20xbf16>,
    %cst_83 = arith.constant 0.000000e+00 : f32
    %88 = vector.broadcast %cst_83 : f32 to vector<64x128xf32>
    %c0_84 = arith.constant 0 : index
    %c0_85 = arith.constant 0 : index
    %89 = vector.load %arg11[%c0_84, %c0_85] : memref<288x20xbf16, #tpu.memory_space<vmem>>, vector<64x20xbf16>
    %c0_86 = arith.constant 0 : index
    %c0_87 = arith.constant 0 : index
    %c0_88 = arith.constant 0 : index
    %90 = vector.load %arg4[%c0_86, %c0_87, %c0_88] : memref<25x20x128xbf16, #tpu.memory_space<vmem>>, vector<1x20x128xbf16>
    %91 = vector.shape_cast %90 : vector<1x20x128xbf16> to vector<20x128xbf16>
    %cst_89 = arith.constant dense<0.000000e+00> : vector<64x128xf32>
    %92 = tpu.matmul %89, %91, %cst_89 {dimension_numbers = #tpu.dot_dimension_numbers<[1], [0], [0], [1], [0, 0, 1, 1], [], []>} : vector<64x20xbf16>, vector<20x128xbf16>, vector<64x128xf32> -> vector<64x128xf32>
    %93 = arith.addf %88, %92 : vector<64x128xf32>
    %c2 = arith.constant 2 : index
    %c0_90 = arith.constant 0 : index
    %94 = vector.load %arg11[%c2, %c0_90] : memref<288x20xbf16, #tpu.memory_space<vmem>>, vector<64x20xbf16>
    %c1 = arith.constant 1 : index
    %c0_91 = arith.constant 0 : index
    %c0_92 = arith.constant 0 : index
    %95 = vector.load %arg4[%c1, %c0_91, %c0_92] : memref<25x20x128xbf16, #tpu.memory_space<vmem>>, vector<1x20x128xbf16>
    %96 = vector.shape_cast %95 : vector<1x20x128xbf16> to vector<20x128xbf16>
    %cst_93 = arith.constant dense<0.000000e+00> : vector<64x128xf32>
    %97 = tpu.matmul %94, %96, %cst_93 {dimension_numbers = #tpu.dot_dimension_numbers<[1], [0], [0], [1], [0, 0, 1, 1], [], []>} : vector<64x20xbf16>, vector<20x128xbf16>, vector<64x128xf32> -> vector<64x128xf32>
    %98 = arith.addf %93, %97 : vector<64x128xf32>
    %c4 = arith.constant 4 : index
    %c0_94 = arith.constant 0 : index
    %99 = vector.load %arg11[%c4, %c0_94] : memref<288x20xbf16, #tpu.memory_space<vmem>>, vector<64x20xbf16>
    %c2_95 = arith.constant 2 : index
    %c0_96 = arith.constant 0 : index
    %c0_97 = arith.constant 0 : index
    %100 = vector.load %arg4[%c2_95, %c0_96, %c0_97] : memref<25x20x128xbf16, #tpu.memory_space<vmem>>, vector<1x20x128xbf16>
    %101 = vector.shape_cast %100 : vector<1x20x128xbf16> to vector<20x128xbf16>
    %cst_98 = arith.constant dense<0.000000e+00> : vector<64x128xf32>
    %102 = tpu.matmul %99, %101, %cst_98 {dimension_numbers = #tpu.dot_dimension_numbers<[1], [0], [0], [1], [0, 0, 1, 1], [], []>} : vector<64x20xbf16>, vector<20x128xbf16>, vector<64x128xf32> -> vector<64x128xf32>
    %103 = arith.addf %98, %102 : vector<64x128xf32>
    %c6 = arith.constant 6 : index
    %c0_99 = arith.constant 0 : index
    %104 = vector.load %arg11[%c6, %c0_99] : memref<288x20xbf16, #tpu.memory_space<vmem>>, vector<64x20xbf16>
    %c3 = arith.constant 3 : index
    %c0_100 = arith.constant 0 : index
    %c0_101 = arith.constant 0 : index
    %105 = vector.load %arg4[%c3, %c0_100, %c0_101] : memref<25x20x128xbf16, #tpu.memory_space<vmem>>, vector<1x20x128xbf16>
    %106 = vector.shape_cast %105 : vector<1x20x128xbf16> to vector<20x128xbf16>
    %cst_102 = arith.constant dense<0.000000e+00> : vector<64x128xf32>
    %107 = tpu.matmul %104, %106, %cst_102 {dimension_numbers = #tpu.dot_dimension_numbers<[1], [0], [0], [1], [0, 0, 1, 1], [], []>} : vector<64x20xbf16>, vector<20x128xbf16>, vector<64x128xf32> -> vector<64x128xf32>
    %108 = arith.addf %103, %107 : vector<64x128xf32>
    %c8 = arith.constant 8 : index
    %c0_103 = arith.constant 0 : index
    %109 = vector.load %arg11[%c8, %c0_103] : memref<288x20xbf16, #tpu.memory_space<vmem>>, vector<64x20xbf16>
    %c4_104 = arith.constant 4 : index
    %c0_105 = arith.constant 0 : index
    %c0_106 = arith.constant 0 : index
    %110 = vector.load %arg4[%c4_104, %c0_105, %c0_106] : memref<25x20x128xbf16, #tpu.memory_space<vmem>>, vector<1x20x128xbf16>
    %111 = vector.shape_cast %110 : vector<1x20x128xbf16> to vector<20x128xbf16>
    %cst_107 = arith.constant dense<0.000000e+00> : vector<64x128xf32>
    %112 = tpu.matmul %109, %111, %cst_107 {dimension_numbers = #tpu.dot_dimension_numbers<[1], [0], [0], [1], [0, 0, 1, 1], [], []>} : vector<64x20xbf16>, vector<20x128xbf16>, vector<64x128xf32> -> vector<64x128xf32>
    %113 = arith.addf %108, %112 : vector<64x128xf32>
    %c24 = arith.constant 24 : index
    %c0_108 = arith.constant 0 : index
    %114 = vector.load %arg11[%c24, %c0_108] : memref<288x20xbf16, #tpu.memory_space<vmem>>, vector<64x20xbf16>
    %c5 = arith.constant 5 : index
    %c0_109 = arith.constant 0 : index
    %c0_110 = arith.constant 0 : index
    %115 = vector.load %arg4[%c5, %c0_109, %c0_110] : memref<25x20x128xbf16, #tpu.memory_space<vmem>>, vector<1x20x128xbf16>
    %116 = vector.shape_cast %115 : vector<1x20x128xbf16> to vector<20x128xbf16>
    %cst_111 = arith.constant dense<0.000000e+00> : vector<64x128xf32>
    %117 = tpu.matmul %114, %116, %cst_111 {dimension_numbers = #tpu.dot_dimension_numbers<[1], [0], [0], [1], [0, 0, 1, 1], [], []>} : vector<64x20xbf16>, vector<20x128xbf16>, vector<64x128xf32> -> vector<64x128xf32>
    %118 = arith.addf %113, %117 : vector<64x128xf32>
    %c26 = arith.constant 26 : index
    %c0_112 = arith.constant 0 : index
    %119 = vector.load %arg11[%c26, %c0_112] : memref<288x20xbf16, #tpu.memory_space<vmem>>, vector<64x20xbf16>
    %c6_113 = arith.constant 6 : index
    %c0_114 = arith.constant 0 : index
    %c0_115 = arith.constant 0 : index
    %120 = vector.load %arg4[%c6_113, %c0_114, %c0_115] : memref<25x20x128xbf16, #tpu.memory_space<vmem>>, vector<1x20x128xbf16>
    %121 = vector.shape_cast %120 : vector<1x20x128xbf16> to vector<20x128xbf16>
    %cst_116 = arith.constant dense<0.000000e+00> : vector<64x128xf32>
    %122 = tpu.matmul %119, %121, %cst_116 {dimension_numbers = #tpu.dot_dimension_numbers<[1], [0], [0], [1], [0, 0, 1, 1], [], []>} : vector<64x20xbf16>, vector<20x128xbf16>, vector<64x128xf32> -> vector<64x128xf32>
    %123 = arith.addf %118, %122 : vector<64x128xf32>
    %c28 = arith.constant 28 : index
    %c0_117 = arith.constant 0 : index
    %124 = vector.load %arg11[%c28, %c0_117] : memref<288x20xbf16, #tpu.memory_space<vmem>>, vector<64x20xbf16>
    %c7 = arith.constant 7 : index
    %c0_118 = arith.constant 0 : index
    %c0_119 = arith.constant 0 : index
    %125 = vector.load %arg4[%c7, %c0_118, %c0_119] : memref<25x20x128xbf16, #tpu.memory_space<vmem>>, vector<1x20x128xbf16>
    %126 = vector.shape_cast %125 : vector<1x20x128xbf16> to vector<20x128xbf16>
    %cst_120 = arith.constant dense<0.000000e+00> : vector<64x128xf32>
    %127 = tpu.matmul %124, %126, %cst_120 {dimension_numbers = #tpu.dot_dimension_numbers<[1], [0], [0], [1], [0, 0, 1, 1], [], []>} : vector<64x20xbf16>, vector<20x128xbf16>, vector<64x128xf32> -> vector<64x128xf32>
    %128 = arith.addf %123, %127 : vector<64x128xf32>
    %c30 = arith.constant 30 : index
    %c0_121 = arith.constant 0 : index
    %129 = vector.load %arg11[%c30, %c0_121] : memref<288x20xbf16, #tpu.memory_space<vmem>>, vector<64x20xbf16>
    %c8_122 = arith.constant 8 : index
    %c0_123 = arith.constant 0 : index
    %c0_124 = arith.constant 0 : index
    %130 = vector.load %arg4[%c8_122, %c0_123, %c0_124] : memref<25x20x128xbf16, #tpu.memory_space<vmem>>, vector<1x20x128xbf16>
    %131 = vector.shape_cast %130 : vector<1x20x128xbf16> to vector<20x128xbf16>
    %cst_125 = arith.constant dense<0.000000e+00> : vector<64x128xf32>
    %132 = tpu.matmul %129, %131, %cst_125 {dimension_numbers = #tpu.dot_dimension_numbers<[1], [0], [0], [1], [0, 0, 1, 1], [], []>} : vector<64x20xbf16>, vector<20x128xbf16>, vector<64x128xf32> -> vector<64x128xf32>
    %133 = arith.addf %128, %132 : vector<64x128xf32>
    %c32 = arith.constant 32 : index
    %c0_126 = arith.constant 0 : index
    %134 = vector.load %arg11[%c32, %c0_126] : memref<288x20xbf16, #tpu.memory_space<vmem>>, vector<64x20xbf16>
    %c9 = arith.constant 9 : index
    %c0_127 = arith.constant 0 : index
    %c0_128 = arith.constant 0 : index
    %135 = vector.load %arg4[%c9, %c0_127, %c0_128] : memref<25x20x128xbf16, #tpu.memory_space<vmem>>, vector<1x20x128xbf16>
    %136 = vector.shape_cast %135 : vector<1x20x128xbf16> to vector<20x128xbf16>
    %cst_129 = arith.constant dense<0.000000e+00> : vector<64x128xf32>
    %137 = tpu.matmul %134, %136, %cst_129 {dimension_numbers = #tpu.dot_dimension_numbers<[1], [0], [0], [1], [0, 0, 1, 1], [], []>} : vector<64x20xbf16>, vector<20x128xbf16>, vector<64x128xf32> -> vector<64x128xf32>
    %138 = arith.addf %133, %137 : vector<64x128xf32>
    %c48 = arith.constant 48 : index
    %c0_130 = arith.constant 0 : index
    %139 = vector.load %arg11[%c48, %c0_130] : memref<288x20xbf16, #tpu.memory_space<vmem>>, vector<64x20xbf16>
    %c10 = arith.constant 10 : index
    %c0_131 = arith.constant 0 : index
    %c0_132 = arith.constant 0 : index
    %140 = vector.load %arg4[%c10, %c0_131, %c0_132] : memref<25x20x128xbf16, #tpu.memory_space<vmem>>, vector<1x20x128xbf16>
    %141 = vector.shape_cast %140 : vector<1x20x128xbf16> to vector<20x128xbf16>
    %cst_133 = arith.constant dense<0.000000e+00> : vector<64x128xf32>
    %142 = tpu.matmul %139, %141, %cst_133 {dimension_numbers = #tpu.dot_dimension_numbers<[1], [0], [0], [1], [0, 0, 1, 1], [], []>} : vector<64x20xbf16>, vector<20x128xbf16>, vector<64x128xf32> -> vector<64x128xf32>
    %143 = arith.addf %138, %142 : vector<64x128xf32>
    %c50 = arith.constant 50 : index
    %c0_134 = arith.constant 0 : index
    %144 = vector.load %arg11[%c50, %c0_134] : memref<288x20xbf16, #tpu.memory_space<vmem>>, vector<64x20xbf16>
    %c11 = arith.constant 11 : index
    %c0_135 = arith.constant 0 : index
    %c0_136 = arith.constant 0 : index
    %145 = vector.load %arg4[%c11, %c0_135, %c0_136] : memref<25x20x128xbf16, #tpu.memory_space<vmem>>, vector<1x20x128xbf16>
    %146 = vector.shape_cast %145 : vector<1x20x128xbf16> to vector<20x128xbf16>
    %cst_137 = arith.constant dense<0.000000e+00> : vector<64x128xf32>
    %147 = tpu.matmul %144, %146, %cst_137 {dimension_numbers = #tpu.dot_dimension_numbers<[1], [0], [0], [1], [0, 0, 1, 1], [], []>} : vector<64x20xbf16>, vector<20x128xbf16>, vector<64x128xf32> -> vector<64x128xf32>
    %148 = arith.addf %143, %147 : vector<64x128xf32>
    %c52 = arith.constant 52 : index
    %c0_138 = arith.constant 0 : index
    %149 = vector.load %arg11[%c52, %c0_138] : memref<288x20xbf16, #tpu.memory_space<vmem>>, vector<64x20xbf16>
    %c12 = arith.constant 12 : index
    %c0_139 = arith.constant 0 : index
    %c0_140 = arith.constant 0 : index
    %150 = vector.load %arg4[%c12, %c0_139, %c0_140] : memref<25x20x128xbf16, #tpu.memory_space<vmem>>, vector<1x20x128xbf16>
    %151 = vector.shape_cast %150 : vector<1x20x128xbf16> to vector<20x128xbf16>
    %cst_141 = arith.constant dense<0.000000e+00> : vector<64x128xf32>
    %152 = tpu.matmul %149, %151, %cst_141 {dimension_numbers = #tpu.dot_dimension_numbers<[1], [0], [0], [1], [0, 0, 1, 1], [], []>} : vector<64x20xbf16>, vector<20x128xbf16>, vector<64x128xf32> -> vector<64x128xf32>
    %153 = arith.addf %148, %152 : vector<64x128xf32>
    %c54 = arith.constant 54 : index
    %c0_142 = arith.constant 0 : index
    %154 = vector.load %arg11[%c54, %c0_142] : memref<288x20xbf16, #tpu.memory_space<vmem>>, vector<64x20xbf16>
    %c13 = arith.constant 13 : index
    %c0_143 = arith.constant 0 : index
    %c0_144 = arith.constant 0 : index
    %155 = vector.load %arg4[%c13, %c0_143, %c0_144] : memref<25x20x128xbf16, #tpu.memory_space<vmem>>, vector<1x20x128xbf16>
    %156 = vector.shape_cast %155 : vector<1x20x128xbf16> to vector<20x128xbf16>
    %cst_145 = arith.constant dense<0.000000e+00> : vector<64x128xf32>
    %157 = tpu.matmul %154, %156, %cst_145 {dimension_numbers = #tpu.dot_dimension_numbers<[1], [0], [0], [1], [0, 0, 1, 1], [], []>} : vector<64x20xbf16>, vector<20x128xbf16>, vector<64x128xf32> -> vector<64x128xf32>
    %158 = arith.addf %153, %157 : vector<64x128xf32>
    %c56 = arith.constant 56 : index
    %c0_146 = arith.constant 0 : index
    %159 = vector.load %arg11[%c56, %c0_146] : memref<288x20xbf16, #tpu.memory_space<vmem>>, vector<64x20xbf16>
    %c14 = arith.constant 14 : index
    %c0_147 = arith.constant 0 : index
    %c0_148 = arith.constant 0 : index
    %160 = vector.load %arg4[%c14, %c0_147, %c0_148] : memref<25x20x128xbf16, #tpu.memory_space<vmem>>, vector<1x20x128xbf16>
    %161 = vector.shape_cast %160 : vector<1x20x128xbf16> to vector<20x128xbf16>
    %cst_149 = arith.constant dense<0.000000e+00> : vector<64x128xf32>
    %162 = tpu.matmul %159, %161, %cst_149 {dimension_numbers = #tpu.dot_dimension_numbers<[1], [0], [0], [1], [0, 0, 1, 1], [], []>} : vector<64x20xbf16>, vector<20x128xbf16>, vector<64x128xf32> -> vector<64x128xf32>
    %163 = arith.addf %158, %162 : vector<64x128xf32>
    %c72_150 = arith.constant 72 : index
    %c0_151 = arith.constant 0 : index
    %164 = vector.load %arg11[%c72_150, %c0_151] : memref<288x20xbf16, #tpu.memory_space<vmem>>, vector<64x20xbf16>
    %c15 = arith.constant 15 : index
    %c0_152 = arith.constant 0 : index
    %c0_153 = arith.constant 0 : index
    %165 = vector.load %arg4[%c15, %c0_152, %c0_153] : memref<25x20x128xbf16, #tpu.memory_space<vmem>>, vector<1x20x128xbf16>
    %166 = vector.shape_cast %165 : vector<1x20x128xbf16> to vector<20x128xbf16>
    %cst_154 = arith.constant dense<0.000000e+00> : vector<64x128xf32>
    %167 = tpu.matmul %164, %166, %cst_154 {dimension_numbers = #tpu.dot_dimension_numbers<[1], [0], [0], [1], [0, 0, 1, 1], [], []>} : vector<64x20xbf16>, vector<20x128xbf16>, vector<64x128xf32> -> vector<64x128xf32>
    %168 = arith.addf %163, %167 : vector<64x128xf32>
    %c74 = arith.constant 74 : index
    %c0_155 = arith.constant 0 : index
    %169 = vector.load %arg11[%c74, %c0_155] : memref<288x20xbf16, #tpu.memory_space<vmem>>, vector<64x20xbf16>
    %c16 = arith.constant 16 : index
    %c0_156 = arith.constant 0 : index
    %c0_157 = arith.constant 0 : index
    %170 = vector.load %arg4[%c16, %c0_156, %c0_157] : memref<25x20x128xbf16, #tpu.memory_space<vmem>>, vector<1x20x128xbf16>
    %171 = vector.shape_cast %170 : vector<1x20x128xbf16> to vector<20x128xbf16>
    %cst_158 = arith.constant dense<0.000000e+00> : vector<64x128xf32>
    %172 = tpu.matmul %169, %171, %cst_158 {dimension_numbers = #tpu.dot_dimension_numbers<[1], [0], [0], [1], [0, 0, 1, 1], [], []>} : vector<64x20xbf16>, vector<20x128xbf16>, vector<64x128xf32> -> vector<64x128xf32>
    %173 = arith.addf %168, %172 : vector<64x128xf32>
    %c76 = arith.constant 76 : index
    %c0_159 = arith.constant 0 : index
    %174 = vector.load %arg11[%c76, %c0_159] : memref<288x20xbf16, #tpu.memory_space<vmem>>, vector<64x20xbf16>
    %c17 = arith.constant 17 : index
    %c0_160 = arith.constant 0 : index
    %c0_161 = arith.constant 0 : index
    %175 = vector.load %arg4[%c17, %c0_160, %c0_161] : memref<25x20x128xbf16, #tpu.memory_space<vmem>>, vector<1x20x128xbf16>
    %176 = vector.shape_cast %175 : vector<1x20x128xbf16> to vector<20x128xbf16>
    %cst_162 = arith.constant dense<0.000000e+00> : vector<64x128xf32>
    %177 = tpu.matmul %174, %176, %cst_162 {dimension_numbers = #tpu.dot_dimension_numbers<[1], [0], [0], [1], [0, 0, 1, 1], [], []>} : vector<64x20xbf16>, vector<20x128xbf16>, vector<64x128xf32> -> vector<64x128xf32>
    %178 = arith.addf %173, %177 : vector<64x128xf32>
    %c78 = arith.constant 78 : index
    %c0_163 = arith.constant 0 : index
    %179 = vector.load %arg11[%c78, %c0_163] : memref<288x20xbf16, #tpu.memory_space<vmem>>, vector<64x20xbf16>
    %c18 = arith.constant 18 : index
    %c0_164 = arith.constant 0 : index
    %c0_165 = arith.constant 0 : index
    %180 = vector.load %arg4[%c18, %c0_164, %c0_165] : memref<25x20x128xbf16, #tpu.memory_space<vmem>>, vector<1x20x128xbf16>
    %181 = vector.shape_cast %180 : vector<1x20x128xbf16> to vector<20x128xbf16>
    %cst_166 = arith.constant dense<0.000000e+00> : vector<64x128xf32>
    %182 = tpu.matmul %179, %181, %cst_166 {dimension_numbers = #tpu.dot_dimension_numbers<[1], [0], [0], [1], [0, 0, 1, 1], [], []>} : vector<64x20xbf16>, vector<20x128xbf16>, vector<64x128xf32> -> vector<64x128xf32>
    %183 = arith.addf %178, %182 : vector<64x128xf32>
    %c80 = arith.constant 80 : index
    %c0_167 = arith.constant 0 : index
    %184 = vector.load %arg11[%c80, %c0_167] : memref<288x20xbf16, #tpu.memory_space<vmem>>, vector<64x20xbf16>
    %c19 = arith.constant 19 : index
    %c0_168 = arith.constant 0 : index
    %c0_169 = arith.constant 0 : index
    %185 = vector.load %arg4[%c19, %c0_168, %c0_169] : memref<25x20x128xbf16, #tpu.memory_space<vmem>>, vector<1x20x128xbf16>
    %186 = vector.shape_cast %185 : vector<1x20x128xbf16> to vector<20x128xbf16>
    %cst_170 = arith.constant dense<0.000000e+00> : vector<64x128xf32>
    %187 = tpu.matmul %184, %186, %cst_170 {dimension_numbers = #tpu.dot_dimension_numbers<[1], [0], [0], [1], [0, 0, 1, 1], [], []>} : vector<64x20xbf16>, vector<20x128xbf16>, vector<64x128xf32> -> vector<64x128xf32>
    %188 = arith.addf %183, %187 : vector<64x128xf32>
    %c96 = arith.constant 96 : index
    %c0_171 = arith.constant 0 : index
    %189 = vector.load %arg11[%c96, %c0_171] : memref<288x20xbf16, #tpu.memory_space<vmem>>, vector<64x20xbf16>
    %c20 = arith.constant 20 : index
    %c0_172 = arith.constant 0 : index
    %c0_173 = arith.constant 0 : index
    %190 = vector.load %arg4[%c20, %c0_172, %c0_173] : memref<25x20x128xbf16, #tpu.memory_space<vmem>>, vector<1x20x128xbf16>
    %191 = vector.shape_cast %190 : vector<1x20x128xbf16> to vector<20x128xbf16>
    %cst_174 = arith.constant dense<0.000000e+00> : vector<64x128xf32>
    %192 = tpu.matmul %189, %191, %cst_174 {dimension_numbers = #tpu.dot_dimension_numbers<[1], [0], [0], [1], [0, 0, 1, 1], [], []>} : vector<64x20xbf16>, vector<20x128xbf16>, vector<64x128xf32> -> vector<64x128xf32>
    %193 = arith.addf %188, %192 : vector<64x128xf32>
    %c98 = arith.constant 98 : index
    %c0_175 = arith.constant 0 : index
    %194 = vector.load %arg11[%c98, %c0_175] : memref<288x20xbf16, #tpu.memory_space<vmem>>, vector<64x20xbf16>
    %c21 = arith.constant 21 : index
    %c0_176 = arith.constant 0 : index
    %c0_177 = arith.constant 0 : index
    %195 = vector.load %arg4[%c21, %c0_176, %c0_177] : memref<25x20x128xbf16, #tpu.memory_space<vmem>>, vector<1x20x128xbf16>
    %196 = vector.shape_cast %195 : vector<1x20x128xbf16> to vector<20x128xbf16>
    %cst_178 = arith.constant dense<0.000000e+00> : vector<64x128xf32>
    %197 = tpu.matmul %194, %196, %cst_178 {dimension_numbers = #tpu.dot_dimension_numbers<[1], [0], [0], [1], [0, 0, 1, 1], [], []>} : vector<64x20xbf16>, vector<20x128xbf16>, vector<64x128xf32> -> vector<64x128xf32>
    %198 = arith.addf %193, %197 : vector<64x128xf32>
    %c100 = arith.constant 100 : index
    %c0_179 = arith.constant 0 : index
    %199 = vector.load %arg11[%c100, %c0_179] : memref<288x20xbf16, #tpu.memory_space<vmem>>, vector<64x20xbf16>
    %c22 = arith.constant 22 : index
    %c0_180 = arith.constant 0 : index
    %c0_181 = arith.constant 0 : index
    %200 = vector.load %arg4[%c22, %c0_180, %c0_181] : memref<25x20x128xbf16, #tpu.memory_space<vmem>>, vector<1x20x128xbf16>
    %201 = vector.shape_cast %200 : vector<1x20x128xbf16> to vector<20x128xbf16>
    %cst_182 = arith.constant dense<0.000000e+00> : vector<64x128xf32>
    %202 = tpu.matmul %199, %201, %cst_182 {dimension_numbers = #tpu.dot_dimension_numbers<[1], [0], [0], [1], [0, 0, 1, 1], [], []>} : vector<64x20xbf16>, vector<20x128xbf16>, vector<64x128xf32> -> vector<64x128xf32>
    %203 = arith.addf %198, %202 : vector<64x128xf32>
    %c102 = arith.constant 102 : index
    %c0_183 = arith.constant 0 : index
    %204 = vector.load %arg11[%c102, %c0_183] : memref<288x20xbf16, #tpu.memory_space<vmem>>, vector<64x20xbf16>
    %c23 = arith.constant 23 : index
    %c0_184 = arith.constant 0 : index
    %c0_185 = arith.constant 0 : index
    %205 = vector.load %arg4[%c23, %c0_184, %c0_185] : memref<25x20x128xbf16, #tpu.memory_space<vmem>>, vector<1x20x128xbf16>
    %206 = vector.shape_cast %205 : vector<1x20x128xbf16> to vector<20x128xbf16>
    %cst_186 = arith.constant dense<0.000000e+00> : vector<64x128xf32>
    %207 = tpu.matmul %204, %206, %cst_186 {dimension_numbers = #tpu.dot_dimension_numbers<[1], [0], [0], [1], [0, 0, 1, 1], [], []>} : vector<64x20xbf16>, vector<20x128xbf16>, vector<64x128xf32> -> vector<64x128xf32>
    %208 = arith.addf %203, %207 : vector<64x128xf32>
    %c104 = arith.constant 104 : index
    %c0_187 = arith.constant 0 : index
    %209 = vector.load %arg11[%c104, %c0_187] : memref<288x20xbf16, #tpu.memory_space<vmem>>, vector<64x20xbf16>
    %c24_188 = arith.constant 24 : index
    %c0_189 = arith.constant 0 : index
    %c0_190 = arith.constant 0 : index
    %210 = vector.load %arg4[%c24_188, %c0_189, %c0_190] : memref<25x20x128xbf16, #tpu.memory_space<vmem>>, vector<1x20x128xbf16>
    %211 = vector.shape_cast %210 : vector<1x20x128xbf16> to vector<20x128xbf16>
    %cst_191 = arith.constant dense<0.000000e+00> : vector<64x128xf32>
    %212 = tpu.matmul %209, %211, %cst_191 {dimension_numbers = #tpu.dot_dimension_numbers<[1], [0], [0], [1], [0, 0, 1, 1], [], []>} : vector<64x20xbf16>, vector<20x128xbf16>, vector<64x128xf32> -> vector<64x128xf32>
    %213 = arith.addf %208, %212 : vector<64x128xf32>
    %c0_192 = arith.constant 0 : index
    %c0_193 = arith.constant 0 : index
    %214 = vector.load %arg12[%c0_192, %c0_193] : memref<184x128xf32, #tpu.memory_space<vmem>>, vector<64x128xf32>
    tpu.vector_store %arg12[%c0_192, %c0_193], %213 {strides = array<i32>} : memref<184x128xf32, #tpu.memory_space<vmem>>, vector<64x128xf32>,
    %cst_194 = arith.constant 0.000000e+00 : f32
    %215 = vector.broadcast %cst_194 : f32 to vector<64x128xf32>
    %c64 = arith.constant 64 : index
    %c0_195 = arith.constant 0 : index
    %216 = vector.load %arg11[%c64, %c0_195] : memref<288x20xbf16, #tpu.memory_space<vmem>>, vector<64x20xbf16>
    %c0_196 = arith.constant 0 : index
    %c0_197 = arith.constant 0 : index
    %c0_198 = arith.constant 0 : index
    %217 = vector.load %arg4[%c0_196, %c0_197, %c0_198] : memref<25x20x128xbf16, #tpu.memory_space<vmem>>, vector<1x20x128xbf16>
    %218 = vector.shape_cast %217 : vector<1x20x128xbf16> to vector<20x128xbf16>
    %cst_199 = arith.constant dense<0.000000e+00> : vector<64x128xf32>
    %219 = tpu.matmul %216, %218, %cst_199 {dimension_numbers = #tpu.dot_dimension_numbers<[1], [0], [0], [1], [0, 0, 1, 1], [], []>} : vector<64x20xbf16>, vector<20x128xbf16>, vector<64x128xf32> -> vector<64x128xf32>
    %220 = arith.addf %215, %219 : vector<64x128xf32>
    %c66 = arith.constant 66 : index
    %c0_200 = arith.constant 0 : index
    %221 = vector.load %arg11[%c66, %c0_200] : memref<288x20xbf16, #tpu.memory_space<vmem>>, vector<64x20xbf16>
    %c1_201 = arith.constant 1 : index
    %c0_202 = arith.constant 0 : index
    %c0_203 = arith.constant 0 : index
    %222 = vector.load %arg4[%c1_201, %c0_202, %c0_203] : memref<25x20x128xbf16, #tpu.memory_space<vmem>>, vector<1x20x128xbf16>
    %223 = vector.shape_cast %222 : vector<1x20x128xbf16> to vector<20x128xbf16>
    %cst_204 = arith.constant dense<0.000000e+00> : vector<64x128xf32>
    %224 = tpu.matmul %221, %223, %cst_204 {dimension_numbers = #tpu.dot_dimension_numbers<[1], [0], [0], [1], [0, 0, 1, 1], [], []>} : vector<64x20xbf16>, vector<20x128xbf16>, vector<64x128xf32> -> vector<64x128xf32>
    %225 = arith.addf %220, %224 : vector<64x128xf32>
    %c68 = arith.constant 68 : index
    %c0_205 = arith.constant 0 : index
    %226 = vector.load %arg11[%c68, %c0_205] : memref<288x20xbf16, #tpu.memory_space<vmem>>, vector<64x20xbf16>
    %c2_206 = arith.constant 2 : index
    %c0_207 = arith.constant 0 : index
    %c0_208 = arith.constant 0 : index
    %227 = vector.load %arg4[%c2_206, %c0_207, %c0_208] : memref<25x20x128xbf16, #tpu.memory_space<vmem>>, vector<1x20x128xbf16>
    %228 = vector.shape_cast %227 : vector<1x20x128xbf16> to vector<20x128xbf16>
    %cst_209 = arith.constant dense<0.000000e+00> : vector<64x128xf32>
    %229 = tpu.matmul %226, %228, %cst_209 {dimension_numbers = #tpu.dot_dimension_numbers<[1], [0], [0], [1], [0, 0, 1, 1], [], []>} : vector<64x20xbf16>, vector<20x128xbf16>, vector<64x128xf32> -> vector<64x128xf32>
    %230 = arith.addf %225, %229 : vector<64x128xf32>
    %c70 = arith.constant 70 : index
    %c0_210 = arith.constant 0 : index
    %231 = vector.load %arg11[%c70, %c0_210] : memref<288x20xbf16, #tpu.memory_space<vmem>>, vector<64x20xbf16>
    %c3_211 = arith.constant 3 : index
    %c0_212 = arith.constant 0 : index
    %c0_213 = arith.constant 0 : index
    %232 = vector.load %arg4[%c3_211, %c0_212, %c0_213] : memref<25x20x128xbf16, #tpu.memory_space<vmem>>, vector<1x20x128xbf16>
    %233 = vector.shape_cast %232 : vector<1x20x128xbf16> to vector<20x128xbf16>
    %cst_214 = arith.constant dense<0.000000e+00> : vector<64x128xf32>
    %234 = tpu.matmul %231, %233, %cst_214 {dimension_numbers = #tpu.dot_dimension_numbers<[1], [0], [0], [1], [0, 0, 1, 1], [], []>} : vector<64x20xbf16>, vector<20x128xbf16>, vector<64x128xf32> -> vector<64x128xf32>
    %235 = arith.addf %230, %234 : vector<64x128xf32>
    %c72_215 = arith.constant 72 : index
    %c0_216 = arith.constant 0 : index
    %236 = vector.load %arg11[%c72_215, %c0_216] : memref<288x20xbf16, #tpu.memory_space<vmem>>, vector<64x20xbf16>
    %c4_217 = arith.constant 4 : index
    %c0_218 = arith.constant 0 : index
    %c0_219 = arith.constant 0 : index
    %237 = vector.load %arg4[%c4_217, %c0_218, %c0_219] : memref<25x20x128xbf16, #tpu.memory_space<vmem>>, vector<1x20x128xbf16>
    %238 = vector.shape_cast %237 : vector<1x20x128xbf16> to vector<20x128xbf16>
    %cst_220 = arith.constant dense<0.000000e+00> : vector<64x128xf32>
    %239 = tpu.matmul %236, %238, %cst_220 {dimension_numbers = #tpu.dot_dimension_numbers<[1], [0], [0], [1], [0, 0, 1, 1], [], []>} : vector<64x20xbf16>, vector<20x128xbf16>, vector<64x128xf32> -> vector<64x128xf32>
    %240 = arith.addf %235, %239 : vector<64x128xf32>
    %c88 = arith.constant 88 : index
    %c0_221 = arith.constant 0 : index
    %241 = vector.load %arg11[%c88, %c0_221] : memref<288x20xbf16, #tpu.memory_space<vmem>>, vector<64x20xbf16>
    %c5_222 = arith.constant 5 : index
    %c0_223 = arith.constant 0 : index
    %c0_224 = arith.constant 0 : index
    %242 = vector.load %arg4[%c5_222, %c0_223, %c0_224] : memref<25x20x128xbf16, #tpu.memory_space<vmem>>, vector<1x20x128xbf16>
    %243 = vector.shape_cast %242 : vector<1x20x128xbf16> to vector<20x128xbf16>
    %cst_225 = arith.constant dense<0.000000e+00> : vector<64x128xf32>
    %244 = tpu.matmul %241, %243, %cst_225 {dimension_numbers = #tpu.dot_dimension_numbers<[1], [0], [0], [1], [0, 0, 1, 1], [], []>} : vector<64x20xbf16>, vector<20x128xbf16>, vector<64x128xf32> -> vector<64x128xf32>
    %245 = arith.addf %240, %244 : vector<64x128xf32>
    %c90 = arith.constant 90 : index
    %c0_226 = arith.constant 0 : index
    %246 = vector.load %arg11[%c90, %c0_226] : memref<288x20xbf16, #tpu.memory_space<vmem>>, vector<64x20xbf16>
    %c6_227 = arith.constant 6 : index
    %c0_228 = arith.constant 0 : index
    %c0_229 = arith.constant 0 : index
    %247 = vector.load %arg4[%c6_227, %c0_228, %c0_229] : memref<25x20x128xbf16, #tpu.memory_space<vmem>>, vector<1x20x128xbf16>
    %248 = vector.shape_cast %247 : vector<1x20x128xbf16> to vector<20x128xbf16>
    %cst_230 = arith.constant dense<0.000000e+00> : vector<64x128xf32>
    %249 = tpu.matmul %246, %248, %cst_230 {dimension_numbers = #tpu.dot_dimension_numbers<[1], [0], [0], [1], [0, 0, 1, 1], [], []>} : vector<64x20xbf16>, vector<20x128xbf16>, vector<64x128xf32> -> vector<64x128xf32>
    %250 = arith.addf %245, %249 : vector<64x128xf32>
    %c92 = arith.constant 92 : index
    %c0_231 = arith.constant 0 : index
    %251 = vector.load %arg11[%c92, %c0_231] : memref<288x20xbf16, #tpu.memory_space<vmem>>, vector<64x20xbf16>
    %c7_232 = arith.constant 7 : index
    %c0_233 = arith.constant 0 : index
    %c0_234 = arith.constant 0 : index
    %252 = vector.load %arg4[%c7_232, %c0_233, %c0_234] : memref<25x20x128xbf16, #tpu.memory_space<vmem>>, vector<1x20x128xbf16>
    %253 = vector.shape_cast %252 : vector<1x20x128xbf16> to vector<20x128xbf16>
    %cst_235 = arith.constant dense<0.000000e+00> : vector<64x128xf32>
    %254 = tpu.matmul %251, %253, %cst_235 {dimension_numbers = #tpu.dot_dimension_numbers<[1], [0], [0], [1], [0, 0, 1, 1], [], []>} : vector<64x20xbf16>, vector<20x128xbf16>, vector<64x128xf32> -> vector<64x128xf32>
    %255 = arith.addf %250, %254 : vector<64x128xf32>
    %c94 = arith.constant 94 : index
    %c0_236 = arith.constant 0 : index
    %256 = vector.load %arg11[%c94, %c0_236] : memref<288x20xbf16, #tpu.memory_space<vmem>>, vector<64x20xbf16>
    %c8_237 = arith.constant 8 : index
    %c0_238 = arith.constant 0 : index
    %c0_239 = arith.constant 0 : index
    %257 = vector.load %arg4[%c8_237, %c0_238, %c0_239] : memref<25x20x128xbf16, #tpu.memory_space<vmem>>, vector<1x20x128xbf16>
    %258 = vector.shape_cast %257 : vector<1x20x128xbf16> to vector<20x128xbf16>
    %cst_240 = arith.constant dense<0.000000e+00> : vector<64x128xf32>
    %259 = tpu.matmul %256, %258, %cst_240 {dimension_numbers = #tpu.dot_dimension_numbers<[1], [0], [0], [1], [0, 0, 1, 1], [], []>} : vector<64x20xbf16>, vector<20x128xbf16>, vector<64x128xf32> -> vector<64x128xf32>
    %260 = arith.addf %255, %259 : vector<64x128xf32>
    %c96_241 = arith.constant 96 : index
    %c0_242 = arith.constant 0 : index
    %261 = vector.load %arg11[%c96_241, %c0_242] : memref<288x20xbf16, #tpu.memory_space<vmem>>, vector<64x20xbf16>
    %c9_243 = arith.constant 9 : index
    %c0_244 = arith.constant 0 : index
    %c0_245 = arith.constant 0 : index
    %262 = vector.load %arg4[%c9_243, %c0_244, %c0_245] : memref<25x20x128xbf16, #tpu.memory_space<vmem>>, vector<1x20x128xbf16>
    %263 = vector.shape_cast %262 : vector<1x20x128xbf16> to vector<20x128xbf16>
    %cst_246 = arith.constant dense<0.000000e+00> : vector<64x128xf32>
    %264 = tpu.matmul %261, %263, %cst_246 {dimension_numbers = #tpu.dot_dimension_numbers<[1], [0], [0], [1], [0, 0, 1, 1], [], []>} : vector<64x20xbf16>, vector<20x128xbf16>, vector<64x128xf32> -> vector<64x128xf32>
    %265 = arith.addf %260, %264 : vector<64x128xf32>
    %c112 = arith.constant 112 : index
    %c0_247 = arith.constant 0 : index
    %266 = vector.load %arg11[%c112, %c0_247] : memref<288x20xbf16, #tpu.memory_space<vmem>>, vector<64x20xbf16>
    %c10_248 = arith.constant 10 : index
    %c0_249 = arith.constant 0 : index
    %c0_250 = arith.constant 0 : index
    %267 = vector.load %arg4[%c10_248, %c0_249, %c0_250] : memref<25x20x128xbf16, #tpu.memory_space<vmem>>, vector<1x20x128xbf16>
    %268 = vector.shape_cast %267 : vector<1x20x128xbf16> to vector<20x128xbf16>
    %cst_251 = arith.constant dense<0.000000e+00> : vector<64x128xf32>
    %269 = tpu.matmul %266, %268, %cst_251 {dimension_numbers = #tpu.dot_dimension_numbers<[1], [0], [0], [1], [0, 0, 1, 1], [], []>} : vector<64x20xbf16>, vector<20x128xbf16>, vector<64x128xf32> -> vector<64x128xf32>
    %270 = arith.addf %265, %269 : vector<64x128xf32>
    %c114 = arith.constant 114 : index
    %c0_252 = arith.constant 0 : index
    %271 = vector.load %arg11[%c114, %c0_252] : memref<288x20xbf16, #tpu.memory_space<vmem>>, vector<64x20xbf16>
    %c11_253 = arith.constant 11 : index
    %c0_254 = arith.constant 0 : index
    %c0_255 = arith.constant 0 : index
    %272 = vector.load %arg4[%c11_253, %c0_254, %c0_255] : memref<25x20x128xbf16, #tpu.memory_space<vmem>>, vector<1x20x128xbf16>
    %273 = vector.shape_cast %272 : vector<1x20x128xbf16> to vector<20x128xbf16>
    %cst_256 = arith.constant dense<0.000000e+00> : vector<64x128xf32>
    %274 = tpu.matmul %271, %273, %cst_256 {dimension_numbers = #tpu.dot_dimension_numbers<[1], [0], [0], [1], [0, 0, 1, 1], [], []>} : vector<64x20xbf16>, vector<20x128xbf16>, vector<64x128xf32> -> vector<64x128xf32>
    %275 = arith.addf %270, %274 : vector<64x128xf32>
    %c116 = arith.constant 116 : index
    %c0_257 = arith.constant 0 : index
    %276 = vector.load %arg11[%c116, %c0_257] : memref<288x20xbf16, #tpu.memory_space<vmem>>, vector<64x20xbf16>
    %c12_258 = arith.constant 12 : index
    %c0_259 = arith.constant 0 : index
    %c0_260 = arith.constant 0 : index
    %277 = vector.load %arg4[%c12_258, %c0_259, %c0_260] : memref<25x20x128xbf16, #tpu.memory_space<vmem>>, vector<1x20x128xbf16>
    %278 = vector.shape_cast %277 : vector<1x20x128xbf16> to vector<20x128xbf16>
    %cst_261 = arith.constant dense<0.000000e+00> : vector<64x128xf32>
    %279 = tpu.matmul %276, %278, %cst_261 {dimension_numbers = #tpu.dot_dimension_numbers<[1], [0], [0], [1], [0, 0, 1, 1], [], []>} : vector<64x20xbf16>, vector<20x128xbf16>, vector<64x128xf32> -> vector<64x128xf32>
    %280 = arith.addf %275, %279 : vector<64x128xf32>
    %c118 = arith.constant 118 : index
    %c0_262 = arith.constant 0 : index
    %281 = vector.load %arg11[%c118, %c0_262] : memref<288x20xbf16, #tpu.memory_space<vmem>>, vector<64x20xbf16>
    %c13_263 = arith.constant 13 : index
    %c0_264 = arith.constant 0 : index
    %c0_265 = arith.constant 0 : index
    %282 = vector.load %arg4[%c13_263, %c0_264, %c0_265] : memref<25x20x128xbf16, #tpu.memory_space<vmem>>, vector<1x20x128xbf16>
    %283 = vector.shape_cast %282 : vector<1x20x128xbf16> to vector<20x128xbf16>
    %cst_266 = arith.constant dense<0.000000e+00> : vector<64x128xf32>
    %284 = tpu.matmul %281, %283, %cst_266 {dimension_numbers = #tpu.dot_dimension_numbers<[1], [0], [0], [1], [0, 0, 1, 1], [], []>} : vector<64x20xbf16>, vector<20x128xbf16>, vector<64x128xf32> -> vector<64x128xf32>
    %285 = arith.addf %280, %284 : vector<64x128xf32>
    %c120 = arith.constant 120 : index
    %c0_267 = arith.constant 0 : index
    %286 = vector.load %arg11[%c120, %c0_267] : memref<288x20xbf16, #tpu.memory_space<vmem>>, vector<64x20xbf16>
    %c14_268 = arith.constant 14 : index
    %c0_269 = arith.constant 0 : index
    %c0_270 = arith.constant 0 : index
    %287 = vector.load %arg4[%c14_268, %c0_269, %c0_270] : memref<25x20x128xbf16, #tpu.memory_space<vmem>>, vector<1x20x128xbf16>
    %288 = vector.shape_cast %287 : vector<1x20x128xbf16> to vector<20x128xbf16>
    %cst_271 = arith.constant dense<0.000000e+00> : vector<64x128xf32>
    %289 = tpu.matmul %286, %288, %cst_271 {dimension_numbers = #tpu.dot_dimension_numbers<[1], [0], [0], [1], [0, 0, 1, 1], [], []>} : vector<64x20xbf16>, vector<20x128xbf16>, vector<64x128xf32> -> vector<64x128xf32>
    %290 = arith.addf %285, %289 : vector<64x128xf32>
    %c136 = arith.constant 136 : index
    %c0_272 = arith.constant 0 : index
    %291 = vector.load %arg11[%c136, %c0_272] : memref<288x20xbf16, #tpu.memory_space<vmem>>, vector<64x20xbf16>
    %c15_273 = arith.constant 15 : index
    %c0_274 = arith.constant 0 : index
    %c0_275 = arith.constant 0 : index
    %292 = vector.load %arg4[%c15_273, %c0_274, %c0_275] : memref<25x20x128xbf16, #tpu.memory_space<vmem>>, vector<1x20x128xbf16>
    %293 = vector.shape_cast %292 : vector<1x20x128xbf16> to vector<20x128xbf16>
    %cst_276 = arith.constant dense<0.000000e+00> : vector<64x128xf32>
    %294 = tpu.matmul %291, %293, %cst_276 {dimension_numbers = #tpu.dot_dimension_numbers<[1], [0], [0], [1], [0, 0, 1, 1], [], []>} : vector<64x20xbf16>, vector<20x128xbf16>, vector<64x128xf32> -> vector<64x128xf32>
    %295 = arith.addf %290, %294 : vector<64x128xf32>
    %c138 = arith.constant 138 : index
    %c0_277 = arith.constant 0 : index
    %296 = vector.load %arg11[%c138, %c0_277] : memref<288x20xbf16, #tpu.memory_space<vmem>>, vector<64x20xbf16>
    %c16_278 = arith.constant 16 : index
    %c0_279 = arith.constant 0 : index
    %c0_280 = arith.constant 0 : index
    %297 = vector.load %arg4[%c16_278, %c0_279, %c0_280] : memref<25x20x128xbf16, #tpu.memory_space<vmem>>, vector<1x20x128xbf16>
    %298 = vector.shape_cast %297 : vector<1x20x128xbf16> to vector<20x128xbf16>
    %cst_281 = arith.constant dense<0.000000e+00> : vector<64x128xf32>
    %299 = tpu.matmul %296, %298, %cst_281 {dimension_numbers = #tpu.dot_dimension_numbers<[1], [0], [0], [1], [0, 0, 1, 1], [], []>} : vector<64x20xbf16>, vector<20x128xbf16>, vector<64x128xf32> -> vector<64x128xf32>
    %300 = arith.addf %295, %299 : vector<64x128xf32>
    %c140 = arith.constant 140 : index
    %c0_282 = arith.constant 0 : index
    %301 = vector.load %arg11[%c140, %c0_282] : memref<288x20xbf16, #tpu.memory_space<vmem>>, vector<64x20xbf16>
    %c17_283 = arith.constant 17 : index
    %c0_284 = arith.constant 0 : index
    %c0_285 = arith.constant 0 : index
    %302 = vector.load %arg4[%c17_283, %c0_284, %c0_285] : memref<25x20x128xbf16, #tpu.memory_space<vmem>>, vector<1x20x128xbf16>
    %303 = vector.shape_cast %302 : vector<1x20x128xbf16> to vector<20x128xbf16>
    %cst_286 = arith.constant dense<0.000000e+00> : vector<64x128xf32>
    %304 = tpu.matmul %301, %303, %cst_286 {dimension_numbers = #tpu.dot_dimension_numbers<[1], [0], [0], [1], [0, 0, 1, 1], [], []>} : vector<64x20xbf16>, vector<20x128xbf16>, vector<64x128xf32> -> vector<64x128xf32>
    %305 = arith.addf %300, %304 : vector<64x128xf32>
    %c142 = arith.constant 142 : index
    %c0_287 = arith.constant 0 : index
    %306 = vector.load %arg11[%c142, %c0_287] : memref<288x20xbf16, #tpu.memory_space<vmem>>, vector<64x20xbf16>
    %c18_288 = arith.constant 18 : index
    %c0_289 = arith.constant 0 : index
    %c0_290 = arith.constant 0 : index
    %307 = vector.load %arg4[%c18_288, %c0_289, %c0_290] : memref<25x20x128xbf16, #tpu.memory_space<vmem>>, vector<1x20x128xbf16>
    %308 = vector.shape_cast %307 : vector<1x20x128xbf16> to vector<20x128xbf16>
    %cst_291 = arith.constant dense<0.000000e+00> : vector<64x128xf32>
    %309 = tpu.matmul %306, %308, %cst_291 {dimension_numbers = #tpu.dot_dimension_numbers<[1], [0], [0], [1], [0, 0, 1, 1], [], []>} : vector<64x20xbf16>, vector<20x128xbf16>, vector<64x128xf32> -> vector<64x128xf32>
    %310 = arith.addf %305, %309 : vector<64x128xf32>
    %c144_292 = arith.constant 144 : index
    %c0_293 = arith.constant 0 : index
    %311 = vector.load %arg11[%c144_292, %c0_293] : memref<288x20xbf16, #tpu.memory_space<vmem>>, vector<64x20xbf16>
    %c19_294 = arith.constant 19 : index
    %c0_295 = arith.constant 0 : index
    %c0_296 = arith.constant 0 : index
    %312 = vector.load %arg4[%c19_294, %c0_295, %c0_296] : memref<25x20x128xbf16, #tpu.memory_space<vmem>>, vector<1x20x128xbf16>
    %313 = vector.shape_cast %312 : vector<1x20x128xbf16> to vector<20x128xbf16>
    %cst_297 = arith.constant dense<0.000000e+00> : vector<64x128xf32>
    %314 = tpu.matmul %311, %313, %cst_297 {dimension_numbers = #tpu.dot_dimension_numbers<[1], [0], [0], [1], [0, 0, 1, 1], [], []>} : vector<64x20xbf16>, vector<20x128xbf16>, vector<64x128xf32> -> vector<64x128xf32>
    %315 = arith.addf %310, %314 : vector<64x128xf32>
    %c160 = arith.constant 160 : index
    %c0_298 = arith.constant 0 : index
    %316 = vector.load %arg11[%c160, %c0_298] : memref<288x20xbf16, #tpu.memory_space<vmem>>, vector<64x20xbf16>
    %c20_299 = arith.constant 20 : index
    %c0_300 = arith.constant 0 : index
    %c0_301 = arith.constant 0 : index
    %317 = vector.load %arg4[%c20_299, %c0_300, %c0_301] : memref<25x20x128xbf16, #tpu.memory_space<vmem>>, vector<1x20x128xbf16>
    %318 = vector.shape_cast %317 : vector<1x20x128xbf16> to vector<20x128xbf16>
    %cst_302 = arith.constant dense<0.000000e+00> : vector<64x128xf32>
    %319 = tpu.matmul %316, %318, %cst_302 {dimension_numbers = #tpu.dot_dimension_numbers<[1], [0], [0], [1], [0, 0, 1, 1], [], []>} : vector<64x20xbf16>, vector<20x128xbf16>, vector<64x128xf32> -> vector<64x128xf32>
    %320 = arith.addf %315, %319 : vector<64x128xf32>
    %c162 = arith.constant 162 : index
    %c0_303 = arith.constant 0 : index
    %321 = vector.load %arg11[%c162, %c0_303] : memref<288x20xbf16, #tpu.memory_space<vmem>>, vector<64x20xbf16>
    %c21_304 = arith.constant 21 : index
    %c0_305 = arith.constant 0 : index
    %c0_306 = arith.constant 0 : index
    %322 = vector.load %arg4[%c21_304, %c0_305, %c0_306] : memref<25x20x128xbf16, #tpu.memory_space<vmem>>, vector<1x20x128xbf16>
    %323 = vector.shape_cast %322 : vector<1x20x128xbf16> to vector<20x128xbf16>
    %cst_307 = arith.constant dense<0.000000e+00> : vector<64x128xf32>
    %324 = tpu.matmul %321, %323, %cst_307 {dimension_numbers = #tpu.dot_dimension_numbers<[1], [0], [0], [1], [0, 0, 1, 1], [], []>} : vector<64x20xbf16>, vector<20x128xbf16>, vector<64x128xf32> -> vector<64x128xf32>
    %325 = arith.addf %320, %324 : vector<64x128xf32>
    %c164 = arith.constant 164 : index
    %c0_308 = arith.constant 0 : index
    %326 = vector.load %arg11[%c164, %c0_308] : memref<288x20xbf16, #tpu.memory_space<vmem>>, vector<64x20xbf16>
    %c22_309 = arith.constant 22 : index
    %c0_310 = arith.constant 0 : index
    %c0_311 = arith.constant 0 : index
    %327 = vector.load %arg4[%c22_309, %c0_310, %c0_311] : memref<25x20x128xbf16, #tpu.memory_space<vmem>>, vector<1x20x128xbf16>
    %328 = vector.shape_cast %327 : vector<1x20x128xbf16> to vector<20x128xbf16>
    %cst_312 = arith.constant dense<0.000000e+00> : vector<64x128xf32>
    %329 = tpu.matmul %326, %328, %cst_312 {dimension_numbers = #tpu.dot_dimension_numbers<[1], [0], [0], [1], [0, 0, 1, 1], [], []>} : vector<64x20xbf16>, vector<20x128xbf16>, vector<64x128xf32> -> vector<64x128xf32>
    %330 = arith.addf %325, %329 : vector<64x128xf32>
    %c166 = arith.constant 166 : index
    %c0_313 = arith.constant 0 : index
    %331 = vector.load %arg11[%c166, %c0_313] : memref<288x20xbf16, #tpu.memory_space<vmem>>, vector<64x20xbf16>
    %c23_314 = arith.constant 23 : index
    %c0_315 = arith.constant 0 : index
    %c0_316 = arith.constant 0 : index
    %332 = vector.load %arg4[%c23_314, %c0_315, %c0_316] : memref<25x20x128xbf16, #tpu.memory_space<vmem>>, vector<1x20x128xbf16>
    %333 = vector.shape_cast %332 : vector<1x20x128xbf16> to vector<20x128xbf16>
    %cst_317 = arith.constant dense<0.000000e+00> : vector<64x128xf32>
    %334 = tpu.matmul %331, %333, %cst_317 {dimension_numbers = #tpu.dot_dimension_numbers<[1], [0], [0], [1], [0, 0, 1, 1], [], []>} : vector<64x20xbf16>, vector<20x128xbf16>, vector<64x128xf32> -> vector<64x128xf32>
    %335 = arith.addf %330, %334 : vector<64x128xf32>
    %c168 = arith.constant 168 : index
    %c0_318 = arith.constant 0 : index
    %336 = vector.load %arg11[%c168, %c0_318] : memref<288x20xbf16, #tpu.memory_space<vmem>>, vector<64x20xbf16>
    %c24_319 = arith.constant 24 : index
    %c0_320 = arith.constant 0 : index
    %c0_321 = arith.constant 0 : index
    %337 = vector.load %arg4[%c24_319, %c0_320, %c0_321] : memref<25x20x128xbf16, #tpu.memory_space<vmem>>, vector<1x20x128xbf16>
    %338 = vector.shape_cast %337 : vector<1x20x128xbf16> to vector<20x128xbf16>
    %cst_322 = arith.constant dense<0.000000e+00> : vector<64x128xf32>
    %339 = tpu.matmul %336, %338, %cst_322 {dimension_numbers = #tpu.dot_dimension_numbers<[1], [0], [0], [1], [0, 0, 1, 1], [], []>} : vector<64x20xbf16>, vector<20x128xbf16>, vector<64x128xf32> -> vector<64x128xf32>
    %340 = arith.addf %335, %339 : vector<64x128xf32>
    %c64_323 = arith.constant 64 : index
    %c0_324 = arith.constant 0 : index
    %341 = vector.load %arg12[%c64_323, %c0_324] : memref<184x128xf32, #tpu.memory_space<vmem>>, vector<64x128xf32>
    tpu.vector_store %arg12[%c64_323, %c0_324], %340 {strides = array<i32>} : memref<184x128xf32, #tpu.memory_space<vmem>>, vector<64x128xf32>,
    %cst_325 = arith.constant 0.000000e+00 : f32
    %342 = vector.broadcast %cst_325 : f32 to vector<56x128xf32>
    %c128 = arith.constant 128 : index
    %c0_326 = arith.constant 0 : index
    %343 = vector.load %arg11[%c128, %c0_326] : memref<288x20xbf16, #tpu.memory_space<vmem>>, vector<56x20xbf16>
    %c0_327 = arith.constant 0 : index
    %c0_328 = arith.constant 0 : index
    %c0_329 = arith.constant 0 : index
    %344 = vector.load %arg4[%c0_327, %c0_328, %c0_329] : memref<25x20x128xbf16, #tpu.memory_space<vmem>>, vector<1x20x128xbf16>
    %345 = vector.shape_cast %344 : vector<1x20x128xbf16> to vector<20x128xbf16>
    %cst_330 = arith.constant dense<0.000000e+00> : vector<56x128xf32>
    %346 = tpu.matmul %343, %345, %cst_330 {dimension_numbers = #tpu.dot_dimension_numbers<[1], [0], [0], [1], [0, 0, 1, 1], [], []>} : vector<56x20xbf16>, vector<20x128xbf16>, vector<56x128xf32> -> vector<56x128xf32>
    %347 = arith.addf %342, %346 : vector<56x128xf32>
    %c130 = arith.constant 130 : index
    %c0_331 = arith.constant 0 : index
    %348 = vector.load %arg11[%c130, %c0_331] : memref<288x20xbf16, #tpu.memory_space<vmem>>, vector<56x20xbf16>
    %c1_332 = arith.constant 1 : index
    %c0_333 = arith.constant 0 : index
    %c0_334 = arith.constant 0 : index
    %349 = vector.load %arg4[%c1_332, %c0_333, %c0_334] : memref<25x20x128xbf16, #tpu.memory_space<vmem>>, vector<1x20x128xbf16>
    %350 = vector.shape_cast %349 : vector<1x20x128xbf16> to vector<20x128xbf16>
    %cst_335 = arith.constant dense<0.000000e+00> : vector<56x128xf32>
    %351 = tpu.matmul %348, %350, %cst_335 {dimension_numbers = #tpu.dot_dimension_numbers<[1], [0], [0], [1], [0, 0, 1, 1], [], []>} : vector<56x20xbf16>, vector<20x128xbf16>, vector<56x128xf32> -> vector<56x128xf32>
    %352 = arith.addf %347, %351 : vector<56x128xf32>
    %c132 = arith.constant 132 : index
    %c0_336 = arith.constant 0 : index
    %353 = vector.load %arg11[%c132, %c0_336] : memref<288x20xbf16, #tpu.memory_space<vmem>>, vector<56x20xbf16>
    %c2_337 = arith.constant 2 : index
    %c0_338 = arith.constant 0 : index
    %c0_339 = arith.constant 0 : index
    %354 = vector.load %arg4[%c2_337, %c0_338, %c0_339] : memref<25x20x128xbf16, #tpu.memory_space<vmem>>, vector<1x20x128xbf16>
    %355 = vector.shape_cast %354 : vector<1x20x128xbf16> to vector<20x128xbf16>
    %cst_340 = arith.constant dense<0.000000e+00> : vector<56x128xf32>
    %356 = tpu.matmul %353, %355, %cst_340 {dimension_numbers = #tpu.dot_dimension_numbers<[1], [0], [0], [1], [0, 0, 1, 1], [], []>} : vector<56x20xbf16>, vector<20x128xbf16>, vector<56x128xf32> -> vector<56x128xf32>
    %357 = arith.addf %352, %356 : vector<56x128xf32>
    %c134 = arith.constant 134 : index
    %c0_341 = arith.constant 0 : index
    %358 = vector.load %arg11[%c134, %c0_341] : memref<288x20xbf16, #tpu.memory_space<vmem>>, vector<56x20xbf16>
    %c3_342 = arith.constant 3 : index
    %c0_343 = arith.constant 0 : index
    %c0_344 = arith.constant 0 : index
    %359 = vector.load %arg4[%c3_342, %c0_343, %c0_344] : memref<25x20x128xbf16, #tpu.memory_space<vmem>>, vector<1x20x128xbf16>
    %360 = vector.shape_cast %359 : vector<1x20x128xbf16> to vector<20x128xbf16>
    %cst_345 = arith.constant dense<0.000000e+00> : vector<56x128xf32>
    %361 = tpu.matmul %358, %360, %cst_345 {dimension_numbers = #tpu.dot_dimension_numbers<[1], [0], [0], [1], [0, 0, 1, 1], [], []>} : vector<56x20xbf16>, vector<20x128xbf16>, vector<56x128xf32> -> vector<56x128xf32>
    %362 = arith.addf %357, %361 : vector<56x128xf32>
    %c136_346 = arith.constant 136 : index
    %c0_347 = arith.constant 0 : index
    %363 = vector.load %arg11[%c136_346, %c0_347] : memref<288x20xbf16, #tpu.memory_space<vmem>>, vector<56x20xbf16>
    %c4_348 = arith.constant 4 : index
    %c0_349 = arith.constant 0 : index
    %c0_350 = arith.constant 0 : index
    %364 = vector.load %arg4[%c4_348, %c0_349, %c0_350] : memref<25x20x128xbf16, #tpu.memory_space<vmem>>, vector<1x20x128xbf16>
    %365 = vector.shape_cast %364 : vector<1x20x128xbf16> to vector<20x128xbf16>
    %cst_351 = arith.constant dense<0.000000e+00> : vector<56x128xf32>
    %366 = tpu.matmul %363, %365, %cst_351 {dimension_numbers = #tpu.dot_dimension_numbers<[1], [0], [0], [1], [0, 0, 1, 1], [], []>} : vector<56x20xbf16>, vector<20x128xbf16>, vector<56x128xf32> -> vector<56x128xf32>
    %367 = arith.addf %362, %366 : vector<56x128xf32>
    %c152 = arith.constant 152 : index
    %c0_352 = arith.constant 0 : index
    %368 = vector.load %arg11[%c152, %c0_352] : memref<288x20xbf16, #tpu.memory_space<vmem>>, vector<56x20xbf16>
    %c5_353 = arith.constant 5 : index
    %c0_354 = arith.constant 0 : index
    %c0_355 = arith.constant 0 : index
    %369 = vector.load %arg4[%c5_353, %c0_354, %c0_355] : memref<25x20x128xbf16, #tpu.memory_space<vmem>>, vector<1x20x128xbf16>
    %370 = vector.shape_cast %369 : vector<1x20x128xbf16> to vector<20x128xbf16>
    %cst_356 = arith.constant dense<0.000000e+00> : vector<56x128xf32>
    %371 = tpu.matmul %368, %370, %cst_356 {dimension_numbers = #tpu.dot_dimension_numbers<[1], [0], [0], [1], [0, 0, 1, 1], [], []>} : vector<56x20xbf16>, vector<20x128xbf16>, vector<56x128xf32> -> vector<56x128xf32>
    %372 = arith.addf %367, %371 : vector<56x128xf32>
    %c154 = arith.constant 154 : index
    %c0_357 = arith.constant 0 : index
    %373 = vector.load %arg11[%c154, %c0_357] : memref<288x20xbf16, #tpu.memory_space<vmem>>, vector<56x20xbf16>
    %c6_358 = arith.constant 6 : index
    %c0_359 = arith.constant 0 : index
    %c0_360 = arith.constant 0 : index
    %374 = vector.load %arg4[%c6_358, %c0_359, %c0_360] : memref<25x20x128xbf16, #tpu.memory_space<vmem>>, vector<1x20x128xbf16>
    %375 = vector.shape_cast %374 : vector<1x20x128xbf16> to vector<20x128xbf16>
    %cst_361 = arith.constant dense<0.000000e+00> : vector<56x128xf32>
    %376 = tpu.matmul %373, %375, %cst_361 {dimension_numbers = #tpu.dot_dimension_numbers<[1], [0], [0], [1], [0, 0, 1, 1], [], []>} : vector<56x20xbf16>, vector<20x128xbf16>, vector<56x128xf32> -> vector<56x128xf32>
    %377 = arith.addf %372, %376 : vector<56x128xf32>
    %c156 = arith.constant 156 : index
    %c0_362 = arith.constant 0 : index
    %378 = vector.load %arg11[%c156, %c0_362] : memref<288x20xbf16, #tpu.memory_space<vmem>>, vector<56x20xbf16>
    %c7_363 = arith.constant 7 : index
    %c0_364 = arith.constant 0 : index
    %c0_365 = arith.constant 0 : index
    %379 = vector.load %arg4[%c7_363, %c0_364, %c0_365] : memref<25x20x128xbf16, #tpu.memory_space<vmem>>, vector<1x20x128xbf16>
    %380 = vector.shape_cast %379 : vector<1x20x128xbf16> to vector<20x128xbf16>
    %cst_366 = arith.constant dense<0.000000e+00> : vector<56x128xf32>
    %381 = tpu.matmul %378, %380, %cst_366 {dimension_numbers = #tpu.dot_dimension_numbers<[1], [0], [0], [1], [0, 0, 1, 1], [], []>} : vector<56x20xbf16>, vector<20x128xbf16>, vector<56x128xf32> -> vector<56x128xf32>
    %382 = arith.addf %377, %381 : vector<56x128xf32>
    %c158 = arith.constant 158 : index
    %c0_367 = arith.constant 0 : index
    %383 = vector.load %arg11[%c158, %c0_367] : memref<288x20xbf16, #tpu.memory_space<vmem>>, vector<56x20xbf16>
    %c8_368 = arith.constant 8 : index
    %c0_369 = arith.constant 0 : index
    %c0_370 = arith.constant 0 : index
    %384 = vector.load %arg4[%c8_368, %c0_369, %c0_370] : memref<25x20x128xbf16, #tpu.memory_space<vmem>>, vector<1x20x128xbf16>
    %385 = vector.shape_cast %384 : vector<1x20x128xbf16> to vector<20x128xbf16>
    %cst_371 = arith.constant dense<0.000000e+00> : vector<56x128xf32>
    %386 = tpu.matmul %383, %385, %cst_371 {dimension_numbers = #tpu.dot_dimension_numbers<[1], [0], [0], [1], [0, 0, 1, 1], [], []>} : vector<56x20xbf16>, vector<20x128xbf16>, vector<56x128xf32> -> vector<56x128xf32>
    %387 = arith.addf %382, %386 : vector<56x128xf32>
    %c160_372 = arith.constant 160 : index
    %c0_373 = arith.constant 0 : index
    %388 = vector.load %arg11[%c160_372, %c0_373] : memref<288x20xbf16, #tpu.memory_space<vmem>>, vector<56x20xbf16>
    %c9_374 = arith.constant 9 : index
    %c0_375 = arith.constant 0 : index
    %c0_376 = arith.constant 0 : index
    %389 = vector.load %arg4[%c9_374, %c0_375, %c0_376] : memref<25x20x128xbf16, #tpu.memory_space<vmem>>, vector<1x20x128xbf16>
    %390 = vector.shape_cast %389 : vector<1x20x128xbf16> to vector<20x128xbf16>
    %cst_377 = arith.constant dense<0.000000e+00> : vector<56x128xf32>
    %391 = tpu.matmul %388, %390, %cst_377 {dimension_numbers = #tpu.dot_dimension_numbers<[1], [0], [0], [1], [0, 0, 1, 1], [], []>} : vector<56x20xbf16>, vector<20x128xbf16>, vector<56x128xf32> -> vector<56x128xf32>
    %392 = arith.addf %387, %391 : vector<56x128xf32>
    %c176 = arith.constant 176 : index
    %c0_378 = arith.constant 0 : index
    %393 = vector.load %arg11[%c176, %c0_378] : memref<288x20xbf16, #tpu.memory_space<vmem>>, vector<56x20xbf16>
    %c10_379 = arith.constant 10 : index
    %c0_380 = arith.constant 0 : index
    %c0_381 = arith.constant 0 : index
    %394 = vector.load %arg4[%c10_379, %c0_380, %c0_381] : memref<25x20x128xbf16, #tpu.memory_space<vmem>>, vector<1x20x128xbf16>
    %395 = vector.shape_cast %394 : vector<1x20x128xbf16> to vector<20x128xbf16>
    %cst_382 = arith.constant dense<0.000000e+00> : vector<56x128xf32>
    %396 = tpu.matmul %393, %395, %cst_382 {dimension_numbers = #tpu.dot_dimension_numbers<[1], [0], [0], [1], [0, 0, 1, 1], [], []>} : vector<56x20xbf16>, vector<20x128xbf16>, vector<56x128xf32> -> vector<56x128xf32>
    %397 = arith.addf %392, %396 : vector<56x128xf32>
    %c178 = arith.constant 178 : index
    %c0_383 = arith.constant 0 : index
    %398 = vector.load %arg11[%c178, %c0_383] : memref<288x20xbf16, #tpu.memory_space<vmem>>, vector<56x20xbf16>
    %c11_384 = arith.constant 11 : index
    %c0_385 = arith.constant 0 : index
    %c0_386 = arith.constant 0 : index
    %399 = vector.load %arg4[%c11_384, %c0_385, %c0_386] : memref<25x20x128xbf16, #tpu.memory_space<vmem>>, vector<1x20x128xbf16>
    %400 = vector.shape_cast %399 : vector<1x20x128xbf16> to vector<20x128xbf16>
    %cst_387 = arith.constant dense<0.000000e+00> : vector<56x128xf32>
    %401 = tpu.matmul %398, %400, %cst_387 {dimension_numbers = #tpu.dot_dimension_numbers<[1], [0], [0], [1], [0, 0, 1, 1], [], []>} : vector<56x20xbf16>, vector<20x128xbf16>, vector<56x128xf32> -> vector<56x128xf32>
    %402 = arith.addf %397, %401 : vector<56x128xf32>
    %c180 = arith.constant 180 : index
    %c0_388 = arith.constant 0 : index
    %403 = vector.load %arg11[%c180, %c0_388] : memref<288x20xbf16, #tpu.memory_space<vmem>>, vector<56x20xbf16>
    %c12_389 = arith.constant 12 : index
    %c0_390 = arith.constant 0 : index
    %c0_391 = arith.constant 0 : index
    %404 = vector.load %arg4[%c12_389, %c0_390, %c0_391] : memref<25x20x128xbf16, #tpu.memory_space<vmem>>, vector<1x20x128xbf16>
    %405 = vector.shape_cast %404 : vector<1x20x128xbf16> to vector<20x128xbf16>
    %cst_392 = arith.constant dense<0.000000e+00> : vector<56x128xf32>
    %406 = tpu.matmul %403, %405, %cst_392 {dimension_numbers = #tpu.dot_dimension_numbers<[1], [0], [0], [1], [0, 0, 1, 1], [], []>} : vector<56x20xbf16>, vector<20x128xbf16>, vector<56x128xf32> -> vector<56x128xf32>
    %407 = arith.addf %402, %406 : vector<56x128xf32>
    %c182 = arith.constant 182 : index
    %c0_393 = arith.constant 0 : index
    %408 = vector.load %arg11[%c182, %c0_393] : memref<288x20xbf16, #tpu.memory_space<vmem>>, vector<56x20xbf16>
    %c13_394 = arith.constant 13 : index
    %c0_395 = arith.constant 0 : index
    %c0_396 = arith.constant 0 : index
    %409 = vector.load %arg4[%c13_394, %c0_395, %c0_396] : memref<25x20x128xbf16, #tpu.memory_space<vmem>>, vector<1x20x128xbf16>
    %410 = vector.shape_cast %409 : vector<1x20x128xbf16> to vector<20x128xbf16>
    %cst_397 = arith.constant dense<0.000000e+00> : vector<56x128xf32>
    %411 = tpu.matmul %408, %410, %cst_397 {dimension_numbers = #tpu.dot_dimension_numbers<[1], [0], [0], [1], [0, 0, 1, 1], [], []>} : vector<56x20xbf16>, vector<20x128xbf16>, vector<56x128xf32> -> vector<56x128xf32>
    %412 = arith.addf %407, %411 : vector<56x128xf32>
    %c184 = arith.constant 184 : index
    %c0_398 = arith.constant 0 : index
    %413 = vector.load %arg11[%c184, %c0_398] : memref<288x20xbf16, #tpu.memory_space<vmem>>, vector<56x20xbf16>
    %c14_399 = arith.constant 14 : index
    %c0_400 = arith.constant 0 : index
    %c0_401 = arith.constant 0 : index
    %414 = vector.load %arg4[%c14_399, %c0_400, %c0_401] : memref<25x20x128xbf16, #tpu.memory_space<vmem>>, vector<1x20x128xbf16>
    %415 = vector.shape_cast %414 : vector<1x20x128xbf16> to vector<20x128xbf16>
    %cst_402 = arith.constant dense<0.000000e+00> : vector<56x128xf32>
    %416 = tpu.matmul %413, %415, %cst_402 {dimension_numbers = #tpu.dot_dimension_numbers<[1], [0], [0], [1], [0, 0, 1, 1], [], []>} : vector<56x20xbf16>, vector<20x128xbf16>, vector<56x128xf32> -> vector<56x128xf32>
    %417 = arith.addf %412, %416 : vector<56x128xf32>
    %c200 = arith.constant 200 : index
    %c0_403 = arith.constant 0 : index
    %418 = vector.load %arg11[%c200, %c0_403] : memref<288x20xbf16, #tpu.memory_space<vmem>>, vector<56x20xbf16>
    %c15_404 = arith.constant 15 : index
    %c0_405 = arith.constant 0 : index
    %c0_406 = arith.constant 0 : index
    %419 = vector.load %arg4[%c15_404, %c0_405, %c0_406] : memref<25x20x128xbf16, #tpu.memory_space<vmem>>, vector<1x20x128xbf16>
    %420 = vector.shape_cast %419 : vector<1x20x128xbf16> to vector<20x128xbf16>
    %cst_407 = arith.constant dense<0.000000e+00> : vector<56x128xf32>
    %421 = tpu.matmul %418, %420, %cst_407 {dimension_numbers = #tpu.dot_dimension_numbers<[1], [0], [0], [1], [0, 0, 1, 1], [], []>} : vector<56x20xbf16>, vector<20x128xbf16>, vector<56x128xf32> -> vector<56x128xf32>
    %422 = arith.addf %417, %421 : vector<56x128xf32>
    %c202 = arith.constant 202 : index
    %c0_408 = arith.constant 0 : index
    %423 = vector.load %arg11[%c202, %c0_408] : memref<288x20xbf16, #tpu.memory_space<vmem>>, vector<56x20xbf16>
    %c16_409 = arith.constant 16 : index
    %c0_410 = arith.constant 0 : index
    %c0_411 = arith.constant 0 : index
    %424 = vector.load %arg4[%c16_409, %c0_410, %c0_411] : memref<25x20x128xbf16, #tpu.memory_space<vmem>>, vector<1x20x128xbf16>
    %425 = vector.shape_cast %424 : vector<1x20x128xbf16> to vector<20x128xbf16>
    %cst_412 = arith.constant dense<0.000000e+00> : vector<56x128xf32>
    %426 = tpu.matmul %423, %425, %cst_412 {dimension_numbers = #tpu.dot_dimension_numbers<[1], [0], [0], [1], [0, 0, 1, 1], [], []>} : vector<56x20xbf16>, vector<20x128xbf16>, vector<56x128xf32> -> vector<56x128xf32>
    %427 = arith.addf %422, %426 : vector<56x128xf32>
    %c204 = arith.constant 204 : index
    %c0_413 = arith.constant 0 : index
    %428 = vector.load %arg11[%c204, %c0_413] : memref<288x20xbf16, #tpu.memory_space<vmem>>, vector<56x20xbf16>
    %c17_414 = arith.constant 17 : index
    %c0_415 = arith.constant 0 : index
    %c0_416 = arith.constant 0 : index
    %429 = vector.load %arg4[%c17_414, %c0_415, %c0_416] : memref<25x20x128xbf16, #tpu.memory_space<vmem>>, vector<1x20x128xbf16>
    %430 = vector.shape_cast %429 : vector<1x20x128xbf16> to vector<20x128xbf16>
    %cst_417 = arith.constant dense<0.000000e+00> : vector<56x128xf32>
    %431 = tpu.matmul %428, %430, %cst_417 {dimension_numbers = #tpu.dot_dimension_numbers<[1], [0], [0], [1], [0, 0, 1, 1], [], []>} : vector<56x20xbf16>, vector<20x128xbf16>, vector<56x128xf32> -> vector<56x128xf32>
    %432 = arith.addf %427, %431 : vector<56x128xf32>
    %c206 = arith.constant 206 : index
    %c0_418 = arith.constant 0 : index
    %433 = vector.load %arg11[%c206, %c0_418] : memref<288x20xbf16, #tpu.memory_space<vmem>>, vector<56x20xbf16>
    %c18_419 = arith.constant 18 : index
    %c0_420 = arith.constant 0 : index
    %c0_421 = arith.constant 0 : index
    %434 = vector.load %arg4[%c18_419, %c0_420, %c0_421] : memref<25x20x128xbf16, #tpu.memory_space<vmem>>, vector<1x20x128xbf16>
    %435 = vector.shape_cast %434 : vector<1x20x128xbf16> to vector<20x128xbf16>
    %cst_422 = arith.constant dense<0.000000e+00> : vector<56x128xf32>
    %436 = tpu.matmul %433, %435, %cst_422 {dimension_numbers = #tpu.dot_dimension_numbers<[1], [0], [0], [1], [0, 0, 1, 1], [], []>} : vector<56x20xbf16>, vector<20x128xbf16>, vector<56x128xf32> -> vector<56x128xf32>
    %437 = arith.addf %432, %436 : vector<56x128xf32>
    %c208 = arith.constant 208 : index
    %c0_423 = arith.constant 0 : index
    %438 = vector.load %arg11[%c208, %c0_423] : memref<288x20xbf16, #tpu.memory_space<vmem>>, vector<56x20xbf16>
    %c19_424 = arith.constant 19 : index
    %c0_425 = arith.constant 0 : index
    %c0_426 = arith.constant 0 : index
    %439 = vector.load %arg4[%c19_424, %c0_425, %c0_426] : memref<25x20x128xbf16, #tpu.memory_space<vmem>>, vector<1x20x128xbf16>
    %440 = vector.shape_cast %439 : vector<1x20x128xbf16> to vector<20x128xbf16>
    %cst_427 = arith.constant dense<0.000000e+00> : vector<56x128xf32>
    %441 = tpu.matmul %438, %440, %cst_427 {dimension_numbers = #tpu.dot_dimension_numbers<[1], [0], [0], [1], [0, 0, 1, 1], [], []>} : vector<56x20xbf16>, vector<20x128xbf16>, vector<56x128xf32> -> vector<56x128xf32>
    %442 = arith.addf %437, %441 : vector<56x128xf32>
    %c224 = arith.constant 224 : index
    %c0_428 = arith.constant 0 : index
    %443 = vector.load %arg11[%c224, %c0_428] : memref<288x20xbf16, #tpu.memory_space<vmem>>, vector<56x20xbf16>
    %c20_429 = arith.constant 20 : index
    %c0_430 = arith.constant 0 : index
    %c0_431 = arith.constant 0 : index
    %444 = vector.load %arg4[%c20_429, %c0_430, %c0_431] : memref<25x20x128xbf16, #tpu.memory_space<vmem>>, vector<1x20x128xbf16>
    %445 = vector.shape_cast %444 : vector<1x20x128xbf16> to vector<20x128xbf16>
    %cst_432 = arith.constant dense<0.000000e+00> : vector<56x128xf32>
    %446 = tpu.matmul %443, %445, %cst_432 {dimension_numbers = #tpu.dot_dimension_numbers<[1], [0], [0], [1], [0, 0, 1, 1], [], []>} : vector<56x20xbf16>, vector<20x128xbf16>, vector<56x128xf32> -> vector<56x128xf32>
    %447 = arith.addf %442, %446 : vector<56x128xf32>
    %c226 = arith.constant 226 : index
    %c0_433 = arith.constant 0 : index
    %448 = vector.load %arg11[%c226, %c0_433] : memref<288x20xbf16, #tpu.memory_space<vmem>>, vector<56x20xbf16>
    %c21_434 = arith.constant 21 : index
    %c0_435 = arith.constant 0 : index
    %c0_436 = arith.constant 0 : index
    %449 = vector.load %arg4[%c21_434, %c0_435, %c0_436] : memref<25x20x128xbf16, #tpu.memory_space<vmem>>, vector<1x20x128xbf16>
    %450 = vector.shape_cast %449 : vector<1x20x128xbf16> to vector<20x128xbf16>
    %cst_437 = arith.constant dense<0.000000e+00> : vector<56x128xf32>
    %451 = tpu.matmul %448, %450, %cst_437 {dimension_numbers = #tpu.dot_dimension_numbers<[1], [0], [0], [1], [0, 0, 1, 1], [], []>} : vector<56x20xbf16>, vector<20x128xbf16>, vector<56x128xf32> -> vector<56x128xf32>
    %452 = arith.addf %447, %451 : vector<56x128xf32>
    %c228 = arith.constant 228 : index
    %c0_438 = arith.constant 0 : index
    %453 = vector.load %arg11[%c228, %c0_438] : memref<288x20xbf16, #tpu.memory_space<vmem>>, vector<56x20xbf16>
    %c22_439 = arith.constant 22 : index
    %c0_440 = arith.constant 0 : index
    %c0_441 = arith.constant 0 : index
    %454 = vector.load %arg4[%c22_439, %c0_440, %c0_441] : memref<25x20x128xbf16, #tpu.memory_space<vmem>>, vector<1x20x128xbf16>
    %455 = vector.shape_cast %454 : vector<1x20x128xbf16> to vector<20x128xbf16>
    %cst_442 = arith.constant dense<0.000000e+00> : vector<56x128xf32>
    %456 = tpu.matmul %453, %455, %cst_442 {dimension_numbers = #tpu.dot_dimension_numbers<[1], [0], [0], [1], [0, 0, 1, 1], [], []>} : vector<56x20xbf16>, vector<20x128xbf16>, vector<56x128xf32> -> vector<56x128xf32>
    %457 = arith.addf %452, %456 : vector<56x128xf32>
    %c230 = arith.constant 230 : index
    %c0_443 = arith.constant 0 : index
    %458 = vector.load %arg11[%c230, %c0_443] : memref<288x20xbf16, #tpu.memory_space<vmem>>, vector<56x20xbf16>
    %c23_444 = arith.constant 23 : index
    %c0_445 = arith.constant 0 : index
    %c0_446 = arith.constant 0 : index
    %459 = vector.load %arg4[%c23_444, %c0_445, %c0_446] : memref<25x20x128xbf16, #tpu.memory_space<vmem>>, vector<1x20x128xbf16>
    %460 = vector.shape_cast %459 : vector<1x20x128xbf16> to vector<20x128xbf16>
    %cst_447 = arith.constant dense<0.000000e+00> : vector<56x128xf32>
    %461 = tpu.matmul %458, %460, %cst_447 {dimension_numbers = #tpu.dot_dimension_numbers<[1], [0], [0], [1], [0, 0, 1, 1], [], []>} : vector<56x20xbf16>, vector<20x128xbf16>, vector<56x128xf32> -> vector<56x128xf32>
    %462 = arith.addf %457, %461 : vector<56x128xf32>
    %c232 = arith.constant 232 : index
    %c0_448 = arith.constant 0 : index
    %463 = vector.load %arg11[%c232, %c0_448] : memref<288x20xbf16, #tpu.memory_space<vmem>>, vector<56x20xbf16>
    %c24_449 = arith.constant 24 : index
    %c0_450 = arith.constant 0 : index
    %c0_451 = arith.constant 0 : index
    %464 = vector.load %arg4[%c24_449, %c0_450, %c0_451] : memref<25x20x128xbf16, #tpu.memory_space<vmem>>, vector<1x20x128xbf16>
    %465 = vector.shape_cast %464 : vector<1x20x128xbf16> to vector<20x128xbf16>
    %cst_452 = arith.constant dense<0.000000e+00> : vector<56x128xf32>
    %466 = tpu.matmul %463, %465, %cst_452 {dimension_numbers = #tpu.dot_dimension_numbers<[1], [0], [0], [1], [0, 0, 1, 1], [], []>} : vector<56x20xbf16>, vector<20x128xbf16>, vector<56x128xf32> -> vector<56x128xf32>
    %467 = arith.addf %462, %466 : vector<56x128xf32>
    %c128_453 = arith.constant 128 : index
    %c0_454 = arith.constant 0 : index
    %468 = vector.load %arg12[%c128_453, %c0_454] : memref<184x128xf32, #tpu.memory_space<vmem>>, vector<56x128xf32>
    tpu.vector_store %arg12[%c128_453, %c0_454], %467 {strides = array<i32>} : memref<184x128xf32, #tpu.memory_space<vmem>>, vector<56x128xf32>,
    %cst_455 = arith.constant 0.000000e+00 : f32
    %469 = vector.broadcast %cst_455 : f32 to vector<2x512xf32>
    %c0_456 = arith.constant 0 : index
    %c0_457 = arith.constant 0 : index
    %470 = vector.load %arg12[%c0_456, %c0_457] : memref<184x128xf32, #tpu.memory_space<vmem>>, vector<2x128xf32>
    %c2_458 = arith.constant 2 : index
    %c0_459 = arith.constant 0 : index
    %471 = vector.load %arg12[%c2_458, %c0_459] : memref<184x128xf32, #tpu.memory_space<vmem>>, vector<2x128xf32>
    %472 = arith.maximumf %470, %471 : vector<2x128xf32>
    %c24_460 = arith.constant 24 : index
    %c0_461 = arith.constant 0 : index
    %473 = vector.load %arg12[%c24_460, %c0_461] : memref<184x128xf32, #tpu.memory_space<vmem>>, vector<2x128xf32>
    %c26_462 = arith.constant 26 : index
    %c0_463 = arith.constant 0 : index
    %474 = vector.load %arg12[%c26_462, %c0_463] : memref<184x128xf32, #tpu.memory_space<vmem>>, vector<2x128xf32>
    %475 = arith.maximumf %473, %474 : vector<2x128xf32>
    %476 = arith.maximumf %472, %475 : vector<2x128xf32>
    %c0_464 = arith.constant 0 : index
    %c0_465 = arith.constant 0 : index
    %477 = vector.load %arg5[%c0_464, %c0_465] : memref<1x128xf32, #tpu.memory_space<vmem>>, vector<1x128xf32>
    %478 = vector.broadcast %477 : vector<1x128xf32> to vector<2x128xf32>
    %479 = arith.addf %476, %478 : vector<2x128xf32>
    %cst_466 = arith.constant 0.000000e+00 : f32
    %480 = vector.broadcast %cst_466 : f32 to vector<2x128xf32>
    %481 = arith.maximumf %479, %480 : vector<2x128xf32>
    %482 = arith.truncf %481 : vector<2x128xf32> to vector<2x128xbf16>
    %c0_467 = arith.constant 0 : index
    %c0_468 = arith.constant 0 : index
    %c0_469 = arith.constant 0 : index
    %483 = vector.load %arg6[%c0_467, %c0_468, %c0_469] : memref<16x128x512xbf16, #tpu.memory_space<vmem>>, vector<1x128x512xbf16>
    %484 = vector.shape_cast %483 : vector<1x128x512xbf16> to vector<128x512xbf16>
    %cst_470 = arith.constant dense<0.000000e+00> : vector<2x512xf32>
    %485 = tpu.matmul %482, %484, %cst_470 {dimension_numbers = #tpu.dot_dimension_numbers<[1], [0], [0], [1], [0, 0, 1, 1], [], []>} : vector<2x128xbf16>, vector<128x512xbf16>, vector<2x512xf32> -> vector<2x512xf32>
    %486 = arith.addf %469, %485 : vector<2x512xf32>
    %c4_471 = arith.constant 4 : index
    %c0_472 = arith.constant 0 : index
    %487 = vector.load %arg12[%c4_471, %c0_472] : memref<184x128xf32, #tpu.memory_space<vmem>>, vector<2x128xf32>
    %c6_473 = arith.constant 6 : index
    %c0_474 = arith.constant 0 : index
    %488 = vector.load %arg12[%c6_473, %c0_474] : memref<184x128xf32, #tpu.memory_space<vmem>>, vector<2x128xf32>
    %489 = arith.maximumf %487, %488 : vector<2x128xf32>
    %c28_475 = arith.constant 28 : index
    %c0_476 = arith.constant 0 : index
    %490 = vector.load %arg12[%c28_475, %c0_476] : memref<184x128xf32, #tpu.memory_space<vmem>>, vector<2x128xf32>
    %c30_477 = arith.constant 30 : index
    %c0_478 = arith.constant 0 : index
    %491 = vector.load %arg12[%c30_477, %c0_478] : memref<184x128xf32, #tpu.memory_space<vmem>>, vector<2x128xf32>
    %492 = arith.maximumf %490, %491 : vector<2x128xf32>
    %493 = arith.maximumf %489, %492 : vector<2x128xf32>
    %c0_479 = arith.constant 0 : index
    %c0_480 = arith.constant 0 : index
    %494 = vector.load %arg5[%c0_479, %c0_480] : memref<1x128xf32, #tpu.memory_space<vmem>>, vector<1x128xf32>
    %495 = vector.broadcast %494 : vector<1x128xf32> to vector<2x128xf32>
    %496 = arith.addf %493, %495 : vector<2x128xf32>
    %cst_481 = arith.constant 0.000000e+00 : f32
    %497 = vector.broadcast %cst_481 : f32 to vector<2x128xf32>
    %498 = arith.maximumf %496, %497 : vector<2x128xf32>
    %499 = arith.truncf %498 : vector<2x128xf32> to vector<2x128xbf16>
    %c1_482 = arith.constant 1 : index
    %c0_483 = arith.constant 0 : index
    %c0_484 = arith.constant 0 : index
    %500 = vector.load %arg6[%c1_482, %c0_483, %c0_484] : memref<16x128x512xbf16, #tpu.memory_space<vmem>>, vector<1x128x512xbf16>
    %501 = vector.shape_cast %500 : vector<1x128x512xbf16> to vector<128x512xbf16>
    %cst_485 = arith.constant dense<0.000000e+00> : vector<2x512xf32>
    %502 = tpu.matmul %499, %501, %cst_485 {dimension_numbers = #tpu.dot_dimension_numbers<[1], [0], [0], [1], [0, 0, 1, 1], [], []>} : vector<2x128xbf16>, vector<128x512xbf16>, vector<2x512xf32> -> vector<2x512xf32>
    %503 = arith.addf %486, %502 : vector<2x512xf32>
    %c8_486 = arith.constant 8 : index
    %c0_487 = arith.constant 0 : index
    %504 = vector.load %arg12[%c8_486, %c0_487] : memref<184x128xf32, #tpu.memory_space<vmem>>, vector<2x128xf32>
    %c10_488 = arith.constant 10 : index
    %c0_489 = arith.constant 0 : index
    %505 = vector.load %arg12[%c10_488, %c0_489] : memref<184x128xf32, #tpu.memory_space<vmem>>, vector<2x128xf32>
    %506 = arith.maximumf %504, %505 : vector<2x128xf32>
    %c32_490 = arith.constant 32 : index
    %c0_491 = arith.constant 0 : index
    %507 = vector.load %arg12[%c32_490, %c0_491] : memref<184x128xf32, #tpu.memory_space<vmem>>, vector<2x128xf32>
    %c34 = arith.constant 34 : index
    %c0_492 = arith.constant 0 : index
    %508 = vector.load %arg12[%c34, %c0_492] : memref<184x128xf32, #tpu.memory_space<vmem>>, vector<2x128xf32>
    %509 = arith.maximumf %507, %508 : vector<2x128xf32>
    %510 = arith.maximumf %506, %509 : vector<2x128xf32>
    %c0_493 = arith.constant 0 : index
    %c0_494 = arith.constant 0 : index
    %511 = vector.load %arg5[%c0_493, %c0_494] : memref<1x128xf32, #tpu.memory_space<vmem>>, vector<1x128xf32>
    %512 = vector.broadcast %511 : vector<1x128xf32> to vector<2x128xf32>
    %513 = arith.addf %510, %512 : vector<2x128xf32>
    %cst_495 = arith.constant 0.000000e+00 : f32
    %514 = vector.broadcast %cst_495 : f32 to vector<2x128xf32>
    %515 = arith.maximumf %513, %514 : vector<2x128xf32>
    %516 = arith.truncf %515 : vector<2x128xf32> to vector<2x128xbf16>
    %c2_496 = arith.constant 2 : index
    %c0_497 = arith.constant 0 : index
    %c0_498 = arith.constant 0 : index
    %517 = vector.load %arg6[%c2_496, %c0_497, %c0_498] : memref<16x128x512xbf16, #tpu.memory_space<vmem>>, vector<1x128x512xbf16>
    %518 = vector.shape_cast %517 : vector<1x128x512xbf16> to vector<128x512xbf16>
    %cst_499 = arith.constant dense<0.000000e+00> : vector<2x512xf32>
    %519 = tpu.matmul %516, %518, %cst_499 {dimension_numbers = #tpu.dot_dimension_numbers<[1], [0], [0], [1], [0, 0, 1, 1], [], []>} : vector<2x128xbf16>, vector<128x512xbf16>, vector<2x512xf32> -> vector<2x512xf32>
    %520 = arith.addf %503, %519 : vector<2x512xf32>
    %c12_500 = arith.constant 12 : index
    %c0_501 = arith.constant 0 : index
    %521 = vector.load %arg12[%c12_500, %c0_501] : memref<184x128xf32, #tpu.memory_space<vmem>>, vector<2x128xf32>
    %c14_502 = arith.constant 14 : index
    %c0_503 = arith.constant 0 : index
    %522 = vector.load %arg12[%c14_502, %c0_503] : memref<184x128xf32, #tpu.memory_space<vmem>>, vector<2x128xf32>
    %523 = arith.maximumf %521, %522 : vector<2x128xf32>
    %c36 = arith.constant 36 : index
    %c0_504 = arith.constant 0 : index
    %524 = vector.load %arg12[%c36, %c0_504] : memref<184x128xf32, #tpu.memory_space<vmem>>, vector<2x128xf32>
    %c38 = arith.constant 38 : index
    %c0_505 = arith.constant 0 : index
    %525 = vector.load %arg12[%c38, %c0_505] : memref<184x128xf32, #tpu.memory_space<vmem>>, vector<2x128xf32>
    %526 = arith.maximumf %524, %525 : vector<2x128xf32>
    %527 = arith.maximumf %523, %526 : vector<2x128xf32>
    %c0_506 = arith.constant 0 : index
    %c0_507 = arith.constant 0 : index
    %528 = vector.load %arg5[%c0_506, %c0_507] : memref<1x128xf32, #tpu.memory_space<vmem>>, vector<1x128xf32>
    %529 = vector.broadcast %528 : vector<1x128xf32> to vector<2x128xf32>
    %530 = arith.addf %527, %529 : vector<2x128xf32>
    %cst_508 = arith.constant 0.000000e+00 : f32
    %531 = vector.broadcast %cst_508 : f32 to vector<2x128xf32>
    %532 = arith.maximumf %530, %531 : vector<2x128xf32>
    %533 = arith.truncf %532 : vector<2x128xf32> to vector<2x128xbf16>
    %c3_509 = arith.constant 3 : index
    %c0_510 = arith.constant 0 : index
    %c0_511 = arith.constant 0 : index
    %534 = vector.load %arg6[%c3_509, %c0_510, %c0_511] : memref<16x128x512xbf16, #tpu.memory_space<vmem>>, vector<1x128x512xbf16>
    %535 = vector.shape_cast %534 : vector<1x128x512xbf16> to vector<128x512xbf16>
    %cst_512 = arith.constant dense<0.000000e+00> : vector<2x512xf32>
    %536 = tpu.matmul %533, %535, %cst_512 {dimension_numbers = #tpu.dot_dimension_numbers<[1], [0], [0], [1], [0, 0, 1, 1], [], []>} : vector<2x128xbf16>, vector<128x512xbf16>, vector<2x512xf32> -> vector<2x512xf32>
    %537 = arith.addf %520, %536 : vector<2x512xf32>
    %c48_513 = arith.constant 48 : index
    %c0_514 = arith.constant 0 : index
    %538 = vector.load %arg12[%c48_513, %c0_514] : memref<184x128xf32, #tpu.memory_space<vmem>>, vector<2x128xf32>
    %c50_515 = arith.constant 50 : index
    %c0_516 = arith.constant 0 : index
    %539 = vector.load %arg12[%c50_515, %c0_516] : memref<184x128xf32, #tpu.memory_space<vmem>>, vector<2x128xf32>
    %540 = arith.maximumf %538, %539 : vector<2x128xf32>
    %c72_517 = arith.constant 72 : index
    %c0_518 = arith.constant 0 : index
    %541 = vector.load %arg12[%c72_517, %c0_518] : memref<184x128xf32, #tpu.memory_space<vmem>>, vector<2x128xf32>
    %c74_519 = arith.constant 74 : index
    %c0_520 = arith.constant 0 : index
    %542 = vector.load %arg12[%c74_519, %c0_520] : memref<184x128xf32, #tpu.memory_space<vmem>>, vector<2x128xf32>
    %543 = arith.maximumf %541, %542 : vector<2x128xf32>
    %544 = arith.maximumf %540, %543 : vector<2x128xf32>
    %c0_521 = arith.constant 0 : index
    %c0_522 = arith.constant 0 : index
    %545 = vector.load %arg5[%c0_521, %c0_522] : memref<1x128xf32, #tpu.memory_space<vmem>>, vector<1x128xf32>
    %546 = vector.broadcast %545 : vector<1x128xf32> to vector<2x128xf32>
    %547 = arith.addf %544, %546 : vector<2x128xf32>
    %cst_523 = arith.constant 0.000000e+00 : f32
    %548 = vector.broadcast %cst_523 : f32 to vector<2x128xf32>
    %549 = arith.maximumf %547, %548 : vector<2x128xf32>
    %550 = arith.truncf %549 : vector<2x128xf32> to vector<2x128xbf16>
    %c4_524 = arith.constant 4 : index
    %c0_525 = arith.constant 0 : index
    %c0_526 = arith.constant 0 : index
    %551 = vector.load %arg6[%c4_524, %c0_525, %c0_526] : memref<16x128x512xbf16, #tpu.memory_space<vmem>>, vector<1x128x512xbf16>
    %552 = vector.shape_cast %551 : vector<1x128x512xbf16> to vector<128x512xbf16>
    %cst_527 = arith.constant dense<0.000000e+00> : vector<2x512xf32>
    %553 = tpu.matmul %550, %552, %cst_527 {dimension_numbers = #tpu.dot_dimension_numbers<[1], [0], [0], [1], [0, 0, 1, 1], [], []>} : vector<2x128xbf16>, vector<128x512xbf16>, vector<2x512xf32> -> vector<2x512xf32>
    %554 = arith.addf %537, %553 : vector<2x512xf32>
    %c52_528 = arith.constant 52 : index
    %c0_529 = arith.constant 0 : index
    %555 = vector.load %arg12[%c52_528, %c0_529] : memref<184x128xf32, #tpu.memory_space<vmem>>, vector<2x128xf32>
    %c54_530 = arith.constant 54 : index
    %c0_531 = arith.constant 0 : index
    %556 = vector.load %arg12[%c54_530, %c0_531] : memref<184x128xf32, #tpu.memory_space<vmem>>, vector<2x128xf32>
    %557 = arith.maximumf %555, %556 : vector<2x128xf32>
    %c76_532 = arith.constant 76 : index
    %c0_533 = arith.constant 0 : index
    %558 = vector.load %arg12[%c76_532, %c0_533] : memref<184x128xf32, #tpu.memory_space<vmem>>, vector<2x128xf32>
    %c78_534 = arith.constant 78 : index
    %c0_535 = arith.constant 0 : index
    %559 = vector.load %arg12[%c78_534, %c0_535] : memref<184x128xf32, #tpu.memory_space<vmem>>, vector<2x128xf32>
    %560 = arith.maximumf %558, %559 : vector<2x128xf32>
    %561 = arith.maximumf %557, %560 : vector<2x128xf32>
    %c0_536 = arith.constant 0 : index
    %c0_537 = arith.constant 0 : index
    %562 = vector.load %arg5[%c0_536, %c0_537] : memref<1x128xf32, #tpu.memory_space<vmem>>, vector<1x128xf32>
    %563 = vector.broadcast %562 : vector<1x128xf32> to vector<2x128xf32>
    %564 = arith.addf %561, %563 : vector<2x128xf32>
    %cst_538 = arith.constant 0.000000e+00 : f32
    %565 = vector.broadcast %cst_538 : f32 to vector<2x128xf32>
    %566 = arith.maximumf %564, %565 : vector<2x128xf32>
    %567 = arith.truncf %566 : vector<2x128xf32> to vector<2x128xbf16>
    %c5_539 = arith.constant 5 : index
    %c0_540 = arith.constant 0 : index
    %c0_541 = arith.constant 0 : index
    %568 = vector.load %arg6[%c5_539, %c0_540, %c0_541] : memref<16x128x512xbf16, #tpu.memory_space<vmem>>, vector<1x128x512xbf16>
    %569 = vector.shape_cast %568 : vector<1x128x512xbf16> to vector<128x512xbf16>
    %cst_542 = arith.constant dense<0.000000e+00> : vector<2x512xf32>
    %570 = tpu.matmul %567, %569, %cst_542 {dimension_numbers = #tpu.dot_dimension_numbers<[1], [0], [0], [1], [0, 0, 1, 1], [], []>} : vector<2x128xbf16>, vector<128x512xbf16>, vector<2x512xf32> -> vector<2x512xf32>
    %571 = arith.addf %554, %570 : vector<2x512xf32>
    %c56_543 = arith.constant 56 : index
    %c0_544 = arith.constant 0 : index
    %572 = vector.load %arg12[%c56_543, %c0_544] : memref<184x128xf32, #tpu.memory_space<vmem>>, vector<2x128xf32>
    %c58 = arith.constant 58 : index
    %c0_545 = arith.constant 0 : index
    %573 = vector.load %arg12[%c58, %c0_545] : memref<184x128xf32, #tpu.memory_space<vmem>>, vector<2x128xf32>
    %574 = arith.maximumf %572, %573 : vector<2x128xf32>
    %c80_546 = arith.constant 80 : index
    %c0_547 = arith.constant 0 : index
    %575 = vector.load %arg12[%c80_546, %c0_547] : memref<184x128xf32, #tpu.memory_space<vmem>>, vector<2x128xf32>
    %c82 = arith.constant 82 : index
    %c0_548 = arith.constant 0 : index
    %576 = vector.load %arg12[%c82, %c0_548] : memref<184x128xf32, #tpu.memory_space<vmem>>, vector<2x128xf32>
    %577 = arith.maximumf %575, %576 : vector<2x128xf32>
    %578 = arith.maximumf %574, %577 : vector<2x128xf32>
    %c0_549 = arith.constant 0 : index
    %c0_550 = arith.constant 0 : index
    %579 = vector.load %arg5[%c0_549, %c0_550] : memref<1x128xf32, #tpu.memory_space<vmem>>, vector<1x128xf32>
    %580 = vector.broadcast %579 : vector<1x128xf32> to vector<2x128xf32>
    %581 = arith.addf %578, %580 : vector<2x128xf32>
    %cst_551 = arith.constant 0.000000e+00 : f32
    %582 = vector.broadcast %cst_551 : f32 to vector<2x128xf32>
    %583 = arith.maximumf %581, %582 : vector<2x128xf32>
    %584 = arith.truncf %583 : vector<2x128xf32> to vector<2x128xbf16>
    %c6_552 = arith.constant 6 : index
    %c0_553 = arith.constant 0 : index
    %c0_554 = arith.constant 0 : index
    %585 = vector.load %arg6[%c6_552, %c0_553, %c0_554] : memref<16x128x512xbf16, #tpu.memory_space<vmem>>, vector<1x128x512xbf16>
    %586 = vector.shape_cast %585 : vector<1x128x512xbf16> to vector<128x512xbf16>
    %cst_555 = arith.constant dense<0.000000e+00> : vector<2x512xf32>
    %587 = tpu.matmul %584, %586, %cst_555 {dimension_numbers = #tpu.dot_dimension_numbers<[1], [0], [0], [1], [0, 0, 1, 1], [], []>} : vector<2x128xbf16>, vector<128x512xbf16>, vector<2x512xf32> -> vector<2x512xf32>
    %588 = arith.addf %571, %587 : vector<2x512xf32>
    %c60 = arith.constant 60 : index
    %c0_556 = arith.constant 0 : index
    %589 = vector.load %arg12[%c60, %c0_556] : memref<184x128xf32, #tpu.memory_space<vmem>>, vector<2x128xf32>
    %c62 = arith.constant 62 : index
    %c0_557 = arith.constant 0 : index
    %590 = vector.load %arg12[%c62, %c0_557] : memref<184x128xf32, #tpu.memory_space<vmem>>, vector<2x128xf32>
    %591 = arith.maximumf %589, %590 : vector<2x128xf32>
    %c84 = arith.constant 84 : index
    %c0_558 = arith.constant 0 : index
    %592 = vector.load %arg12[%c84, %c0_558] : memref<184x128xf32, #tpu.memory_space<vmem>>, vector<2x128xf32>
    %c86 = arith.constant 86 : index
    %c0_559 = arith.constant 0 : index
    %593 = vector.load %arg12[%c86, %c0_559] : memref<184x128xf32, #tpu.memory_space<vmem>>, vector<2x128xf32>
    %594 = arith.maximumf %592, %593 : vector<2x128xf32>
    %595 = arith.maximumf %591, %594 : vector<2x128xf32>
    %c0_560 = arith.constant 0 : index
    %c0_561 = arith.constant 0 : index
    %596 = vector.load %arg5[%c0_560, %c0_561] : memref<1x128xf32, #tpu.memory_space<vmem>>, vector<1x128xf32>
    %597 = vector.broadcast %596 : vector<1x128xf32> to vector<2x128xf32>
    %598 = arith.addf %595, %597 : vector<2x128xf32>
    %cst_562 = arith.constant 0.000000e+00 : f32
    %599 = vector.broadcast %cst_562 : f32 to vector<2x128xf32>
    %600 = arith.maximumf %598, %599 : vector<2x128xf32>
    %601 = arith.truncf %600 : vector<2x128xf32> to vector<2x128xbf16>
    %c7_563 = arith.constant 7 : index
    %c0_564 = arith.constant 0 : index
    %c0_565 = arith.constant 0 : index
    %602 = vector.load %arg6[%c7_563, %c0_564, %c0_565] : memref<16x128x512xbf16, #tpu.memory_space<vmem>>, vector<1x128x512xbf16>
    %603 = vector.shape_cast %602 : vector<1x128x512xbf16> to vector<128x512xbf16>
    %cst_566 = arith.constant dense<0.000000e+00> : vector<2x512xf32>
    %604 = tpu.matmul %601, %603, %cst_566 {dimension_numbers = #tpu.dot_dimension_numbers<[1], [0], [0], [1], [0, 0, 1, 1], [], []>} : vector<2x128xbf16>, vector<128x512xbf16>, vector<2x512xf32> -> vector<2x512xf32>
    %605 = arith.addf %588, %604 : vector<2x512xf32>
    %c96_567 = arith.constant 96 : index
    %c0_568 = arith.constant 0 : index
    %606 = vector.load %arg12[%c96_567, %c0_568] : memref<184x128xf32, #tpu.memory_space<vmem>>, vector<2x128xf32>
    %c98_569 = arith.constant 98 : index
    %c0_570 = arith.constant 0 : index
    %607 = vector.load %arg12[%c98_569, %c0_570] : memref<184x128xf32, #tpu.memory_space<vmem>>, vector<2x128xf32>
    %608 = arith.maximumf %606, %607 : vector<2x128xf32>
    %c120_571 = arith.constant 120 : index
    %c0_572 = arith.constant 0 : index
    %609 = vector.load %arg12[%c120_571, %c0_572] : memref<184x128xf32, #tpu.memory_space<vmem>>, vector<2x128xf32>
    %c122 = arith.constant 122 : index
    %c0_573 = arith.constant 0 : index
    %610 = vector.load %arg12[%c122, %c0_573] : memref<184x128xf32, #tpu.memory_space<vmem>>, vector<2x128xf32>
    %611 = arith.maximumf %609, %610 : vector<2x128xf32>
    %612 = arith.maximumf %608, %611 : vector<2x128xf32>
    %c0_574 = arith.constant 0 : index
    %c0_575 = arith.constant 0 : index
    %613 = vector.load %arg5[%c0_574, %c0_575] : memref<1x128xf32, #tpu.memory_space<vmem>>, vector<1x128xf32>
    %614 = vector.broadcast %613 : vector<1x128xf32> to vector<2x128xf32>
    %615 = arith.addf %612, %614 : vector<2x128xf32>
    %cst_576 = arith.constant 0.000000e+00 : f32
    %616 = vector.broadcast %cst_576 : f32 to vector<2x128xf32>
    %617 = arith.maximumf %615, %616 : vector<2x128xf32>
    %618 = arith.truncf %617 : vector<2x128xf32> to vector<2x128xbf16>
    %c8_577 = arith.constant 8 : index
    %c0_578 = arith.constant 0 : index
    %c0_579 = arith.constant 0 : index
    %619 = vector.load %arg6[%c8_577, %c0_578, %c0_579] : memref<16x128x512xbf16, #tpu.memory_space<vmem>>, vector<1x128x512xbf16>
    %620 = vector.shape_cast %619 : vector<1x128x512xbf16> to vector<128x512xbf16>
    %cst_580 = arith.constant dense<0.000000e+00> : vector<2x512xf32>
    %621 = tpu.matmul %618, %620, %cst_580 {dimension_numbers = #tpu.dot_dimension_numbers<[1], [0], [0], [1], [0, 0, 1, 1], [], []>} : vector<2x128xbf16>, vector<128x512xbf16>, vector<2x512xf32> -> vector<2x512xf32>
    %622 = arith.addf %605, %621 : vector<2x512xf32>
    %c100_581 = arith.constant 100 : index
    %c0_582 = arith.constant 0 : index
    %623 = vector.load %arg12[%c100_581, %c0_582] : memref<184x128xf32, #tpu.memory_space<vmem>>, vector<2x128xf32>
    %c102_583 = arith.constant 102 : index
    %c0_584 = arith.constant 0 : index
    %624 = vector.load %arg12[%c102_583, %c0_584] : memref<184x128xf32, #tpu.memory_space<vmem>>, vector<2x128xf32>
    %625 = arith.maximumf %623, %624 : vector<2x128xf32>
    %c124 = arith.constant 124 : index
    %c0_585 = arith.constant 0 : index
    %626 = vector.load %arg12[%c124, %c0_585] : memref<184x128xf32, #tpu.memory_space<vmem>>, vector<2x128xf32>
    %c126 = arith.constant 126 : index
    %c0_586 = arith.constant 0 : index
    %627 = vector.load %arg12[%c126, %c0_586] : memref<184x128xf32, #tpu.memory_space<vmem>>, vector<2x128xf32>
    %628 = arith.maximumf %626, %627 : vector<2x128xf32>
    %629 = arith.maximumf %625, %628 : vector<2x128xf32>
    %c0_587 = arith.constant 0 : index
    %c0_588 = arith.constant 0 : index
    %630 = vector.load %arg5[%c0_587, %c0_588] : memref<1x128xf32, #tpu.memory_space<vmem>>, vector<1x128xf32>
    %631 = vector.broadcast %630 : vector<1x128xf32> to vector<2x128xf32>
    %632 = arith.addf %629, %631 : vector<2x128xf32>
    %cst_589 = arith.constant 0.000000e+00 : f32
    %633 = vector.broadcast %cst_589 : f32 to vector<2x128xf32>
    %634 = arith.maximumf %632, %633 : vector<2x128xf32>
    %635 = arith.truncf %634 : vector<2x128xf32> to vector<2x128xbf16>
    %c9_590 = arith.constant 9 : index
    %c0_591 = arith.constant 0 : index
    %c0_592 = arith.constant 0 : index
    %636 = vector.load %arg6[%c9_590, %c0_591, %c0_592] : memref<16x128x512xbf16, #tpu.memory_space<vmem>>, vector<1x128x512xbf16>
    %637 = vector.shape_cast %636 : vector<1x128x512xbf16> to vector<128x512xbf16>
    %cst_593 = arith.constant dense<0.000000e+00> : vector<2x512xf32>
    %638 = tpu.matmul %635, %637, %cst_593 {dimension_numbers = #tpu.dot_dimension_numbers<[1], [0], [0], [1], [0, 0, 1, 1], [], []>} : vector<2x128xbf16>, vector<128x512xbf16>, vector<2x512xf32> -> vector<2x512xf32>
    %639 = arith.addf %622, %638 : vector<2x512xf32>
    %c104_594 = arith.constant 104 : index
    %c0_595 = arith.constant 0 : index
    %640 = vector.load %arg12[%c104_594, %c0_595] : memref<184x128xf32, #tpu.memory_space<vmem>>, vector<2x128xf32>
    %c106 = arith.constant 106 : index
    %c0_596 = arith.constant 0 : index
    %641 = vector.load %arg12[%c106, %c0_596] : memref<184x128xf32, #tpu.memory_space<vmem>>, vector<2x128xf32>
    %642 = arith.maximumf %640, %641 : vector<2x128xf32>
    %c128_597 = arith.constant 128 : index
    %c0_598 = arith.constant 0 : index
    %643 = vector.load %arg12[%c128_597, %c0_598] : memref<184x128xf32, #tpu.memory_space<vmem>>, vector<2x128xf32>
    %c130_599 = arith.constant 130 : index
    %c0_600 = arith.constant 0 : index
    %644 = vector.load %arg12[%c130_599, %c0_600] : memref<184x128xf32, #tpu.memory_space<vmem>>, vector<2x128xf32>
    %645 = arith.maximumf %643, %644 : vector<2x128xf32>
    %646 = arith.maximumf %642, %645 : vector<2x128xf32>
    %c0_601 = arith.constant 0 : index
    %c0_602 = arith.constant 0 : index
    %647 = vector.load %arg5[%c0_601, %c0_602] : memref<1x128xf32, #tpu.memory_space<vmem>>, vector<1x128xf32>
    %648 = vector.broadcast %647 : vector<1x128xf32> to vector<2x128xf32>
    %649 = arith.addf %646, %648 : vector<2x128xf32>
    %cst_603 = arith.constant 0.000000e+00 : f32
    %650 = vector.broadcast %cst_603 : f32 to vector<2x128xf32>
    %651 = arith.maximumf %649, %650 : vector<2x128xf32>
    %652 = arith.truncf %651 : vector<2x128xf32> to vector<2x128xbf16>
    %c10_604 = arith.constant 10 : index
    %c0_605 = arith.constant 0 : index
    %c0_606 = arith.constant 0 : index
    %653 = vector.load %arg6[%c10_604, %c0_605, %c0_606] : memref<16x128x512xbf16, #tpu.memory_space<vmem>>, vector<1x128x512xbf16>
    %654 = vector.shape_cast %653 : vector<1x128x512xbf16> to vector<128x512xbf16>
    %cst_607 = arith.constant dense<0.000000e+00> : vector<2x512xf32>
    %655 = tpu.matmul %652, %654, %cst_607 {dimension_numbers = #tpu.dot_dimension_numbers<[1], [0], [0], [1], [0, 0, 1, 1], [], []>} : vector<2x128xbf16>, vector<128x512xbf16>, vector<2x512xf32> -> vector<2x512xf32>
    %656 = arith.addf %639, %655 : vector<2x512xf32>
    %c108 = arith.constant 108 : index
    %c0_608 = arith.constant 0 : index
    %657 = vector.load %arg12[%c108, %c0_608] : memref<184x128xf32, #tpu.memory_space<vmem>>, vector<2x128xf32>
    %c110 = arith.constant 110 : index
    %c0_609 = arith.constant 0 : index
    %658 = vector.load %arg12[%c110, %c0_609] : memref<184x128xf32, #tpu.memory_space<vmem>>, vector<2x128xf32>
    %659 = arith.maximumf %657, %658 : vector<2x128xf32>
    %c132_610 = arith.constant 132 : index
    %c0_611 = arith.constant 0 : index
    %660 = vector.load %arg12[%c132_610, %c0_611] : memref<184x128xf32, #tpu.memory_space<vmem>>, vector<2x128xf32>
    %c134_612 = arith.constant 134 : index
    %c0_613 = arith.constant 0 : index
    %661 = vector.load %arg12[%c134_612, %c0_613] : memref<184x128xf32, #tpu.memory_space<vmem>>, vector<2x128xf32>
    %662 = arith.maximumf %660, %661 : vector<2x128xf32>
    %663 = arith.maximumf %659, %662 : vector<2x128xf32>
    %c0_614 = arith.constant 0 : index
    %c0_615 = arith.constant 0 : index
    %664 = vector.load %arg5[%c0_614, %c0_615] : memref<1x128xf32, #tpu.memory_space<vmem>>, vector<1x128xf32>
    %665 = vector.broadcast %664 : vector<1x128xf32> to vector<2x128xf32>
    %666 = arith.addf %663, %665 : vector<2x128xf32>
    %cst_616 = arith.constant 0.000000e+00 : f32
    %667 = vector.broadcast %cst_616 : f32 to vector<2x128xf32>
    %668 = arith.maximumf %666, %667 : vector<2x128xf32>
    %669 = arith.truncf %668 : vector<2x128xf32> to vector<2x128xbf16>
    %c11_617 = arith.constant 11 : index
    %c0_618 = arith.constant 0 : index
    %c0_619 = arith.constant 0 : index
    %670 = vector.load %arg6[%c11_617, %c0_618, %c0_619] : memref<16x128x512xbf16, #tpu.memory_space<vmem>>, vector<1x128x512xbf16>
    %671 = vector.shape_cast %670 : vector<1x128x512xbf16> to vector<128x512xbf16>
    %cst_620 = arith.constant dense<0.000000e+00> : vector<2x512xf32>
    %672 = tpu.matmul %669, %671, %cst_620 {dimension_numbers = #tpu.dot_dimension_numbers<[1], [0], [0], [1], [0, 0, 1, 1], [], []>} : vector<2x128xbf16>, vector<128x512xbf16>, vector<2x512xf32> -> vector<2x512xf32>
    %673 = arith.addf %656, %672 : vector<2x512xf32>
    %c144_621 = arith.constant 144 : index
    %c0_622 = arith.constant 0 : index
    %674 = vector.load %arg12[%c144_621, %c0_622] : memref<184x128xf32, #tpu.memory_space<vmem>>, vector<2x128xf32>
    %c146 = arith.constant 146 : index
    %c0_623 = arith.constant 0 : index
    %675 = vector.load %arg12[%c146, %c0_623] : memref<184x128xf32, #tpu.memory_space<vmem>>, vector<2x128xf32>
    %676 = arith.maximumf %674, %675 : vector<2x128xf32>
    %c168_624 = arith.constant 168 : index
    %c0_625 = arith.constant 0 : index
    %677 = vector.load %arg12[%c168_624, %c0_625] : memref<184x128xf32, #tpu.memory_space<vmem>>, vector<2x128xf32>
    %c170 = arith.constant 170 : index
    %c0_626 = arith.constant 0 : index
    %678 = vector.load %arg12[%c170, %c0_626] : memref<184x128xf32, #tpu.memory_space<vmem>>, vector<2x128xf32>
    %679 = arith.maximumf %677, %678 : vector<2x128xf32>
    %680 = arith.maximumf %676, %679 : vector<2x128xf32>
    %c0_627 = arith.constant 0 : index
    %c0_628 = arith.constant 0 : index
    %681 = vector.load %arg5[%c0_627, %c0_628] : memref<1x128xf32, #tpu.memory_space<vmem>>, vector<1x128xf32>
    %682 = vector.broadcast %681 : vector<1x128xf32> to vector<2x128xf32>
    %683 = arith.addf %680, %682 : vector<2x128xf32>
    %cst_629 = arith.constant 0.000000e+00 : f32
    %684 = vector.broadcast %cst_629 : f32 to vector<2x128xf32>
    %685 = arith.maximumf %683, %684 : vector<2x128xf32>
    %686 = arith.truncf %685 : vector<2x128xf32> to vector<2x128xbf16>
    %c12_630 = arith.constant 12 : index
    %c0_631 = arith.constant 0 : index
    %c0_632 = arith.constant 0 : index
    %687 = vector.load %arg6[%c12_630, %c0_631, %c0_632] : memref<16x128x512xbf16, #tpu.memory_space<vmem>>, vector<1x128x512xbf16>
    %688 = vector.shape_cast %687 : vector<1x128x512xbf16> to vector<128x512xbf16>
    %cst_633 = arith.constant dense<0.000000e+00> : vector<2x512xf32>
    %689 = tpu.matmul %686, %688, %cst_633 {dimension_numbers = #tpu.dot_dimension_numbers<[1], [0], [0], [1], [0, 0, 1, 1], [], []>} : vector<2x128xbf16>, vector<128x512xbf16>, vector<2x512xf32> -> vector<2x512xf32>
    %690 = arith.addf %673, %689 : vector<2x512xf32>
    %c148 = arith.constant 148 : index
    %c0_634 = arith.constant 0 : index
    %691 = vector.load %arg12[%c148, %c0_634] : memref<184x128xf32, #tpu.memory_space<vmem>>, vector<2x128xf32>
    %c150 = arith.constant 150 : index
    %c0_635 = arith.constant 0 : index
    %692 = vector.load %arg12[%c150, %c0_635] : memref<184x128xf32, #tpu.memory_space<vmem>>, vector<2x128xf32>
    %693 = arith.maximumf %691, %692 : vector<2x128xf32>
    %c172 = arith.constant 172 : index
    %c0_636 = arith.constant 0 : index
    %694 = vector.load %arg12[%c172, %c0_636] : memref<184x128xf32, #tpu.memory_space<vmem>>, vector<2x128xf32>
    %c174 = arith.constant 174 : index
    %c0_637 = arith.constant 0 : index
    %695 = vector.load %arg12[%c174, %c0_637] : memref<184x128xf32, #tpu.memory_space<vmem>>, vector<2x128xf32>
    %696 = arith.maximumf %694, %695 : vector<2x128xf32>
    %697 = arith.maximumf %693, %696 : vector<2x128xf32>
    %c0_638 = arith.constant 0 : index
    %c0_639 = arith.constant 0 : index
    %698 = vector.load %arg5[%c0_638, %c0_639] : memref<1x128xf32, #tpu.memory_space<vmem>>, vector<1x128xf32>
    %699 = vector.broadcast %698 : vector<1x128xf32> to vector<2x128xf32>
    %700 = arith.addf %697, %699 : vector<2x128xf32>
    %cst_640 = arith.constant 0.000000e+00 : f32
    %701 = vector.broadcast %cst_640 : f32 to vector<2x128xf32>
    %702 = arith.maximumf %700, %701 : vector<2x128xf32>
    %703 = arith.truncf %702 : vector<2x128xf32> to vector<2x128xbf16>
    %c13_641 = arith.constant 13 : index
    %c0_642 = arith.constant 0 : index
    %c0_643 = arith.constant 0 : index
    %704 = vector.load %arg6[%c13_641, %c0_642, %c0_643] : memref<16x128x512xbf16, #tpu.memory_space<vmem>>, vector<1x128x512xbf16>
    %705 = vector.shape_cast %704 : vector<1x128x512xbf16> to vector<128x512xbf16>
    %cst_644 = arith.constant dense<0.000000e+00> : vector<2x512xf32>
    %706 = tpu.matmul %703, %705, %cst_644 {dimension_numbers = #tpu.dot_dimension_numbers<[1], [0], [0], [1], [0, 0, 1, 1], [], []>} : vector<2x128xbf16>, vector<128x512xbf16>, vector<2x512xf32> -> vector<2x512xf32>
    %707 = arith.addf %690, %706 : vector<2x512xf32>
    %c152_645 = arith.constant 152 : index
    %c0_646 = arith.constant 0 : index
    %708 = vector.load %arg12[%c152_645, %c0_646] : memref<184x128xf32, #tpu.memory_space<vmem>>, vector<2x128xf32>
    %c154_647 = arith.constant 154 : index
    %c0_648 = arith.constant 0 : index
    %709 = vector.load %arg12[%c154_647, %c0_648] : memref<184x128xf32, #tpu.memory_space<vmem>>, vector<2x128xf32>
    %710 = arith.maximumf %708, %709 : vector<2x128xf32>
    %c176_649 = arith.constant 176 : index
    %c0_650 = arith.constant 0 : index
    %711 = vector.load %arg12[%c176_649, %c0_650] : memref<184x128xf32, #tpu.memory_space<vmem>>, vector<2x128xf32>
    %c178_651 = arith.constant 178 : index
    %c0_652 = arith.constant 0 : index
    %712 = vector.load %arg12[%c178_651, %c0_652] : memref<184x128xf32, #tpu.memory_space<vmem>>, vector<2x128xf32>
    %713 = arith.maximumf %711, %712 : vector<2x128xf32>
    %714 = arith.maximumf %710, %713 : vector<2x128xf32>
    %c0_653 = arith.constant 0 : index
    %c0_654 = arith.constant 0 : index
    %715 = vector.load %arg5[%c0_653, %c0_654] : memref<1x128xf32, #tpu.memory_space<vmem>>, vector<1x128xf32>
    %716 = vector.broadcast %715 : vector<1x128xf32> to vector<2x128xf32>
    %717 = arith.addf %714, %716 : vector<2x128xf32>
    %cst_655 = arith.constant 0.000000e+00 : f32
    %718 = vector.broadcast %cst_655 : f32 to vector<2x128xf32>
    %719 = arith.maximumf %717, %718 : vector<2x128xf32>
    %720 = arith.truncf %719 : vector<2x128xf32> to vector<2x128xbf16>
    %c14_656 = arith.constant 14 : index
    %c0_657 = arith.constant 0 : index
    %c0_658 = arith.constant 0 : index
    %721 = vector.load %arg6[%c14_656, %c0_657, %c0_658] : memref<16x128x512xbf16, #tpu.memory_space<vmem>>, vector<1x128x512xbf16>
    %722 = vector.shape_cast %721 : vector<1x128x512xbf16> to vector<128x512xbf16>
    %cst_659 = arith.constant dense<0.000000e+00> : vector<2x512xf32>
    %723 = tpu.matmul %720, %722, %cst_659 {dimension_numbers = #tpu.dot_dimension_numbers<[1], [0], [0], [1], [0, 0, 1, 1], [], []>} : vector<2x128xbf16>, vector<128x512xbf16>, vector<2x512xf32> -> vector<2x512xf32>
    %724 = arith.addf %707, %723 : vector<2x512xf32>
    %c156_660 = arith.constant 156 : index
    %c0_661 = arith.constant 0 : index
    %725 = vector.load %arg12[%c156_660, %c0_661] : memref<184x128xf32, #tpu.memory_space<vmem>>, vector<2x128xf32>
    %c158_662 = arith.constant 158 : index
    %c0_663 = arith.constant 0 : index
    %726 = vector.load %arg12[%c158_662, %c0_663] : memref<184x128xf32, #tpu.memory_space<vmem>>, vector<2x128xf32>
    %727 = arith.maximumf %725, %726 : vector<2x128xf32>
    %c180_664 = arith.constant 180 : index
    %c0_665 = arith.constant 0 : index
    %728 = vector.load %arg12[%c180_664, %c0_665] : memref<184x128xf32, #tpu.memory_space<vmem>>, vector<2x128xf32>
    %c182_666 = arith.constant 182 : index
    %c0_667 = arith.constant 0 : index
    %729 = vector.load %arg12[%c182_666, %c0_667] : memref<184x128xf32, #tpu.memory_space<vmem>>, vector<2x128xf32>
    %730 = arith.maximumf %728, %729 : vector<2x128xf32>
    %731 = arith.maximumf %727, %730 : vector<2x128xf32>
    %c0_668 = arith.constant 0 : index
    %c0_669 = arith.constant 0 : index
    %732 = vector.load %arg5[%c0_668, %c0_669] : memref<1x128xf32, #tpu.memory_space<vmem>>, vector<1x128xf32>
    %733 = vector.broadcast %732 : vector<1x128xf32> to vector<2x128xf32>
    %734 = arith.addf %731, %733 : vector<2x128xf32>
    %cst_670 = arith.constant 0.000000e+00 : f32
    %735 = vector.broadcast %cst_670 : f32 to vector<2x128xf32>
    %736 = arith.maximumf %734, %735 : vector<2x128xf32>
    %737 = arith.truncf %736 : vector<2x128xf32> to vector<2x128xbf16>
    %c15_671 = arith.constant 15 : index
    %c0_672 = arith.constant 0 : index
    %c0_673 = arith.constant 0 : index
    %738 = vector.load %arg6[%c15_671, %c0_672, %c0_673] : memref<16x128x512xbf16, #tpu.memory_space<vmem>>, vector<1x128x512xbf16>
    %739 = vector.shape_cast %738 : vector<1x128x512xbf16> to vector<128x512xbf16>
    %cst_674 = arith.constant dense<0.000000e+00> : vector<2x512xf32>
    %740 = tpu.matmul %737, %739, %cst_674 {dimension_numbers = #tpu.dot_dimension_numbers<[1], [0], [0], [1], [0, 0, 1, 1], [], []>} : vector<2x128xbf16>, vector<128x512xbf16>, vector<2x512xf32> -> vector<2x512xf32>
    %741 = arith.addf %724, %740 : vector<2x512xf32>
    %c0_675 = arith.constant 0 : index
    %c0_676 = arith.constant 0 : index
    %742 = vector.load %arg7[%c0_675, %c0_676] : memref<1x512xf32, #tpu.memory_space<vmem>>, vector<1x512xf32>
    %743 = vector.broadcast %742 : vector<1x512xf32> to vector<2x512xf32>
    %744 = arith.addf %741, %743 : vector<2x512xf32>
    %cst_677 = arith.constant 0.000000e+00 : f32
    %745 = vector.broadcast %cst_677 : f32 to vector<2x512xf32>
    %746 = arith.maximumf %744, %745 : vector<2x512xf32>
    %747 = arith.truncf %746 : vector<2x512xf32> to vector<2x512xbf16>
    %c0_678 = arith.constant 0 : index
    %c0_679 = arith.constant 0 : index
    %748 = vector.load %arg8[%c0_678, %c0_679] : memref<512x128xbf16, #tpu.memory_space<vmem>>, vector<512x128xbf16>
    %cst_680 = arith.constant dense<0.000000e+00> : vector<2x128xf32>
    %749 = tpu.matmul %747, %748, %cst_680 {dimension_numbers = #tpu.dot_dimension_numbers<[1], [0], [0], [1], [0, 0, 1, 1], [], []>} : vector<2x512xbf16>, vector<512x128xbf16>, vector<2x128xf32> -> vector<2x128xf32>
    %c0_681 = arith.constant 0 : index
    %c0_682 = arith.constant 0 : index
    %750 = vector.load %arg9[%c0_681, %c0_682] : memref<1x128xf32, #tpu.memory_space<vmem>>, vector<1x128xf32>
    %751 = vector.broadcast %750 : vector<1x128xf32> to vector<2x128xf32>
    %752 = arith.addf %749, %751 : vector<2x128xf32>
    %c0_683 = arith.constant 0 : index
    %c0_684 = arith.constant 0 : index
    %753 = vector.load %arg10[%c0_683, %c0_684] : memref<2x128xf32, #tpu.memory_space<vmem>>, vector<2x128xf32>
    tpu.vector_store %arg10[%c0_683, %c0_684], %752 {strides = array<i32>} : memref<2x128xf32, #tpu.memory_space<vmem>>, vector<2x128xf32>,
    return
  }
  func.func @transform_0(%arg0: i32) -> (i32, i32) {
    %c0_i32 = arith.constant 0 : i32
    %c0_i32_0 = arith.constant 0 : i32
    return %arg0, %c0_i32 : i32, i32
  }
  func.func @transform_1(%arg0: i32) -> (i32, i32) {
    %c0_i32 = arith.constant 0 : i32
    %c0_i32_0 = arith.constant 0 : i32
    %c0_i32_1 = arith.constant 0 : i32
    return %c0_i32, %c0_i32_0 : i32, i32
  }
  func.func @transform_2(%arg0: i32) -> (i32, i32) {
    %c0_i32 = arith.constant 0 : i32
    %c0_i32_0 = arith.constant 0 : i32
    %c0_i32_1 = arith.constant 0 : i32
    return %c0_i32, %c0_i32_0 : i32, i32
  }
  func.func @transform_3(%arg0: i32) -> (i32, i32, i32) {
    %c0_i32 = arith.constant 0 : i32
    %c0_i32_0 = arith.constant 0 : i32
    %c0_i32_1 = arith.constant 0 : i32
    %c0_i32_2 = arith.constant 0 : i32
    return %c0_i32, %c0_i32_0, %c0_i32_1 : i32, i32, i32
  }
  func.func @transform_4(%arg0: i32) -> (i32, i32) {
    %c0_i32 = arith.constant 0 : i32
    %c0_i32_0 = arith.constant 0 : i32
    %c0_i32_1 = arith.constant 0 : i32
    return %c0_i32, %c0_i32_0 : i32, i32
  }
  func.func @transform_5(%arg0: i32) -> (i32, i32, i32) {
    %c0_i32 = arith.constant 0 : i32
    %c0_i32_0 = arith.constant 0 : i32
    %c0_i32_1 = arith.constant 0 : i32
    %c0_i32_2 = arith.constant 0 : i32
    return %c0_i32, %c0_i32_0, %c0_i32_1 : i32, i32, i32
  }
  func.func @transform_6(%arg0: i32) -> (i32, i32) {
    %c0_i32 = arith.constant 0 : i32
    %c0_i32_0 = arith.constant 0 : i32
    %c0_i32_1 = arith.constant 0 : i32
    return %c0_i32, %c0_i32_0 : i32, i32
  }
  func.func @transform_7(%arg0: i32) -> (i32, i32) {
    %c0_i32 = arith.constant 0 : i32
    %c0_i32_0 = arith.constant 0 : i32
    %c0_i32_1 = arith.constant 0 : i32
    return %c0_i32, %c0_i32_0 : i32, i32
  }
  func.func @transform_8(%arg0: i32) -> (i32, i32) {
    %c0_i32 = arith.constant 0 : i32
    %c0_i32_0 = arith.constant 0 : i32
    %c0_i32_1 = arith.constant 0 : i32
    return %c0_i32, %c0_i32_0 : i32, i32
  }
  func.func @transform_9(%arg0: i32) -> (i32, i32) {
    %c0_i32 = arith.constant 0 : i32
    %c0_i32_0 = arith.constant 0 : i32
    return %arg0, %c0_i32 : i32, i32
  }
}

</mosaic_0001>

<bundles_post_ra>
// kernel: lenet5_quantized_forward.1
= control target key start
LH: loop header
LB: loop body
LE: loop exit
PB: predicated region body
PF: predicated region fallthrough
CT: control target
= control target key end

     0   :  { %v21136_v1 = vmov 0.0   ;;  %vm97_vm0 = vcmask 1043456   ;;  %vm98_vm1 = vcmask 1044480   ;;  %v21137_v3 = vmov 65535   ;;  %s25691_s0 = inlined_call_operand.vmem [shape: bf16[1152,25], index: 0, kind: input, shape index: {}]   ;;  %s25692_s1 = inlined_call_operand.vmem [shape: bf16[25,20], index: 1, kind: input, shape index: {}]   ;;  %s25693_s2 = inlined_call_operand.vmem [shape: f32[1,20], index: 2, kind: input, shape index: {}]   ;;  %s25694_s3 = inlined_call_operand.vmem [shape: bf16[25,20,128], index: 3, kind: input, shape index: {}]   ;;  %s25695_s4 = inlined_call_operand.vmem [shape: f32[1,128], index: 4, kind: input, shape index: {}]   ;;  %s25696_s5 = inlined_call_operand.vmem [shape: bf16[16,128,512], index: 5, kind: input, shape index: {}]   ;;  %s25697_s6 = inlined_call_operand.vmem [shape: f32[1,512], index: 6, kind: input, shape index: {}]   ;;  %s25698_s7 = inlined_call_operand.vmem [shape: bf16[512,128], index: 7, kind: input, shape index: {}]   ;;  %s25699_s8 = inlined_call_operand.vmem [shape: f32[1,128], index: 8, kind: input, shape index: {}]   ;;  %s25700_s9 = inlined_call_operand.hbm [shape: f32[2,128], index: 9, kind: output, shape index: {}]  }
   0x1   :  { %v20065_v0 = vld [vmem:[%s25692_s1] sm:$0xff]   ;;  %18121 = vmatprep.subr.bf16.mxu0 %v21136_v1  ;;  %19405 = vmatprep.subr.bf16.mxu1 %v21136_v1  ;;  %v20066_v2 = vld [vmem:[%s25692_s1 + $0x8] sm:$0x1f]   ;;  %v99_v4 = vsel %vm97_vm0, 4294967295, %v21137_v3  ;;  %vm21138_vm2 = vmmov 0   ;;  %vm81_vm3 = vcmask 203776  }
   0x2   :  { %18122 = vmatpush3.bf16.msra.mxu0 %v20065_v0  ;;  %19407 = vmatpush3.bf16.msra.mxu1 %v20065_v0  ;;  %v21203_v5 = vsel %vm98_vm1, %v99_v4, 0  ;;  %v20067_v6 = vld [vmem:[%s25691_s0] sm:$0xff]   ;;  %v20069_v9 = vld [vmem:[%s25691_s0 + $0x8] sm:$0xff]   ;;  %v20070_v10 = vld [vmem:[%s25691_s0 + $0x90] sm:$0xff]   ;;  %vm590_vm4 = vcmask 162816   ;;  %vm2354_vm5 = vcmask 1041408  }
   0x3   :  { %18123 = vmatprep.subr.bf16.mxu0 %v21136_v1  ;;  %19406 = vmatprep.subr.bf16.mxu1 %v21136_v1  ;;  %v20068_v7 = vld [vmem:[%s25691_s0 + $0x20] ss:$0 sps:$4 sm:$0xff]   ;;  %v102_v8 = vand.u32 %v20066_v2, %v21203_v5  ;;  %v20071_v11 = vld [vmem:[%s25691_s0 + $0x10] sm:$0xff]   ;;  %v20072_v12 = vld [vmem:[%s25691_s0 + $0x98] sm:$0xff]   ;;  %vm595_vm6 = vcmask 158720   ;;  %vm2323_vm7 = vcmask 1046528  }
   0x4   :  { %18125 = vmatprep.mubr.msk.bf16.mxu0 %vm21138_vm2, %v21136_v1  ;;  %18141 = vmatprep.mubr.msk.bf16.mxu1 %vm21138_vm2, %v21136_v1  ;;  %v20073_v13 = vld [vmem:[%s25691_s0 + $0x18] sm:$0xff]   ;;  %v20074_v14 = vld [vmem:[%s25691_s0 + $0xa0] sm:$0xff]   ;;  %v20075_v15 = vld [vmem:[%s25691_s0 + $0xa8] sm:$0xff]   ;;  %vm2520_vm8 = vcmask 1045504   ;;  %vm1168_vm9 = vcmask 162820   ;;  %vm2984_vm10 = vcmask 1042432  }
   0x5   :  { %v20076_v16 = vld [vmem:[%s25691_s0 + $0x120] sm:$0xff]   ;;  %v20082_v18 = vld [vmem:[%s25692_s1 + $0x8] sm:$0x1f]   ;;  %v20078_v20 = vld [vmem:[%s25691_s0 + $0xb0] ss:$0 sps:$4 sm:$0xff]   ;;  %vm3214_vm11 = vcmask 1040384  }
   0x6   :  { %18124 = vmatpush3.bf16.msra.mxu0 %v102_v8  ;;  %19408 = vmatpush3.bf16.msra.mxu1 %v102_v8  ;;  %v20077_v17 = vld [vmem:[%s25692_s1] sm:$0xff]   ;;  %v660_v19 = vand.u32 %v20082_v18, %v21203_v5  ;;  %v20079_v21 = vld [vmem:[%s25691_s0 + $0x128] sm:$0xff]   ;;  %v20080_v22 = vld [vmem:[%s25691_s0 + $0x130] sm:$0xff]  }
   0x7   :  { %18145 = vmatprep.subr.bf16.mxu1 %v21136_v1  ;;  %18169 = vmatprep.subr.bf16.mxu0 %v21136_v1  ;;  %v20081_v23 = vld [vmem:[%s25691_s0 + $0x1b0] sm:$0xff]   ;;  %v20083_v24 = vld [vmem:[%s25691_s0 + $0x138] sm:$0xff]   ;;  %v20085_v26 = vld [vmem:[%s25691_s0 + $0x140] ss:$0 sps:$4 sm:$0xff]  }
   0x8   :  { %v20084_v25 = vld [vmem:[%s25691_s0 + $0x1b8] sm:$0xff]   ;;  %v20086_v27 = vld [vmem:[%s25691_s0 + $0x1c0] sm:$0xff]   ;;  %v20087_v28 = vld [vmem:[%s25691_s0 + $0x1c8] sm:$0xff]  }
   0x9   :  { %18126 = vmatmul.mubr.msk.bf16.vlgmr.msra.gmra.mrb[0].mxu0 %vm81_vm3, %v20067_v6  ;;  %18142 = vmatmul.mubr.msk.bf16.vlgmr.msra.gmra.mrb[0].mxu1 %vm81_vm3, %v20068_v7  ;;  %v20088_v29 = vld [vmem:[%s25691_s0 + $0x24] sm:$0xff]   ;;  %v20089_v30 = vld [vmem:[%s25691_s0 + $0x1d0] ss:$0 sps:$4 sm:$0xff]   ;;  %v20091_v32 = vld [vmem:[%s25691_s0 + $0x34] sm:$0xff]  }
   0xa   :  { %18146 = vmatpush3.bf16.msra.mxu1 %v20065_v0  ;;  %18170 = vmatpush3.bf16.msra.mxu0 %v20065_v0  ;;  %v20090_v31 = vld [vmem:[%s25691_s0 + $0x2c] sm:$0xff]   ;;  %v20092_v33 = vld [vmem:[%s25691_s0 + $0xb4] sm:$0xff]   ;;  %v20093_v34 = vld [vmem:[%s25691_s0 + $0x3c] sm:$0xff]  }
   0xb   :  { %18147 = vmatprep.subr.bf16.mxu1 %v21136_v1  ;;  %18129 = vmatprep.mubr.msk.bf16.mxu0 %vm21138_vm2, %v21136_v1  ;;  %v20094_v35 = vld [vmem:[%s25691_s0 + $0xbc] sm:$0xff]   ;;  %v20095_v36 = vld [vmem:[%s25691_s0 + $0x44] ss:$0 sps:$4 sm:$0xff]   ;;  %v20097_v38 = vld [vmem:[%s25691_s0 + $0xcc] sm:$0xff]  }
   0xc   :  { %18149 = vmatprep.mubr.msk.bf16.mxu1 %vm21138_vm2, %v21136_v1  ;;  %18171 = vmatprep.subr.bf16.mxu0 %v21136_v1  ;;  %v20096_v37 = vld [vmem:[%s25691_s0 + $0xc4] sm:$0xff]   ;;  %v20100_v43 = vld [vmem:[%s25691_s0 + $0xd4] ss:$0 sps:$4 sm:$0xff]   ;;  %v20101_v44 = vld [vmem:[%s25691_s0 + $0x14c] sm:$0xff]  }
   0xd   :  { %v20098_v39 = vld [vmem:[%s25691_s0 + $0x144] sm:$0xff]   ;;  %v20102_v45 = vld [vmem:[%s25691_s0 + $0x154] sm:$0xff]   ;;  %v20105_v47 = vld [vmem:[%s25691_s0 + $0x15c] sm:$0xff]  }
   0xe   :  { %18148 = vmatpush3.bf16.msra.mxu1 %v102_v8  ;;  %18172 = vmatpush3.bf16.msra.mxu0 %v102_v8  ;;  %v20099_v40 = vld [vmem:[%s25692_s1] sm:$0xff]   ;;  %v20104_v41 = vld [vmem:[%s25692_s1 + $0x8] sm:$0x1f]   ;;  %v20103_v46 = vld [vmem:[%s25691_s0 + $0x1d4] sm:$0xff]  }
   0xf   :  { %18193 = vmatprep.subr.bf16.mxu1 %v21136_v1  ;;  %18217 = vmatprep.subr.bf16.mxu0 %v21136_v1  ;;  %v1237_v42 = vand.u32 %v20104_v41, %v21203_v5  ;;  %v20106_v48 = vld [vmem:[%s25691_s0 + $0x1dc] sm:$0xff]   ;;  %v20107_v49 = vld [vmem:[%s25691_s0 + $0x164] ss:$0 sps:$4 sm:$0xff]   ;;  %v20109_v51 = vld [vmem:[%s25691_s0 + $0x1ec] sm:$0xff]  }
  0x10   :  { %v20108_v50 = vld [vmem:[%s25691_s0 + $0x1e4] sm:$0xff]   ;;  %v20111_v53 = vld [vmem:[%s25691_s0 + $0x1f4] ss:$0 sps:$4 sm:$0xff]   ;;  %v20113_v55 = vld [vmem:[%s25691_s0 + $0x58] sm:$0xff]  }
  0x11   :  { %18130 = vmatmul.mubr.msk.bf16.gmra.mrb[4].mxu0 %vm81_vm3, %v20069_v9  ;;  %18150 = vmatmul.mubr.msk.bf16.vlgmr.msra.gmra.mrb[4].mxu1 %vm81_vm3, %v20070_v10  ;;  %v20110_v52 = vld [vmem:[%s25691_s0 + $0x48] sm:$0xff]   ;;  %v20112_v54 = vld [vmem:[%s25691_s0 + $0x50] sm:$0xff]   ;;  %v20114_v56 = vld [vmem:[%s25691_s0 + $0xd8] sm:$0xff]  }
  0x12   :  { %18133 = vmatprep.mubr.msk.bf16.mxu0 %vm21138_vm2, %v21136_v1  ;;  %18153 = vmatprep.mubr.msk.bf16.mxu1 %vm21138_vm2, %v21136_v1  ;;  %v20115_v57 = vld [vmem:[%s25691_s0 + $0x60] sm:$0xff]   ;;  %v20117_v59 = vld [vmem:[%s25691_s0 + $0x68] ss:$0 sps:$4 sm:$0xff]   ;;  %v20119_v61 = vld [vmem:[%s25691_s0 + $0xf0] sm:$0xff]  }
  0x13   :  { %18194 = vmatpush3.bf16.msra.mxu1 %v20065_v0  ;;  %v20116_v58 = vld [vmem:[%s25691_s0 + $0xe0] sm:$0xff]   ;;  %v20118_v60 = vld [vmem:[%s25691_s0 + $0xe8] sm:$0xff]   ;;  %v20122_v3 = vld [vmem:[%s25691_s0 + $0xf8] ss:$0 sps:$4 sm:$0xff]  }
  0x14   :  { %18195 = vmatprep.subr.bf16.mxu1 %v21136_v1  ;;  %v20120_v62 = vld [vmem:[%s25691_s0 + $0x168] sm:$0xff]   ;;  %v21545_v63 = vld [vmem:[%s25692_s1] sm:$0xff]   ;;  %v20123_v4 = vld [vmem:[%s25691_s0 + $0x170] sm:$0xff]  }
  0x15   :  { %v20126_v0 = vld [vmem:[%s25692_s1 + $0x8] sm:$0x1f]   ;;  %v20125_v6 = vld [vmem:[%s25691_s0 + $0x1f8] sm:$0xff]   ;;  %v20127_v7 = vld [vmem:[%s25691_s0 + $0x180] sm:$0xff]  }
  0x16   :  { %v21556_v2 = vand.u32 %v20126_v0, %v21203_v5  ;;  %v20124_v5 = vld [vmem:[%s25691_s0 + $0x178] sm:$0xff]   ;;  %v20130_v18 = vld [vmem:[%s25691_s0 + $0x208] sm:$0xff]  }
  0x17   :  { %18196 = vmatpush3.bf16.msra.mxu1 %v102_v8  ;;  %v20128_v8 = vld [vmem:[%s25691_s0 + $0x200] sm:$0xff]   ;;  %v21647_v41 = vld [vmem:[%s25694_s3 + $0xc] sm:$0xff]  }
  0x18   :  { %18241 = vmatprep.subr.bf16.mxu1 %v21136_v1 }
  0x19   :  { %18134 = vmatmul.mubr.msk.bf16.gmra.mrb[8].mxu0 %vm81_vm3, %v20071_v11  ;;  %18154 = vmatmul.mubr.msk.bf16.gmra.mrb[8].mxu1 %vm81_vm3, %v20072_v12 }
  0x1a   :  { %18137 = vmatprep.mubr.msk.bf16.mxu0 %vm21138_vm2, %v21136_v1  ;;  %18157 = vmatprep.mubr.msk.bf16.mxu1 %vm21138_vm2, %v21136_v1 }
  0x21   :  { %18138 = vmatmul.mubr.msk.bf16.gmra.mrb[12].mxu0 %vm81_vm3, %v20073_v13  ;;  %18158 = vmatmul.mubr.msk.bf16.gmra.mrb[12].mxu1 %vm81_vm3, %v20074_v14 }
  0x22   :  { %18161 = vmatprep.mubr.msk.bf16.mxu1 %vm21138_vm2, %v21136_v1  ;;  %18173 = vmatprep.mubr.msk.bf16.mxu0 %vm21138_vm2, %v21136_v1 }
  0x29   :  { %18162 = vmatmul.mubr.msk.bf16.gmra.mrb[16].mxu1 %vm81_vm3, %v20075_v15  ;;  %18174 = vmatmul.mubr.msk.bf16.vlgmr.msra.gmra.mrb[16].mxu0 %vm81_vm3, %v20076_v16 }
  0x2a   :  { %18218 = vmatpush3.bf16.msra.mxu0 %v20077_v17  ;;  %18165 = vmatprep.mubr.msk.bf16.mxu1 %vm21138_vm2, %v21136_v1 }
  0x2b   :  { %18177 = vmatprep.mubr.msk.bf16.mxu0 %vm21138_vm2, %v21136_v1  ;;  %18219 = vmatprep.subr.bf16.mxu0 %v21136_v1 }
  0x2e   :  { %18220 = vmatpush3.bf16.msra.mxu0 %v660_v19 }
  0x2f   :  { %18265 = vmatprep.subr.bf16.mxu0 %v21136_v1 }
  0x31   :  { %18166 = vmatmul.mubr.msk.bf16.gmra.mrb[20].mxu1 %vm81_vm3, %v20078_v20  ;;  %18178 = vmatmul.mubr.msk.bf16.gmra.mrb[20].mxu0 %vm81_vm3, %v20079_v21 }
  0x32   :  { %18181 = vmatprep.mubr.msk.bf16.mxu0 %vm21138_vm2, %v21136_v1  ;;  %18197 = vmatprep.mubr.msk.bf16.mxu1 %vm21138_vm2, %v21136_v1 }
  0x39   :  { %18182 = vmatmul.mubr.msk.bf16.gmra.mrb[24].mxu0 %vm81_vm3, %v20080_v22  ;;  %18198 = vmatmul.mubr.msk.bf16.vlgmr.msra.gmra.mrb[24].mxu1 %vm81_vm3, %v20081_v23 }
  0x3a   :  { %18185 = vmatprep.mubr.msk.bf16.mxu0 %vm21138_vm2, %v21136_v1  ;;  %18201 = vmatprep.mubr.msk.bf16.mxu1 %vm21138_vm2, %v21136_v1 }
  0x3b   :  { %18242 = vmatpush3.bf16.msra.mxu1 %v20077_v17 }
  0x3c   :  { %18243 = vmatprep.subr.bf16.mxu1 %v21136_v1 }
  0x3f   :  { %18244 = vmatpush3.bf16.msra.mxu1 %v660_v19 }
  0x40   :  { %18289 = vmatprep.subr.bf16.mxu1 %v21136_v1 }
  0x41   :  { %18186 = vmatmul.mubr.msk.bf16.gmra.mrb[28].mxu0 %vm81_vm3, %v20083_v24  ;;  %18202 = vmatmul.mubr.msk.bf16.gmra.mrb[28].mxu1 %vm81_vm3, %v20084_v25 }
  0x42   :  { %18189 = vmatprep.mubr.msk.bf16.mxu0 %vm21138_vm2, %v21136_v1  ;;  %18205 = vmatprep.mubr.msk.bf16.mxu1 %vm21138_vm2, %v21136_v1 }
  0x49   :  { %18190 = vmatmul.mubr.msk.bf16.gmra.mrb[32].mxu0 %vm81_vm3, %v20085_v26  ;;  %18206 = vmatmul.mubr.msk.bf16.gmra.mrb[32].mxu1 %vm81_vm3, %v20086_v27 }
  0x4a   :  { %18209 = vmatprep.mubr.msk.bf16.mxu1 %vm21138_vm2, %v21136_v1  ;;  %18221 = vmatprep.mubr.msk.bf16.mxu0 %vm21138_vm2, %v21136_v1 }
  0x51   :  { %18210 = vmatmul.mubr.msk.bf16.gmra.mrb[36].mxu1 %vm81_vm3, %v20087_v28  ;;  %18222 = vmatmul.mubr.msk.bf16.vlgmr.msra.gmra.mrb[36].mxu0 %vm81_vm3, %v20088_v29 }
  0x52   :  { %18266 = vmatpush3.bf16.msra.mxu0 %v20077_v17  ;;  %18213 = vmatprep.mubr.msk.bf16.mxu1 %vm21138_vm2, %v21136_v1 }
  0x53   :  { %18225 = vmatprep.mubr.msk.bf16.mxu0 %vm21138_vm2, %v21136_v1  ;;  %18267 = vmatprep.subr.bf16.mxu0 %v21136_v1 }
  0x56   :  { %18268 = vmatpush3.bf16.msra.mxu0 %v660_v19 }
  0x57   :  { %18313 = vmatprep.subr.bf16.mxu0 %v21136_v1 }
  0x59   :  { %18214 = vmatmul.mubr.msk.bf16.gmra.mrb[40].mxu1 %vm81_vm3, %v20089_v30  ;;  %18226 = vmatmul.mubr.msk.bf16.gmra.mrb[40].mxu0 %vm81_vm3, %v20090_v31  ;;  %v20131_v31 = vld [vmem:[%s25691_s0 + $0x210] sm:$0xff]  }
  0x5a   :  { %18229 = vmatprep.mubr.msk.bf16.mxu0 %vm21138_vm2, %v21136_v1  ;;  %18245 = vmatprep.mubr.msk.bf16.mxu1 %vm21138_vm2, %v21136_v1 }
  0x61   :  { %18230 = vmatmul.mubr.msk.bf16.gmra.mrb[44].mxu0 %vm81_vm3, %v20091_v32  ;;  %18246 = vmatmul.mubr.msk.bf16.vlgmr.msra.gmra.mrb[44].mxu1 %vm81_vm3, %v20092_v33  ;;  %v20132_v32 = vld [vmem:[%s25691_s0 + $0x6c] sm:$0xff]  }
  0x62   :  { %18233 = vmatprep.mubr.msk.bf16.mxu0 %vm21138_vm2, %v21136_v1  ;;  %18249 = vmatprep.mubr.msk.bf16.mxu1 %vm21138_vm2, %v21136_v1 }
  0x63   :  { %18290 = vmatpush3.bf16.msra.mxu1 %v20077_v17  ;;  %v20129_v17 = vld [vmem:[%s25691_s0 + $0x188] ss:$0 sps:$4 sm:$0xff]  }
  0x64   :  { %18291 = vmatprep.subr.bf16.mxu1 %v21136_v1 }
  0x67   :  { %18292 = vmatpush3.bf16.msra.mxu1 %v660_v19 }
  0x68   :  { %18337 = vmatprep.subr.bf16.mxu1 %v21136_v1 }
  0x69   :  { %18234 = vmatmul.mubr.msk.bf16.gmra.mrb[48].mxu0 %vm81_vm3, %v20093_v34  ;;  %18250 = vmatmul.mubr.msk.bf16.gmra.mrb[48].mxu1 %vm81_vm3, %v20094_v35 }
  0x6a   :  { %18237 = vmatprep.mubr.msk.bf16.mxu0 %vm21138_vm2, %v21136_v1  ;;  %18253 = vmatprep.mubr.msk.bf16.mxu1 %vm21138_vm2, %v21136_v1 }
  0x71   :  { %18238 = vmatmul.mubr.msk.bf16.gmra.mrb[52].mxu0 %vm81_vm3, %v20095_v36  ;;  %18254 = vmatmul.mubr.msk.bf16.gmra.mrb[52].mxu1 %vm81_vm3, %v20096_v37 }
  0x72   :  { %18257 = vmatprep.mubr.msk.bf16.mxu1 %vm21138_vm2, %v21136_v1  ;;  %18269 = vmatprep.mubr.msk.bf16.mxu0 %vm21138_vm2, %v21136_v1 }
  0x79   :  { %18258 = vmatmul.mubr.msk.bf16.gmra.mrb[56].mxu1 %vm81_vm3, %v20097_v38  ;;  %18270 = vmatmul.mubr.msk.bf16.vlgmr.msra.gmra.mrb[56].mxu0 %vm81_vm3, %v20098_v39 }
  0x7a   :  { %18314 = vmatpush3.bf16.msra.mxu0 %v20099_v40  ;;  %18261 = vmatprep.mubr.msk.bf16.mxu1 %vm21138_vm2, %v21136_v1 }
  0x7b   :  { %18273 = vmatprep.mubr.msk.bf16.mxu0 %vm21138_vm2, %v21136_v1  ;;  %18315 = vmatprep.subr.bf16.mxu0 %v21136_v1 }
  0x7e   :  { %18316 = vmatpush3.bf16.msra.mxu0 %v1237_v42 }
  0x7f   :  { %18361 = vmatprep.subr.bf16.mxu0 %v21136_v1 }
  0x81   :  { %18262 = vmatmul.mubr.msk.bf16.gmra.mrb[60].mxu1 %vm81_vm3, %v20100_v43  ;;  %18274 = vmatmul.mubr.msk.bf16.gmra.mrb[60].mxu0 %vm81_vm3, %v20101_v44  ;;  %v20134_v43 = vld [vmem:[%s25691_s0 + $0x74] sm:$0xff]  }
  0x82   :  { %18277 = vmatprep.mubr.msk.bf16.mxu0 %vm21138_vm2, %v21136_v1  ;;  %18293 = vmatprep.mubr.msk.bf16.mxu1 %vm21138_vm2, %v21136_v1 }
  0x89   :  { %18278 = vmatmul.mubr.msk.bf16.gmra.mrb[64].mxu0 %vm81_vm3, %v20102_v45  ;;  %18294 = vmatmul.mubr.msk.bf16.vlgmr.msra.gmra.mrb[64].mxu1 %vm81_vm3, %v20103_v46 }
  0x8a   :  { %18281 = vmatprep.mubr.msk.bf16.mxu0 %vm21138_vm2, %v21136_v1  ;;  %18297 = vmatprep.mubr.msk.bf16.mxu1 %vm21138_vm2, %v21136_v1 }
  0x8b   :  { %18338 = vmatpush3.bf16.msra.mxu1 %v20099_v40 }
  0x8c   :  { %18339 = vmatprep.subr.bf16.mxu1 %v21136_v1 }
  0x8f   :  { %18340 = vmatpush3.bf16.msra.mxu1 %v1237_v42 }
  0x90   :  { %18385 = vmatprep.subr.bf16.mxu1 %v21136_v1 }
  0x91   :  { %18282 = vmatmul.mubr.msk.bf16.gmra.mrb[68].mxu0 %vm81_vm3, %v20105_v47  ;;  %18298 = vmatmul.mubr.msk.bf16.gmra.mrb[68].mxu1 %vm81_vm3, %v20106_v48 }
  0x92   :  { %18285 = vmatprep.mubr.msk.bf16.mxu0 %vm21138_vm2, %v21136_v1  ;;  %18301 = vmatprep.mubr.msk.bf16.mxu1 %vm21138_vm2, %v21136_v1 }
  0x99   :  { %18286 = vmatmul.mubr.msk.bf16.gmra.mrb[72].mxu0 %vm81_vm3, %v20107_v49  ;;  %18302 = vmatmul.mubr.msk.bf16.gmra.mrb[72].mxu1 %vm81_vm3, %v20108_v50 }
  0x9a   :  { %18305 = vmatprep.mubr.msk.bf16.mxu1 %vm21138_vm2, %v21136_v1  ;;  %18317 = vmatprep.mubr.msk.bf16.mxu0 %vm21138_vm2, %v21136_v1 }
  0xa1   :  { %18306 = vmatmul.mubr.msk.bf16.gmra.mrb[76].mxu1 %vm81_vm3, %v20109_v51  ;;  %18318 = vmatmul.mubr.msk.bf16.vlgmr.msra.gmra.mrb[76].mxu0 %vm81_vm3, %v20110_v52 }
  0xa2   :  { %18362 = vmatpush3.bf16.msra.mxu0 %v20099_v40  ;;  %18309 = vmatprep.mubr.msk.bf16.mxu1 %vm21138_vm2, %v21136_v1 }
  0xa3   :  { %18321 = vmatprep.mubr.msk.bf16.mxu0 %vm21138_vm2, %v21136_v1  ;;  %18363 = vmatprep.subr.bf16.mxu0 %v21136_v1 }
  0xa6   :  { %18364 = vmatpush3.bf16.msra.mxu0 %v1237_v42 }
  0xa7   :  { %18409 = vmatprep.subr.bf16.mxu0 %v21136_v1 }
  0xa9   :  { %18310 = vmatmul.mubr.msk.bf16.gmra.mrb[80].mxu1 %vm81_vm3, %v20111_v53  ;;  %18322 = vmatmul.mubr.msk.bf16.gmra.mrb[80].mxu0 %vm81_vm3, %v20112_v54 }
  0xaa   :  { %18325 = vmatprep.mubr.msk.bf16.mxu0 %vm21138_vm2, %v21136_v1  ;;  %18341 = vmatprep.mubr.msk.bf16.mxu1 %vm21138_vm2, %v21136_v1 }
  0xb1   :  { %18326 = vmatmul.mubr.msk.bf16.gmra.mrb[84].mxu0 %vm81_vm3, %v20113_v55  ;;  %18342 = vmatmul.mubr.msk.bf16.vlgmr.msra.gmra.mrb[84].mxu1 %vm81_vm3, %v20114_v56 }
  0xb2   :  { %18329 = vmatprep.mubr.msk.bf16.mxu0 %vm21138_vm2, %v21136_v1  ;;  %18345 = vmatprep.mubr.msk.bf16.mxu1 %vm21138_vm2, %v21136_v1 }
  0xb3   :  { %18386 = vmatpush3.bf16.msra.mxu1 %v20099_v40 }
  0xb4   :  { %18387 = vmatprep.subr.bf16.mxu1 %v21136_v1 }
  0xb7   :  { %18388 = vmatpush3.bf16.msra.mxu1 %v1237_v42  ;;  %v20133_v42 = vld [vmem:[%s25691_s0 + $0x218] ss:$0 sps:$4 sm:$0xff]  }
  0xb8   :  { %18433 = vmatprep.subr.bf16.mxu1 %v21136_v1 }
  0xb9   :  { %18330 = vmatmul.mubr.msk.bf16.gmra.mrb[88].mxu0 %vm81_vm3, %v20115_v57  ;;  %18346 = vmatmul.mubr.msk.bf16.gmra.mrb[88].mxu1 %vm81_vm3, %v20116_v58 }
  0xba   :  { %18333 = vmatprep.mubr.msk.bf16.mxu0 %vm21138_vm2, %v21136_v1  ;;  %18349 = vmatprep.mubr.msk.bf16.mxu1 %vm21138_vm2, %v21136_v1 }
  0xc1   :  { %18334 = vmatmul.mubr.msk.bf16.gmra.mrb[92].mxu0 %vm81_vm3, %v20117_v59  ;;  %18350 = vmatmul.mubr.msk.bf16.gmra.mrb[92].mxu1 %vm81_vm3, %v20118_v60  ;;  %v20135_v60 = vld [vmem:[%s25691_s0 + $0x7c] sm:$0xff]  }
  0xc2   :  { %18353 = vmatprep.mubr.msk.bf16.mxu1 %vm21138_vm2, %v21136_v1  ;;  %18365 = vmatprep.mubr.msk.bf16.mxu0 %vm21138_vm2, %v21136_v1 }
  0xc9   :  { %18354 = vmatmul.mubr.msk.bf16.gmra.mrb[96].mxu1 %vm81_vm3, %v20119_v61  ;;  %18366 = vmatmul.mubr.msk.bf16.vlgmr.msra.gmra.mrb[96].mxu0 %vm81_vm3, %v20120_v62  ;;  %v20136_v61 = vld [vmem:[%s25691_s0 + $0xfc] sm:$0xff]  }
  0xca   :  { %18410 = vmatpush3.bf16.msra.mxu0 %v21545_v63  ;;  %18357 = vmatprep.mubr.msk.bf16.mxu1 %vm21138_vm2, %v21136_v1 }
  0xcb   :  { %18369 = vmatprep.mubr.msk.bf16.mxu0 %vm21138_vm2, %v21136_v1  ;;  %18411 = vmatprep.subr.bf16.mxu0 %v21136_v1 }
  0xce   :  { %18412 = vmatpush3.bf16.msra.mxu0 %v21556_v2 }
  0xcf   :  { %18457 = vmatprep.subr.bf16.mxu0 %v21136_v1 }
  0xd1   :  { %18358 = vmatmul.mubr.msk.bf16.gmra.mrb[100].mxu1 %vm81_vm3, %v20122_v3  ;;  %18370 = vmatmul.mubr.msk.bf16.gmra.mrb[100].mxu0 %vm81_vm3, %v20123_v4 }
  0xd2   :  { %18373 = vmatprep.mubr.msk.bf16.mxu0 %vm21138_vm2, %v21136_v1  ;;  %18389 = vmatprep.mubr.msk.bf16.mxu1 %vm21138_vm2, %v21136_v1 }
  0xd9   :  { %18374 = vmatmul.mubr.msk.bf16.gmra.mrb[104].mxu0 %vm81_vm3, %v20124_v5  ;;  %18390 = vmatmul.mubr.msk.bf16.vlgmr.msra.gmra.mrb[104].mxu1 %vm81_vm3, %v20125_v6 }
  0xda   :  { %18377 = vmatprep.mubr.msk.bf16.mxu0 %vm21138_vm2, %v21136_v1  ;;  %18393 = vmatprep.mubr.msk.bf16.mxu1 %vm21138_vm2, %v21136_v1 }
  0xdb   :  { %18434 = vmatpush3.bf16.msra.mxu1 %v21545_v63 }
  0xdc   :  { %v21594_v9 = vpop.f32.mrb[0].mxu0  ;;  %v21596_v10 = vpop.f32.mrb[0].mxu1  ;;  %18435 = vmatprep.subr.bf16.mxu1 %v21136_v1 }
  0xdd   :  { %v18127_v11 = vpop.f32.mrb[1].mxu0  ;;  %v18143_v12 = vpop.f32.mrb[1].mxu1 }
  0xde   :  { %v21599_v13 = vpop.f32.mrb[2].mxu0  ;;  %v173_v14 = vpop.f32.mrb[2].mxu1 }
  0xdf   :  { %v18128_v15 = vpop.f32.mrb[3].mxu0  ;;  %v18144_v16 = vpop.f32.mrb[3].mxu1  ;;  %18436 = vmatpush3.bf16.msra.mxu1 %v21556_v2 }
  0xe0   :  { %18481 = vmatprep.subr.bf16.mxu1 %v21136_v1 }
  0xe1   :  { %18378 = vmatmul.mubr.msk.bf16.gmra.mrb[108].mxu0 %vm81_vm3, %v20127_v7  ;;  %18394 = vmatmul.mubr.msk.bf16.gmra.mrb[108].mxu1 %vm81_vm3, %v20128_v8  ;;  %v21701_v7 = vld [vmem:[%s25694_s3 + $0xc] sm:$0xff]   ;;  %v20137_v8 = vld [vmem:[%s25691_s0 + $0x84] sm:$0xff]  }
  0xe2   :  { %18381 = vmatprep.mubr.msk.bf16.mxu0 %vm21138_vm2, %v21136_v1  ;;  %18397 = vmatprep.mubr.msk.bf16.mxu1 %vm21138_vm2, %v21136_v1 }
  0xe4   :  { %v21615_v19 = vpop.f32.mrb[4].mxu0  ;;  %v257_v20 = vpop.f32.mrb[4].mxu1 }
  0xe5   :  { %v18131_v21 = vpop.f32.mrb[5].mxu0  ;;  %v18151_v22 = vpop.f32.mrb[5].mxu1  ;;  %v295_v23 = vmax.f32 %v21594_v9, %v257_v20  ;;  %v20138_v9 = vld [vmem:[%s25691_s0 + $0x104] sm:$0xff]  }
  0xe6   :  { %v21618_v24 = vpop.f32.mrb[6].mxu0  ;;  %v260_v25 = vpop.f32.mrb[6].mxu1  ;;  %v20140_v22 = vld [vmem:[%s25691_s0 + $0x10c] sm:$0xff]  }
  0xe7   :  { %v18132_v26 = vpop.f32.mrb[7].mxu0  ;;  %v18152_v27 = vpop.f32.mrb[7].mxu1  ;;  %v296_v28 = vmax.f32 %v21599_v13, %v260_v25 }
  0xe9   :  { %18382 = vmatmul.mubr.msk.bf16.gmra.mrb[112].mxu0 %vm81_vm3, %v20129_v17  ;;  %18398 = vmatmul.mubr.msk.bf16.gmra.mrb[112].mxu1 %vm81_vm3, %v20130_v18 }
  0xea   :  { %18401 = vmatprep.mubr.msk.bf16.mxu1 %vm21138_vm2, %v21136_v1  ;;  %18413 = vmatprep.mubr.msk.bf16.mxu0 %vm21138_vm2, %v21136_v1 }
  0xec   :  { %v21627_v29 = vpop.f32.mrb[8].mxu0  ;;  %v21629_v30 = vpop.f32.mrb[8].mxu1 }
  0xed   :  { %v297_v33 = vmax.f32 %v21615_v19, %v21629_v30  ;;  %v18135_v34 = vpop.f32.mrb[9].mxu0  ;;  %v18155_v35 = vpop.f32.mrb[9].mxu1 }
  0xee   :  { %v21639_v36 = vpop.f32.mrb[10].mxu0  ;;  %v268_v37 = vpop.f32.mrb[10].mxu1 }
  0xef   :  { %v298_v38 = vmax.f32 %v21618_v24, %v268_v37  ;;  %v18136_v39 = vpop.f32.mrb[11].mxu0  ;;  %v18156_v40 = vpop.f32.mrb[11].mxu1 }
  0xf0   :  { %v20141_v39 = vld [vmem:[%s25691_s0 + $0x114] sm:$0xff]   ;;  %v20142_v40 = vld [vmem:[%s25691_s0 + $0x18c] sm:$0xff]  }
  0xf1   :  { %18402 = vmatmul.mubr.msk.bf16.gmra.mrb[116].mxu1 %vm81_vm3, %v20131_v31  ;;  %18414 = vmatmul.mubr.msk.bf16.vlgmr.msra.gmra.mrb[116].mxu0 %vm81_vm3, %v20132_v32 }
  0xf2   :  { %18458 = vmatpush3.bf16.msra.mxu0 %v21545_v63  ;;  %18405 = vmatprep.mubr.msk.bf16.mxu1 %vm21138_vm2, %v21136_v1 }
  0xf3   :  { %18417 = vmatprep.mubr.msk.bf16.mxu0 %vm21138_vm2, %v21136_v1  ;;  %18459 = vmatprep.subr.bf16.mxu0 %v21136_v1 }
  0xf4   :  { %v21661_v44 = vpop.f32.mrb[12].mxu0  ;;  %v273_v45 = vpop.f32.mrb[12].mxu1 }
  0xf5   :  { %v299_v46 = vmax.f32 %v21627_v29, %v273_v45  ;;  %v18139_v47 = vpop.f32.mrb[13].mxu0  ;;  %v18159_v48 = vpop.f32.mrb[13].mxu1 }
  0xf6   :  { %v21664_v49 = vpop.f32.mrb[14].mxu0  ;;  %v21666_v50 = vpop.f32.mrb[14].mxu1  ;;  %18460 = vmatpush3.bf16.msra.mxu0 %v21556_v2 }
  0xf7   :  { %v300_v51 = vmax.f32 %v21639_v36, %v21666_v50  ;;  %v18140_v52 = vpop.f32.mrb[15].mxu0  ;;  %v18160_v53 = vpop.f32.mrb[15].mxu1  ;;  %18505 = vmatprep.subr.bf16.mxu0 %v21647_v41 }
  0xf9   :  { %18406 = vmatmul.mubr.msk.bf16.gmra.mrb[120].mxu1 %vm81_vm3, %v20133_v42  ;;  %18418 = vmatmul.mubr.msk.bf16.gmra.mrb[120].mxu0 %vm81_vm3, %v20134_v43 }
  0xfa   :  { %18421 = vmatprep.mubr.msk.bf16.mxu0 %vm21138_vm2, %v21136_v1  ;;  %18437 = vmatprep.mubr.msk.bf16.mxu1 %vm21138_vm2, %v21136_v1 }
  0xfc   :  { %v21678_v54 = vpop.f32.mrb[16].mxu1  ;;  %v385_v55 = vpop.f32.mrb[16].mxu0 }
  0xfd   :  { %v301_v56 = vmax.f32 %v21661_v44, %v21678_v54  ;;  %v423_v57 = vmax.f32 %v295_v23, %v385_v55  ;;  %v18163_v58 = vpop.f32.mrb[17].mxu1  ;;  %v18175_v59 = vpop.f32.mrb[17].mxu0  ;;  %v20148_v44 = vld [vmem:[%s25694_s3 + $0x14] ss:$0 sps:$4 sm:$0x33]  }
  0xfe   :  { %v21688_v62 = vpop.f32.mrb[18].mxu1  ;;  %v388_v0 = vpop.f32.mrb[18].mxu0 }
  0xff   :  { %v302_v3 = vmax.f32 %v21664_v49, %v21688_v62  ;;  %v424_v4 = vmax.f32 %v296_v28, %v388_v0  ;;  %v18176_v5 = vpop.f32.mrb[19].mxu0  ;;  %v18164_v6 = vpop.f32.mrb[19].mxu1  ;;  %v20145_v62 = vld [vmem:[%s25691_s0 + $0x194] sm:$0xff]  }
 0x101   :  { %18422 = vmatmul.mubr.msk.bf16.gmra.mrb[124].mxu0 %vm81_vm3, %v20135_v60  ;;  %18438 = vmatmul.mubr.msk.bf16.vlgmr.msra.gmra.mrb[124].mxu1 %vm81_vm3, %v20136_v61  ;;  %v20144_v61 = vld [vmem:[%s25691_s0 + $0x11c] ss:$0 sps:$4 sm:$0xff]  }
 0x102   :  { %18425 = vmatprep.mubr.msk.bf16.mxu0 %vm21138_vm2, %v21136_v1  ;;  %18441 = vmatprep.mubr.msk.bf16.mxu1 %vm21138_vm2, %v21136_v1 }
 0x103   :  { %18482 = vmatpush3.bf16.msra.mxu1 %v21545_v63  ;;  %v21722_v63 = vld [vmem:[%s25693_s2] ss:$0 sm:$0xff] }
 0x104   :  { %v21710_v11 = vpop.f32.mrb[20].mxu1  ;;  %v393_v12 = vpop.f32.mrb[20].mxu0  ;;  %18483 = vmatprep.subr.bf16.mxu1 %v21136_v1 }
 0x105   :  { %v303_v13 = vmax.f32 %v21596_v10, %v21710_v11  ;;  %v425_v14 = vmax.f32 %v297_v33, %v393_v12  ;;  %v18179_v15 = vpop.f32.mrb[21].mxu0  ;;  %v18167_v16 = vpop.f32.mrb[21].mxu1 }
 0x106   :  { %v396_v17 = vpop.f32.mrb[22].mxu0  ;;  %v292_v18 = vpop.f32.mrb[22].mxu1 }
 0x107   :  { %v426_v19 = vmax.f32 %v298_v38, %v396_v17  ;;  %v18180_v20 = vpop.f32.mrb[23].mxu0  ;;  %v18168_v21 = vpop.f32.mrb[23].mxu1  ;;  %18484 = vmatpush3.bf16.msra.mxu1 %v21556_v2  ;;  %v20139_v2 = vld [vmem:[%s25691_s0 + $0x8c] ss:$0 sps:$4 sm:$0xff]  }
 0x108   :  { %18805 = vmatprep.subr.bf16.mxu1 %v21701_v7  ;;  %v20147_v20 = vld [vmem:[%s25691_s0 + $0x21c] sm:$0xff]  }
 0x109   :  { %18426 = vmatmul.mubr.msk.bf16.gmra.mrb[128].mxu0 %vm81_vm3, %v20137_v8  ;;  %18442 = vmatmul.mubr.msk.bf16.gmra.mrb[128].mxu1 %vm81_vm3, %v20138_v9 }
 0x10a   :  { %18429 = vmatprep.mubr.msk.bf16.mxu0 %vm21138_vm2, %v21136_v1  ;;  %18445 = vmatprep.mubr.msk.bf16.mxu1 %vm21138_vm2, %v21136_v1 }
 0x10c   :  { %v401_v23 = vpop.f32.mrb[24].mxu0  ;;  %v513_v24 = vpop.f32.mrb[24].mxu1 }
 0x10d   :  { %v21734_v25 = vmax.f32 %v299_v46, %v401_v23  ;;  %v551_v26 = vmax.f32 %v423_v57, %v513_v24  ;;  %v18183_v27 = vpop.f32.mrb[25].mxu0  ;;  %v18199_v28 = vpop.f32.mrb[25].mxu1 }
 0x10e   :  { %v404_v29 = vpop.f32.mrb[26].mxu0  ;;  %v516_v30 = vpop.f32.mrb[26].mxu1 }
 0x10f   :  { %v567_v31 = vadd.f32 %v21722_v63, %v551_v26  ;;  %v428_v32 = vmax.f32 %v300_v51, %v404_v29  ;;  %v552_v33 = vmax.f32 %v424_v4, %v516_v30  ;;  %v18184_v34 = vpop.f32.mrb[27].mxu0  ;;  %v18200_v35 = vpop.f32.mrb[27].mxu1 }
 0x110   :  { %v21821_v34 = vld [vmem:[%s25694_s3] sm:$0xff]  }
 0x111   :  { %v568_v36 = vadd.f32 %v21722_v63, %v552_v33  ;;  %18430 = vmatmul.mubr.msk.bf16.gmra.mrb[132].mxu0 %vm81_vm3, %v20139_v2  ;;  %18446 = vmatmul.mubr.msk.bf16.gmra.mrb[132].mxu1 %vm81_vm3, %v20140_v22  ;;  %v576_v37 = vmax.f32 %v567_v31, 0.0 }
 0x112   :  { %18449 = vmatprep.mubr.msk.bf16.mxu1 %vm21138_vm2, %v21136_v1  ;;  %18461 = vmatprep.mubr.msk.bf16.mxu0 %vm21138_vm2, %v21136_v1 }
 0x113   :  { %v577_v38 = vmax.f32 %v568_v36, 0.0 }
 0x114   :  { %v409_v42 = vpop.f32.mrb[28].mxu0  ;;  %v521_v43 = vpop.f32.mrb[28].mxu1 }
 0x115   :  { %v585_v45 = vpack.c.bf16 %v577_v38, %v576_v37  ;;  %v429_v46 = vmax.f32 %v301_v56, %v409_v42  ;;  %v553_v47 = vmax.f32 %v425_v14, %v521_v43  ;;  %v18187_v48 = vpop.f32.mrb[29].mxu0  ;;  %v18203_v50 = vpop.f32.mrb[29].mxu1  ;;  %v21767_v56 = vld [vmem:[%s25694_s3] sm:$0xff]  }
 0x116   :  { %v412_v51 = vpop.f32.mrb[30].mxu0  ;;  %v524_v52 = vpop.f32.mrb[30].mxu1  ;;  %v20149_v37 = vld [vmem:[%s25691_s0 + $0x1a4] sm:$0xff]  }
 0x117   :  { %591 = vst.msk [vmem:[#allocation2] sm:$0xff] %vm590_vm4, %v585_v45  ;;  %v569_v53 = vadd.f32 %v21722_v63, %v553_v47  ;;  %v430_v55 = vmax.f32 %v302_v3, %v412_v51  ;;  %v554_v57 = vmax.f32 %v426_v19, %v524_v52  ;;  %v18188_v58 = vpop.f32.mrb[31].mxu0  ;;  %v18204_v59 = vpop.f32.mrb[31].mxu1  ;;  %v20150_v47 = vld [vmem:[%s25691_s0 + $0x224] sm:$0xff]  }
 0x118   :  { %v20151_v58 = vld [vmem:[%s25691_s0 + $0x1ac] ss:$0 sps:$4 sm:$0xff]  }
 0x119   :  { %v570_v54 = vadd.f32 %v21722_v63, %v554_v57  ;;  %18450 = vmatmul.mubr.msk.bf16.gmra.mrb[136].mxu1 %vm81_vm3, %v20141_v39  ;;  %18462 = vmatmul.mubr.msk.bf16.vlgmr.msra.gmra.mrb[136].mxu0 %vm81_vm3, %v20142_v40  ;;  %v578_v49 = vmax.f32 %v569_v53, 0.0  ;;  %v20152_v59 = vld [vmem:[%s25691_s0 + $0x22c] sm:$0xff]  }
 0x11a   :  { %18506 = vmatpush3.bf16.msra.mxu0 %v21647_v41  ;;  %18453 = vmatprep.mubr.msk.bf16.mxu1 %vm21138_vm2, %v21136_v1  ;;  %v2356_v41 = vsel %vm2354_vm5, %v20148_v44, 0 }
 0x11b   :  { %v579_v60 = vmax.f32 %v570_v54, 0.0  ;;  %18465 = vmatprep.mubr.msk.bf16.mxu0 %vm21138_vm2, %v21136_v1  ;;  %19985 = vmatprep.subr.msk.bf16.mxu0 %vm2354_vm5, %v20148_v44 }
 0x11c   :  { %v417_v0 = vpop.f32.mrb[32].mxu0  ;;  %v529_v3 = vpop.f32.mrb[32].mxu1 }
 0x11d   :  { %v586_v4 = vpack.c.bf16 %v579_v60, %v578_v49  ;;  %v431_v5 = vmax.f32 %v303_v13, %v417_v0  ;;  %v555_v6 = vmax.f32 %v21734_v25, %v529_v3  ;;  %v18191_v8 = vpop.f32.mrb[33].mxu0  ;;  %v18207_v9 = vpop.f32.mrb[33].mxu1  ;;  %v20146_v13 = vld [vmem:[%s25691_s0 + $0x19c] sm:$0xff]  }
 0x11e   :  { %v420_v12 = vpop.f32.mrb[34].mxu0  ;;  %v532_v14 = vpop.f32.mrb[34].mxu1  ;;  %18508 = vmatpush3.bf16.msra.mxu0 %v2356_v41  ;;  %v2312_v49 = vld [vmem:[#allocation2] sm:$0xfe] }
 0x11f   :  { %592 = vst.msk [vmem:[#allocation2 + $0x8] sm:$0xff] %vm590_vm4, %v586_v4  ;;  %v571_v15 = vadd.f32 %v21722_v63, %v555_v6  ;;  %v556_v16 = vmax.f32 %v428_v32, %v532_v14  ;;  %v18192_v17 = vpop.f32.mrb[35].mxu0  ;;  %v18208_v18 = vpop.f32.mrb[35].mxu1  ;;  %18517 = vmatprep.subr.bf16.mxu0 %v21767_v56  ;;  %v20165_v32 = vld [vmem:[%s25694_s3 + $0x14] ss:$0 sps:$4 sm:$0x33]  }
 0x120   :  { %v5177_v40 = vsel %vm2354_vm5, %v20165_v32, 0  ;;  %v2324_v6 = vrot.slane %v2312_v49, 1 }
 0x121   :  { %v572_v19 = vadd.f32 %v21722_v63, %v556_v16  ;;  %18454 = vmatmul.mubr.msk.bf16.gmra.mrb[140].mxu1 %vm81_vm3, %v20144_v61  ;;  %18466 = vmatmul.mubr.msk.bf16.gmra.mrb[140].mxu0 %vm81_vm3, %v20145_v62  ;;  %v580_v10 = vmax.f32 %v571_v15, 0.0 }
 0x122   :  { %18469 = vmatprep.mubr.msk.bf16.mxu0 %vm21138_vm2, %v21136_v1  ;;  %18485 = vmatprep.mubr.msk.bf16.mxu1 %vm21138_vm2, %v21136_v1 }
 0x123   :  { %v581_v11 = vmax.f32 %v572_v19, 0.0 }
 0x124   :  { %v537_v21 = vpop.f32.mrb[36].mxu1  ;;  %v21802_v2 = vpop.f32.mrb[36].mxu0 }
 0x125   :  { %v587_v22 = vpack.c.bf16 %v581_v11, %v580_v10  ;;  %v557_v23 = vmax.f32 %v429_v46, %v537_v21  ;;  %v18211_v24 = vpop.f32.mrb[37].mxu1  ;;  %v18223_v25 = vpop.f32.mrb[37].mxu0  ;;  %v20153_v11 = vld [vmem:[%s25691_s0 + $0x234] sm:$0xff]  }
 0x126   :  { %v540_v26 = vpop.f32.mrb[38].mxu1  ;;  %v21804_v27 = vpop.f32.mrb[38].mxu0  ;;  %v21838_v53 = vld [vmem:[#allocation2 + $0x8] sm:$0xff] }
 0x127   :  { %593 = vst.msk [vmem:[#allocation2 + $0x10] sm:$0xff] %vm590_vm4, %v587_v22  ;;  %v573_v28 = vadd.f32 %v21722_v63, %v557_v23  ;;  %v558_v29 = vmax.f32 %v430_v55, %v540_v26  ;;  %v18224_v30 = vpop.f32.mrb[39].mxu0  ;;  %v18212_v31 = vpop.f32.mrb[39].mxu1  ;;  %v2325_v41 = vrot.slane %v21838_v53, 1 }
 0x128   :  { %v20156_v22 = vld [vmem:[%s25694_s3 + $0x8] ss:$0 sps:$4 sm:$0x33]   ;;  %v20157_v30 = vld [vmem:[%s25694_s3 + $0x18] sm:$0xff]  }
 0x129   :  { %v574_v33 = vadd.f32 %v21722_v63, %v558_v29  ;;  %18470 = vmatmul.mubr.msk.bf16.gmra.mrb[144].mxu0 %vm81_vm3, %v20146_v13  ;;  %18486 = vmatmul.mubr.msk.bf16.vlgmr.msra.gmra.mrb[144].mxu1 %vm81_vm3, %v20147_v20  ;;  %v582_v35 = vmax.f32 %v573_v28, 0.0  ;;  %v2326_v9 = vsel %vm2323_vm7, %v2324_v6, %v2325_v41  ;;  %v20155_v31 = vld [vmem:[%s25691_s0 + $0x23c] ss:$0 sps:$4 sm:$0xff]  }
 0x12a   :  { %18473 = vmatprep.mubr.msk.bf16.mxu0 %vm21138_vm2, %v21136_v1  ;;  %18489 = vmatprep.mubr.msk.bf16.mxu1 %vm21138_vm2, %v21136_v1 }
 0x12b   :  { %v583_v36 = vmax.f32 %v574_v33, 0.0  ;;  %18806 = vmatpush3.bf16.msra.mxu1 %v21701_v7 }
 0x12c   :  { %v545_v38 = vpop.f32.mrb[40].mxu1  ;;  %v21827_v39 = vpop.f32.mrb[40].mxu0  ;;  %20010 = vmatprep.subr.msk.bf16.mxu1 %vm2354_vm5, %v20165_v32  ;;  %v2445_v32 = vsel %vm2354_vm5, %v20156_v22, 0 }
 0x12d   :  { %v588_v42 = vpack.c.bf16 %v583_v36, %v582_v35  ;;  %v559_v43 = vmax.f32 %v431_v5, %v545_v38  ;;  %v18227_v45 = vpop.f32.mrb[41].mxu0  ;;  %v18215_v46 = vpop.f32.mrb[41].mxu1 }
 0x12e   :  { %v21834_v48 = vpop.f32.mrb[42].mxu0  ;;  %v548_v50 = vpop.f32.mrb[42].mxu1  ;;  %v21870_v12 = vld [vmem:[#allocation2 + $0x10] sm:$0xff] }
 0x12f   :  { %594 = vst.msk [vmem:[#allocation2 + $0x18] sm:$0xff] %vm590_vm4, %v588_v42  ;;  %v575_v7 = vadd.f32 %v21722_v63, %v559_v43  ;;  %v18228_v51 = vpop.f32.mrb[43].mxu0  ;;  %v18216_v52 = vpop.f32.mrb[43].mxu1  ;;  %18808 = vmatpush3.bf16.msra.mxu1 %v5177_v40  ;;  %v2327_v17 = vrot.slane %v21870_v12, 1 }
 0x130   :  { %18817 = vmatprep.subr.bf16.mxu1 %v21821_v34 }
 0x131   :  { %v584_v55 = vmax.f32 %v575_v7, 0.0  ;;  %18474 = vmatmul.mubr.msk.bf16.gmra.mrb[148].mxu0 %vm81_vm3, %v20149_v37  ;;  %18490 = vmatmul.mubr.msk.bf16.gmra.mrb[148].mxu1 %vm81_vm3, %v20150_v47  ;;  %v2328_v28 = vsel %vm2323_vm7, %v2325_v41, %v2327_v17  ;;  %v2305_v47 = vld [vmem:[#allocation2] sm:$0xff] }
 0x132   :  { %18477 = vmatprep.mubr.msk.bf16.mxu0 %vm21138_vm2, %v21136_v1  ;;  %18493 = vmatprep.mubr.msk.bf16.mxu1 %vm21138_vm2, %v21136_v1  ;;  %v20158_v41 = vld [vmem:[%s25694_s3 + $0x20] ss:$0 sps:$4 sm:$0x33]  }
 0x133   :  { %v589_v57 = vpack.c.bf16 %v584_v55, %v584_v55 }
 0x134   :  { %v21853_v44 = vpop.f32.mrb[44].mxu0  ;;  %v21855_v54 = vpop.f32.mrb[44].mxu1 }
 0x135   :  { %596 = vst.msk [vmem:[#allocation2 + $0x20] sm:$0xf] %vm595_vm6, %v589_v57  ;;  %v853_v60 = vmax.f32 %v21802_v2, %v21855_v54  ;;  %v18231_v61 = vpop.f32.mrb[45].mxu0  ;;  %v18247_v62 = vpop.f32.mrb[45].mxu1  ;;  %v20159_v2 = vld [vmem:[%s25694_s3 + $0x24] sm:$0xff]  }
 0x136   :  { %v21861_v0 = vpop.f32.mrb[46].mxu0  ;;  %v21863_v3 = vpop.f32.mrb[46].mxu1  ;;  %v21875_v14 = vld [vmem:[#allocation2 + $0x18] sm:$0xff]  ;;  %v2512_v54 = vld [vmem:[#allocation2] sm:$0xfc] }
 0x137   :  { %v854_v4 = vmax.f32 %v21804_v27, %v21863_v3  ;;  %v18232_v5 = vpop.f32.mrb[47].mxu0  ;;  %v18248_v8 = vpop.f32.mrb[47].mxu1  ;;  %v2329_v13 = vrot.slane %v21875_v14, 1  ;;  %v2552_v27 = vsel %vm2354_vm5, %v20158_v41, 0 }
 0x138   :  { %v2522_v8 = vrot.slane %v21838_v53, 2 }
 0x139   :  { %18478 = vmatmul.mubr.msk.bf16.gmra.mrb[152].mxu0 %vm81_vm3, %v20151_v58  ;;  %18494 = vmatmul.mubr.msk.bf16.gmra.mrb[152].mxu1 %vm81_vm3, %v20152_v59  ;;  %v2330_v29 = vsel %vm2323_vm7, %v2327_v17, %v2329_v13 }
 0x13a   :  { %18509 = vmatprep.mubr.msk.bf16.mxu0 %vm590_vm4, %v2326_v9  ;;  %18497 = vmatprep.mubr.msk.bf16.mxu1 %vm21138_vm2, %v21136_v1 }
 0x13c   :  { %v21877_v15 = vpop.f32.mrb[48].mxu0  ;;  %v21879_v16 = vpop.f32.mrb[48].mxu1  ;;  %v2313_v26 = vld [vmem:[#allocation2 + $0x20] sm:$0x1] }
 0x13d   :  { %v855_v18 = vmax.f32 %v21827_v39, %v21879_v16  ;;  %v18235_v19 = vpop.f32.mrb[49].mxu0  ;;  %v18251_v10 = vpop.f32.mrb[49].mxu1  ;;  %v2331_v36 = vrot.slane %v2313_v26, 1  ;;  %v2526_v26 = vrot.slane %v21875_v14, 2 }
 0x13e   :  { %v21888_v20 = vpop.f32.mrb[50].mxu0  ;;  %v21890_v21 = vpop.f32.mrb[50].mxu1 }
 0x13f   :  { %v856_v23 = vmax.f32 %v21834_v48, %v21890_v21  ;;  %v18236_v24 = vpop.f32.mrb[51].mxu0  ;;  %v18252_v25 = vpop.f32.mrb[51].mxu1  ;;  %v2332_v46 = vsel %vm2323_vm7, %v2329_v13, %v2331_v36  ;;  %v20160_v48 = vld [vmem:[%s25694_s3 + $0x2c] ss:$0 sps:$4 sm:$0x33]  }
 0x141   :  { %18498 = vmatmul.mubr.msk.bf16.gmra.mrb[156].mxu1 %vm81_vm3, %v20153_v11  ;;  %18510 = vmatmul.mubr.msk.bf16.vlgmr.msra.gmra.mrb[156].mxu0 %vm590_vm4, %v2328_v28  ;;  %v2521_v11 = vrot.slane %v2512_v54, 2  ;;  %v2627_v28 = vld [vmem:[#allocation2] sm:$0xf8] }
 0x142   :  { %18513 = vmatprep.mubr.msk.bf16.mxu0 %vm590_vm4, %v2330_v29  ;;  %18518 = vmatpush3.bf16.msra.mxu0 %v21767_v56 }
 0x143   :  { %18501 = vmatprep.mubr.msk.bf16.mxu1 %vm21138_vm2, %v21136_v1  ;;  %19986 = vmatprep.subr.msk.bf16.mxu0 %vm2354_vm5, %v20156_v22  ;;  %v2523_v39 = vsel %vm2520_vm8, %v2521_v11, %v2522_v8  ;;  %v2524_v22 = vrot.slane %v21870_v12, 2 }
 0x144   :  { %v21913_v33 = vpop.f32.mrb[52].mxu0  ;;  %v831_v35 = vpop.f32.mrb[52].mxu1 }
 0x145   :  { %v857_v37 = vmax.f32 %v21853_v44, %v831_v35  ;;  %v18239_v38 = vpop.f32.mrb[53].mxu0  ;;  %v18255_v40 = vpop.f32.mrb[53].mxu1 }
 0x146   :  { %v731_v56 = vpop.f32.mrb[54].mxu0  ;;  %v21916_v42 = vpop.f32.mrb[54].mxu1  ;;  %18520 = vmatpush3.bf16.msra.mxu0 %v2445_v32 }
 0x147   :  { %v858_v1 = vmax.f32 %v21861_v0, %v21916_v42  ;;  %v18240_v43 = vpop.f32.mrb[55].mxu0  ;;  %v18256_v45 = vpop.f32.mrb[55].mxu1  ;;  %18529 = vmatprep.subr.bf16.mxu0 %v20157_v30  ;;  %v2525_v56 = vsel %vm2520_vm8, %v2522_v8, %v2524_v22  ;;  %v2527_v42 = vsel %vm2520_vm8, %v2524_v22, %v2526_v26 }
 0x148   :  { %v20161_v43 = vld [vmem:[%s25694_s3 + $0x30] sm:$0xff]   ;;  %v2636_v45 = vrot.slane %v2627_v28, 3 }
 0x149   :  { %18502 = vmatmul.mubr.msk.bf16.gmra.mrb[160].mxu1 %vm81_vm3, %v20155_v31  ;;  %18514 = vmatmul.mubr.msk.bf16.gmra.mrb[160].mxu0 %vm590_vm4, %v2332_v46  ;;  %v2513_v31 = vld [vmem:[#allocation2 + $0x20] sm:$0x3] }
 0x14a   :  { %18521 = vmatprep.mubr.msk.bf16.mxu0 %vm590_vm4, %v2305_v47 }
 0x14c   :  { %v21924_v50 = vpop.f32.mrb[56].mxu1  ;;  %v943_v7 = vpop.f32.mrb[56].mxu0 }
 0x14d   :  { %v859_v51 = vmax.f32 %v21877_v15, %v21924_v50  ;;  %v981_v52 = vmax.f32 %v853_v60, %v943_v7  ;;  %v18259_v55 = vpop.f32.mrb[57].mxu1  ;;  %v18271_v57 = vpop.f32.mrb[57].mxu0  ;;  %v2528_v7 = vrot.slane %v2513_v31, 2 }
 0x14e   :  { %v21931_v58 = vpop.f32.mrb[58].mxu1  ;;  %v946_v59 = vpop.f32.mrb[58].mxu0 }
 0x14f   :  { %v860_v44 = vmax.f32 %v21888_v20, %v21931_v58  ;;  %v982_v49 = vmax.f32 %v854_v4, %v946_v59  ;;  %v18272_v61 = vpop.f32.mrb[59].mxu0  ;;  %v18260_v62 = vpop.f32.mrb[59].mxu1  ;;  %v2529_v15 = vsel %vm2520_vm8, %v2526_v26, %v2528_v7  ;;  %v2641_v20 = vrot.slane %v21875_v14, 3 }
 0x151   :  { %18522 = vmatmul.mubr.msk.bf16.vlgmr.msra.gmra.mrb[156].mxu0 %vm590_vm4, %v21838_v53 }
 0x152   :  { %18525 = vmatprep.mubr.msk.bf16.mxu0 %vm590_vm4, %v21870_v12  ;;  %18530 = vmatpush3.bf16.msra.mxu0 %v20157_v30 }
 0x153   :  { %19987 = vmatprep.subr.msk.bf16.mxu0 %vm2354_vm5, %v20158_v41 }
 0x154   :  { %v21950_v60 = vpop.f32.mrb[60].mxu1  ;;  %v951_v0 = vpop.f32.mrb[60].mxu0 }
 0x155   :  { %v861_v3 = vmax.f32 %v21913_v33, %v21950_v60  ;;  %v983_v4 = vmax.f32 %v855_v18, %v951_v0  ;;  %v18275_v5 = vpop.f32.mrb[61].mxu0  ;;  %v18263_v6 = vpop.f32.mrb[61].mxu1 }
 0x156   :  { %v954_v9 = vpop.f32.mrb[62].mxu0  ;;  %v850_v17 = vpop.f32.mrb[62].mxu1  ;;  %18532 = vmatpush3.bf16.msra.mxu0 %v2552_v27 }
 0x157   :  { %v984_v19 = vmax.f32 %v856_v23, %v954_v9  ;;  %v18276_v10 = vpop.f32.mrb[63].mxu0  ;;  %v18264_v13 = vpop.f32.mrb[63].mxu1  ;;  %18541 = vmatprep.subr.bf16.mxu0 %v20159_v2 }
 0x159   :  { %18526 = vmatmul.mubr.msk.bf16.gmra.mrb[160].mxu0 %vm590_vm4, %v21875_v14 }
 0x15a   :  { %18533 = vmatprep.mubr.msk.bf16.mxu0 %vm590_vm4, %v2523_v39 }
 0x15c   :  { %v959_v16 = vpop.f32.mrb[64].mxu0  ;;  %v1071_v18 = vpop.f32.mrb[64].mxu1 }
 0x15d   :  { %v21969_v21 = vmax.f32 %v857_v37, %v959_v16  ;;  %v1109_v23 = vmax.f32 %v981_v52, %v1071_v18  ;;  %v18279_v24 = vpop.f32.mrb[65].mxu0  ;;  %v18295_v25 = vpop.f32.mrb[65].mxu1  ;;  %v2637_v52 = vrot.slane %v21838_v53, 3  ;;  %v20162_v16 = vld [vmem:[%s25694_s3 + $0x38] ss:$0 sps:$4 sm:$0x33]  }
 0x15e   :  { %v962_v29 = vpop.f32.mrb[66].mxu0  ;;  %v1074_v30 = vpop.f32.mrb[66].mxu1 }
 0x15f   :  { %v1125_v32 = vadd.f32 %v21722_v63, %v1109_v23  ;;  %v21973_v35 = vmax.f32 %v858_v1, %v962_v29  ;;  %v1110_v36 = vmax.f32 %v982_v49, %v1074_v30  ;;  %v18280_v38 = vpop.f32.mrb[67].mxu0  ;;  %v18296_v40 = vpop.f32.mrb[67].mxu1  ;;  %v2667_v1 = vsel %vm2354_vm5, %v20160_v48, 0  ;;  %v22017_v23 = vld [vmem:[%s25693_s2] ss:$0 sm:$0xff] }
 0x160   :  { %v2628_v29 = vld [vmem:[#allocation2 + $0x20] sm:$0x7] }
 0x161   :  { %v1126_v37 = vadd.f32 %v21722_v63, %v1110_v36  ;;  %18534 = vmatmul.mubr.msk.bf16.vlgmr.msra.gmra.mrb[156].mxu0 %vm590_vm4, %v2525_v56  ;;  %v1134_v46 = vmax.f32 %v1125_v32, 0.0  ;;  %v2781_v32 = vsel %vm2354_vm5, %v20162_v16, 0  ;;  %v2643_v40 = vrot.slane %v2628_v29, 3  ;;  %v2742_v56 = vld [vmem:[#allocation2] sm:$0xf0] }
 0x162   :  { %18537 = vmatprep.mubr.msk.bf16.mxu0 %vm590_vm4, %v2527_v42  ;;  %18542 = vmatpush3.bf16.msra.mxu0 %v20159_v2 }
 0x163   :  { %v1135_v47 = vmax.f32 %v1126_v37, 0.0  ;;  %19988 = vmatprep.subr.msk.bf16.mxu0 %vm2354_vm5, %v20160_v48 }
 0x164   :  { %v967_v55 = vpop.f32.mrb[68].mxu0  ;;  %v1079_v57 = vpop.f32.mrb[68].mxu1 }
 0x165   :  { %v1143_v59 = vpack.c.bf16 %v1135_v47, %v1134_v46  ;;  %v21989_v49 = vmax.f32 %v859_v51, %v967_v55  ;;  %v1111_v61 = vmax.f32 %v983_v4, %v1079_v57  ;;  %v18283_v62 = vpop.f32.mrb[69].mxu0  ;;  %v18299_v41 = vpop.f32.mrb[69].mxu1  ;;  %v2638_v51 = vsel %vm98_vm1, %v2636_v45, %v2637_v52 }
 0x166   :  { %v970_v2 = vpop.f32.mrb[70].mxu0  ;;  %v1082_v54 = vpop.f32.mrb[70].mxu1  ;;  %18544 = vmatpush3.bf16.msra.mxu0 %v2667_v1  ;;  %v2639_v4 = vrot.slane %v21870_v12, 3  ;;  %v2751_v45 = vrot.slane %v21838_v53, 4 }
 0x167   :  { %v1154_v27 = vrot.slane %v1143_v59, 4  ;;  %v1127_v0 = vadd.f32 %v21722_v63, %v1111_v61  ;;  %v21995_v5 = vmax.f32 %v860_v44, %v970_v2  ;;  %v1112_v6 = vmax.f32 %v984_v19, %v1082_v54  ;;  %v18284_v8 = vpop.f32.mrb[71].mxu0  ;;  %v18300_v9 = vpop.f32.mrb[71].mxu1  ;;  %18553 = vmatprep.subr.bf16.mxu0 %v20161_v43 }
 0x168   :  { %v2640_v24 = vsel %vm98_vm1, %v2637_v52, %v2639_v4  ;;  %v2642_v28 = vsel %vm98_vm1, %v2639_v4, %v2641_v20  ;;  %v2750_v59 = vrot.slane %v2742_v56, 4 }
 0x169   :  { %1169 = vst.msk [vmem:[#allocation2 + $0x20] sm:$0xf0] %vm1168_vm9, %v1154_v27  ;;  %v1128_v50 = vadd.f32 %v21722_v63, %v1112_v6  ;;  %18538 = vmatmul.mubr.msk.bf16.gmra.mrb[160].mxu0 %vm590_vm4, %v2529_v15  ;;  %v1136_v58 = vmax.f32 %v1127_v0, 0.0 }
 0x16a   :  { %18545 = vmatprep.mubr.msk.bf16.mxu0 %vm590_vm4, %v2638_v51  ;;  %v2752_v2 = vsel %vm97_vm0, %v2750_v59, %v2751_v45 }
 0x16b   :  { %v1137_v44 = vmax.f32 %v1128_v50, 0.0  ;;  %v2753_v50 = vrot.slane %v21870_v12, 4 }
 0x16c   :  { %v975_v17 = vpop.f32.mrb[72].mxu0  ;;  %v1087_v19 = vpop.f32.mrb[72].mxu1 }
 0x16d   :  { %v1144_v10 = vpack.c.bf16 %v1137_v44, %v1136_v58  ;;  %v22008_v11 = vmax.f32 %v861_v3, %v975_v17  ;;  %v1113_v63 = vmax.f32 %v21969_v21, %v1087_v19  ;;  %v18287_v13 = vpop.f32.mrb[73].mxu0  ;;  %v18303_v39 = vpop.f32.mrb[73].mxu1  ;;  %v22061_v44 = vrot.slane %v21875_v14, 4 }
 0x16e   :  { %v978_v18 = vpop.f32.mrb[74].mxu0  ;;  %v1090_v22 = vpop.f32.mrb[74].mxu1 }
 0x16f   :  { %v1155_v48 = vrot.slane %v1144_v10, 4  ;;  %v1129_v33 = vadd.f32 %v22017_v23, %v1113_v63  ;;  %v1114_v60 = vmax.f32 %v21973_v35, %v1090_v22  ;;  %v18288_v3 = vpop.f32.mrb[75].mxu0  ;;  %v18304_v21 = vpop.f32.mrb[75].mxu1  ;;  %v20164_v35 = vld [vmem:[%s25694_s3 + $0x3c] sm:$0xff]  }
 0x170   :  { %v5136_v62 = vld [vmem:[#allocation2 + $0x20] sm:$0xfe]  ;;  %v20169_v3 = vld [vmem:[%s25694_s3 + $0x8] ss:$0 sps:$4 sm:$0x33]  }
 0x171   :  { %v1156_v25 = vsel %vm97_vm0, %v1154_v27, %v1155_v48  ;;  %v1130_v26 = vadd.f32 %v22017_v23, %v1114_v60  ;;  %18546 = vmatmul.mubr.msk.bf16.vlgmr.msra.gmra.mrb[156].mxu0 %vm590_vm4, %v2640_v24  ;;  %v1138_v30 = vmax.f32 %v1129_v33, 0.0  ;;  %v5146_v27 = vrot.slane %v5136_v62, 1  ;;  %v20166_v10 = vld [vmem:[%s25694_s3 + $0x44] ss:$0 sps:$4 sm:$0x33]  }
 0x172   :  { %1170 = vst.msk [vmem:[#allocation2 + $0x28] sm:$0xff] %vm590_vm4, %v1156_v25  ;;  %18549 = vmatprep.mubr.msk.bf16.mxu0 %vm590_vm4, %v2642_v28  ;;  %18554 = vmatpush3.bf16.msra.mxu0 %v20161_v43  ;;  %v2743_v60 = vld [vmem:[#allocation2 + $0x20] sm:$0xf]  ;;  %v2901_v24 = vsel %vm2354_vm5, %v20166_v10, 0  ;;  %v2856_v25 = vld [vmem:[#allocation2 + $0x8] sm:$0xf0] }
 0x173   :  { %v1139_v31 = vmax.f32 %v1130_v26, 0.0  ;;  %19989 = vmatprep.subr.msk.bf16.mxu0 %vm2354_vm5, %v20162_v16  ;;  %v20167_v26 = vld [vmem:[%s25694_s3 + $0x48] sm:$0xff]  }
 0x174   :  { %v1095_v36 = vpop.f32.mrb[76].mxu1  ;;  %v22033_v38 = vpop.f32.mrb[76].mxu0 }
 0x175   :  { %v1145_v37 = vpack.c.bf16 %v1139_v31, %v1138_v30  ;;  %v1115_v42 = vmax.f32 %v21989_v49, %v1095_v36  ;;  %v18307_v1 = vpop.f32.mrb[77].mxu1  ;;  %v18319_v43 = vpop.f32.mrb[77].mxu0  ;;  %v2644_v49 = vsel %vm98_vm1, %v2641_v20, %v2643_v40  ;;  %v2757_v31 = vrot.slane %v2743_v60, 4 }
 0x176   :  { %v1098_v46 = vpop.f32.mrb[78].mxu1  ;;  %v22037_v47 = vpop.f32.mrb[78].mxu0  ;;  %18556 = vmatpush3.bf16.msra.mxu0 %v2781_v32 }
 0x177   :  { %v1157_v7 = vrot.slane %v1145_v37, 4  ;;  %v1131_v52 = vadd.f32 %v22017_v23, %v1115_v42  ;;  %v1116_v55 = vmax.f32 %v21995_v5, %v1098_v46  ;;  %v18320_v57 = vpop.f32.mrb[79].mxu0  ;;  %v18308_v61 = vpop.f32.mrb[79].mxu1  ;;  %18565 = vmatprep.subr.bf16.mxu0 %v20164_v35  ;;  %v5266_v42 = vsel %vm2354_vm5, %v20169_v3, 0 }
 0x178   :  { %v2870_v46 = vrot.slane %v2856_v25, 4  ;;  %v22126_v61 = vld [vmem:[#allocation2 + $0x20] sm:$0xff] }
 0x179   :  { %v1158_v41 = vsel %vm97_vm0, %v1155_v48, %v1157_v7  ;;  %v1132_v53 = vadd.f32 %v22017_v23, %v1116_v55  ;;  %18550 = vmatmul.mubr.msk.bf16.gmra.mrb[160].mxu0 %vm590_vm4, %v2644_v49  ;;  %v22046_v54 = vld [vmem:[#allocation2 + $0x28] sm:$0xff]  ;;  %v1140_v5 = vmax.f32 %v1131_v52, 0.0  ;;  %v2756_v48 = vsel %vm97_vm0, %v2753_v50, %v22061_v44  ;;  %v22115_v52 = vld [vmem:[%s25694_s3 + $0x18] sm:$0xff]  }
 0x17a   :  { %1171 = vst.msk [vmem:[#allocation2 + $0x30] sm:$0xff] %vm590_vm4, %v1158_v41  ;;  %18557 = vmatprep.mubr.msk.bf16.mxu0 %vm590_vm4, %v2752_v2  ;;  %v22051_v0 = vrot.slane %v22046_v54, 1  ;;  %v2872_v55 = vsel %vm97_vm0, %v2870_v46, %v2753_v50  ;;  %v2988_v46 = vrot.slane %v21875_v14, 5 }
 0x17b   :  { %v1141_v6 = vmax.f32 %v1132_v53, 0.0 }
 0x17c   :  { %v1103_v8 = vpop.f32.mrb[80].mxu1  ;;  %v22053_v9 = vpop.f32.mrb[80].mxu0  ;;  %v5148_v15 = vsel %vm2323_vm7, %v5146_v27, %v22051_v0 }
 0x17d   :  { %v1146_v51 = vpack.c.bf16 %v1141_v6, %v1140_v5  ;;  %v1117_v4 = vmax.f32 %v22008_v11, %v1103_v8  ;;  %v18323_v20 = vpop.f32.mrb[81].mxu0  ;;  %18809 = vmatprep.mubr.msk.bf16.mxu1 %vm590_vm4, %v5148_v15  ;;  %v18311_v58 = vpop.f32.mrb[81].mxu1  ;;  %v2754_v11 = vsel %vm97_vm0, %v2751_v45, %v2753_v50  ;;  %v2875_v5 = vrot.slane %v22126_v61, 4  ;;  %v20170_v15 = vld [vmem:[%s25694_s3 + $0x50] ss:$0 sps:$4 sm:$0x33]  }
 0x17e   :  { %v22063_v17 = vpop.f32.mrb[82].mxu0  ;;  %v1106_v19 = vpop.f32.mrb[82].mxu1 }
 0x17f   :  { %v1159_v63 = vrot.slane %v1146_v51, 4  ;;  %v1133_v13 = vadd.f32 %v22017_v23, %v1117_v4  ;;  %v18324_v39 = vpop.f32.mrb[83].mxu0  ;;  %v18312_v16 = vpop.f32.mrb[83].mxu1  ;;  %v2876_v19 = vsel %vm97_vm0, %v22061_v44, %v2875_v5 }
 0x180   :  { %v20171_v39 = vld [vmem:[%s25694_s3 + $0x54] sm:$0xff]  }
 0x181   :  { %v1160_v18 = vsel %vm97_vm0, %v1157_v7, %v1159_v63  ;;  %v1142_v22 = vmax.f32 %v1133_v13, 0.0  ;;  %18558 = vmatmul.mubr.msk.bf16.vlgmr.msra.gmra.mrb[156].mxu0 %vm590_vm4, %v2754_v11  ;;  %v22074_v33 = vld [vmem:[#allocation2 + $0x30] sm:$0xff]  ;;  %v3016_v13 = vsel %vm2354_vm5, %v20170_v15, 0 }
 0x182   :  { %1172 = vst.msk [vmem:[#allocation2 + $0x38] sm:$0xff] %vm590_vm4, %v1160_v18  ;;  %18561 = vmatprep.mubr.msk.bf16.mxu0 %vm590_vm4, %v2756_v48  ;;  %18566 = vmatpush3.bf16.msra.mxu0 %v20164_v35  ;;  %v22079_v23 = vrot.slane %v22074_v33, 1  ;;  %v2976_v18 = vld [vmem:[#allocation2 + $0x8] sm:$0xe0] }
 0x183   :  { %v1147_v21 = vpack.c.bf16 %v1142_v22, %v1142_v22  ;;  %19990 = vmatprep.subr.msk.bf16.mxu0 %vm2354_vm5, %v20166_v10  ;;  %v2860_v10 = vld [vmem:[#allocation2 + $0x28] sm:$0xf] }
 0x184   :  { %v22089_v28 = vpop.f32.mrb[84].mxu0  ;;  %v22091_v29 = vpop.f32.mrb[84].mxu1  ;;  %v22096_v30 = vsel %vm2323_vm7, %v22051_v0, %v22079_v23 }
 0x185   :  { %v1161_v32 = vrot.slane %v1147_v21, 4  ;;  %v1430_v35 = vmax.f32 %v22033_v38, %v22091_v29  ;;  %v18327_v36 = vpop.f32.mrb[85].mxu0  ;;  %v18343_v40 = vpop.f32.mrb[85].mxu1  ;;  %18810 = vmatmul.mubr.msk.bf16.vlgmr.msra.gmra.mrb[164].mxu1 %vm590_vm4, %v22096_v30 }
 0x186   :  { %v22102_v56 = vpop.f32.mrb[86].mxu0  ;;  %v22104_v37 = vpop.f32.mrb[86].mxu1  ;;  %18568 = vmatpush3.bf16.msra.mxu0 %v2901_v24  ;;  %18818 = vmatpush3.bf16.msra.mxu1 %v21821_v34  ;;  %v2758_v34 = vsel %vm97_vm0, %v22061_v44, %v2757_v31  ;;  %v2877_v44 = vrot.slane %v2860_v10, 4  ;;  %v2985_v31 = vrot.slane %v2976_v18, 5  ;;  %v2977_v10 = vld [vmem:[#allocation2 + $0x28] sm:$0x1f] }
 0x187   :  { %v1162_v1 = vsel %vm97_vm0, %v1159_v63, %v1161_v32  ;;  %v1431_v43 = vmax.f32 %v22037_v47, %v22104_v37  ;;  %v18328_v45 = vpop.f32.mrb[87].mxu0  ;;  %v18344_v7 = vpop.f32.mrb[87].mxu1  ;;  %18577 = vmatprep.subr.bf16.mxu0 %v20167_v26  ;;  %20011 = vmatprep.subr.msk.bf16.mxu1 %vm2354_vm5, %v20169_v3  ;;  %v2986_v3 = vrot.slane %v21870_v12, 5  ;;  %v3091_v37 = vld [vmem:[#allocation2 + $0x8] sm:$0xc0]  ;;  %v2992_v18 = vrot.slane %v2977_v10, 5 }
 0x188   :  { %1173 = vst.msk [vmem:[#allocation2 + $0x40] sm:$0xff] %vm590_vm4, %v1162_v1  ;;  %v2878_v36 = vsel %vm97_vm0, %v2875_v5, %v2877_v44  ;;  %v20174_v7 = vld [vmem:[%s25694_s3 + $0x5c] ss:$0 sps:$4 sm:$0x33]  }
 0x189   :  { %18562 = vmatmul.mubr.msk.bf16.gmra.mrb[160].mxu0 %vm590_vm4, %v2758_v34  ;;  %v22122_v57 = vld [vmem:[#allocation2 + $0x38] sm:$0xff]  ;;  %v2987_v40 = vsel %vm2984_vm10, %v2985_v31, %v2986_v3  ;;  %v3131_v47 = vsel %vm2354_vm5, %v20174_v7, 0  ;;  %v5446_v31 = vld [vmem:[#allocation2 + $0x20] sm:$0xf8] }
 0x18a   :  { %18569 = vmatprep.mubr.msk.bf16.mxu0 %vm590_vm4, %v2872_v55  ;;  %v5151_v59 = vrot.slane %v22122_v57, 1  ;;  %18820 = vmatpush3.bf16.msra.mxu1 %v5266_v42  ;;  %v20173_v42 = vld [vmem:[%s25694_s3 + $0x20] ss:$0 sps:$4 sm:$0x33]  }
 0x18b   :  { %18829 = vmatprep.subr.bf16.mxu1 %v22115_v52  ;;  %v5371_v14 = vsel %vm2354_vm5, %v20173_v42, 0 }
 0x18c   :  { %v22129_v62 = vpop.f32.mrb[88].mxu0  ;;  %v22131_v49 = vpop.f32.mrb[88].mxu1  ;;  %v5152_v41 = vsel %vm2323_vm7, %v22079_v23, %v5151_v59 }
 0x18d   :  { %v1432_v53 = vmax.f32 %v22053_v9, %v22131_v49  ;;  %v18331_v2 = vpop.f32.mrb[89].mxu0  ;;  %v18347_v27 = vpop.f32.mrb[89].mxu1  ;;  %18813 = vmatprep.mubr.msk.bf16.mxu1 %vm590_vm4, %v5152_v41  ;;  %v5345_v9 = vrot.slane %v22122_v57, 2 }
 0x18e   :  { %v22139_v6 = vpop.f32.mrb[90].mxu0  ;;  %v22141_v8 = vpop.f32.mrb[90].mxu1  ;;  %v2990_v2 = vrot.slane %v22126_v61, 5 }
 0x18f   :  { %v1433_v50 = vmax.f32 %v22063_v17, %v22141_v8  ;;  %v18332_v51 = vpop.f32.mrb[91].mxu0  ;;  %v18348_v4 = vpop.f32.mrb[91].mxu1  ;;  %v5137_v20 = vld [vmem:[#allocation2 + $0x40] sm:$0x1] }
 0x190   :  { %v5153_v58 = vrot.slane %v5137_v20, 1  ;;  %v22215_v4 = vrot.slane %v22046_v54, 2  ;;  %v2989_v20 = vsel %vm2984_vm10, %v2986_v3, %v2988_v46  ;;  %v2993_v49 = vsel %vm2984_vm10, %v2990_v2, %v2992_v18 }
 0x191   :  { %18570 = vmatmul.mubr.msk.bf16.vlgmr.msra.gmra.mrb[156].mxu0 %vm590_vm4, %v2756_v48 }
 0x192   :  { %18573 = vmatprep.mubr.msk.bf16.mxu0 %vm590_vm4, %v2876_v19  ;;  %18578 = vmatpush3.bf16.msra.mxu0 %v20167_v26  ;;  %v5154_v63 = vsel %vm2323_vm7, %v5151_v59, %v5153_v58  ;;  %v2991_v58 = vsel %vm2984_vm10, %v2988_v46, %v2990_v2  ;;  %v3100_v46 = vrot.slane %v3091_v37, 6 }
 0x193   :  { %18814 = vmatmul.mubr.msk.bf16.gmra.mrb[168].mxu1 %vm590_vm4, %v5154_v63  ;;  %19991 = vmatprep.subr.msk.bf16.mxu0 %vm2354_vm5, %v20170_v15  ;;  %v5333_v15 = vld [vmem:[#allocation2 + $0x20] sm:$0xfc] }
 0x194   :  { %v22159_v16 = vpop.f32.mrb[92].mxu0  ;;  %v22161_v11 = vpop.f32.mrb[92].mxu1  ;;  %18821 = vmatprep.mubr.msk.bf16.mxu1 %vm590_vm4, %v22126_v61  ;;  %v5340_v19 = vrot.slane %v5333_v15, 2  ;;  %v5453_v15 = vrot.slane %v5446_v31, 3 }
 0x195   :  { %v1434_v22 = vmax.f32 %v22089_v28, %v22161_v11  ;;  %v18335_v48 = vpop.f32.mrb[93].mxu0  ;;  %v18351_v60 = vpop.f32.mrb[93].mxu1 }
 0x196   :  { %v1308_v21 = vpop.f32.mrb[94].mxu0  ;;  %v22168_v24 = vpop.f32.mrb[94].mxu1  ;;  %18580 = vmatpush3.bf16.msra.mxu0 %v3016_v13  ;;  %v5342_v63 = vsel %vm2520_vm8, %v5340_v19, %v22215_v4  ;;  %v22232_v13 = vld [vmem:[%s25694_s3 + $0x60] sm:$0xff]   ;;  %v22243_v48 = vld [vmem:[%s25694_s3 + $0x68] ss:$0 sps:$4 sm:$0x33]  }
 0x197   :  { %v1435_v25 = vmax.f32 %v22102_v56, %v22168_v24  ;;  %v18336_v26 = vpop.f32.mrb[95].mxu0  ;;  %v18352_v32 = vpop.f32.mrb[95].mxu1  ;;  %18589 = vmatprep.subr.bf16.mxu0 %v20171_v39  ;;  %v22320_v56 = vld [vmem:[%s25694_s3 + $0x6c] sm:$0xff]  }
 0x199   :  { %18574 = vmatmul.mubr.msk.bf16.gmra.mrb[160].mxu0 %vm590_vm4, %v2878_v36 }
 0x19a   :  { %18581 = vmatprep.mubr.msk.bf16.mxu0 %vm590_vm4, %v2987_v40  ;;  %v22253_v40 = vrot.slane %v22074_v33, 2 }
 0x19b   :  { %18822 = vmatmul.mubr.msk.bf16.vlgmr.msra.gmra.mrb[164].mxu1 %vm590_vm4, %v22046_v54 }
 0x19c   :  { %v22181_v1 = vpop.f32.mrb[96].mxu1  ;;  %v1520_v45 = vpop.f32.mrb[96].mxu0  ;;  %18825 = vmatprep.mubr.msk.bf16.mxu1 %vm590_vm4, %v22074_v33  ;;  %18830 = vmatpush3.bf16.msra.mxu1 %v22115_v52  ;;  %v22203_v52 = vld [vmem:[%s25694_s3 + $0x24] sm:$0xff]   ;;  %v22275_v2 = vsel %vm2520_vm8, %v22215_v4, %v22253_v40 }
 0x19d   :  { %v1436_v34 = vmax.f32 %v22129_v62, %v22181_v1  ;;  %v22195_v55 = vmax.f32 %v1430_v35, %v1520_v45  ;;  %v18355_v59 = vpop.f32.mrb[97].mxu1  ;;  %v18367_v41 = vpop.f32.mrb[97].mxu0  ;;  %20012 = vmatprep.subr.msk.bf16.mxu1 %vm2354_vm5, %v20173_v42 }
 0x19e   :  { %v22205_v27 = vpop.f32.mrb[98].mxu1  ;;  %v1523_v5 = vpop.f32.mrb[98].mxu0  ;;  %v22265_v41 = vld [vmem:[#allocation2 + $0x18] sm:$0xff] }
 0x19f   :  { %v1437_v38 = vmax.f32 %v22139_v6, %v22205_v27  ;;  %v22212_v29 = vmax.f32 %v1431_v43, %v1523_v5  ;;  %v18368_v35 = vpop.f32.mrb[99].mxu0  ;;  %v18356_v51 = vpop.f32.mrb[99].mxu1  ;;  %v3101_v43 = vrot.slane %v21870_v12, 6  ;;  %v3103_v17 = vrot.slane %v22265_v41, 6 }
 0x1a0   :  { %18832 = vmatpush3.bf16.msra.mxu1 %v5371_v14  ;;  %v22280_v14 = vld [vmem:[%s25693_s2] ss:$0 sm:$0xff]  ;;  %v3105_v5 = vrot.slane %v22126_v61, 6  ;;  %v5346_v35 = vsel %vm2520_vm8, %v22253_v40, %v5345_v9 }
 0x1a1   :  { %18582 = vmatmul.mubr.msk.bf16.vlgmr.msra.gmra.mrb[156].mxu0 %vm590_vm4, %v2989_v20  ;;  %18841 = vmatprep.subr.bf16.mxu1 %v22203_v52  ;;  %v3102_v59 = vsel %vm2354_vm5, %v3100_v46, %v3101_v43  ;;  %v22288_v20 = vrot.slane %v22046_v54, 3 }
 0x1a2   :  { %18585 = vmatprep.mubr.msk.bf16.mxu0 %vm590_vm4, %v2991_v58  ;;  %18590 = vmatpush3.bf16.msra.mxu0 %v20171_v39  ;;  %v20177_v39 = vld [vmem:[%s25694_s3 + $0x2c] ss:$0 sps:$4 sm:$0x33]   ;;  %v22293_v58 = vld [vmem:[%s25694_s3 + $0x30] sm:$0xff]  }
 0x1a3   :  { %18826 = vmatmul.mubr.msk.bf16.gmra.mrb[168].mxu1 %vm590_vm4, %v22122_v57  ;;  %19992 = vmatprep.subr.msk.bf16.mxu0 %vm2354_vm5, %v20174_v7  ;;  %v5484_v8 = vsel %vm2354_vm5, %v20177_v39, 0 }
 0x1a4   :  { %v22237_v44 = vpop.f32.mrb[100].mxu1  ;;  %v1528_v12 = vpop.f32.mrb[100].mxu0  ;;  %18833 = vmatprep.mubr.msk.bf16.mxu1 %vm590_vm4, %v5342_v63 }
 0x1a5   :  { %v1438_v60 = vmax.f32 %v22159_v16, %v22237_v44  ;;  %v22250_v3 = vmax.f32 %v1432_v53, %v1528_v12  ;;  %v18371_v21 = vpop.f32.mrb[101].mxu0  ;;  %v18359_v26 = vpop.f32.mrb[101].mxu1  ;;  %v5334_v53 = vld [vmem:[#allocation2 + $0x40] sm:$0x3] }
 0x1a6   :  { %v1531_v32 = vpop.f32.mrb[102].mxu0  ;;  %v1427_v36 = vpop.f32.mrb[102].mxu1  ;;  %18592 = vmatpush3.bf16.msra.mxu0 %v3131_v47  ;;  %v5347_v51 = vrot.slane %v5334_v53, 2 }
 0x1a7   :  { %v22258_v42 = vmax.f32 %v1433_v50, %v1531_v32  ;;  %v18372_v45 = vpop.f32.mrb[103].mxu0  ;;  %v18360_v7 = vpop.f32.mrb[103].mxu1  ;;  %18601 = vmatprep.subr.bf16.mxu0 %v22232_v13  ;;  %v3246_v50 = vsel %vm2354_vm5, %v22243_v48, 0  ;;  %v3092_v36 = vld [vmem:[#allocation2 + $0x28] sm:$0x3f] }
 0x1a8   :  { %v5348_v24 = vsel %vm2520_vm8, %v5345_v9, %v5347_v51  ;;  %v3107_v7 = vrot.slane %v3092_v36, 6  ;;  %v22342_v51 = vrot.slane %v22074_v33, 3 }
 0x1a9   :  { %18586 = vmatmul.mubr.msk.bf16.gmra.mrb[160].mxu0 %vm590_vm4, %v2993_v49 }
 0x1aa   :  { %18593 = vmatprep.mubr.msk.bf16.mxu0 %vm590_vm4, %v3102_v59  ;;  %v22367_v6 = vsel %vm98_vm1, %v22288_v20, %v22342_v51 }
 0x1ab   :  { %18834 = vmatmul.mubr.msk.bf16.vlgmr.msra.gmra.mrb[164].mxu1 %vm590_vm4, %v22275_v2 }
 0x1ac   :  { %v1536_v19 = vpop.f32.mrb[104].mxu0  ;;  %v1648_v10 = vpop.f32.mrb[104].mxu1  ;;  %18837 = vmatprep.mubr.msk.bf16.mxu1 %vm590_vm4, %v5346_v35  ;;  %18842 = vmatpush3.bf16.msra.mxu1 %v22203_v52 }
 0x1ad   :  { %v22300_v47 = vmax.f32 %v1434_v22, %v1536_v19  ;;  %v1686_v37 = vmax.f32 %v22195_v55, %v1648_v10  ;;  %v18375_v63 = vpop.f32.mrb[105].mxu0  ;;  %v18391_v12 = vpop.f32.mrb[105].mxu1  ;;  %20013 = vmatprep.subr.msk.bf16.mxu1 %vm2354_vm5, %v20177_v39  ;;  %v3206_v22 = vld [vmem:[#allocation2 + $0x8] sm:$0x80]  ;;  %v3104_v55 = vsel %vm2354_vm5, %v3101_v43, %v3103_v17  ;;  %v3106_v39 = vsel %vm2354_vm5, %v3103_v17, %v3105_v5 }
 0x1ae   :  { %v1539_v18 = vpop.f32.mrb[106].mxu0  ;;  %v1651_v21 = vpop.f32.mrb[106].mxu1  ;;  %v5455_v43 = vsel %vm98_vm1, %v5453_v15, %v22288_v20  ;;  %v3215_v49 = vrot.slane %v3206_v22, 7  ;;  %v5458_v19 = vrot.slane %v22122_v57, 3 }
 0x1af   :  { %v1702_v26 = vadd.f32 %v22280_v14, %v1686_v37  ;;  %v22308_v31 = vmax.f32 %v1435_v25, %v1539_v18  ;;  %v1687_v52 = vmax.f32 %v22212_v29, %v1651_v21  ;;  %v18376_v28 = vpop.f32.mrb[107].mxu0  ;;  %v18392_v11 = vpop.f32.mrb[107].mxu1  ;;  %v20181_v10 = vld [vmem:[%s25694_s3 + $0x38] ss:$0 sps:$4 sm:$0x33]   ;;  %v3108_v37 = vsel %vm2354_vm5, %v3105_v5, %v3107_v7 }
 0x1b0   :  { %18844 = vmatpush3.bf16.msra.mxu1 %v5484_v8 }
 0x1b1   :  { %v1703_v32 = vadd.f32 %v22280_v14, %v1687_v52  ;;  %18594 = vmatmul.mubr.msk.bf16.vlgmr.msra.gmra.mrb[156].mxu0 %vm590_vm4, %v3104_v55  ;;  %18853 = vmatprep.subr.bf16.mxu1 %v22293_v58  ;;  %v1711_v25 = vmax.f32 %v1702_v26, 0.0 }
 0x1b2   :  { %18597 = vmatprep.mubr.msk.bf16.mxu0 %vm590_vm4, %v3106_v39  ;;  %18602 = vmatpush3.bf16.msra.mxu0 %v22232_v13  ;;  %v22332_v13 = vld [vmem:[#allocation2 + $0x10] sm:$0xff] }
 0x1b3   :  { %v1712_v29 = vmax.f32 %v1703_v32, 0.0  ;;  %18838 = vmatmul.mubr.msk.bf16.gmra.mrb[168].mxu1 %vm590_vm4, %v5348_v24  ;;  %19993 = vmatprep.subr.msk.bf16.mxu0 %vm2354_vm5, %v22243_v48  ;;  %v3216_v9 = vrot.slane %v22332_v13, 7 }
 0x1b4   :  { %v1544_v45 = vpop.f32.mrb[108].mxu0  ;;  %v1656_v46 = vpop.f32.mrb[108].mxu1  ;;  %18845 = vmatprep.mubr.msk.bf16.mxu1 %vm590_vm4, %v5455_v43 }
 0x1b5   :  { %v1720_v53 = vpack.c.bf16 %v1712_v29, %v1711_v25  ;;  %v22338_v59 = vmax.f32 %v1436_v34, %v1544_v45  ;;  %v1688_v17 = vmax.f32 %v22250_v3, %v1656_v46  ;;  %v18379_v48 = vpop.f32.mrb[109].mxu0  ;;  %v18395_v8 = vpop.f32.mrb[109].mxu1  ;;  %v3217_v12 = vsel %vm3214_vm11, %v3215_v49, %v3216_v9 }
 0x1b6   :  { %v1547_v15 = vpop.f32.mrb[110].mxu0  ;;  %v1659_v35 = vpop.f32.mrb[110].mxu1  ;;  %18604 = vmatpush3.bf16.msra.mxu0 %v3246_v50 }
 0x1b7   :  { %1725 = vst.msk [vmem:[#allocation2 + $0x48] sm:$0xff] %vm590_vm4, %v1720_v53  ;;  %v1704_v62 = vadd.f32 %v22280_v14, %v1688_v17  ;;  %v22353_v1 = vmax.f32 %v1437_v38, %v1547_v15  ;;  %v1689_v34 = vmax.f32 %v22258_v42, %v1659_v35  ;;  %v18380_v3 = vpop.f32.mrb[111].mxu0  ;;  %v18396_v50 = vpop.f32.mrb[111].mxu1  ;;  %18613 = vmatprep.subr.bf16.mxu0 %v22320_v56 }
 0x1b9   :  { %v1705_v63 = vadd.f32 %v22280_v14, %v1689_v34  ;;  %18598 = vmatmul.mubr.msk.bf16.gmra.mrb[160].mxu0 %vm590_vm4, %v3108_v37 }
 0x1ba   :  { %18605 = vmatprep.mubr.msk.bf16.mxu0 %vm590_vm4, %v3217_v12 }
 0x1bb   :  { %14 = vsyncpa [#allocation5], 0  ;;  %v1713_v27 = vmax.f32 %v1704_v62, 0.0  ;;  %v1714_v38 = vmax.f32 %v1705_v63, 0.0  ;;  %18846 = vmatmul.mubr.msk.bf16.vlgmr.msra.gmra.mrb[164].mxu1 %vm590_vm4, %v22367_v6  ;;  %v5459_v42 = vsel %vm98_vm1, %v22342_v51, %v5458_v19  ;;  %v5447_v5 = vld [vmem:[#allocation2 + $0x40] sm:$0x7] }
 0x1bc   :  { %v1552_v18 = vpop.f32.mrb[112].mxu0  ;;  %v1664_v21 = vpop.f32.mrb[112].mxu1  ;;  %18849 = vmatprep.mubr.msk.bf16.mxu1 %vm590_vm4, %v5459_v42  ;;  %v3218_v26 = vrot.slane %v22265_v41, 7  ;;  %18854 = vmatpush3.bf16.msra.mxu1 %v22293_v58  ;;  %v5597_v52 = vsel %vm2354_vm5, %v20181_v10, 0  ;;  %v3220_v39 = vrot.slane %v22126_v61, 7  ;;  %v22388_v58 = vld [vmem:[%s25694_s3 + $0x3c] sm:$0xff]  }
 0x1bd   :  { %v1721_v28 = vpack.c.bf16 %v1714_v38, %v1713_v27  ;;  %v22380_v11 = vmax.f32 %v1438_v60, %v1552_v18  ;;  %v1690_v22 = vmax.f32 %v22300_v47, %v1664_v21  ;;  %v18383_v55 = vpop.f32.mrb[113].mxu0  ;;  %v18399_v32 = vpop.f32.mrb[113].mxu1  ;;  %20014 = vmatprep.subr.msk.bf16.mxu1 %vm2354_vm5, %v20181_v10  ;;  %v5460_v25 = vrot.slane %v5447_v5, 3  ;;  %v5559_v29 = vld [vmem:[#allocation2 + $0x20] sm:$0xf0]  ;;  %v20183_v35 = vld [vmem:[%s25694_s3 + $0x78] sm:$0xff]  }
 0x1be   :  { %v1555_v36 = vpop.f32.mrb[114].mxu0  ;;  %v1667_v24 = vpop.f32.mrb[114].mxu1  ;;  %v22394_v43 = vrot.slane %v22046_v54, 4  ;;  %v20182_v45 = vld [vmem:[%s25694_s3 + $0x74] ss:$0 sps:$4 sm:$0x33]   ;;  %v3219_v46 = vsel %vm3214_vm11, %v3216_v9, %v3218_v26  ;;  %v3221_v49 = vsel %vm3214_vm11, %v3218_v26, %v3220_v39 }
 0x1bf   :  { %1726 = vst.msk [vmem:[#allocation2 + $0x50] sm:$0xff] %vm590_vm4, %v1721_v28  ;;  %v1706_v16 = vadd.f32 %v22280_v14, %v1690_v22  ;;  %v1691_v44 = vmax.f32 %v22308_v31, %v1667_v24  ;;  %v18384_v60 = vpop.f32.mrb[115].mxu0  ;;  %v18400_v47 = vpop.f32.mrb[115].mxu1  ;;  %v5566_v53 = vrot.slane %v5559_v29, 4  ;;  %v3207_v31 = vld [vmem:[#allocation2 + $0x28] sm:$0x7f]  ;;  %v5461_v17 = vsel %vm98_vm1, %v5458_v19, %v5460_v25 }
 0x1c0   :  { %18856 = vmatpush3.bf16.msra.mxu1 %v5597_v52  ;;  %v3348_v15 = vsel %vm2354_vm5, %v20182_v45, 0  ;;  %v22422_v12 = vrot.slane %v22074_v33, 4  ;;  %v22428_v18 = vrot.slane %v22122_v57, 4  ;;  %v20185_v26 = vld [vmem:[%s25694_s3 + $0x44] ss:$0 sps:$4 sm:$0x33]  }
 0x1c1   :  { %v1707_v7 = vadd.f32 %v22280_v14, %v1691_v44  ;;  %18606 = vmatmul.mubr.msk.bf16.vlgmr.msra.gmra.mrb[156].mxu0 %vm590_vm4, %v3219_v46  ;;  %18865 = vmatprep.subr.bf16.mxu1 %v22388_v58  ;;  %v1715_v48 = vmax.f32 %v1706_v16, 0.0  ;;  %v5568_v9 = vsel %vm97_vm0, %v5566_v53, %v22394_v43  ;;  %v5560_v55 = vld [vmem:[#allocation2 + $0x40] sm:$0xf]  ;;  %v5716_v29 = vsel %vm2354_vm5, %v20185_v26, 0  ;;  %v20188_v16 = vld [vmem:[%s25694_s3 + $0x48] sm:$0xff]   ;;  %s21140_s24 = smov [#allocation4]  }
 0x1c2   :  { %18609 = vmatprep.mubr.msk.bf16.mxu0 %vm590_vm4, %v3221_v49  ;;  %18614 = vmatpush3.bf16.msra.mxu0 %v22320_v56  ;;  %v3222_v56 = vrot.slane %v3207_v31, 7  ;;  %v5572_v22 = vsel %vm97_vm0, %v22422_v12, %v22428_v18  ;;  %v5573_v47 = vrot.slane %v5560_v55, 4  ;;  %s15643_s25 = sshll.u32 %s21140_s24, 4  ;;  %s15644_s25 = int_to_ptr.vmem [resolvable:$true] %s15643_s25 }
 0x1c3   :  { %v1716_v8 = vmax.f32 %v1707_v7, 0.0  ;;  %18850 = vmatmul.mubr.msk.bf16.gmra.mrb[168].mxu1 %vm590_vm4, %v5461_v17  ;;  %19994 = vmatprep.subr.msk.bf16.mxu0 %vm2354_vm5, %v20182_v45  ;;  %v5672_v45 = vld [vmem:[#allocation2 + $0x28] sm:$0xf0]  ;;  %v20186_v7 = vld [vmem:[%s25694_s3 + $0x80] ss:$0 sps:$4 sm:$0x33]   ;;  %p21117_p1 = scmp.lt.s32.totalorder %s15644_s25, %s15644_s25 }
 0x1c4   :  { %v1672_v10 = vpop.f32.mrb[116].mxu1  ;;  %v22415_v62 = vpop.f32.mrb[116].mxu0  ;;  %18857 = vmatprep.mubr.msk.bf16.mxu1 %vm590_vm4, %v5568_v9  ;;  %v5685_v53 = vrot.slane %v5672_v45, 4  ;;  %v5574_v31 = vsel %vm97_vm0, %v22428_v18, %v5573_v47  ;;  %v5799_v47 = vrot.slane %v22074_v33, 5  ;;  %s21112_s26 = scalar_lea.vmem %s15644_s25, 32 }
 0x1c5   :  { %v1722_v19 = vpack.c.bf16 %v1716_v8, %v1715_v48  ;;  %v1692_v34 = vmax.f32 %v22338_v59, %v1672_v10  ;;  %v18403_v3 = vpop.f32.mrb[117].mxu1  ;;  %v18415_v50 = vpop.f32.mrb[117].mxu0  ;;  %v3223_v59 = vsel %vm3214_vm11, %v3220_v39, %v3222_v56  ;;  %v3453_v8 = vsel %vm2354_vm5, %v20186_v7, 0  ;;  %v20190_v45 = vld [vmem:[%s25694_s3 + $0x8c] ss:$0 sps:$4 sm:$0x33]   ;;  %p21113_p0 = scmp.ne.s32.totalorder %s15644_s25, %s21112_s26  ;;  %p21118_p2 = scmp.lt.s32.totalorder %s21112_s26, %s21112_s26 }
 0x1c6   :  { %v1675_v37 = vpop.f32.mrb[118].mxu1  ;;  %v22419_v63 = vpop.f32.mrb[118].mxu0  ;;  %18616 = vmatpush3.bf16.msra.mxu0 %v3348_v15  ;;  %v5687_v48 = vsel %vm97_vm0, %v5685_v53, %v22422_v12 }
 0x1c7   :  { %1727 = vst.msk [vmem:[#allocation2 + $0x58] sm:$0xff] %vm590_vm4, %v1722_v19  ;;  %v1708_v27 = vadd.f32 %v22280_v14, %v1692_v34  ;;  %v1693_v38 = vmax.f32 %v22353_v1, %v1675_v37  ;;  %v18416_v42 = vpop.f32.mrb[119].mxu0  ;;  %v18404_v5 = vpop.f32.mrb[119].mxu1  ;;  %18625 = vmatprep.subr.bf16.mxu0 %v20183_v35  ;;  %v22441_v1 = vsel %vm97_vm0, %v22394_v43, %v22422_v12  ;;  %p21119_p3 = por %p21118_p2, %p21117_p1 }
 0x1c8   :  { %v3423_v42 = vld [vmem:[#allocation2 + $0x18] sm:$0xff]  ;;  %v20189_v5 = vld [vmem:[%s25694_s3 + $0x50] ss:$0 sps:$4 sm:$0x33]  }
 0x1c9   :  { %v1709_v21 = vadd.f32 %v22280_v14, %v1693_v38  ;;  %18610 = vmatmul.mubr.msk.bf16.gmra.mrb[160].mxu0 %vm590_vm4, %v3223_v59  ;;  %v1717_v52 = vmax.f32 %v1708_v27, 0.0  ;;  %p21120_p4 = pnand %p21119_p3, %p21113_p0 }
 0x1ca   :  { %18617 = vmatprep.mubr.msk.bf16.mxu0 %vm590_vm4, %v22332_v13 }
 0x1cb   :  { %v1718_v28 = vmax.f32 %v1709_v21, 0.0  ;;  %18858 = vmatmul.mubr.msk.bf16.vlgmr.msra.gmra.mrb[164].mxu1 %vm590_vm4, %v22441_v1  ;;  %v5676_v21 = vld [vmem:[#allocation2 + $0x48] sm:$0xf] }
 0x1cc   :  { %v1680_v32 = vpop.f32.mrb[120].mxu1  ;;  %v22448_v39 = vpop.f32.mrb[120].mxu0  ;;  %18861 = vmatprep.mubr.msk.bf16.mxu1 %vm590_vm4, %v5572_v22  ;;  %18866 = vmatpush3.bf16.msra.mxu1 %v22388_v58 }
 0x1cd   :  { %v1723_v13 = vpack.c.bf16 %v1718_v28, %v1717_v52  ;;  %v1694_v36 = vmax.f32 %v22380_v11, %v1680_v32  ;;  %v18419_v24 = vpop.f32.mrb[121].mxu0  ;;  %v18407_v25 = vpop.f32.mrb[121].mxu1  ;;  %20015 = vmatprep.subr.msk.bf16.mxu1 %vm2354_vm5, %v20185_v26 }
 0x1ce   :  { %v22458_v44 = vpop.f32.mrb[122].mxu0  ;;  %v1683_v60 = vpop.f32.mrb[122].mxu1  ;;  %v5692_v24 = vrot.slane %v5676_v21, 4  ;;  %v5791_v25 = vld [vmem:[#allocation2 + $0x28] sm:$0xe0] }
 0x1cf   :  { %1728 = vst.msk [vmem:[#allocation2 + $0x60] sm:$0xff] %vm590_vm4, %v1723_v13  ;;  %v1710_v58 = vadd.f32 %v22280_v14, %v1694_v36  ;;  %v18420_v11 = vpop.f32.mrb[123].mxu0  ;;  %v18408_v46 = vpop.f32.mrb[123].mxu1 }
 0x1d0   :  { %18868 = vmatpush3.bf16.msra.mxu1 %v5716_v29 }
 0x1d1   :  { %v1719_v49 = vmax.f32 %v1710_v58, 0.0  ;;  %18618 = vmatmul.mubr.msk.bf16.vlgmr.msra.gmra.mrb[156].mxu0 %vm590_vm4, %v22265_v41  ;;  %18877 = vmatprep.subr.bf16.mxu1 %v20188_v16  ;;  %v20187_v41 = vld [vmem:[%s25694_s3 + $0x84] sm:$0xff]   ;;  %v5798_v58 = vrot.slane %v5791_v25, 5 }
 0x1d2   :  { %18621 = vmatprep.mubr.msk.bf16.mxu0 %vm590_vm4, %v22126_v61  ;;  %18626 = vmatpush3.bf16.msra.mxu0 %v20183_v35  ;;  %v22484_v35 = vld [vmem:[#allocation2 + $0x40] sm:$0xff]  ;;  %v5792_v25 = vld [vmem:[#allocation2 + $0x48] sm:$0x1f] }
 0x1d3   :  { %v1724_v17 = vpack.c.bf16 %v1719_v49, %v1719_v49  ;;  %18862 = vmatmul.mubr.msk.bf16.gmra.mrb[168].mxu1 %vm590_vm4, %v5574_v31  ;;  %19995 = vmatprep.subr.msk.bf16.mxu0 %vm2354_vm5, %v20186_v7  ;;  %v22496_v38 = vrot.slane %v22484_v35, 4  ;;  %v5800_v46 = vsel %vm2984_vm10, %v5798_v58, %v5799_v47  ;;  %v3573_v7 = vsel %vm2354_vm5, %v20190_v45, 0  ;;  %v20191_v49 = vld [vmem:[%s25694_s3 + $0x90] sm:$0xff]  }
 0x1d4   :  { %v22479_v9 = vpop.f32.mrb[124].mxu0  ;;  %v22481_v15 = vpop.f32.mrb[124].mxu1  ;;  %18869 = vmatprep.mubr.msk.bf16.mxu1 %vm590_vm4, %v5687_v48  ;;  %v5803_v21 = vrot.slane %v22484_v35, 5 }
 0x1d5   :  { %1729 = vst.msk [vmem:[#allocation2 + $0x68] sm:$0xf] %vm595_vm6, %v1724_v17  ;;  %v1986_v10 = vmax.f32 %v22415_v62, %v22481_v15  ;;  %v18423_v56 = vpop.f32.mrb[125].mxu0  ;;  %v18439_v19 = vpop.f32.mrb[125].mxu1  ;;  %v5691_v59 = vsel %vm97_vm0, %v22428_v18, %v22496_v38  ;;  %v20192_v18 = vld [vmem:[%s25694_s3 + $0x54] sm:$0xff]   ;;  %v5693_v11 = vsel %vm97_vm0, %v22496_v38, %v5692_v24 }
 0x1d6   :  { %v22489_v34 = vpop.f32.mrb[126].mxu0  ;;  %v22491_v3 = vpop.f32.mrb[126].mxu1  ;;  %18628 = vmatpush3.bf16.msra.mxu0 %v3453_v8 }
 0x1d7   :  { %v1987_v50 = vmax.f32 %v22419_v63, %v22491_v3  ;;  %v18424_v37 = vpop.f32.mrb[127].mxu0  ;;  %v18440_v27 = vpop.f32.mrb[127].mxu1  ;;  %18637 = vmatprep.subr.bf16.mxu0 %v20187_v41  ;;  %v20195_v3 = vld [vmem:[%s25694_s3 + $0x9c] sm:$0xff]  }
 0x1d8   :  { %v5801_v37 = vrot.slane %v22122_v57, 5 }
 0x1d9   :  { %18622 = vmatmul.mubr.msk.bf16.gmra.mrb[160].mxu0 %vm590_vm4, %v22046_v54 }
 0x1da   :  { %18629 = vmatprep.mubr.msk.bf16.mxu0 %vm590_vm4, %v3423_v42  ;;  %v5804_v24 = vsel %vm2984_vm10, %v5801_v37, %v5803_v21 }
 0x1db   :  { %18870 = vmatmul.mubr.msk.bf16.vlgmr.msra.gmra.mrb[164].mxu1 %vm590_vm4, %v5572_v22  ;;  %v5829_v22 = vsel %vm2354_vm5, %v20189_v5, 0 }
 0x1dc   :  { %v22508_v26 = vpop.f32.mrb[128].mxu0  ;;  %v22510_v52 = vpop.f32.mrb[128].mxu1  ;;  %18873 = vmatprep.mubr.msk.bf16.mxu1 %vm590_vm4, %v5691_v59  ;;  %18878 = vmatpush3.bf16.msra.mxu1 %v20188_v16 }
 0x1dd   :  { %v1988_v28 = vmax.f32 %v22448_v39, %v22510_v52  ;;  %v18427_v55 = vpop.f32.mrb[129].mxu0  ;;  %v18443_v32 = vpop.f32.mrb[129].mxu1  ;;  %20016 = vmatprep.subr.msk.bf16.mxu1 %vm2354_vm5, %v20189_v5  ;;  %v5916_v39 = vrot.slane %v22484_v35, 6 }
 0x1de   :  { %v22520_v13 = vpop.f32.mrb[130].mxu0  ;;  %v22522_v36 = vpop.f32.mrb[130].mxu1  ;;  %v20193_v32 = vld [vmem:[%s25694_s3 + $0x5c] ss:$0 sps:$4 sm:$0x33]  }
 0x1df   :  { %v1989_v29 = vmax.f32 %v22458_v44, %v22522_v36  ;;  %v18428_v16 = vpop.f32.mrb[131].mxu0  ;;  %v18444_v60 = vpop.f32.mrb[131].mxu1  ;;  %v5905_v36 = vld [vmem:[#allocation2 + $0x48] sm:$0x3f] }
 0x1e0   :  { %18880 = vmatpush3.bf16.msra.mxu1 %v5829_v22  ;;  %v5802_v22 = vsel %vm2984_vm10, %v5799_v47, %v5801_v37  ;;  %v5912_v37 = vrot.slane %v22074_v33, 6 }
 0x1e1   :  { %18630 = vmatmul.mubr.msk.bf16.vlgmr.msra.gmra.mrb[156].mxu0 %vm590_vm4, %v22126_v61  ;;  %18889 = vmatprep.subr.bf16.mxu1 %v20192_v18 }
 0x1e2   :  { %18633 = vmatprep.mubr.msk.bf16.mxu0 %vm590_vm4, %v22046_v54  ;;  %18638 = vmatpush3.bf16.msra.mxu0 %v20187_v41  ;;  %v3528_v54 = vld [vmem:[#allocation2 + $0x18] sm:$0xfe]  ;;  %v3543_v41 = vrot.slane %v22126_v61, 1 }
 0x1e3   :  { %18874 = vmatmul.mubr.msk.bf16.gmra.mrb[168].mxu1 %vm590_vm4, %v5693_v11  ;;  %19996 = vmatprep.subr.msk.bf16.mxu0 %vm2354_vm5, %v20190_v45  ;;  %v3542_v5 = vrot.slane %v3528_v54, 1 }
 0x1e4   :  { %v22543_v53 = vpop.f32.mrb[132].mxu0  ;;  %v22545_v31 = vpop.f32.mrb[132].mxu1  ;;  %18881 = vmatprep.mubr.msk.bf16.mxu1 %vm590_vm4, %v5800_v46  ;;  %v5942_v46 = vsel %vm2354_vm5, %v20193_v32, 0 }
 0x1e5   :  { %v1990_v17 = vmax.f32 %v22479_v9, %v22545_v31  ;;  %v18431_v48 = vpop.f32.mrb[133].mxu0  ;;  %v18447_v8 = vpop.f32.mrb[133].mxu1  ;;  %v3544_v55 = vsel %vm2323_vm7, %v3542_v5, %v3543_v41  ;;  %v3546_v5 = vsel %vm2323_vm7, %v3543_v41, %v22051_v0 }
 0x1e6   :  { %v1864_v56 = vpop.f32.mrb[134].mxu0  ;;  %v22551_v19 = vpop.f32.mrb[134].mxu1  ;;  %18640 = vmatpush3.bf16.msra.mxu0 %v3573_v7  ;;  %v20196_v7 = vld [vmem:[%s25694_s3 + $0x60] sm:$0xff]   ;;  %v5805_v48 = vrot.slane %v5792_v25, 5  ;;  %v5904_v8 = vld [vmem:[#allocation2 + $0x28] sm:$0xc0] }
 0x1e7   :  { %v1991_v27 = vmax.f32 %v22489_v34, %v22551_v19  ;;  %v18432_v42 = vpop.f32.mrb[135].mxu0  ;;  %v18448_v59 = vpop.f32.mrb[135].mxu1  ;;  %18649 = vmatprep.subr.bf16.mxu0 %v20191_v49  ;;  %v3657_v25 = vrot.slane %v22126_v61, 2 }
 0x1e8   :  { %v20194_v42 = vld [vmem:[%s25694_s3 + $0x98] ss:$0 sps:$4 sm:$0x33]   ;;  %v5911_v59 = vrot.slane %v5904_v8, 6  ;;  %v5806_v63 = vsel %vm2984_vm10, %v5803_v21, %v5805_v48 }
 0x1e9   :  { %18634 = vmatmul.mubr.msk.bf16.gmra.mrb[160].mxu0 %vm590_vm4, %v22074_v33  ;;  %v3687_v0 = vsel %vm2354_vm5, %v20194_v42, 0 }
 0x1ea   :  { %18641 = vmatprep.mubr.msk.bf16.mxu0 %vm590_vm4, %v3544_v55  ;;  %v3532_v55 = vld [vmem:[#allocation2 + $0x38] sm:$0x1]  ;;  %v5913_v33 = vsel %vm2354_vm5, %v5911_v59, %v5912_v37  ;;  %v22649_v59 = vld [vmem:[%s25694_s3 + $0x6c] sm:$0xff]  }
 0x1eb   :  { %18882 = vmatmul.mubr.msk.bf16.vlgmr.msra.gmra.mrb[164].mxu1 %vm590_vm4, %v5802_v22 }
 0x1ec   :  { %v22567_v16 = vpop.f32.mrb[136].mxu1  ;;  %v2076_v60 = vpop.f32.mrb[136].mxu0  ;;  %18885 = vmatprep.mubr.msk.bf16.mxu1 %vm590_vm4, %v5804_v24  ;;  %18890 = vmatpush3.bf16.msra.mxu1 %v20192_v18 }
 0x1ed   :  { %v1992_v45 = vmax.f32 %v22508_v26, %v22567_v16  ;;  %v22575_v58 = vmax.f32 %v1986_v10, %v2076_v60  ;;  %v18451_v47 = vpop.f32.mrb[137].mxu1  ;;  %v18463_v11 = vpop.f32.mrb[137].mxu0  ;;  %20017 = vmatprep.subr.msk.bf16.mxu1 %vm2354_vm5, %v20193_v32  ;;  %v6029_v26 = vrot.slane %v22484_v35, 7 }
 0x1ee   :  { %v22582_v54 = vpop.f32.mrb[138].mxu1  ;;  %v2079_v18 = vpop.f32.mrb[138].mxu0  ;;  %v5914_v11 = vrot.slane %v22122_v57, 6  ;;  %v20197_v57 = vld [vmem:[%s25694_s3 + $0x68] ss:$0 sps:$4 sm:$0x33]  }
 0x1ef   :  { %v1993_v62 = vmax.f32 %v22520_v13, %v22582_v54  ;;  %v22589_v15 = vmax.f32 %v1987_v50, %v2079_v18  ;;  %v18464_v10 = vpop.f32.mrb[139].mxu0  ;;  %v18452_v56 = vpop.f32.mrb[139].mxu1  ;;  %v20201_v13 = vld [vmem:[%s25694_s3 + $0x74] ss:$0 sps:$4 sm:$0x33]  }
 0x1f0   :  { %18892 = vmatpush3.bf16.msra.mxu1 %v5942_v46  ;;  %v5915_v44 = vsel %vm2354_vm5, %v5912_v37, %v5914_v11  ;;  %v6055_v37 = vsel %vm2354_vm5, %v20197_v57, 0 }
 0x1f1   :  { %18642 = vmatmul.mubr.msk.bf16.vlgmr.msra.gmra.mrb[156].mxu0 %vm590_vm4, %v3546_v5  ;;  %18901 = vmatprep.subr.bf16.mxu1 %v20196_v7 }
 0x1f2   :  { %18645 = vmatprep.mubr.msk.bf16.mxu0 %vm590_vm4, %v22096_v30  ;;  %18650 = vmatpush3.bf16.msra.mxu0 %v20191_v49  ;;  %v3549_v30 = vrot.slane %v3532_v55, 1  ;;  %v3648_v49 = vld [vmem:[#allocation2 + $0x18] sm:$0xfc] }
 0x1f3   :  { %18886 = vmatmul.mubr.msk.bf16.gmra.mrb[168].mxu1 %vm590_vm4, %v5806_v63  ;;  %19997 = vmatprep.subr.msk.bf16.mxu0 %vm2354_vm5, %v20194_v42  ;;  %v3656_v48 = vrot.slane %v3648_v49, 2  ;;  %v5918_v63 = vrot.slane %v5905_v36, 6  ;;  %v20198_v49 = vld [vmem:[%s25694_s3 + $0xa4] ss:$0 sps:$4 sm:$0x33]  }
 0x1f4   :  { %v22608_v50 = vpop.f32.mrb[140].mxu1  ;;  %v2084_v41 = vpop.f32.mrb[140].mxu0  ;;  %18893 = vmatprep.mubr.msk.bf16.mxu1 %vm590_vm4, %v5913_v33  ;;  %v3550_v52 = vsel %vm2323_vm7, %v22079_v23, %v3549_v30  ;;  %v6017_v33 = vld [vmem:[#allocation2 + $0x28] sm:$0x80] }
 0x1f5   :  { %v1994_v21 = vmax.f32 %v22543_v53, %v22608_v50  ;;  %v22616_v32 = vmax.f32 %v1988_v28, %v2084_v41  ;;  %v18467_v22 = vpop.f32.mrb[141].mxu0  ;;  %v18455_v24 = vpop.f32.mrb[141].mxu1  ;;  %v3658_v61 = vsel %vm2520_vm8, %v3656_v48, %v3657_v25  ;;  %v5917_v28 = vsel %vm2354_vm5, %v5914_v11, %v5916_v39  ;;  %v22658_v41 = vld [vmem:[#allocation2 + $0x30] sm:$0xff]  ;;  %v22679_v11 = vld [vmem:[%s25694_s3 + $0xa8] sm:$0xff]  }
 0x1f6   :  { %v2087_v60 = vpop.f32.mrb[142].mxu0  ;;  %v1983_v47 = vpop.f32.mrb[142].mxu1  ;;  %18652 = vmatpush3.bf16.msra.mxu0 %v3687_v0  ;;  %v6025_v30 = vrot.slane %v22658_v41, 7  ;;  %v3660_v22 = vsel %vm2520_vm8, %v3657_v25, %v22215_v4  ;;  %v6024_v19 = vrot.slane %v6017_v33, 7  ;;  %v3801_v25 = vsel %vm2354_vm5, %v20198_v49, 0 }
 0x1f7   :  { %v22623_v46 = vmax.f32 %v1989_v29, %v2087_v60  ;;  %v18468_v18 = vpop.f32.mrb[143].mxu0  ;;  %v18456_v8 = vpop.f32.mrb[143].mxu1  ;;  %18661 = vmatprep.subr.bf16.mxu0 %v20195_v3  ;;  %v3762_v47 = vld [vmem:[#allocation2 + $0x18] sm:$0xf8]  ;;  %v6018_v33 = vld [vmem:[#allocation2 + $0x48] sm:$0x7f] }
 0x1f8   :  { %v6026_v4 = vsel %vm3214_vm11, %v6024_v19, %v6025_v30  ;;  %v20204_v19 = vld [vmem:[%s25694_s3 + $0x78] sm:$0xff]  }
 0x1f9   :  { %18646 = vmatmul.mubr.msk.bf16.gmra.mrb[160].mxu0 %vm590_vm4, %v3550_v52 }
 0x1fa   :  { %18653 = vmatprep.mubr.msk.bf16.mxu0 %vm590_vm4, %v3658_v61 }
 0x1fb   :  { %18894 = vmatmul.mubr.msk.bf16.vlgmr.msra.gmra.mrb[164].mxu1 %vm590_vm4, %v5915_v44 }
 0x1fc   :  { %v2092_v29 = vpop.f32.mrb[144].mxu0  ;;  %v2204_v10 = vpop.f32.mrb[144].mxu1  ;;  %18897 = vmatprep.mubr.msk.bf16.mxu1 %vm590_vm4, %v5917_v28  ;;  %18902 = vmatpush3.bf16.msra.mxu1 %v20196_v7 }
 0x1fd   :  { %v22641_v23 = vmax.f32 %v1990_v17, %v2092_v29  ;;  %v2242_v56 = vmax.f32 %v22575_v58, %v2204_v10  ;;  %v18471_v42 = vpop.f32.mrb[145].mxu0  ;;  %v18487_v5 = vpop.f32.mrb[145].mxu1  ;;  %20018 = vmatprep.subr.msk.bf16.mxu1 %vm2354_vm5, %v20197_v57  ;;  %v22688_v57 = vld [vmem:[#allocation2 + $0x20] sm:$0xff]  ;;  %v3770_v29 = vrot.slane %v3762_v47, 3  ;;  %v22691_v10 = vld [vmem:[#allocation2 + $0x38] sm:$0xff] }
 0x1fe   :  { %v2095_v55 = vpop.f32.mrb[146].mxu0  ;;  %v2207_v7 = vpop.f32.mrb[146].mxu1  ;;  %v3771_v44 = vrot.slane %v22688_v57, 3 }
 0x1ff   :  { %v2258_v9 = vadd.f32 %v22280_v14, %v2242_v56  ;;  %v22655_v31 = vmax.f32 %v1991_v27, %v2095_v55  ;;  %v2243_v17 = vmax.f32 %v22589_v15, %v2207_v7  ;;  %v18472_v58 = vpop.f32.mrb[147].mxu0  ;;  %v18488_v0 = vpop.f32.mrb[147].mxu1  ;;  %v3649_v27 = vld [vmem:[#allocation2 + $0x38] sm:$0x3]  ;;  %v5919_v15 = vsel %vm2354_vm5, %v5916_v39, %v5918_v63 }
 0x200   :  { %18904 = vmatpush3.bf16.msra.mxu1 %v6055_v37  ;;  %v3663_v18 = vrot.slane %v3649_v27, 2  ;;  %v6027_v56 = vrot.slane %v22691_v10, 7  ;;  %v3772_v63 = vsel %vm98_vm1, %v3770_v29, %v3771_v44 }
 0x201   :  { %v2259_v34 = vadd.f32 %v22280_v14, %v2243_v17  ;;  %18654 = vmatmul.mubr.msk.bf16.vlgmr.msra.gmra.mrb[156].mxu0 %vm590_vm4, %v3660_v22  ;;  %18913 = vmatprep.subr.bf16.mxu1 %v22649_v59  ;;  %v2267_v24 = vmax.f32 %v2258_v9, 0.0 }
 0x202   :  { %18657 = vmatprep.mubr.msk.bf16.mxu0 %vm590_vm4, %v22275_v2  ;;  %18662 = vmatpush3.bf16.msra.mxu0 %v20195_v3  ;;  %v3664_v55 = vsel %vm2520_vm8, %v22253_v40, %v3663_v18  ;;  %v6028_v54 = vsel %vm3214_vm11, %v6025_v30, %v6027_v56  ;;  %v6030_v40 = vsel %vm3214_vm11, %v6027_v56, %v6029_v26 }
 0x203   :  { %v2268_v60 = vmax.f32 %v2259_v34, 0.0  ;;  %18898 = vmatmul.mubr.msk.bf16.gmra.mrb[168].mxu1 %vm590_vm4, %v5919_v15  ;;  %19998 = vmatprep.subr.msk.bf16.mxu0 %vm2354_vm5, %v20198_v49  ;;  %v6156_v34 = vsel %vm2354_vm5, %v20201_v13, 0  ;;  %v6031_v15 = vrot.slane %v6018_v33, 7 }
 0x204   :  { %v2100_v2 = vpop.f32.mrb[148].mxu0  ;;  %v2212_v3 = vpop.f32.mrb[148].mxu1  ;;  %18905 = vmatprep.mubr.msk.bf16.mxu1 %vm590_vm4, %v6026_v4  ;;  %v3774_v4 = vsel %vm98_vm1, %v3771_v44, %v22288_v20 }
 0x205   :  { %v2276_v48 = vpack.c.bf16 %v2268_v60, %v2267_v24  ;;  %v22685_v8 = vmax.f32 %v1992_v45, %v2100_v2  ;;  %v2244_v39 = vmax.f32 %v22616_v32, %v2212_v3  ;;  %v18475_v52 = vpop.f32.mrb[149].mxu0  ;;  %v18491_v61 = vpop.f32.mrb[149].mxu1  ;;  %v20202_v60 = vld [vmem:[%s25694_s3 + $0xb0] ss:$0 sps:$4 sm:$0x33]  }
 0x206   :  { %v2103_v28 = vpop.f32.mrb[150].mxu0  ;;  %v2215_v36 = vpop.f32.mrb[150].mxu1  ;;  %18664 = vmatpush3.bf16.msra.mxu0 %v3801_v25  ;;  %v3763_v2 = vld [vmem:[#allocation2 + $0x38] sm:$0x7]  ;;  %v3915_v18 = vsel %vm2354_vm5, %v20202_v60, 0 }
 0x207   :  { %v2286_v16 = vrot.slane %v2276_v48, 4  ;;  %v2260_v45 = vadd.f32 %v22280_v14, %v2244_v39  ;;  %v22699_v32 = vmax.f32 %v1993_v62, %v2103_v28  ;;  %v2245_v42 = vmax.f32 %v22623_v46, %v2215_v36  ;;  %v18476_v5 = vpop.f32.mrb[151].mxu0  ;;  %v18492_v37 = vpop.f32.mrb[151].mxu1  ;;  %18673 = vmatprep.subr.bf16.mxu0 %v22679_v11  ;;  %v20203_v48 = vld [vmem:[%s25694_s3 + $0xb4] sm:$0xff]  }
 0x208   :  { %v3885_v28 = vrot.slane %v22688_v57, 4  ;;  %v20205_v5 = vld [vmem:[%s25694_s3 + $0x80] ss:$0 sps:$4 sm:$0x33]  }
 0x209   :  { %2300 = vst.msk [vmem:[#allocation2 + $0x68] sm:$0xf0] %vm1168_vm9, %v2286_v16  ;;  %v2261_v7 = vadd.f32 %v22280_v14, %v2245_v42  ;;  %18658 = vmatmul.mubr.msk.bf16.gmra.mrb[160].mxu0 %vm590_vm4, %v3664_v55  ;;  %v2269_v62 = vmax.f32 %v2260_v45, 0.0 }
 0x20a   :  { %18665 = vmatprep.mubr.msk.bf16.mxu0 %vm590_vm4, %v3772_v63  ;;  %v20208_v63 = vld [vmem:[%s25694_s3 + $0x84] sm:$0xff]  }
 0x20b   :  { %v2270_v46 = vmax.f32 %v2261_v7, 0.0  ;;  %18906 = vmatmul.mubr.msk.bf16.vlgmr.msra.gmra.mrb[164].mxu1 %vm590_vm4, %v6028_v54  ;;  %v6260_v7 = vsel %vm2354_vm5, %v20205_v5, 0 }
 0x20c   :  { %v2108_v9 = vpop.f32.mrb[152].mxu0  ;;  %v2220_v17 = vpop.f32.mrb[152].mxu1  ;;  %18909 = vmatprep.mubr.msk.bf16.mxu1 %vm590_vm4, %v6030_v40  ;;  %18914 = vmatpush3.bf16.msra.mxu1 %v22649_v59  ;;  %v20206_v40 = vld [vmem:[%s25694_s3 + $0xbc] ss:$0 sps:$4 sm:$0x33]  }
 0x20d   :  { %v2277_v58 = vpack.c.bf16 %v2270_v46, %v2269_v62  ;;  %v22721_v0 = vmax.f32 %v1994_v21, %v2108_v9  ;;  %v2246_v30 = vmax.f32 %v22641_v23, %v2220_v17  ;;  %v18479_v49 = vpop.f32.mrb[153].mxu0  ;;  %v18495_v22 = vpop.f32.mrb[153].mxu1  ;;  %20019 = vmatprep.subr.msk.bf16.mxu1 %vm2354_vm5, %v20201_v13  ;;  %v3888_v9 = vsel %vm97_vm0, %v3885_v28, %v22394_v43  ;;  %v22796_v43 = vld [vmem:[#allocation2 + $0x38] sm:$0xff] }
 0x20e   :  { %v2111_v27 = vpop.f32.mrb[154].mxu0  ;;  %v2223_v59 = vpop.f32.mrb[154].mxu1  ;;  %v22792_v49 = vld [vmem:[#allocation2 + $0x28] sm:$0xff] }
 0x20f   :  { %v2287_v24 = vrot.slane %v2277_v58, 4  ;;  %v2262_v53 = vadd.f32 %v22280_v14, %v2246_v30  ;;  %v2247_v50 = vmax.f32 %v22655_v31, %v2223_v59  ;;  %v18480_v21 = vpop.f32.mrb[155].mxu0  ;;  %v18496_v23 = vpop.f32.mrb[155].mxu1  ;;  %v6032_v31 = vsel %vm3214_vm11, %v6029_v26, %v6031_v15  ;;  %v22790_v30 = vld [vmem:[#allocation2 + $0x48] sm:$0xff]  ;;  %v3990_v27 = vld [vmem:[#allocation2 + $0x20] sm:$0xf0] }
 0x210   :  { %18916 = vmatpush3.bf16.msra.mxu1 %v6156_v34  ;;  %v4035_v34 = vsel %vm2354_vm5, %v20206_v40, 0  ;;  %v4005_v15 = vrot.slane %v22792_v49, 4  ;;  %v22812_v23 = vld [vmem:[#allocation2 + $0x30] sm:$0xff] }
 0x211   :  { %v2288_v25 = vsel %vm97_vm0, %v2286_v16, %v2287_v24  ;;  %v2263_v47 = vadd.f32 %v22280_v14, %v2247_v50  ;;  %18666 = vmatmul.mubr.msk.bf16.vlgmr.msra.gmra.mrb[156].mxu0 %vm590_vm4, %v3774_v4  ;;  %18925 = vmatprep.subr.bf16.mxu1 %v20204_v19  ;;  %v2271_v3 = vmax.f32 %v2262_v53, 0.0  ;;  %v4004_v53 = vrot.slane %v3990_v27, 4 }
 0x212   :  { %2301 = vst.msk [vmem:[#allocation2 + $0x70] sm:$0xff] %vm590_vm4, %v2288_v25  ;;  %18669 = vmatprep.mubr.msk.bf16.mxu0 %vm590_vm4, %v22367_v6  ;;  %18674 = vmatpush3.bf16.msra.mxu0 %v22679_v11  ;;  %v3777_v6 = vrot.slane %v3763_v2, 3  ;;  %v3876_v11 = vld [vmem:[#allocation2 + $0x18] sm:$0xf0]  ;;  %v22824_v4 = vrot.slane %v22796_v43, 4 }
 0x213   :  { %v2272_v20 = vmax.f32 %v2263_v47, 0.0  ;;  %18910 = vmatmul.mubr.msk.bf16.gmra.mrb[168].mxu1 %vm590_vm4, %v6032_v31  ;;  %19999 = vmatprep.subr.msk.bf16.mxu0 %vm2354_vm5, %v20202_v60  ;;  %v3884_v16 = vrot.slane %v3876_v11, 4  ;;  %v4006_v21 = vsel %vm97_vm0, %v4004_v53, %v4005_v15  ;;  %v20209_v60 = vld [vmem:[%s25694_s3 + $0x8c] ss:$0 sps:$4 sm:$0x33]   ;;  %v20212_v47 = vld [vmem:[%s25694_s3 + $0x90] sm:$0xff]  }
 0x214   :  { %v2228_v39 = vpop.f32.mrb[156].mxu1  ;;  %18917 = vmatprep.mubr.msk.bf16.mxu1 %vm590_vm4, %v22658_v41  ;;  %v3778_v41 = vsel %vm98_vm1, %v22342_v51, %v3777_v6  ;;  %v6379_v25 = vsel %vm2354_vm5, %v20209_v60, 0  ;;  %v6335_v2 = vld [vmem:[#allocation2 + $0x38] sm:$0xfe]  ;;  %v6349_v31 = vrot.slane %v22484_v35, 1  ;;  %v22840_v6 = vld [vmem:[#allocation2 + $0x50] sm:$0xff] }
 0x215   :  { %v2278_v52 = vpack.c.bf16 %v2272_v20, %v2271_v3  ;;  %v2248_v61 = vmax.f32 %v22685_v8, %v2228_v39  ;;  %v18499_v44 = vpop.f32.mrb[157].mxu1  ;;  %v3886_v57 = vsel %vm97_vm0, %v3884_v16, %v3885_v28  ;;  %v20210_v3 = vld [vmem:[%s25694_s3 + $0xc8] ss:$0 sps:$4 sm:$0x33]   ;;  %v3994_v39 = vld [vmem:[#allocation2 + $0x40] sm:$0xf] }
 0x216   :  { %v2231_v36 = vpop.f32.mrb[158].mxu1  ;;  %18676 = vmatpush3.bf16.msra.mxu0 %v3915_v18  ;;  %v4011_v44 = vrot.slane %v3994_v39, 4  ;;  %v4110_v28 = vld [vmem:[#allocation2 + $0x20] sm:$0xe0]  ;;  %v6455_v53 = vld [vmem:[#allocation2 + $0x58] sm:$0x3] }
 0x217   :  { %v2289_v29 = vrot.slane %v2278_v52, 4  ;;  %v2264_v56 = vadd.f32 %v22280_v14, %v2248_v61  ;;  %v2249_v26 = vmax.f32 %v22699_v32, %v2231_v36  ;;  %v18500_v45 = vpop.f32.mrb[159].mxu1  ;;  %18685 = vmatprep.subr.bf16.mxu0 %v20203_v48  ;;  %v4149_v52 = vsel %vm2354_vm5, %v20210_v3, 0  ;;  %v20211_v61 = vld [vmem:[%s25694_s3 + $0xcc] sm:$0xff]  }
 0x218   :  { %v4119_v36 = vrot.slane %v22792_v49, 5  ;;  %v4012_v16 = vsel %vm97_vm0, %v22824_v4, %v4011_v44  ;;  %v4338_v44 = vld [vmem:[#allocation2 + $0x20] sm:$0x80] }
 0x219   :  { %v2290_v42 = vsel %vm97_vm0, %v2287_v24, %v2289_v29  ;;  %v2265_v8 = vadd.f32 %v22280_v14, %v2249_v26  ;;  %18670 = vmatmul.mubr.msk.bf16.gmra.mrb[160].mxu0 %vm590_vm4, %v3778_v41  ;;  %v2273_v32 = vmax.f32 %v2264_v56, 0.0  ;;  %v4118_v56 = vrot.slane %v4110_v28, 5  ;;  %v20213_v41 = vld [vmem:[%s25694_s3 + $0x98] ss:$0 sps:$4 sm:$0x33]  }
 0x21a   :  { %2302 = vst.msk [vmem:[#allocation2 + $0x78] sm:$0xff] %vm590_vm4, %v2290_v42  ;;  %18677 = vmatprep.mubr.msk.bf16.mxu0 %vm590_vm4, %v3886_v57  ;;  %v22856_v26 = vrot.slane %v22840_v6, 1  ;;  %v6339_v57 = vld [vmem:[#allocation2 + $0x58] sm:$0x1]  ;;  %v4347_v28 = vrot.slane %v22792_v49, 7 }
 0x21b   :  { %v2274_v37 = vmax.f32 %v2265_v8, 0.0  ;;  %18918 = vmatmul.mubr.msk.bf16.vlgmr.msra.gmra.mrb[164].mxu1 %vm590_vm4, %v22691_v10  ;;  %v21109_v10 = vld [vmem:[%s25693_s2] ss:$0 sm:$0xff]  ;;  %v4120_v45 = vsel %vm2984_vm10, %v4118_v56, %v4119_v36  ;;  %v4346_v56 = vrot.slane %v4338_v44, 7  ;;  %v6920_v44 = vrot.slane %v22790_v30, 5 }
 0x21c   :  { %v2236_v51 = vpop.f32.mrb[160].mxu1  ;;  %18921 = vmatprep.mubr.msk.bf16.mxu1 %vm590_vm4, %v22484_v35  ;;  %18926 = vmatpush3.bf16.msra.mxu1 %v20204_v19  ;;  %v20207_v19 = vld [vmem:[%s25694_s3 + $0xc0] sm:$0xff]  }
 0x21d   :  { %v2279_v14 = vpack.c.bf16 %v2274_v37, %v2273_v32  ;;  %v2250_v55 = vmax.f32 %v22721_v0, %v2236_v51  ;;  %20020 = vmatprep.subr.msk.bf16.mxu1 %vm2354_vm5, %v20205_v5  ;;  %v18503_v13 = vpop.f32.mrb[161].mxu1  ;;  %v3877_v0 = vld [vmem:[#allocation2 + $0x38] sm:$0xf]  ;;  %v4121_v5 = vrot.slane %v22812_v23, 5  ;;  %v4123_v32 = vrot.slane %v22796_v43, 5  ;;  %v20216_v51 = vld [vmem:[%s25694_s3 + $0x9c] sm:$0xff]  }
 0x21e   :  { %v2239_v54 = vpop.f32.mrb[162].mxu1  ;;  %v6492_v37 = vsel %vm2354_vm5, %v20213_v41, 0 }
 0x21f   :  { %v2291_v62 = vrot.slane %v2279_v14, 4  ;;  %v2266_v46 = vadd.f32 %v21109_v10, %v2250_v55  ;;  %v18504_v33 = vpop.f32.mrb[163].mxu1  ;;  %v6355_v14 = vrot.slane %v6339_v57, 1  ;;  %v6454_v55 = vld [vmem:[#allocation2 + $0x38] sm:$0xfc]  ;;  %v4122_v13 = vsel %vm2984_vm10, %v4119_v36, %v4121_v5 }
 0x220   :  { %18928 = vmatpush3.bf16.msra.mxu1 %v6260_v7  ;;  %v6462_v7 = vrot.slane %v22484_v35, 2  ;;  %v4124_v54 = vsel %vm2984_vm10, %v4121_v5, %v4123_v32  ;;  %v4111_v10 = vld [vmem:[#allocation2 + $0x40] sm:$0x1f]  ;;  %v22952_v36 = vrot.slane %v22790_v30, 3 }
 0x221   :  { %v2292_v17 = vsel %vm97_vm0, %v2289_v29, %v2291_v62  ;;  %v2275_v58 = vmax.f32 %v2266_v46, 0.0  ;;  %18678 = vmatmul.mubr.msk.bf16.vlgmr.msra.gmra.mrb[156].mxu0 %vm590_vm4, %v3888_v9  ;;  %18937 = vmatprep.subr.bf16.mxu1 %v20208_v63  ;;  %v22853_v29 = vrot.slane %v22790_v30, 1  ;;  %v6356_v46 = vsel %vm2323_vm7, %v22856_v26, %v6355_v14  ;;  %v20215_v9 = vld [vmem:[%s25694_s3 + $0xd8] sm:$0xff]  }
 0x222   :  { %2303 = vst.msk [vmem:[#allocation2 + $0x80] sm:$0xff] %vm590_vm4, %v2292_v17  ;;  %18681 = vmatprep.mubr.msk.bf16.mxu0 %vm590_vm4, %v22441_v1  ;;  %18686 = vmatpush3.bf16.msra.mxu0 %v20203_v48  ;;  %v3891_v1 = vrot.slane %v3877_v0, 4  ;;  %v6348_v48 = vrot.slane %v6335_v2, 1  ;;  %v4125_v17 = vrot.slane %v4111_v10, 5  ;;  %v4233_v0 = vrot.slane %v22792_v49, 6 }
 0x223   :  { %v2280_v22 = vpack.c.bf16 %v2275_v58, %v2275_v58  ;;  %18922 = vmatmul.mubr.msk.bf16.gmra.mrb[168].mxu1 %vm590_vm4, %v22790_v30  ;;  %20000 = vmatprep.subr.msk.bf16.mxu0 %vm2354_vm5, %v20206_v40  ;;  %v6352_v42 = vsel %vm2323_vm7, %v6349_v31, %v22853_v29  ;;  %v22872_v8 = vsel %vm2323_vm7, %v22853_v29, %v22856_v26  ;;  %v4224_v58 = vld [vmem:[#allocation2 + $0x20] sm:$0xc0]  ;;  %v6575_v2 = vrot.slane %v22484_v35, 3 }
 0x224   :  { %18929 = vmatprep.mubr.msk.bf16.mxu1 %vm590_vm4, %v22796_v43  ;;  %v3892_v50 = vsel %vm97_vm0, %v22422_v12, %v3891_v1  ;;  %v4007_v12 = vrot.slane %v22812_v23, 4  ;;  %v6350_v11 = vsel %vm2323_vm7, %v6348_v48, %v6349_v31  ;;  %v4126_v1 = vsel %vm2984_vm10, %v4123_v32, %v4125_v17  ;;  %v20218_v31 = vld [vmem:[%s25694_s3 + $0xe0] ss:$0 sps:$4 sm:$0x33]   ;;  %v6568_v32 = vld [vmem:[#allocation2 + $0x58] sm:$0x7] }
 0x225   :  { %v2293_v59 = vrot.slane %v2280_v22, 4  ;;  %v22903_v22 = vrot.slane %v22790_v30, 2  ;;  %v4225_v48 = vld [vmem:[#allocation2 + $0x40] sm:$0x3f]  ;;  %v6578_v57 = vsel %vm98_vm1, %v6575_v2, %v22952_v36  ;;  %v20223_v17 = vld [vmem:[%s25694_s3 + $0xf0] sm:$0xff]  }
 0x226   :  { %18688 = vmatpush3.bf16.msra.mxu0 %v4035_v34  ;;  %v4008_v20 = vsel %vm97_vm0, %v4005_v15, %v4007_v12  ;;  %v4010_v18 = vsel %vm97_vm0, %v4007_v12, %v22824_v4  ;;  %v4232_v34 = vrot.slane %v4224_v58, 6  ;;  %v20220_v12 = vld [vmem:[%s25694_s3 + $0xa8] sm:$0xff]  }
 0x227   :  { %v2294_v24 = vsel %vm97_vm0, %v2291_v62, %v2293_v59  ;;  %18697 = vmatprep.subr.bf16.mxu0 %v20207_v19  ;;  %v6461_v62 = vrot.slane %v6454_v55, 2  ;;  %v20217_v59 = vld [vmem:[%s25694_s3 + $0xa4] ss:$0 sps:$4 sm:$0x33]   ;;  %v6465_v15 = vsel %vm2520_vm8, %v6462_v7, %v22903_v22  ;;  %v20224_v55 = vld [vmem:[%s25694_s3 + $0xb4] sm:$0xff]  }
 0x228   :  { %2304 = vst.msk [vmem:[#allocation2 + $0x88] sm:$0xff] %vm590_vm4, %v2294_v24  ;;  %v4234_v27 = vsel %vm2354_vm5, %v4232_v34, %v4233_v0  ;;  %v6692_v34 = vrot.slane %v22840_v6, 4 }
 0x229   :  { %18682 = vmatmul.mubr.msk.bf16.gmra.mrb[160].mxu0 %vm590_vm4, %v3892_v50  ;;  %v6463_v40 = vsel %vm2520_vm8, %v6461_v62, %v6462_v7  ;;  %v4235_v50 = vrot.slane %v22812_v23, 6  ;;  %v6581_v7 = vrot.slane %v6568_v32, 3  ;;  %v4659_v32 = vld [vmem:[#allocation2 + $0x30] sm:$0xfe] }
 0x22a   :  { %18689 = vmatprep.mubr.msk.bf16.mxu0 %vm590_vm4, %v4006_v21  ;;  %v4237_v21 = vrot.slane %v22796_v43, 6 }
 0x22b   :  { %18930 = vmatmul.mubr.msk.bf16.vlgmr.msra.gmra.mrb[164].mxu1 %vm590_vm4, %v22484_v35 }
 0x22c   :  { %18933 = vmatprep.mubr.msk.bf16.mxu1 %vm590_vm4, %v22790_v30  ;;  %18938 = vmatpush3.bf16.msra.mxu1 %v20208_v63  ;;  %v20214_v63 = vld [vmem:[%s25694_s3 + $0xd4] ss:$0 sps:$4 sm:$0x33]  }
 0x22d   :  { %20021 = vmatprep.subr.msk.bf16.mxu1 %vm2354_vm5, %v20209_v60  ;;  %v4263_v33 = vsel %vm2354_vm5, %v20214_v63, 0  ;;  %v6605_v60 = vsel %vm2354_vm5, %v20217_v59, 0 }
 0x230   :  { %18940 = vmatpush3.bf16.msra.mxu1 %v6379_v25  ;;  %v6468_v25 = vrot.slane %v6455_v53, 2  ;;  %v6681_v53 = vld [vmem:[#allocation2 + $0x58] sm:$0xf] }
 0x231   :  { %18690 = vmatmul.mubr.msk.bf16.vlgmr.msra.gmra.mrb[156].mxu0 %vm590_vm4, %v4008_v20  ;;  %18949 = vmatprep.subr.bf16.mxu1 %v20212_v47  ;;  %v4238_v20 = vsel %vm2354_vm5, %v4235_v50, %v4237_v21 }
 0x232   :  { %18693 = vmatprep.mubr.msk.bf16.mxu0 %vm590_vm4, %v4010_v18  ;;  %18698 = vmatpush3.bf16.msra.mxu0 %v20207_v19  ;;  %v22906_v19 = vrot.slane %v22840_v6, 2 }
 0x233   :  { %18934 = vmatmul.mubr.msk.bf16.gmra.mrb[168].mxu1 %vm590_vm4, %v22840_v6  ;;  %20001 = vmatprep.subr.msk.bf16.mxu0 %vm2354_vm5, %v20210_v3  ;;  %v4236_v3 = vsel %vm2354_vm5, %v4233_v0, %v4235_v50  ;;  %v23000_v0 = vrot.slane %v22790_v30, 4 }
 0x234   :  { %18941 = vmatprep.mubr.msk.bf16.mxu1 %vm590_vm4, %v6350_v11  ;;  %v22921_v24 = vsel %vm2520_vm8, %v22903_v22, %v22906_v19  ;;  %v6469_v35 = vsel %vm2520_vm8, %v22906_v19, %v6468_v25  ;;  %v4377_v11 = vsel %vm2354_vm5, %v20218_v31, 0 }
 0x236   :  { %18700 = vmatpush3.bf16.msra.mxu0 %v4149_v52  ;;  %v20219_v52 = vld [vmem:[%s25694_s3 + $0xe4] sm:$0xff]  }
 0x237   :  { %18709 = vmatprep.subr.bf16.mxu0 %v20211_v61 }
 0x239   :  { %18694 = vmatmul.mubr.msk.bf16.gmra.mrb[160].mxu0 %vm590_vm4, %v4012_v16  ;;  %v22955_v16 = vrot.slane %v22840_v6, 3 }
 0x23a   :  { %18701 = vmatprep.mubr.msk.bf16.mxu0 %vm590_vm4, %v4120_v45 }
 0x23b   :  { %18942 = vmatmul.mubr.msk.bf16.vlgmr.msra.gmra.mrb[164].mxu1 %vm590_vm4, %v6352_v42  ;;  %v20221_v42 = vld [vmem:[%s25694_s3 + $0xb0] ss:$0 sps:$4 sm:$0x33]   ;;  %v22970_v5 = vsel %vm98_vm1, %v22952_v36, %v22955_v16 }
 0x23c   :  { %18945 = vmatprep.mubr.msk.bf16.mxu1 %vm590_vm4, %v22872_v8  ;;  %18950 = vmatpush3.bf16.msra.mxu1 %v20212_v47  ;;  %v6567_v47 = vld [vmem:[#allocation2 + $0x38] sm:$0xf8]  ;;  %v6718_v14 = vsel %vm2354_vm5, %v20221_v42, 0 }
 0x23d   :  { %20022 = vmatprep.subr.msk.bf16.mxu1 %vm2354_vm5, %v20213_v41  ;;  %v6574_v18 = vrot.slane %v6567_v47, 3  ;;  %v4348_v41 = vsel %vm3214_vm11, %v4346_v56, %v4347_v28 }
 0x23f   :  { %v6576_v39 = vsel %vm98_vm1, %v6574_v18, %v6575_v2  ;;  %v23047_v18 = vld [vmem:[#allocation2 + $0x40] sm:$0xff] }
 0x240   :  { %18952 = vmatpush3.bf16.msra.mxu1 %v6492_v37  ;;  %v4349_v37 = vrot.slane %v22812_v23, 7 }
 0x241   :  { %18702 = vmatmul.mubr.msk.bf16.vlgmr.msra.gmra.mrb[156].mxu0 %vm590_vm4, %v4122_v13  ;;  %18961 = vmatprep.subr.bf16.mxu1 %v20216_v51  ;;  %v20222_v13 = vld [vmem:[%s25694_s3 + $0xec] ss:$0 sps:$4 sm:$0x33]  }
 0x242   :  { %18705 = vmatprep.mubr.msk.bf16.mxu0 %vm590_vm4, %v4124_v54  ;;  %18710 = vmatpush3.bf16.msra.mxu0 %v20211_v61  ;;  %v4239_v61 = vrot.slane %v4225_v48, 6  ;;  %v4350_v54 = vsel %vm3214_vm11, %v4347_v28, %v4349_v37  ;;  %v20229_v48 = vld [vmem:[%s25694_s3 + $0xc8] ss:$0 sps:$4 sm:$0x33]  }
 0x243   :  { %18946 = vmatmul.mubr.msk.bf16.gmra.mrb[168].mxu1 %vm590_vm4, %v6356_v46  ;;  %20002 = vmatprep.subr.msk.bf16.mxu0 %vm2354_vm5, %v20214_v63  ;;  %v6680_v63 = vld [vmem:[#allocation2 + $0x38] sm:$0xf0]  ;;  %v4339_v46 = vld [vmem:[#allocation2 + $0x40] sm:$0x7f] }
 0x244   :  { %18953 = vmatprep.mubr.msk.bf16.mxu1 %vm590_vm4, %v6463_v40  ;;  %v4240_v45 = vsel %vm2354_vm5, %v4237_v21, %v4239_v61  ;;  %v6687_v10 = vrot.slane %v6680_v63, 4  ;;  %v6582_v40 = vsel %vm98_vm1, %v22955_v16, %v6581_v7  ;;  %v4353_v58 = vrot.slane %v4339_v46, 7  ;;  %v6793_v21 = vld [vmem:[#allocation2 + $0x40] sm:$0xf0] }
 0x245   :  { %v6912_v61 = vld [vmem:[#allocation2 + $0x40] sm:$0xe0]  ;;  %v20230_v28 = vld [vmem:[%s25694_s3 + $0x104] ss:$0 sps:$4 sm:$0x33]  }
 0x246   :  { %18712 = vmatpush3.bf16.msra.mxu0 %v4263_v33  ;;  %v6689_v33 = vsel %vm97_vm0, %v6687_v10, %v22496_v38  ;;  %v6919_v56 = vrot.slane %v6912_v61, 5  ;;  %v20233_v63 = vld [vmem:[%s25694_s3 + $0xd4] ss:$0 sps:$4 sm:$0x33]   ;;  %v4676_v10 = vrot.slane %v23047_v18, 1  ;;  %v4790_v61 = vrot.slane %v23047_v18, 2 }
 0x247   :  { %18721 = vmatprep.subr.bf16.mxu0 %v20215_v9  ;;  %v7063_v46 = vsel %vm2354_vm5, %v20233_v63, 0 }
 0x249   :  { %18706 = vmatmul.mubr.msk.bf16.gmra.mrb[160].mxu0 %vm590_vm4, %v4126_v1 }
 0x24a   :  { %18713 = vmatprep.mubr.msk.bf16.mxu0 %vm590_vm4, %v4234_v27  ;;  %v20225_v27 = vld [vmem:[%s25694_s3 + $0xbc] ss:$0 sps:$4 sm:$0x33]  }
 0x24b   :  { %18954 = vmatmul.mubr.msk.bf16.vlgmr.msra.gmra.mrb[164].mxu1 %vm590_vm4, %v6465_v15  ;;  %v23016_v15 = vsel %vm97_vm0, %v23000_v0, %v6692_v34  ;;  %v6837_v50 = vsel %vm2354_vm5, %v20225_v27, 0 }
 0x24c   :  { %18957 = vmatprep.mubr.msk.bf16.mxu1 %vm590_vm4, %v22921_v24  ;;  %18962 = vmatpush3.bf16.msra.mxu1 %v20216_v51  ;;  %v4351_v51 = vrot.slane %v22796_v43, 7 }
 0x24d   :  { %20023 = vmatprep.subr.msk.bf16.mxu1 %vm2354_vm5, %v20217_v59  ;;  %v6691_v59 = vsel %vm97_vm0, %v22496_v38, %v23000_v0  ;;  %v6694_v38 = vrot.slane %v6681_v53, 4 }
 0x24e   :  { %v4352_v62 = vsel %vm3214_vm11, %v4349_v37, %v4351_v51  ;;  %v4354_v1 = vsel %vm3214_vm11, %v4351_v51, %v4353_v58  ;;  %v4674_v37 = vrot.slane %v22796_v43, 1  ;;  %v6922_v51 = vrot.slane %v22840_v6, 5  ;;  %v20234_v58 = vld [vmem:[%s25694_s3 + $0x110] ss:$0 sps:$4 sm:$0x33]  }
 0x24f   :  { %v6695_v25 = vsel %vm97_vm0, %v6692_v34, %v6694_v38  ;;  %v20235_v38 = vld [vmem:[%s25694_s3 + $0x114] sm:$0xff]  }
 0x250   :  { %18964 = vmatpush3.bf16.msra.mxu1 %v6605_v60  ;;  %v20226_v60 = vld [vmem:[%s25694_s3 + $0xf8] ss:$0 sps:$4 sm:$0x33]  }
 0x251   :  { %18714 = vmatmul.mubr.msk.bf16.vlgmr.msra.gmra.mrb[156].mxu0 %vm590_vm4, %v4236_v3  ;;  %18973 = vmatprep.subr.bf16.mxu1 %v20220_v12  ;;  %v4584_v2 = vsel %vm2354_vm5, %v20226_v60, 0  ;;  %v23042_v3 = vld [vmem:[#allocation2 + $0x58] sm:$0xff] }
 0x252   :  { %18717 = vmatprep.mubr.msk.bf16.mxu0 %vm590_vm4, %v4238_v20  ;;  %18722 = vmatpush3.bf16.msra.mxu0 %v20215_v9  ;;  %v4479_v9 = vsel %vm2354_vm5, %v20222_v13, 0  ;;  %v23045_v20 = vrot.slane %v23042_v3, 4 }
 0x253   :  { %18958 = vmatmul.mubr.msk.bf16.gmra.mrb[168].mxu1 %vm590_vm4, %v6469_v35  ;;  %20003 = vmatprep.subr.msk.bf16.mxu0 %vm2354_vm5, %v20218_v31  ;;  %v20227_v31 = vld [vmem:[%s25694_s3 + $0xfc] sm:$0xff]  }
 0x254   :  { %18965 = vmatprep.mubr.msk.bf16.mxu1 %vm590_vm4, %v6576_v39  ;;  %v23060_v35 = vsel %vm97_vm0, %v6692_v34, %v23045_v20  ;;  %v6797_v39 = vld [vmem:[#allocation2 + $0x60] sm:$0xf]  ;;  %v4677_v34 = vsel %vm2323_vm7, %v4674_v37, %v4676_v10 }
 0x256   :  { %18724 = vmatpush3.bf16.msra.mxu0 %v4377_v11  ;;  %v6950_v11 = vsel %vm2354_vm5, %v20229_v48, 0 }
 0x257   :  { %18733 = vmatprep.subr.bf16.mxu0 %v20219_v52 }
 0x259   :  { %18718 = vmatmul.mubr.msk.bf16.gmra.mrb[160].mxu0 %vm590_vm4, %v4240_v45 }
 0x25a   :  { %18725 = vmatprep.mubr.msk.bf16.mxu0 %vm590_vm4, %v4348_v41  ;;  %v6921_v41 = vsel %vm2984_vm10, %v6919_v56, %v6920_v44 }
 0x25b   :  { %18966 = vmatmul.mubr.msk.bf16.vlgmr.msra.gmra.mrb[164].mxu1 %vm590_vm4, %v6578_v57  ;;  %v20231_v57 = vld [vmem:[%s25694_s3 + $0x108] sm:$0xff]  }
 0x25c   :  { %18969 = vmatprep.mubr.msk.bf16.mxu1 %vm590_vm4, %v22970_v5  ;;  %18974 = vmatpush3.bf16.msra.mxu1 %v20220_v12  ;;  %v6806_v12 = vrot.slane %v6793_v21, 4 }
 0x25d   :  { %20024 = vmatprep.subr.msk.bf16.mxu1 %vm2354_vm5, %v20221_v42  ;;  %v4704_v42 = vsel %vm2354_vm5, %v20230_v28, 0 }
 0x25e   :  { %v6808_v47 = vsel %vm97_vm0, %v6806_v12, %v23000_v0  ;;  %v4788_v12 = vrot.slane %v22796_v43, 2 }
 0x260   :  { %18976 = vmatpush3.bf16.msra.mxu1 %v6718_v14  ;;  %v4673_v14 = vrot.slane %v4659_v32, 1  ;;  %v4793_v32 = vsel %vm2520_vm8, %v4790_v61, %v22903_v22 }
 0x261   :  { %18726 = vmatmul.mubr.msk.bf16.vlgmr.msra.gmra.mrb[156].mxu0 %vm590_vm4, %v4350_v54  ;;  %18985 = vmatprep.subr.bf16.mxu1 %v20224_v55 }
 0x262   :  { %18729 = vmatprep.mubr.msk.bf16.mxu0 %vm590_vm4, %v4352_v62  ;;  %18734 = vmatpush3.bf16.msra.mxu0 %v20219_v52  ;;  %v6813_v52 = vrot.slane %v6797_v39, 4  ;;  %v4675_v7 = vsel %vm2323_vm7, %v4673_v14, %v4674_v37  ;;  %v6913_v62 = vld [vmem:[#allocation2 + $0x60] sm:$0x1f] }
 0x263   :  { %18970 = vmatmul.mubr.msk.bf16.gmra.mrb[168].mxu1 %vm590_vm4, %v6582_v40  ;;  %20004 = vmatprep.subr.msk.bf16.mxu0 %vm2354_vm5, %v20222_v13  ;;  %v6923_v13 = vsel %vm2984_vm10, %v6920_v44, %v6922_v51  ;;  %v20236_v40 = vld [vmem:[%s25694_s3 + $0xd8] sm:$0xff]   ;;  %v20237_v39 = vld [vmem:[%s25694_s3 + $0xe0] ss:$0 sps:$4 sm:$0x33]  }
 0x264   :  { %18977 = vmatprep.mubr.msk.bf16.mxu1 %vm590_vm4, %v6689_v33  ;;  %v6814_v45 = vsel %vm97_vm0, %v23045_v20, %v6813_v52  ;;  %v6926_v33 = vrot.slane %v6913_v62, 5  ;;  %v7026_v52 = vld [vmem:[#allocation2 + $0x60] sm:$0x3f]  ;;  %v7176_v44 = vsel %vm2354_vm5, %v20237_v39, 0  ;;  %v4893_v62 = vld [vmem:[#allocation2 + $0x30] sm:$0xf8] }
 0x265   :  { %v7039_v56 = vrot.slane %v7026_v52, 6  ;;  %v20244_v52 = vld [vmem:[%s25694_s3 + $0xf8] ss:$0 sps:$4 sm:$0x33]  }
 0x266   :  { %18736 = vmatpush3.bf16.msra.mxu0 %v4479_v9  ;;  %v7025_v9 = vld [vmem:[#allocation2 + $0x40] sm:$0xc0] }
 0x267   :  { %18745 = vmatprep.subr.bf16.mxu0 %v20223_v17 }
 0x269   :  { %18730 = vmatmul.mubr.msk.bf16.gmra.mrb[160].mxu0 %vm590_vm4, %v4354_v1  ;;  %v4679_v1 = vsel %vm2323_vm7, %v4676_v10, %v22853_v29  ;;  %v4902_v10 = vrot.slane %v22796_v43, 3 }
 0x26a   :  { %18737 = vmatprep.mubr.msk.bf16.mxu0 %vm590_vm4, %v22792_v49  ;;  %v20228_v49 = vld [vmem:[%s25694_s3 + $0xc0] sm:$0xff]  }
 0x26b   :  { %18978 = vmatmul.mubr.msk.bf16.vlgmr.msra.gmra.mrb[164].mxu1 %vm590_vm4, %v6691_v59  ;;  %v4663_v59 = vld [vmem:[#allocation2 + $0x50] sm:$0x1] }
 0x26c   :  { %18981 = vmatprep.mubr.msk.bf16.mxu1 %vm590_vm4, %v23016_v15  ;;  %18986 = vmatpush3.bf16.msra.mxu1 %v20224_v55  ;;  %v23090_v55 = vrot.slane %v23042_v3, 5  ;;  %v4680_v21 = vrot.slane %v4663_v59, 1 }
 0x26d   :  { %20025 = vmatprep.subr.msk.bf16.mxu1 %vm2354_vm5, %v20225_v27  ;;  %v7032_v27 = vrot.slane %v7025_v9, 6 }
 0x26e   :  { %v6925_v54 = vsel %vm2984_vm10, %v6922_v51, %v23090_v55  ;;  %v6927_v53 = vsel %vm2984_vm10, %v23090_v55, %v6926_v33  ;;  %v4780_v51 = vld [vmem:[#allocation2 + $0x50] sm:$0x3]  ;;  %v23175_v33 = vrot.slane %v23042_v3, 7 }
 0x270   :  { %18988 = vmatpush3.bf16.msra.mxu1 %v6837_v50 }
 0x271   :  { %18738 = vmatmul.mubr.msk.bf16.vlgmr.msra.gmra.mrb[156].mxu0 %vm590_vm4, %v22812_v23  ;;  %18997 = vmatprep.subr.bf16.mxu1 %v20228_v49 }
 0x272   :  { %18741 = vmatprep.mubr.msk.bf16.mxu0 %vm590_vm4, %v22796_v43  ;;  %18746 = vmatpush3.bf16.msra.mxu0 %v20223_v17  ;;  %v7033_v17 = vrot.slane %v22790_v30, 6 }
 0x273   :  { %18982 = vmatmul.mubr.msk.bf16.gmra.mrb[168].mxu1 %vm590_vm4, %v6695_v25  ;;  %20005 = vmatprep.subr.msk.bf16.mxu0 %vm2354_vm5, %v20226_v60  ;;  %v4779_v60 = vld [vmem:[#allocation2 + $0x30] sm:$0xfc]  ;;  %v7035_v25 = vrot.slane %v22840_v6, 6 }
 0x274   :  { %18989 = vmatprep.mubr.msk.bf16.mxu1 %vm590_vm4, %v6808_v47  ;;  %v7034_v50 = vsel %vm2354_vm5, %v7032_v27, %v7033_v17  ;;  %v4787_v47 = vrot.slane %v4779_v60, 2  ;;  %v4904_v27 = vrot.slane %v23047_v18, 3  ;;  %v4894_v60 = vld [vmem:[#allocation2 + $0x50] sm:$0x7] }
 0x276   :  { %18748 = vmatpush3.bf16.msra.mxu0 %v4584_v2  ;;  %v23132_v2 = vrot.slane %v23042_v3, 6 }
 0x277   :  { %18757 = vmatprep.subr.bf16.mxu0 %v20227_v31 }
 0x278   :  { %v7040_v14 = vsel %vm2354_vm5, %v23132_v2, %v7039_v56  ;;  %v20246_v56 = vld [vmem:[%s25694_s3 + $0x14] ss:$0 sps:$4 sm:$0x33]  }
 0x279   :  { %18742 = vmatmul.mubr.msk.bf16.gmra.mrb[160].mxu0 %vm590_vm4, %v23047_v18 }
 0x27a   :  { %18749 = vmatprep.mubr.msk.bf16.mxu0 %vm590_vm4, %v22812_v23  ;;  %v20232_v23 = vld [vmem:[%s25694_s3 + $0xcc] sm:$0xff]  }
 0x27b   :  { %18990 = vmatmul.mubr.msk.bf16.vlgmr.msra.gmra.mrb[164].mxu1 %vm590_vm4, %v23016_v15 }
 0x27c   :  { %18993 = vmatprep.mubr.msk.bf16.mxu1 %vm590_vm4, %v23060_v35  ;;  %18998 = vmatpush3.bf16.msra.mxu1 %v20228_v49  ;;  %v4818_v49 = vsel %vm2354_vm5, %v20234_v58, 0 }
 0x27d   :  { %20026 = vmatprep.subr.msk.bf16.mxu1 %vm2354_vm5, %v20229_v48  ;;  %v4789_v48 = vsel %vm2520_vm8, %v4787_v47, %v4788_v12  ;;  %v20245_v47 = vld [vmem:[%s25694_s3 + $0xc] sm:$0xff]  }
 0x280   :  { %19000 = vmatpush3.bf16.msra.mxu1 %v6950_v11  ;;  %v7036_v11 = vsel %vm2354_vm5, %v7033_v17, %v7035_v25 }
 0x281   :  { %18750 = vmatmul.mubr.msk.bf16.vlgmr.msra.gmra.mrb[156].mxu0 %vm590_vm4, %v22796_v43  ;;  %19009 = vmatprep.subr.bf16.mxu1 %v20232_v23 }
 0x282   :  { %18753 = vmatprep.mubr.msk.bf16.mxu0 %vm590_vm4, %v23047_v18  ;;  %18758 = vmatpush3.bf16.msra.mxu0 %v20227_v31  ;;  %v4681_v31 = vsel %vm2323_vm7, %v22853_v29, %v4680_v21  ;;  %v4907_v21 = vsel %vm98_vm1, %v4904_v27, %v22952_v36 }
 0x283   :  { %18994 = vmatmul.mubr.msk.bf16.gmra.mrb[168].mxu1 %vm590_vm4, %v6814_v45  ;;  %20006 = vmatprep.subr.msk.bf16.mxu0 %vm2354_vm5, %v20230_v28  ;;  %v20240_v28 = vld [vmem:[%s25694_s3 + $0xe4] sm:$0xff]  }
 0x284   :  { %19001 = vmatprep.mubr.msk.bf16.mxu1 %vm590_vm4, %v6921_v41  ;;  %v7138_v45 = vld [vmem:[#allocation2 + $0x40] sm:$0x80]  ;;  %v7146_v41 = vrot.slane %v22790_v30, 7 }
 0x285   :  { %v7145_v37 = vrot.slane %v7138_v45, 7 }
 0x286   :  { %18760 = vmatpush3.bf16.msra.mxu0 %v4704_v42  ;;  %v20238_v42 = vld [vmem:[%s25694_s3 + $0x11c] ss:$0 sps:$4 sm:$0x33]  }
 0x287   :  { %18769 = vmatprep.subr.bf16.mxu0 %v20231_v57 }
 0x289   :  { %18754 = vmatmul.mubr.msk.bf16.gmra.mrb[160].mxu0 %vm590_vm4, %v22790_v30 }
 0x28a   :  { %18761 = vmatprep.mubr.msk.bf16.mxu0 %vm590_vm4, %v4675_v7  ;;  %v7147_v7 = vsel %vm3214_vm11, %v7145_v37, %v7146_v41 }
 0x28b   :  { %19002 = vmatmul.mubr.msk.bf16.vlgmr.msra.gmra.mrb[164].mxu1 %vm590_vm4, %v6923_v13  ;;  %v20239_v13 = vld [vmem:[%s25694_s3 + $0x120] sm:$0xff]  }
 0x28c   :  { %19005 = vmatprep.mubr.msk.bf16.mxu1 %vm590_vm4, %v6925_v54  ;;  %19010 = vmatpush3.bf16.msra.mxu1 %v20232_v23  ;;  %v7038_v23 = vsel %vm2354_vm5, %v7035_v25, %v23132_v2  ;;  %v4794_v54 = vrot.slane %v4780_v51, 2  ;;  %v7929_v51 = vld [vmem:[#allocation2 + $0x40] sm:$0xfe] }
 0x28d   :  { %20027 = vmatprep.subr.msk.bf16.mxu1 %vm2354_vm5, %v20233_v63  ;;  %v4932_v63 = vsel %vm2354_vm5, %v20238_v42, 0 }
 0x28e   :  { %v4795_v9 = vsel %vm2520_vm8, %v22903_v22, %v4794_v54  ;;  %v7930_v54 = vld [vmem:[#allocation2 + $0x58] sm:$0x1f] }
 0x290   :  { %19012 = vmatpush3.bf16.msra.mxu1 %v7063_v46  ;;  %v7148_v46 = vrot.slane %v22840_v6, 7 }
 0x291   :  { %18762 = vmatmul.mubr.msk.bf16.vlgmr.msra.gmra.mrb[156].mxu0 %vm590_vm4, %v4677_v34  ;;  %19021 = vmatprep.subr.bf16.mxu1 %v20236_v40 }
 0x292   :  { %18765 = vmatprep.mubr.msk.bf16.mxu0 %vm590_vm4, %v4679_v1  ;;  %18770 = vmatpush3.bf16.msra.mxu0 %v20231_v57  ;;  %v4791_v57 = vsel %vm2520_vm8, %v4788_v12, %v4790_v61  ;;  %v7149_v43 = vsel %vm3214_vm11, %v7146_v41, %v7148_v46  ;;  %v7151_v34 = vsel %vm3214_vm11, %v7148_v46, %v23175_v33  ;;  %v7139_v1 = vld [vmem:[#allocation2 + $0x60] sm:$0x7f]  ;;  %v5018_v61 = vrot.slane %v23047_v18, 4  ;;  %v7456_v46 = vld [vmem:[#allocation2 + $0x50] sm:$0xfe] }
 0x293   :  { %19006 = vmatmul.mubr.msk.bf16.gmra.mrb[168].mxu1 %vm590_vm4, %v6927_v53  ;;  %20007 = vmatprep.subr.msk.bf16.mxu0 %vm2354_vm5, %v20234_v58  ;;  %v20241_v58 = vld [vmem:[%s25694_s3 + $0xec] ss:$0 sps:$4 sm:$0x33]   ;;  %v20243_v53 = vld [vmem:[%s25694_s3 + $0xf0] sm:$0xff]  }
 0x294   :  { %19013 = vmatprep.mubr.msk.bf16.mxu1 %vm590_vm4, %v7034_v50  ;;  %v7277_v59 = vsel %vm2354_vm5, %v20241_v58, 0  ;;  %v7152_v50 = vrot.slane %v7139_v1, 7  ;;  %v5019_v45 = vsel %vm97_vm0, %v22824_v4, %v5018_v61  ;;  %v5021_v41 = vsel %vm97_vm0, %v5018_v61, %v23000_v0  ;;  %v7925_v61 = vld [vmem:[#allocation2 + $0x58] sm:$0xf] }
 0x296   :  { %18772 = vmatpush3.bf16.msra.mxu0 %v4818_v49  ;;  %v20242_v49 = vld [vmem:[%s25694_s3 + $0x128] ss:$0 sps:$4 sm:$0x33]   ;;  %v7153_v12 = vsel %vm3214_vm11, %v23175_v33, %v7152_v50 }
 0x297   :  { %18781 = vmatprep.subr.bf16.mxu0 %v20235_v38  ;;  %v5046_v25 = vsel %vm2354_vm5, %v20242_v49, 0 }
 0x299   :  { %18766 = vmatmul.mubr.msk.bf16.gmra.mrb[160].mxu0 %vm590_vm4, %v4681_v31  ;;  %v4908_v31 = vrot.slane %v4894_v60, 3  ;;  %v7575_v60 = vld [vmem:[#allocation2 + $0x50] sm:$0xfc] }
 0x29a   :  { %18773 = vmatprep.mubr.msk.bf16.mxu0 %vm590_vm4, %v4789_v48  ;;  %v5007_v48 = vld [vmem:[#allocation2 + $0x30] sm:$0xf0] }
 0x29b   :  { %19014 = vmatmul.mubr.msk.bf16.vlgmr.msra.gmra.mrb[164].mxu1 %vm590_vm4, %v7036_v11  ;;  %v4909_v11 = vsel %vm98_vm1, %v22952_v36, %v4908_v31 }
 0x29c   :  { %19017 = vmatprep.mubr.msk.bf16.mxu1 %vm590_vm4, %v7038_v23  ;;  %19022 = vmatpush3.bf16.msra.mxu1 %v20236_v40  ;;  %v4901_v40 = vrot.slane %v4893_v62, 3  ;;  %v7943_v62 = vrot.slane %v7930_v54, 1 }
 0x29d   :  { %20028 = vmatprep.subr.msk.bf16.mxu1 %vm2354_vm5, %v20237_v39  ;;  %v5015_v39 = vrot.slane %v5007_v48, 4 }
 0x29e   :  { %v4903_v17 = vsel %vm98_vm1, %v4901_v40, %v4902_v10  ;;  %v7470_v40 = vrot.slane %v23042_v3, 1 }
 0x29f   :  { %v5017_v23 = vsel %vm97_vm0, %v5015_v39, %v22824_v4  ;;  %v7967_v4 = vsel %vm2354_vm5, %v20246_v56, 0 }
 0x2a0   :  { %19024 = vmatpush3.bf16.msra.mxu1 %v7176_v44  ;;  %v7381_v44 = vsel %vm2354_vm5, %v20244_v52, 0 }
 0x2a1   :  { %18774 = vmatmul.mubr.msk.bf16.vlgmr.msra.gmra.mrb[156].mxu0 %vm590_vm4, %v4791_v57  ;;  %19033 = vmatprep.subr.bf16.mxu1 %v20240_v28  ;;  %v23242_v57 = vld [vmem:[#allocation2 + $0x60] sm:$0xff] }
 0x2a2   :  { %18777 = vmatprep.mubr.msk.bf16.mxu0 %vm590_vm4, %v4793_v32  ;;  %18782 = vmatpush3.bf16.msra.mxu0 %v20235_v38  ;;  %v4905_v38 = vsel %vm98_vm1, %v4902_v10, %v4904_v27  ;;  %v20249_v32 = vld [vmem:[%s25694_s3] sm:$0xff]  }
 0x2a3   :  { %19018 = vmatmul.mubr.msk.bf16.gmra.mrb[168].mxu1 %vm590_vm4, %v7040_v14  ;;  %20008 = vmatprep.subr.msk.bf16.mxu0 %vm2354_vm5, %v20238_v42  ;;  %v5008_v42 = vld [vmem:[#allocation2 + $0x50] sm:$0xf]  ;;  %v7938_v14 = vrot.slane %v7929_v51, 1 }
 0x2a4   :  { %19025 = vmatprep.mubr.msk.bf16.mxu1 %vm590_vm4, %v7147_v7  ;;  %v5022_v37 = vrot.slane %v5008_v42, 4  ;;  %v7576_v42 = vld [vmem:[#allocation2 + $0x70] sm:$0x3]  ;;  %v7688_v51 = vld [vmem:[#allocation2 + $0x50] sm:$0xf8] }
 0x2a6   :  { %18784 = vmatpush3.bf16.msra.mxu0 %v4932_v63  ;;  %v5023_v7 = vsel %vm97_vm0, %v23000_v0, %v5022_v37  ;;  %v7940_v63 = vsel %vm2323_vm7, %v7938_v14, %v22853_v29  ;;  %v20251_v29 = vld [vmem:[%s25694_s3 + $0x108] sm:$0xff]   ;;  %v7589_v37 = vrot.slane %v7576_v42, 2  ;;  %v7696_v14 = vrot.slane %v23042_v3, 3  ;;  %v20264_v42 = vld [vmem:[%s25694_s3 + $0x44] ss:$0 sps:$4 sm:$0x33]  }
 0x2a7   :  { %18793 = vmatprep.subr.bf16.mxu0 %v20239_v13 }
 0x2a9   :  { %18778 = vmatmul.mubr.msk.bf16.gmra.mrb[160].mxu0 %vm590_vm4, %v4795_v9  ;;  %v20250_v9 = vld [vmem:[%s25694_s3 + $0x8] ss:$0 sps:$4 sm:$0x33]  }
 0x2aa   :  { %18785 = vmatprep.mubr.msk.bf16.mxu0 %vm590_vm4, %v4903_v17  ;;  %v7944_v17 = vsel %vm2323_vm7, %v22856_v26, %v7943_v62  ;;  %v8055_v1 = vsel %vm2354_vm5, %v20250_v9, 0  ;;  %v20253_v26 = vld [vmem:[%s25694_s3 + $0x18] sm:$0xff]  }
 0x2ab   :  { %19026 = vmatmul.mubr.msk.bf16.vlgmr.msra.gmra.mrb[164].mxu1 %vm590_vm4, %v7149_v43  ;;  %v23280_v43 = vld [vmem:[#allocation2 + $0x68] sm:$0xff] }
 0x2ac   :  { %19029 = vmatprep.mubr.msk.bf16.mxu1 %vm590_vm4, %v7151_v34  ;;  %19034 = vmatpush3.bf16.msra.mxu1 %v20240_v28  ;;  %v20247_v28 = vld [vmem:[%s25694_s3 + $0xfc] sm:$0xff]   ;;  %v23295_v27 = vrot.slane %v23280_v43, 1 }
 0x2ad   :  { %20029 = vmatprep.subr.msk.bf16.mxu1 %vm2354_vm5, %v20241_v58  ;;  %v7469_v58 = vrot.slane %v7456_v46, 1 }
 0x2af   :  { %v7471_v34 = vsel %vm2323_vm7, %v7469_v58, %v7470_v40 }
 0x2b0   :  { %19036 = vmatpush3.bf16.msra.mxu1 %v7277_v59  ;;  %v20252_v59 = vld [vmem:[%s25694_s3 + $0x110] ss:$0 sps:$4 sm:$0x33]  }
 0x2b1   :  { %18786 = vmatmul.mubr.msk.bf16.vlgmr.msra.gmra.mrb[156].mxu0 %vm590_vm4, %v4905_v38  ;;  %19045 = vmatprep.subr.bf16.mxu1 %v20243_v53  ;;  %v7613_v38 = vsel %vm2354_vm5, %v20252_v59, 0 }
 0x2b2   :  { %18789 = vmatprep.mubr.msk.bf16.mxu0 %vm590_vm4, %v4907_v21  ;;  %18794 = vmatpush3.bf16.msra.mxu0 %v20239_v13  ;;  %v20248_v13 = vld [vmem:[%s25694_s3 + $0x104] ss:$0 sps:$4 sm:$0x33]  }
 0x2b3   :  { %19030 = vmatmul.mubr.msk.bf16.gmra.mrb[168].mxu1 %vm590_vm4, %v7153_v12  ;;  %20009 = vmatprep.subr.msk.bf16.mxu0 %vm2354_vm5, %v20242_v49  ;;  %v7500_v10 = vsel %vm2354_vm5, %v20248_v13, 0  ;;  %v7460_v49 = vld [vmem:[#allocation2 + $0x70] sm:$0x1]  ;;  %v7583_v12 = vrot.slane %v23042_v3, 2 }
 0x2b4   :  { %19037 = vmatprep.mubr.msk.bf16.mxu1 %vm590_vm4, %v22790_v30  ;;  %v7476_v21 = vrot.slane %v7460_v49, 1  ;;  %v7801_v49 = vld [vmem:[#allocation2 + $0x50] sm:$0xf0] }
 0x2b6   :  { %18796 = vmatpush3.bf16.msra.mxu0 %v5046_v25  ;;  %v20254_v25 = vld [vmem:[%s25694_s3 + $0x20] ss:$0 sps:$4 sm:$0x33]   ;;  %v7477_v31 = vsel %vm2323_vm7, %v23295_v27, %v7476_v21  ;;  %v7808_v21 = vrot.slane %v7801_v49, 4  ;;  %v20307_v49 = vld [vmem:[%s25696_s5 + $0x10c] ss:$16 sps:$4 sm:$0xff]  }
 0x2b7   :  { %19105 = vmatprep.subr.bf16.mxu0 %v20245_v47  ;;  %v8157_v39 = vsel %vm2354_vm5, %v20254_v25, 0 }
 0x2b9   :  { %18790 = vmatmul.mubr.msk.bf16.gmra.mrb[160].mxu0 %vm590_vm4, %v4909_v11  ;;  %v8121_v11 = vld [vmem:[#allocation2 + $0x40] sm:$0xfc] }
 0x2ba   :  { %18797 = vmatprep.mubr.msk.bf16.mxu0 %vm590_vm4, %v5017_v23  ;;  %v8128_v23 = vrot.slane %v8121_v11, 2 }
 0x2bb   :  { %19038 = vmatmul.mubr.msk.bf16.vlgmr.msra.gmra.mrb[164].mxu1 %vm590_vm4, %v22840_v6 }
 0x2bc   :  { %19041 = vmatprep.mubr.msk.bf16.mxu1 %vm590_vm4, %v23042_v3  ;;  %19046 = vmatpush3.bf16.msra.mxu1 %v20243_v53 }
 0x2bd   :  { %20030 = vmatprep.subr.msk.bf16.mxu1 %vm2354_vm5, %v20244_v52  ;;  %v23340_v52 = vrot.slane %v23280_v43, 2 }
 0x2bf   :  { %v7590_v54 = vsel %vm2520_vm8, %v23340_v52, %v7589_v37  ;;  %v8488_v37 = vsel %vm2354_vm5, %v20264_v42, 0 }
 0x2c0   :  { %19048 = vmatpush3.bf16.msra.mxu1 %v7381_v44  ;;  %v8130_v44 = vsel %vm2520_vm8, %v8128_v23, %v22903_v22 }
 0x2c1   :  { %18798 = vmatmul.mubr.msk.bf16.vlgmr.msra.gmra.mrb[156].mxu0 %vm590_vm4, %v5019_v45  ;;  %19057 = vmatprep.subr.bf16.mxu1 %v20247_v28  ;;  %v8122_v45 = vld [vmem:[#allocation2 + $0x58] sm:$0x3f] }
 0x2c2   :  { %18801 = vmatprep.mubr.msk.bf16.mxu0 %vm590_vm4, %v5021_v41  ;;  %19106 = vmatpush3.bf16.msra.mxu0 %v20245_v47  ;;  %v7582_v47 = vrot.slane %v7575_v60, 2  ;;  %v8133_v22 = vrot.slane %v8122_v45, 2 }
 0x2c3   :  { %19042 = vmatmul.mubr.msk.bf16.gmra.mrb[168].mxu1 %vm590_vm4, %v23242_v57  ;;  %20035 = vmatprep.subr.msk.bf16.mxu0 %vm2354_vm5, %v20246_v56 }
 0x2c4   :  { %19049 = vmatprep.mubr.msk.bf16.mxu1 %vm590_vm4, %v22840_v6  ;;  %v7584_v48 = vsel %vm2520_vm8, %v7582_v47, %v7583_v12  ;;  %v8339_v47 = vld [vmem:[#allocation2 + $0x40] sm:$0xf0] }
 0x2c6   :  { %19108 = vmatpush3.bf16.msra.mxu0 %v7967_v4 }
 0x2c7   :  { %19117 = vmatprep.subr.bf16.mxu0 %v20249_v32 }
 0x2c9   :  { %18802 = vmatmul.mubr.msk.bf16.gmra.mrb[160].mxu0 %vm590_vm4, %v5023_v7  ;;  %v20258_v7 = vld [vmem:[%s25694_s3 + $0x2c] ss:$0 sps:$4 sm:$0x33]  }
 0x2ca   :  { %19109 = vmatprep.mubr.msk.bf16.mxu0 %vm590_vm4, %v7940_v63  ;;  %v8134_v63 = vsel %vm2520_vm8, %v22906_v19, %v8133_v22  ;;  %v20261_v19 = vld [vmem:[%s25694_s3 + $0x30] sm:$0xff]  }
 0x2cb   :  { %19050 = vmatmul.mubr.msk.bf16.vlgmr.msra.gmra.mrb[164].mxu1 %vm590_vm4, %v23042_v3 }
 0x2cc   :  { %19053 = vmatprep.mubr.msk.bf16.mxu1 %vm590_vm4, %v23242_v57  ;;  %19058 = vmatpush3.bf16.msra.mxu1 %v20247_v28  ;;  %v20256_v28 = vld [vmem:[%s25694_s3 + $0x11c] ss:$0 sps:$4 sm:$0x33]  }
 0x2cd   :  { %20031 = vmatprep.subr.msk.bf16.mxu1 %vm2354_vm5, %v20248_v13  ;;  %v7726_v4 = vsel %vm2354_vm5, %v20256_v28, 0  ;;  %v7695_v13 = vrot.slane %v7688_v51, 3  ;;  %v8448_v51 = vld [vmem:[#allocation2 + $0x48] sm:$0xf0] }
 0x2d0   :  { %19060 = vmatpush3.bf16.msra.mxu1 %v7500_v10  ;;  %v8266_v10 = vsel %vm2354_vm5, %v20258_v7, 0 }
 0x2d1   :  { %19110 = vmatmul.mubr.msk.bf16.vlgmr.msra.gmra.mrb[164].mxu0 %vm590_vm4, %v22872_v8  ;;  %19069 = vmatprep.subr.bf16.mxu1 %v20251_v29  ;;  %v23292_v8 = vrot.slane %v23242_v57, 1 }
 0x2d2   :  { %19113 = vmatprep.mubr.msk.bf16.mxu0 %vm590_vm4, %v7944_v17  ;;  %19118 = vmatpush3.bf16.msra.mxu0 %v20249_v32  ;;  %v20259_v32 = vld [vmem:[%s25694_s3 + $0x120] sm:$0xff]   ;;  %v20260_v17 = vld [vmem:[%s25694_s3 + $0x128] ss:$0 sps:$4 sm:$0x33]  }
 0x2d3   :  { %19054 = vmatmul.mubr.msk.bf16.gmra.mrb[168].mxu1 %vm590_vm4, %v23280_v43  ;;  %20036 = vmatprep.subr.msk.bf16.mxu0 %vm2354_vm5, %v20250_v9  ;;  %v7473_v53 = vsel %vm2323_vm7, %v7470_v40, %v23292_v8  ;;  %v23309_v50 = vsel %vm2323_vm7, %v23292_v8, %v23295_v27  ;;  %v23387_v40 = vrot.slane %v23280_v43, 3 }
 0x2d4   :  { %19061 = vmatprep.mubr.msk.bf16.mxu1 %vm590_vm4, %v7471_v34  ;;  %v8231_v34 = vld [vmem:[#allocation2 + $0x58] sm:$0x7f] }
 0x2d6   :  { %19120 = vmatpush3.bf16.msra.mxu0 %v8055_v1 }
 0x2d7   :  { %19129 = vmatprep.subr.bf16.mxu0 %v20253_v26 }
 0x2d9   :  { %19114 = vmatmul.mubr.msk.bf16.gmra.mrb[168].mxu0 %vm590_vm4, %v7943_v62  ;;  %v7697_v62 = vsel %vm98_vm1, %v7695_v13, %v7696_v14  ;;  %v20291_v13 = vld [vmem:[%s25696_s5 + $0x180] ss:$16 sps:$4 sm:$0xff]  }
 0x2da   :  { %19121 = vmatprep.mubr.msk.bf16.mxu0 %vm590_vm4, %v23047_v18  ;;  %v20255_v18 = vld [vmem:[%s25694_s3 + $0x114] sm:$0xff]  }
 0x2db   :  { %19062 = vmatmul.mubr.msk.bf16.vlgmr.msra.gmra.mrb[164].mxu1 %vm590_vm4, %v7473_v53 }
 0x2dc   :  { %19065 = vmatprep.mubr.msk.bf16.mxu1 %vm590_vm4, %v23309_v50  ;;  %19070 = vmatpush3.bf16.msra.mxu1 %v20251_v29  ;;  %v23384_v29 = vrot.slane %v23242_v57, 3 }
 0x2dd   :  { %20032 = vmatprep.subr.msk.bf16.mxu1 %vm2354_vm5, %v20252_v59  ;;  %v7839_v59 = vsel %vm2354_vm5, %v20260_v17, 0 }
 0x2de   :  { %v7699_v58 = vsel %vm98_vm1, %v7696_v14, %v23384_v29  ;;  %v23402_v1 = vsel %vm98_vm1, %v23384_v29, %v23387_v40  ;;  %v20288_v14 = vld [vmem:[%s25696_s5 + $0x160] ss:$16 sps:$4 sm:$0xff]  }
 0x2e0   :  { %19072 = vmatpush3.bf16.msra.mxu1 %v7613_v38  ;;  %v20262_v38 = vld [vmem:[%s25694_s3 + $0x38] ss:$0 sps:$4 sm:$0x33]  }
 0x2e1   :  { %19122 = vmatmul.mubr.msk.bf16.vlgmr.msra.gmra.mrb[164].mxu0 %vm590_vm4, %v22790_v30  ;;  %19081 = vmatprep.subr.bf16.mxu1 %v20255_v18  ;;  %v20257_v30 = vld [vmem:[%s25694_s3 + $0x24] sm:$0xff]  }
 0x2e2   :  { %19125 = vmatprep.mubr.msk.bf16.mxu0 %vm590_vm4, %v22840_v6  ;;  %19130 = vmatpush3.bf16.msra.mxu0 %v20253_v26  ;;  %v23337_v6 = vrot.slane %v23242_v57, 2  ;;  %v7689_v26 = vld [vmem:[#allocation2 + $0x70] sm:$0x7] }
 0x2e3   :  { %19066 = vmatmul.mubr.msk.bf16.gmra.mrb[168].mxu1 %vm590_vm4, %v7477_v31  ;;  %20037 = vmatprep.subr.msk.bf16.mxu0 %vm2354_vm5, %v20254_v25  ;;  %v7702_v53 = vrot.slane %v7689_v26, 3  ;;  %v7810_v25 = vsel %vm97_vm0, %v7808_v21, %v23045_v20  ;;  %v23431_v31 = vrot.slane %v23242_v57, 4  ;;  %v8561_v26 = vld [vmem:[#allocation2 + $0x48] sm:$0xe0]  ;;  %v8579_v21 = vrot.slane %v23242_v57, 5 }
 0x2e4   :  { %19073 = vmatprep.mubr.msk.bf16.mxu1 %vm590_vm4, %v7584_v48  ;;  %v7586_v56 = vsel %vm2520_vm8, %v7583_v12, %v23337_v6  ;;  %v23355_v41 = vsel %vm2520_vm8, %v23337_v6, %v23340_v52  ;;  %v20279_v12 = vld [vmem:[%s25696_s5 + $0x104] ss:$16 sps:$4 sm:$0xff]   ;;  %v8346_v48 = vrot.slane %v8339_v47, 4 }
 0x2e5   :  { %v7703_v60 = vsel %vm98_vm1, %v23387_v40, %v7702_v53  ;;  %v7812_v23 = vsel %vm97_vm0, %v23045_v20, %v23431_v31  ;;  %v20269_v47 = vld [vmem:[%s25694_s3 + $0x60] sm:$0xff]  }
 0x2e6   :  { %19132 = vmatpush3.bf16.msra.mxu0 %v8157_v39  ;;  %v23434_v39 = vrot.slane %v23280_v43, 4  ;;  %v8348_v11 = vsel %vm97_vm0, %v8346_v48, %v23000_v0  ;;  %v20281_v0 = vld [vmem:[%s25696_s5 + $0x120] ss:$16 sps:$4 sm:$0xff]  }
 0x2e7   :  { %19141 = vmatprep.subr.bf16.mxu0 %v20257_v30 }
 0x2e9   :  { %19126 = vmatmul.mubr.msk.bf16.gmra.mrb[168].mxu0 %vm590_vm4, %v7925_v61  ;;  %v20283_v61 = vld [vmem:[%s25696_s5 + $0x124] ss:$16 sps:$4 sm:$0xff]  }
 0x2ea   :  { %19133 = vmatprep.mubr.msk.bf16.mxu0 %vm590_vm4, %v8130_v44  ;;  %v23453_v44 = vsel %vm97_vm0, %v23431_v31, %v23434_v39 }
 0x2eb   :  { %19074 = vmatmul.mubr.msk.bf16.vlgmr.msra.gmra.mrb[164].mxu1 %vm590_vm4, %v7586_v56  ;;  %v20287_v56 = vld [vmem:[%s25696_s5 + $0x144] ss:$16 sps:$4 sm:$0xff]  }
 0x2ec   :  { %19077 = vmatprep.mubr.msk.bf16.mxu1 %vm590_vm4, %v23355_v41  ;;  %19082 = vmatpush3.bf16.msra.mxu1 %v20255_v18 }
 0x2ed   :  { %20033 = vmatprep.subr.msk.bf16.mxu1 %vm2354_vm5, %v20256_v28  ;;  %v7802_v28 = vld [vmem:[#allocation2 + $0x70] sm:$0xf] }
 0x2ee   :  { %v7815_v45 = vrot.slane %v7802_v28, 4  ;;  %v8690_v28 = vrot.slane %v23242_v57, 6 }
 0x2f0   :  { %19084 = vmatpush3.bf16.msra.mxu1 %v7726_v4  ;;  %v7816_v4 = vsel %vm97_vm0, %v23434_v39, %v7815_v45  ;;  %v8691_v45 = vsel %vm2354_vm5, %v23132_v2, %v8690_v28 }
 0x2f1   :  { %19134 = vmatmul.mubr.msk.bf16.vlgmr.msra.gmra.mrb[164].mxu0 %vm590_vm4, %v22921_v24  ;;  %19093 = vmatprep.subr.bf16.mxu1 %v20259_v32  ;;  %v8230_v24 = vld [vmem:[#allocation2 + $0x40] sm:$0xf8] }
 0x2f2   :  { %19137 = vmatprep.mubr.msk.bf16.mxu0 %vm590_vm4, %v8134_v63  ;;  %19142 = vmatpush3.bf16.msra.mxu0 %v20257_v30  ;;  %v8237_v46 = vrot.slane %v8230_v24, 3  ;;  %v20277_v30 = vld [vmem:[%s25696_s5 + $0x100] ss:$16 sps:$4 sm:$0xff]   ;;  %v8459_v63 = vrot.slane %v8448_v51, 4 }
 0x2f3   :  { %19078 = vmatmul.mubr.msk.bf16.gmra.mrb[168].mxu1 %vm590_vm4, %v7590_v54  ;;  %20038 = vmatprep.subr.msk.bf16.mxu0 %vm2354_vm5, %v20258_v7  ;;  %v20290_v7 = vld [vmem:[%s25696_s5 + $0x164] ss:$16 sps:$4 sm:$0xff]   ;;  %v20266_v24 = vld [vmem:[%s25694_s3 + $0x50] ss:$0 sps:$4 sm:$0x33]  }
 0x2f4   :  { %19085 = vmatprep.mubr.msk.bf16.mxu1 %vm590_vm4, %v7697_v62  ;;  %v8239_v9 = vsel %vm98_vm1, %v8237_v46, %v22952_v36  ;;  %v8242_v36 = vrot.slane %v8231_v34, 3  ;;  %v20293_v54 = vld [vmem:[%s25696_s5 + $0x184] ss:$16 sps:$4 sm:$0xff]  }
 0x2f5   :  { %v20267_v34 = vld [vmem:[%s25694_s3 + $0x54] sm:$0xff]  }
 0x2f6   :  { %19144 = vmatpush3.bf16.msra.mxu0 %v8266_v10  ;;  %v8243_v18 = vsel %vm98_vm1, %v22955_v16, %v8242_v36  ;;  %v8375_v16 = vsel %vm2354_vm5, %v20262_v38, 0  ;;  %v20295_v10 = vld [vmem:[%s25696_s5 + $0x1a0] ss:$16 sps:$4 sm:$0xff]  }
 0x2f7   :  { %19153 = vmatprep.subr.bf16.mxu0 %v20261_v19 }
 0x2f9   :  { %19138 = vmatmul.mubr.msk.bf16.gmra.mrb[168].mxu0 %vm590_vm4, %v8133_v22  ;;  %v20285_v22 = vld [vmem:[%s25696_s5 + $0x140] ss:$16 sps:$4 sm:$0xff]  }
 0x2fa   :  { %19145 = vmatprep.mubr.msk.bf16.mxu0 %vm590_vm4, %v8239_v9  ;;  %v20299_v9 = vld [vmem:[%s25696_s5 + $0x1c0] ss:$16 sps:$4 sm:$0xff]  }
 0x2fb   :  { %19086 = vmatmul.mubr.msk.bf16.vlgmr.msra.gmra.mrb[164].mxu1 %vm590_vm4, %v7699_v58  ;;  %v20304_v58 = vld [vmem:[%s25696_s5 + $0x1e4] ss:$16 sps:$4 sm:$0xff]  }
 0x2fc   :  { %19089 = vmatprep.mubr.msk.bf16.mxu1 %vm590_vm4, %v23402_v1  ;;  %19094 = vmatpush3.bf16.msra.mxu1 %v20259_v32  ;;  %v23475_v32 = vld [vmem:[#allocation2 + $0x50] sm:$0xff] }
 0x2fd   :  { %20034 = vmatprep.subr.msk.bf16.mxu1 %vm2354_vm5, %v20260_v17  ;;  %v20301_v17 = vld [vmem:[%s25696_s5 + $0x1c4] ss:$16 sps:$4 sm:$0xff]   ;;  %v8575_v53 = vrot.slane %v23475_v32, 5  ;;  %v8797_v51 = vrot.slane %v23475_v32, 7 }
 0x300   :  { %19096 = vmatpush3.bf16.msra.mxu1 %v7839_v59  ;;  %v21139_v59 = vmov 0  }
 0x301   :  { %19146 = vmatmul.mubr.msk.bf16.vlgmr.msra.gmra.mrb[164].mxu0 %vm590_vm4, %v22970_v5  ;;  %v20263_v5 = vld [vmem:[%s25694_s3 + $0x3c] sm:$0xff]   ;;  %10889 = vmatprep.subr.bf16.mxu1 %v20279_v12  ;;  %v8578_v12 = vsel %vm2984_vm10, %v8575_v53, %v23090_v55 }
 0x302   :  { %19149 = vmatprep.mubr.msk.bf16.mxu0 %vm590_vm4, %v8243_v18  ;;  %19154 = vmatpush3.bf16.msra.mxu0 %v20261_v19  ;;  %v20297_v19 = vld [vmem:[%s25696_s5 + $0x1a4] ss:$16 sps:$4 sm:$0xff]  }
 0x303   :  { %19090 = vmatmul.mubr.msk.bf16.gmra.mrb[168].mxu1 %vm590_vm4, %v7703_v60  ;;  %20039 = vmatprep.subr.msk.bf16.mxu0 %vm2354_vm5, %v20262_v38  ;;  %v8574_v38 = vrot.slane %v8561_v26, 5  ;;  %v20268_v60 = vld [vmem:[%s25694_s3 + $0x5c] ss:$0 sps:$4 sm:$0x33]  }
 0x304   :  { %19097 = vmatprep.mubr.msk.bf16.mxu1 %vm590_vm4, %v7810_v25  ;;  %v8580_v25 = vsel %vm2984_vm10, %v23090_v55, %v8579_v21  ;;  %v9101_v26 = vld [vmem:[#allocation2 + $0x58] sm:$0xfe] }
 0x305   :  { %v8576_v18 = vsel %vm2984_vm10, %v8574_v38, %v8575_v53  ;;  %v9002_v53 = vld [vmem:[#allocation2 + $0x70] sm:$0xf]  ;;  %v20284_v38 = vld [vmem:[%s25694_s3 + $0x98] ss:$0 sps:$4 sm:$0x33]  }
 0x306   :  { %19156 = vmatpush3.bf16.msra.mxu0 %v8375_v16  ;;  %v8565_v16 = vld [vmem:[#allocation2 + $0x68] sm:$0x1] }
 0x307   :  { %19165 = vmatprep.subr.bf16.mxu0 %v20263_v5  ;;  %v8581_v48 = vrot.slane %v8565_v16, 5  ;;  %v20298_v16 = vld [vmem:[%s25694_s3 + $0xa4] ss:$0 sps:$4 sm:$0x33]  }
 0x309   :  { %19150 = vmatmul.mubr.msk.bf16.gmra.mrb[168].mxu0 %vm590_vm4, %v8242_v36  ;;  %v20302_v36 = vld [vmem:[%s25696_s5 + $0x1e0] ss:$16 sps:$4 sm:$0xff]   ;;  %v8582_v55 = vsel %vm2984_vm10, %v8579_v21, %v8581_v48 }
 0x30a   :  { %19157 = vmatprep.mubr.msk.bf16.mxu0 %vm590_vm4, %v8348_v11  ;;  %v8686_v11 = vrot.slane %v23475_v32, 6  ;;  %v20294_v21 = vld [vmem:[%s25694_s3 + $0x9c] sm:$0xff]  }
 0x30b   :  { %19098 = vmatmul.mubr.msk.bf16.vlgmr.msra.gmra.mrb[164].mxu1 %vm590_vm4, %v7812_v23 }
 0x30c   :  { %19101 = vmatprep.mubr.msk.bf16.mxu1 %vm590_vm4, %v23453_v44  ;;  %10890 = vmatpush1.bf16.msra.mxu1 %v20277_v30  ;;  %v8678_v30 = vld [vmem:[#allocation2 + $0x48] sm:$0xc0] }
 0x30d   :  { %10891 = vmatprep.subr.bf16.mxu1 %v20283_v61 }
 0x310   :  { %10892 = vmatpush1.bf16.msra.mxu1 %v20281_v0  ;;  %v20270_v0 = vld [vmem:[%s25694_s3 + $0x68] ss:$0 sps:$4 sm:$0x33]  }
 0x311   :  { %19158 = vmatmul.mubr.msk.bf16.vlgmr.msra.gmra.mrb[164].mxu0 %vm590_vm4, %v23016_v15  ;;  %10893 = vmatprep.subr.bf16.mxu1 %v20287_v56  ;;  %v20265_v15 = vld [vmem:[%s25694_s3 + $0x48] sm:$0xff]   ;;  %v8689_v56 = vsel %vm2354_vm5, %v8686_v11, %v23132_v2 }
 0x312   :  { %19161 = vmatprep.mubr.msk.bf16.mxu0 %vm590_vm4, %v23060_v35  ;;  %19166 = vmatpush3.bf16.msra.mxu0 %v20263_v5  ;;  %v8460_v35 = vrot.slane %v23475_v32, 4  ;;  %v8716_v5 = vsel %vm2354_vm5, %v20268_v60, 0 }
 0x313   :  { %19102 = vmatmul.mubr.msk.bf16.gmra.mrb[168].mxu1 %vm590_vm4, %v7816_v4  ;;  %20040 = vmatprep.subr.msk.bf16.mxu0 %vm2354_vm5, %v20264_v42  ;;  %v8679_v42 = vld [vmem:[#allocation2 + $0x68] sm:$0x3]  ;;  %v20271_v4 = vld [vmem:[%s25694_s3 + $0x6c] sm:$0xff]  }
 0x314   :  { %10894 = vmatpush1.bf16.msra.mxu1 %v20285_v22  ;;  %v8461_v62 = vsel %vm97_vm0, %v8459_v63, %v8460_v35  ;;  %v8463_v46 = vsel %vm97_vm0, %v8460_v35, %v23045_v20  ;;  %10921 = vmatprep.mubr.bf16.mxu1 %v21139_v59  ;;  %v8827_v22 = vsel %vm2354_vm5, %v20270_v0, 0  ;;  %v20272_v63 = vld [vmem:[%s25694_s3 + $0x74] ss:$0 sps:$4 sm:$0x33]  }
 0x315   :  { %10895 = vmatprep.subr.bf16.mxu1 %v20290_v7  ;;  %v8801_v7 = vrot.slane %v23242_v57, 7 }
 0x316   :  { %19168 = vmatpush3.bf16.msra.mxu0 %v8488_v37  ;;  %v8692_v37 = vrot.slane %v8679_v42, 6 }
 0x317   :  { %19177 = vmatprep.subr.bf16.mxu0 %v20265_v15 }
 0x318   :  { %10896 = vmatpush1.bf16.msra.mxu1 %v20288_v14  ;;  %v8693_v2 = vsel %vm2354_vm5, %v8690_v28, %v8692_v37 }
 0x319   :  { %19162 = vmatmul.mubr.msk.bf16.gmra.mrb[168].mxu0 %vm590_vm4, %v23045_v20  ;;  %10897 = vmatprep.subr.bf16.mxu1 %v20293_v54  ;;  %v8605_v20 = vsel %vm2354_vm5, %v20266_v24, 0  ;;  %v8802_v54 = vsel %vm3214_vm11, %v23175_v33, %v8801_v7 }
 0x31a   :  { %19169 = vmatprep.mubr.msk.bf16.mxu0 %vm590_vm4, %v8461_v62  ;;  %v8790_v62 = vld [vmem:[#allocation2 + $0x68] sm:$0x7] }
 0x31c   :  { %10898 = vmatpush1.bf16.msra.mxu1 %v20291_v13  ;;  %v8800_v13 = vsel %vm3214_vm11, %v8797_v51, %v23175_v33  ;;  %v20274_v33 = vld [vmem:[%s25694_s3 + $0x80] ss:$0 sps:$4 sm:$0x33]  }
 0x31d   :  { %10899 = vmatprep.subr.bf16.mxu1 %v20297_v19  ;;  %v20273_v19 = vld [vmem:[%s25694_s3 + $0x78] sm:$0xff]  }
 0x320   :  { %10900 = vmatpush1.bf16.msra.mxu1 %v20295_v10  ;;  %v8926_v10 = vsel %vm2354_vm5, %v20272_v63, 0 }
 0x321   :  { %19170 = vmatmul.mubr.msk.bf16.vlgmr.msra.gmra.mrb[164].mxu0 %vm590_vm4, %v8463_v46  ;;  %10901 = vmatprep.subr.bf16.mxu1 %v20301_v17  ;;  %v20275_v17 = vld [vmem:[%s25694_s3 + $0x84] sm:$0xff]  }
 0x322   :  { %19173 = vmatprep.mubr.msk.bf16.mxu0 %vm590_vm4, %v7812_v23  ;;  %19178 = vmatpush3.bf16.msra.mxu0 %v20265_v15  ;;  %v8685_v23 = vrot.slane %v8678_v30, 6  ;;  %v8789_v15 = vld [vmem:[#allocation2 + $0x48] sm:$0x80]  ;;  %v9321_v30 = vld [vmem:[#allocation2 + $0x58] sm:$0xf8] }
 0x323   :  { %20041 = vmatprep.subr.msk.bf16.mxu0 %vm2354_vm5, %v20266_v24  ;;  %v8796_v35 = vrot.slane %v8789_v15, 7  ;;  %v8803_v24 = vrot.slane %v8790_v62, 7  ;;  %v9430_v62 = vld [vmem:[#allocation2 + $0x58] sm:$0xf0] }
 0x324   :  { %10902 = vmatpush1.bf16.msra.mxu1 %v20299_v9  ;;  %v8687_v61 = vsel %vm2354_vm5, %v8685_v23, %v8686_v11  ;;  %v9028_v9 = vsel %vm2354_vm5, %v20274_v33, 0 }
 0x325   :  { %10903 = vmatprep.subr.bf16.mxu1 %v20304_v58  ;;  %v8798_v14 = vsel %vm3214_vm11, %v8796_v35, %v8797_v51  ;;  %v8804_v46 = vsel %vm3214_vm11, %v8801_v7, %v8803_v24  ;;  %v8999_v58 = vld [vmem:[#allocation2 + $0x58] sm:$0xff] }
 0x326   :  { %19180 = vmatpush3.bf16.msra.mxu0 %v8605_v20  ;;  %v20311_v24 = vld [vmem:[%s25696_s5 + $0x12c] ss:$16 sps:$4 sm:$0xff]  }
 0x327   :  { %19189 = vmatprep.subr.bf16.mxu0 %v20267_v34 }
 0x328   :  { %10904 = vmatpush1.bf16.msra.mxu1 %v20302_v36  ;;  %v9110_v36 = vrot.slane %v9101_v26, 1  ;;  %v23721_v26 = vld [vmem:[#allocation2 + $0x68] sm:$0xff] }
 0x329   :  { %19174 = vmatmul.mubr.msk.bf16.gmra.mrb[168].mxu0 %vm590_vm4, %v23431_v31  ;;  %10930 = vmatprep.subr.bf16.mxu1 %v20307_v49 }
 0x32a   :  { %19181 = vmatprep.mubr.msk.bf16.mxu0 %vm590_vm4, %v8576_v18 }
 0x331   :  { %19182 = vmatmul.mubr.msk.bf16.vlgmr.msra.gmra.mrb[164].mxu0 %vm590_vm4, %v8578_v12 }
 0x332   :  { %19185 = vmatprep.mubr.msk.bf16.mxu0 %vm590_vm4, %v8580_v25  ;;  %19190 = vmatpush3.bf16.msra.mxu0 %v20267_v34  ;;  %v20280_v34 = vld [vmem:[%s25694_s3 + $0x90] sm:$0xff]  }
 0x333   :  { %20042 = vmatprep.subr.msk.bf16.mxu0 %vm2354_vm5, %v20268_v60  ;;  %v9212_v60 = vld [vmem:[#allocation2 + $0x58] sm:$0xfc] }
 0x334   :  { %v9219_v12 = vrot.slane %v9212_v60, 2  ;;  %v20329_v60 = vld [vmem:[%s25696_s5 + $0x1cc] ss:$16 sps:$4 sm:$0xff]  }
 0x336   :  { %19192 = vmatpush3.bf16.msra.mxu0 %v8716_v5 }
 0x337   :  { %19201 = vmatprep.subr.bf16.mxu0 %v20269_v47 }
 0x339   :  { %19186 = vmatmul.mubr.msk.bf16.gmra.mrb[168].mxu0 %vm590_vm4, %v8582_v55 }
 0x33a   :  { %19193 = vmatprep.mubr.msk.bf16.mxu0 %vm590_vm4, %v8687_v61  ;;  %v9322_v61 = vld [vmem:[#allocation2 + $0x70] sm:$0x7f] }
 0x341   :  { %19194 = vmatmul.mubr.msk.bf16.vlgmr.msra.gmra.mrb[164].mxu0 %vm590_vm4, %v8689_v56  ;;  %v9333_v56 = vrot.slane %v9322_v61, 3 }
 0x342   :  { %19197 = vmatprep.mubr.msk.bf16.mxu0 %vm590_vm4, %v8691_v45  ;;  %19202 = vmatpush3.bf16.msra.mxu0 %v20269_v47  ;;  %v20308_v47 = vld [vmem:[%s25694_s3 + $0xa8] sm:$0xff]  }
 0x343   :  { %20043 = vmatprep.subr.msk.bf16.mxu0 %vm2354_vm5, %v20270_v0 }
 0x346   :  { %19204 = vmatpush3.bf16.msra.mxu0 %v8827_v22 }
 0x347   :  { %19213 = vmatprep.subr.bf16.mxu0 %v20271_v4 }
 0x349   :  { %19198 = vmatmul.mubr.msk.bf16.gmra.mrb[168].mxu0 %vm590_vm4, %v8693_v2  ;;  %v23668_v2 = vld [vmem:[%s25695_s4] ss:$0 sm:$0xff] }
 0x34a   :  { %19205 = vmatprep.mubr.msk.bf16.mxu0 %vm590_vm4, %v8798_v14  ;;  %v9334_v14 = vsel %vm98_vm1, %v23387_v40, %v9333_v56  ;;  %v20305_v40 = vld [vmem:[%s25696_s5 + $0x108] ss:$16 sps:$4 sm:$0xff]  }
 0x351   :  { %19206 = vmatmul.mubr.msk.bf16.vlgmr.msra.gmra.mrb[164].mxu0 %vm590_vm4, %v8800_v13 }
 0x352   :  { %19209 = vmatprep.mubr.msk.bf16.mxu0 %vm590_vm4, %v8802_v54  ;;  %19214 = vmatpush3.bf16.msra.mxu0 %v20271_v4  ;;  %v20322_v54 = vld [vmem:[%s25694_s3 + $0xb4] sm:$0xff]  }
 0x353   :  { %20044 = vmatprep.subr.msk.bf16.mxu0 %vm2354_vm5, %v20272_v63 }
 0x356   :  { %19216 = vmatpush3.bf16.msra.mxu0 %v8926_v10 }
 0x357   :  { %19225 = vmatprep.subr.bf16.mxu0 %v20273_v19 }
 0x359   :  { %19210 = vmatmul.mubr.msk.bf16.gmra.mrb[168].mxu0 %vm590_vm4, %v8804_v46 }
 0x35a   :  { %19217 = vmatprep.mubr.msk.bf16.mxu0 %vm590_vm4, %v23475_v32  ;;  %v8900_v32 = vld [vmem:[#allocation2 + $0x68] sm:$0xf] }
 0x361   :  { %19218 = vmatmul.mubr.msk.bf16.vlgmr.msra.gmra.mrb[164].mxu0 %vm590_vm4, %v23042_v3  ;;  %v20276_v3 = vld [vmem:[%s25694_s3 + $0x8c] ss:$0 sps:$4 sm:$0x33]  }
 0x362   :  { %19221 = vmatprep.mubr.msk.bf16.mxu0 %vm590_vm4, %v23242_v57  ;;  %19226 = vmatpush3.bf16.msra.mxu0 %v20273_v19  ;;  %v9139_v20 = vsel %vm2354_vm5, %v20276_v3, 0  ;;  %v9437_v19 = vrot.slane %v9430_v62, 4 }
 0x363   :  { %20045 = vmatprep.subr.msk.bf16.mxu0 %vm2354_vm5, %v20274_v33  ;;  %v20309_v33 = vld [vmem:[%s25696_s5 + $0x128] ss:$16 sps:$4 sm:$0xff]  }
 0x364   :  { %v9439_v46 = vsel %vm97_vm0, %v9437_v19, %v23431_v31  ;;  %v20313_v31 = vld [vmem:[%s25696_s5 + $0x148] ss:$16 sps:$4 sm:$0xff]   ;;  %v20347_v19 = vld [vmem:[%s25696_s5 + $0x80] ss:$16 sps:$4 sm:$0xff]  }
 0x366   :  { %19228 = vmatpush3.bf16.msra.mxu0 %v9028_v9  ;;  %v23697_v9 = vld [vmem:[#allocation2 + $0x70] sm:$0xff] }
 0x367   :  { %19237 = vmatprep.subr.bf16.mxu0 %v20275_v17 }
 0x369   :  { %19222 = vmatmul.mubr.msk.bf16.gmra.mrb[168].mxu0 %vm590_vm4, %v8900_v32  ;;  %v9442_v32 = vrot.slane %v23697_v9, 4 }
 0x36a   :  { %19229 = vmatprep.mubr.msk.bf16.mxu0 %vm590_vm4, %v8999_v58  ;;  %v20318_v58 = vld [vmem:[%s25696_s5 + $0x16c] ss:$16 sps:$4 sm:$0xff]  }
 0x371   :  { %19230 = vmatmul.mubr.msk.bf16.vlgmr.msra.gmra.mrb[164].mxu0 %vm590_vm4, %v23242_v57  ;;  %v9112_v57 = vsel %vm2323_vm7, %v9110_v36, %v23292_v8  ;;  %v9248_v8 = vsel %vm2354_vm5, %v20284_v38, 0  ;;  %v20321_v36 = vld [vmem:[%s25696_s5 + $0x18c] ss:$16 sps:$4 sm:$0xff]  }
 0x372   :  { %19233 = vmatprep.mubr.msk.bf16.mxu0 %vm590_vm4, %v23280_v43  ;;  %19238 = vmatpush3.bf16.msra.mxu0 %v20275_v17  ;;  %v9102_v43 = vld [vmem:[#allocation2 + $0x70] sm:$0x1f]  ;;  %v20315_v17 = vld [vmem:[%s25696_s5 + $0x14c] ss:$16 sps:$4 sm:$0xff]  }
 0x373   :  { %20046 = vmatprep.subr.msk.bf16.mxu0 %vm2354_vm5, %v20276_v3  ;;  %v9115_v49 = vrot.slane %v9102_v43, 1  ;;  %v20326_v3 = vld [vmem:[%s25694_s3 + $0xbc] ss:$0 sps:$4 sm:$0x33]   ;;  %v20319_v43 = vld [vmem:[%s25696_s5 + $0x188] ss:$16 sps:$4 sm:$0xff]  }
 0x375   :  { %v9116_v18 = vsel %vm2323_vm7, %v23295_v27, %v9115_v49  ;;  %v9221_v27 = vsel %vm2520_vm8, %v9219_v12, %v23337_v6  ;;  %v9357_v6 = vsel %vm2354_vm5, %v20298_v16, 0 }
 0x376   :  { %19240 = vmatpush3.bf16.msra.mxu0 %v9139_v20  ;;  %v9443_v20 = vsel %vm97_vm0, %v23434_v39, %v9442_v32  ;;  %v9579_v39 = vsel %vm2354_vm5, %v20326_v3, 0 }
 0x377   :  { %19249 = vmatprep.subr.bf16.mxu0 %v20280_v34 }
 0x379   :  { %19234 = vmatmul.mubr.msk.bf16.gmra.mrb[168].mxu0 %vm590_vm4, %v9002_v53  ;;  %v9539_v53 = vld [vmem:[#allocation2 + $0x60] sm:$0xf0] }
 0x37a   :  { %19241 = vmatprep.mubr.msk.bf16.mxu0 %vm590_vm4, %v9112_v57  ;;  %v9551_v57 = vrot.slane %v23721_v26, 4 }
 0x381   :  { %19242 = vmatmul.mubr.msk.bf16.vlgmr.msra.gmra.mrb[164].mxu0 %vm590_vm4, %v23309_v50  ;;  %v9213_v50 = vld [vmem:[#allocation2 + $0x70] sm:$0x3f] }
 0x382   :  { %19245 = vmatprep.mubr.msk.bf16.mxu0 %vm590_vm4, %v9116_v18  ;;  %19250 = vmatpush3.bf16.msra.mxu0 %v20280_v34  ;;  %v9224_v25 = vrot.slane %v9213_v50, 2  ;;  %v20316_v34 = vld [vmem:[%s25696_s5 + $0x168] ss:$16 sps:$4 sm:$0xff]   ;;  %v20332_v50 = vld [vmem:[%s25696_s5 + $0x1ec] ss:$16 sps:$4 sm:$0xff]  }
 0x383   :  { %20047 = vmatprep.subr.msk.bf16.mxu0 %vm2354_vm5, %v20284_v38  ;;  %v20325_v38 = vld [vmem:[%s25696_s5 + $0x1ac] ss:$16 sps:$4 sm:$0xff]  }
 0x384   :  { %v9225_v5 = vsel %vm2520_vm8, %v23340_v52, %v9224_v25  ;;  %v9328_v52 = vrot.slane %v9321_v30, 3 }
 0x386   :  { %19252 = vmatpush3.bf16.msra.mxu0 %v9248_v8  ;;  %v9330_v55 = vsel %vm98_vm1, %v9328_v52, %v23384_v29  ;;  %v20312_v29 = vld [vmem:[%s25694_s3 + $0xb0] ss:$0 sps:$4 sm:$0x33]   ;;  %v20323_v8 = vld [vmem:[%s25696_s5 + $0x1a8] ss:$16 sps:$4 sm:$0xff]  }
 0x387   :  { %19261 = vmatprep.subr.bf16.mxu0 %v20294_v21  ;;  %v9466_v13 = vsel %vm2354_vm5, %v20312_v29, 0 }
 0x389   :  { %19246 = vmatmul.mubr.msk.bf16.gmra.mrb[168].mxu0 %vm590_vm4, %v9115_v49  ;;  %v9550_v49 = vrot.slane %v9539_v53, 4 }
 0x38a   :  { %19253 = vmatprep.mubr.msk.bf16.mxu0 %vm590_vm4, %v9221_v27  ;;  %v20327_v27 = vld [vmem:[%s25696_s5 + $0x1c8] ss:$16 sps:$4 sm:$0xff]  }
 0x38b   :  { %v9552_v18 = vsel %vm97_vm0, %v9550_v49, %v9551_v57 }
 0x391   :  { %19254 = vmatmul.mubr.msk.bf16.vlgmr.msra.gmra.mrb[164].mxu0 %vm590_vm4, %v23355_v41 }
 0x392   :  { %19257 = vmatprep.mubr.msk.bf16.mxu0 %vm590_vm4, %v9225_v5  ;;  %19262 = vmatpush3.bf16.msra.mxu0 %v20294_v21  ;;  %v23744_v21 = vld [vmem:[#allocation2 + $0x78] sm:$0xff] }
 0x393   :  { %20048 = vmatprep.subr.msk.bf16.mxu0 %vm2354_vm5, %v20298_v16  ;;  %v23750_v12 = vrot.slane %v23744_v21, 4  ;;  %v20340_v16 = vld [vmem:[%s25694_s3 + $0xc8] ss:$0 sps:$4 sm:$0x33]  }
 0x394   :  { %v18799_v48 = vpop.f32.mrb[156].mxu0  ;;  %v9696_v30 = vsel %vm2354_vm5, %v20340_v16, 0 }
 0x395   :  { %v5082_v11 = vpop.f32.mrb[157].mxu0  ;;  %v9556_v5 = vsel %vm97_vm0, %v9442_v32, %v23750_v12  ;;  %v9652_v48 = vld [vmem:[#allocation2 + $0x60] sm:$0xe0] }
 0x396   :  { %5121 = vst [vmem:[#allocation3] sm:$0xff] %v5082_v11  ;;  %v18800_v23 = vpop.f32.mrb[158].mxu0  ;;  %19264 = vmatpush3.bf16.msra.mxu0 %v9357_v6  ;;  %v20330_v6 = vld [vmem:[%s25696_s5 + $0x1e8] ss:$16 sps:$4 sm:$0xff]   ;;  %v20350_v11 = vld [vmem:[%s25694_s3 + $0xcc] sm:$0xff]   ;;  %v9665_v52 = vrot.slane %v9652_v48, 5 }
 0x397   :  { %5124 = vst [vmem:[#allocation3 + $0x18] sm:$0xff] %v18800_v23  ;;  %v5085_v41 = vpop.f32.mrb[159].mxu0  ;;  %19273 = vmatprep.subr.bf16.mxu0 %v20308_v47  ;;  %v9666_v23 = vrot.slane %v23721_v26, 5  ;;  %v20378_v48 = vld [vmem:[%s25694_s3 + $0xe4] sm:$0xff]  }
 0x398   :  { %5122 = vst [vmem:[#allocation3 + $0x8] sm:$0xff] %v5085_v41  ;;  %v20333_v41 = vld [vmem:[%s25696_s5] ss:$16 sps:$4 sm:$0xff]  }
 0x399   :  { %19258 = vmatmul.mubr.msk.bf16.gmra.mrb[168].mxu0 %vm590_vm4, %v9224_v25  ;;  %v9554_v25 = vsel %vm97_vm0, %v9551_v57, %v9442_v32  ;;  %v9667_v61 = vsel %vm2984_vm10, %v9665_v52, %v9666_v23  ;;  %v20360_v57 = vld [vmem:[%s25696_s5 + $0xe4] ss:$16 sps:$4 sm:$0xff]  }
 0x39a   :  { %19265 = vmatprep.mubr.msk.bf16.mxu0 %vm590_vm4, %v9330_v55  ;;  %v20339_v55 = vld [vmem:[%s25696_s5 + $0x24] ss:$16 sps:$4 sm:$0xff]  }
 0x39c   :  { %v18803_v28 = vpop.f32.mrb[160].mxu0 }
 0x39d   :  { %5127 = vst [vmem:[#allocation3 + $0x30] sm:$0xff] %v18803_v28  ;;  %v5098_v0 = vpop.f32.mrb[161].mxu0  ;;  %v10686_v45 = vld [vmem:[#allocation3 + $0x4] sm:$0x3]  ;;  %v10687_v42 = vld [vmem:[#allocation3 + $0x6] sm:$0x3] }
 0x39e   :  { %5125 = vst [vmem:[#allocation3 + $0x20] sm:$0xff] %v5098_v0  ;;  %v18804_v22 = vpop.f32.mrb[162].mxu0  ;;  %v10688_v4 = vmax.f32 %v10686_v45, %v10687_v42  ;;  %v10689_v37 = vld [vmem:[#allocation3 + $0x1c] sm:$0x3]  ;;  %v10690_v15 = vld [vmem:[#allocation3 + $0x1e] sm:$0x3] }
 0x39f   :  { %5128 = vst [vmem:[#allocation3 + $0x38] sm:$0xff] %v18804_v22  ;;  %v5101_v51 = vpop.f32.mrb[163].mxu0  ;;  %v10691_v35 = vmax.f32 %v10689_v37, %v10690_v15  ;;  %v20337_v28 = vld [vmem:[%s25696_s5 + $0x20] ss:$16 sps:$4 sm:$0xff]   ;;  %v20343_v0 = vld [vmem:[%s25696_s5 + $0x44] ss:$16 sps:$4 sm:$0xff]  }
 0x3a0   :  { %v9670_v45 = vrot.slane %v23744_v21, 5  ;;  %v20341_v42 = vld [vmem:[%s25696_s5 + $0x40] ss:$16 sps:$4 sm:$0xff]   ;;  %v20354_v37 = vld [vmem:[%s25694_s3 + $0xd4] ss:$0 sps:$4 sm:$0x33]  }
 0x3a1   :  { %19266 = vmatmul.mubr.msk.bf16.vlgmr.msra.gmra.mrb[164].mxu0 %vm590_vm4, %v23402_v1  ;;  %v10692_v7 = vmax.f32 %v10688_v4, %v10691_v35  ;;  %v9656_v22 = vld [vmem:[#allocation2 + $0x80] sm:$0x1]  ;;  %v20346_v4 = vld [vmem:[%s25696_s5 + $0x64] ss:$16 sps:$4 sm:$0xff]   ;;  %v10638_v62 = vld [vmem:[#allocation3 + $0x2] sm:$0x3] }
 0x3a2   :  { %19269 = vmatprep.mubr.msk.bf16.mxu0 %vm590_vm4, %v9334_v14  ;;  %19274 = vmatpush3.bf16.msra.mxu0 %v20308_v47  ;;  %v20335_v47 = vld [vmem:[%s25696_s5 + $0x4] ss:$16 sps:$4 sm:$0xff]   ;;  %v20344_v35 = vld [vmem:[%s25696_s5 + $0x60] ss:$16 sps:$4 sm:$0xff]  }
 0x3a3   :  { %v10693_v63 = vadd.f32 %v23668_v2, %v10692_v7  ;;  %20049 = vmatprep.subr.msk.bf16.mxu0 %vm2354_vm5, %v20312_v29  ;;  %v9672_v29 = vrot.slane %v9656_v22, 5  ;;  %v9769_v14 = vld [vmem:[#allocation2 + $0x60] sm:$0xc0]  ;;  %v20371_v22 = vld [vmem:[%s25696_s5 + $0x4c] ss:$16 sps:$4 sm:$0xff]  }
 0x3a4   :  { %v20349_v7 = vld [vmem:[%s25696_s5 + $0x84] ss:$16 sps:$4 sm:$0xff]  }
 0x3a5   :  { %v10694_v10 = vmax.f32 %v10693_v63, 0.0  ;;  %v9807_v63 = vsel %vm2354_vm5, %v20354_v37, 0 }
 0x3a6   :  { %19276 = vmatpush3.bf16.msra.mxu0 %v9466_v13  ;;  %v10637_v13 = vld [vmem:[#allocation3] sm:$0x3] }
 0x3a7   :  { %v23684_v1 = vpack.c.bf16 %v10694_v10, %v10694_v10  ;;  %19285 = vmatprep.subr.bf16.mxu0 %v20322_v54  ;;  %v10640_v10 = vld [vmem:[#allocation3 + $0x18] sm:$0x3] }
 0x3a9   :  { %19270 = vmatmul.mubr.msk.bf16.gmra.mrb[168].mxu0 %vm590_vm4, %v9333_v56  ;;  %10922 = vmatmul.mubr.bf16.vlgmr.msra.gmra.mrb[172].mxu1 %v23684_v1  ;;  %v9668_v56 = vrot.slane %v23697_v9, 5 }
 0x3aa   :  { %10931 = vmatpush1.bf16.msra.mxu1 %v20305_v40  ;;  %19277 = vmatprep.mubr.msk.bf16.mxu0 %vm590_vm4, %v9439_v46  ;;  %v10641_v40 = vld [vmem:[#allocation3 + $0x1a] sm:$0x3]  ;;  %v20353_v46 = vld [vmem:[%s25696_s5 + $0xa4] ss:$16 sps:$4 sm:$0xff]  }
 0x3ab   :  { %10932 = vmatprep.subr.bf16.mxu1 %v20311_v24  ;;  %10962 = vmatprep.mubr.bf16.mxu1 %v21139_v59  ;;  %v9669_v15 = vsel %vm2984_vm10, %v9666_v23, %v9668_v56  ;;  %v9671_v51 = vsel %vm2984_vm10, %v9668_v56, %v9670_v45  ;;  %v9776_v24 = vrot.slane %v9769_v14, 6  ;;  %v20361_v23 = vld [vmem:[%s25696_s5 + $0x8] ss:$16 sps:$4 sm:$0xff]  }
 0x3ae   :  { %10933 = vmatpush1.bf16.msra.mxu1 %v20309_v33  ;;  %v10639_v33 = vmax.f32 %v10637_v13, %v10638_v62  ;;  %v20377_v13 = vld [vmem:[%s25696_s5 + $0x8c] ss:$16 sps:$4 sm:$0xff]  }
 0x3af   :  { %10934 = vmatprep.subr.bf16.mxu1 %v20315_v17  ;;  %v10642_v17 = vmax.f32 %v10640_v10, %v10641_v40  ;;  %v20392_v10 = vld [vmem:[%s25694_s3 + $0xf0] sm:$0xff]   ;;  %v20375_v40 = vld [vmem:[%s25696_s5 + $0x88] ss:$16 sps:$4 sm:$0xff]  }
 0x3b1   :  { %19278 = vmatmul.mubr.msk.bf16.vlgmr.msra.gmra.mrb[164].mxu0 %vm590_vm4, %v23453_v44  ;;  %v20336_v44 = vld [vmem:[%s25694_s3 + $0xc0] sm:$0xff]  }
 0x3b2   :  { %10935 = vmatpush1.bf16.msra.mxu1 %v20313_v31  ;;  %19281 = vmatprep.mubr.msk.bf16.mxu0 %vm590_vm4, %v9443_v20  ;;  %v10643_v20 = vmax.f32 %v10639_v33, %v10642_v17  ;;  %v20383_v33 = vld [vmem:[%s25696_s5 + $0xc8] ss:$16 sps:$4 sm:$0xff]   ;;  %v20388_v17 = vld [vmem:[%s25696_s5 + $0xec] ss:$16 sps:$4 sm:$0xff]  }
 0x3b3   :  { %10936 = vmatprep.subr.bf16.mxu1 %v20318_v58  ;;  %19286 = vmatpush3.bf16.msra.mxu0 %v20322_v54  ;;  %v20364_v54 = vld [vmem:[%s25694_s3 + $0xd8] sm:$0xff]   ;;  %v20351_v58 = vld [vmem:[%s25696_s5 + $0xa0] ss:$16 sps:$4 sm:$0xff]  }
 0x3b4   :  { %20050 = vmatprep.subr.msk.bf16.mxu0 %vm2354_vm5, %v20326_v3  ;;  %v20357_v3 = vld [vmem:[%s25696_s5 + $0xc4] ss:$16 sps:$4 sm:$0xff]  }
 0x3b6   :  { %10937 = vmatpush1.bf16.msra.mxu1 %v20316_v34  ;;  %v9779_v34 = vrot.slane %v23697_v9, 6 }
 0x3b7   :  { %10938 = vmatprep.subr.bf16.mxu1 %v20321_v36  ;;  %19288 = vmatpush3.bf16.msra.mxu0 %v9579_v39  ;;  %v9781_v36 = vrot.slane %v23744_v21, 6  ;;  %v20355_v39 = vld [vmem:[%s25696_s5 + $0xc0] ss:$16 sps:$4 sm:$0xff]  }
 0x3b8   :  { %19297 = vmatprep.subr.bf16.mxu0 %v20336_v44 }
 0x3b9   :  { %19282 = vmatmul.mubr.msk.bf16.gmra.mrb[168].mxu0 %vm590_vm4, %v9442_v32  ;;  %v9673_v32 = vsel %vm2984_vm10, %v9670_v45, %v9672_v29  ;;  %v20382_v29 = vld [vmem:[%s25694_s3 + $0xec] ss:$0 sps:$4 sm:$0x33]  }
 0x3ba   :  { %10939 = vmatpush1.bf16.msra.mxu1 %v20319_v43  ;;  %19289 = vmatprep.mubr.msk.bf16.mxu0 %vm590_vm4, %v9552_v18  ;;  %v10651_v43 = vadd.f32 %v23668_v2, %v10643_v20  ;;  %v20368_v18 = vld [vmem:[%s25694_s3 + $0xe0] ss:$0 sps:$4 sm:$0x33]   ;;  %v10017_v62 = vsel %vm2354_vm5, %v20382_v29, 0 }
 0x3bb   :  { %10940 = vmatprep.subr.bf16.mxu1 %v20325_v38  ;;  %v20389_v20 = vld [vmem:[%s25696_s5 + $0x200] ss:$16 sps:$4 sm:$0xff]  }
 0x3be   :  { %10941 = vmatpush1.bf16.msra.mxu1 %v20323_v8 }
 0x3bf   :  { %10942 = vmatprep.subr.bf16.mxu1 %v20329_v60  ;;  %v9782_v60 = vsel %vm2354_vm5, %v9779_v34, %v9781_v36 }
 0x3c1   :  { %19290 = vmatmul.mubr.msk.bf16.vlgmr.msra.gmra.mrb[164].mxu0 %vm590_vm4, %v9554_v25  ;;  %v10652_v25 = vmax.f32 %v10651_v43, 0.0  ;;  %v23981_v43 = vld [vmem:[#allocation2 + $0x80] sm:$0xff] }
 0x3c2   :  { %10943 = vmatpush1.bf16.msra.mxu1 %v20327_v27  ;;  %19293 = vmatprep.mubr.msk.bf16.mxu0 %vm590_vm4, %v9556_v5  ;;  %v9770_v27 = vld [vmem:[#allocation2 + $0x80] sm:$0x3] }
 0x3c3   :  { %10944 = vmatprep.subr.bf16.mxu1 %v20332_v50  ;;  %19298 = vmatpush3.bf16.msra.mxu0 %v20336_v44  ;;  %v20358_v50 = vld [vmem:[%s25696_s5 + $0xe0] ss:$16 sps:$4 sm:$0xff]   ;;  %v9783_v5 = vrot.slane %v9770_v27, 6  ;;  %v23870_v52 = vpack.c.bf16 %v10652_v25, %v10652_v25  ;;  %v10202_v25 = vrot.slane %v23744_v21, 1 }
 0x3c4   :  { %20051 = vmatprep.subr.msk.bf16.mxu0 %vm2354_vm5, %v20340_v16  ;;  %v20363_v16 = vld [vmem:[%s25696_s5 + $0xc] ss:$16 sps:$4 sm:$0xff]   ;;  %v11217_v27 = vld [vmem:[#allocation3 + $0x22] sm:$0x3] }
 0x3c6   :  { %10945 = vmatpush1.bf16.msra.mxu1 %v20330_v6  ;;  %v9880_v6 = vld [vmem:[#allocation2 + $0x60] sm:$0x80] }
 0x3c7   :  { %11131 = vmatprep.subr.bf16.mxu1 %v20335_v47  ;;  %19300 = vmatpush3.bf16.msra.mxu0 %v9696_v30  ;;  %v9918_v47 = vsel %vm2354_vm5, %v20368_v18, 0  ;;  %v9888_v30 = vrot.slane %v23721_v26, 7 }
 0x3c8   :  { %19309 = vmatprep.subr.bf16.mxu0 %v20350_v11 }
 0x3c9   :  { %10963 = vmatmul.mubr.bf16.vlgmr.msra.gmra.mrb[176].mxu1 %v23684_v1  ;;  %19294 = vmatmul.mubr.msk.bf16.gmra.mrb[168].mxu0 %vm590_vm4, %v23750_v12  ;;  %v9777_v1 = vrot.slane %v23721_v26, 6 }
 0x3ca   :  { %11132 = vmatpush1.bf16.msra.mxu1 %v20333_v41  ;;  %19301 = vmatprep.mubr.msk.bf16.mxu0 %vm590_vm4, %v9667_v61  ;;  %v20367_v61 = vld [vmem:[%s25696_s5 + $0x2c] ss:$16 sps:$4 sm:$0xff]  }
 0x3cb   :  { %11133 = vmatprep.subr.bf16.mxu1 %v20339_v55  ;;  %11163 = vmatprep.mubr.bf16.mxu1 %v21139_v59  ;;  %v9778_v31 = vsel %vm2354_vm5, %v9776_v24, %v9777_v1  ;;  %v9780_v38 = vsel %vm2354_vm5, %v9777_v1, %v9779_v34  ;;  %v9887_v55 = vrot.slane %v9880_v6, 7  ;;  %v20381_v1 = vld [vmem:[%s25696_s5 + $0xac] ss:$16 sps:$4 sm:$0xff]   ;;  %v20379_v24 = vld [vmem:[%s25696_s5 + $0xa8] ss:$16 sps:$4 sm:$0xff]  }
 0x3cc   :  { %v20395_v34 = vld [vmem:[%s25696_s5 + $0x224] ss:$16 sps:$4 sm:$0xff]   ;;  %v11214_v6 = vld [vmem:[#allocation3 + $0xa] sm:$0x3] }
 0x3cd   :  { %v9889_v45 = vsel %vm3214_vm11, %v9887_v55, %v9888_v30  ;;  %v10193_v55 = vld [vmem:[#allocation2 + $0x88] sm:$0x1f] }
 0x3ce   :  { %11134 = vmatpush1.bf16.msra.mxu1 %v20337_v28 }
 0x3cf   :  { %11135 = vmatprep.subr.bf16.mxu1 %v20343_v0  ;;  %v9784_v0 = vsel %vm2354_vm5, %v9781_v36, %v9783_v5  ;;  %v9991_v36 = vld [vmem:[#allocation2 + $0x80] sm:$0xf]  ;;  %v11213_v5 = vld [vmem:[#allocation3 + $0x8] sm:$0x3] }
 0x3d1   :  { %19302 = vmatmul.mubr.msk.bf16.vlgmr.msra.gmra.mrb[164].mxu0 %vm590_vm4, %v9669_v15  ;;  %v20369_v15 = vld [vmem:[%s25696_s5 + $0x48] ss:$16 sps:$4 sm:$0xff]  }
 0x3d2   :  { %11136 = vmatpush1.bf16.msra.mxu1 %v20341_v42  ;;  %19305 = vmatprep.mubr.msk.bf16.mxu0 %vm590_vm4, %v9671_v51  ;;  %v20365_v42 = vld [vmem:[%s25696_s5 + $0x28] ss:$16 sps:$4 sm:$0xff]   ;;  %v20374_v51 = vld [vmem:[%s25696_s5 + $0x6c] ss:$16 sps:$4 sm:$0xff]  }
 0x3d3   :  { %11137 = vmatprep.subr.bf16.mxu1 %v20346_v4  ;;  %19310 = vmatpush3.bf16.msra.mxu0 %v20350_v11  ;;  %v9890_v4 = vrot.slane %v23697_v9, 7 }
 0x3d4   :  { %20052 = vmatprep.subr.msk.bf16.mxu0 %vm2354_vm5, %v20354_v37  ;;  %v9892_v37 = vrot.slane %v23744_v21, 7 }
 0x3d6   :  { %11138 = vmatpush1.bf16.msra.mxu1 %v20344_v35  ;;  %v9891_v35 = vsel %vm3214_vm11, %v9888_v30, %v9890_v4  ;;  %v9893_v14 = vsel %vm3214_vm11, %v9890_v4, %v9892_v37 }
 0x3d7   :  { %11139 = vmatprep.subr.bf16.mxu1 %v20349_v7  ;;  %19312 = vmatpush3.bf16.msra.mxu0 %v9807_v63  ;;  %v9881_v7 = vld [vmem:[#allocation2 + $0x80] sm:$0x7]  ;;  %v20372_v63 = vld [vmem:[%s25696_s5 + $0x68] ss:$16 sps:$4 sm:$0xff]  }
 0x3d8   :  { %19321 = vmatprep.subr.bf16.mxu0 %v20364_v54 }
 0x3d9   :  { %19306 = vmatmul.mubr.msk.bf16.gmra.mrb[168].mxu0 %vm590_vm4, %v9673_v32  ;;  %v20386_v32 = vld [vmem:[%s25696_s5 + $0xe8] ss:$16 sps:$4 sm:$0xff]  }
 0x3da   :  { %11140 = vmatpush1.bf16.msra.mxu1 %v20347_v19  ;;  %19313 = vmatprep.mubr.msk.bf16.mxu0 %vm590_vm4, %v9778_v31  ;;  %v20391_v31 = vld [vmem:[%s25696_s5 + $0x204] ss:$16 sps:$4 sm:$0xff]  }
 0x3db   :  { %11141 = vmatprep.subr.bf16.mxu1 %v20353_v46  ;;  %v20385_v46 = vld [vmem:[%s25696_s5 + $0xcc] ss:$16 sps:$4 sm:$0xff]  }
 0x3de   :  { %11142 = vmatpush1.bf16.msra.mxu1 %v20351_v58  ;;  %v19099_v53 = vpop.f32.mrb[164].mxu1 }
 0x3df   :  { %7916 = vst [vmem:[#allocation3 + $0x50] sm:$0xff] %v19099_v53  ;;  %v7875_v44 = vpop.f32.mrb[165].mxu1  ;;  %11143 = vmatprep.subr.bf16.mxu1 %v20357_v3  ;;  %v20406_v3 = vld [vmem:[%s25694_s3 + $0xfc] sm:$0xff]  }
 0x3e0   :  { %v19100_v49 = vpop.f32.mrb[166].mxu1  ;;  %v20393_v53 = vld [vmem:[%s25696_s5 + $0x220] ss:$16 sps:$4 sm:$0xff]  }
 0x3e1   :  { %v7878_v8 = vpop.f32.mrb[167].mxu1  ;;  %19314 = vmatmul.mubr.msk.bf16.vlgmr.msra.gmra.mrb[164].mxu0 %vm590_vm4, %v9780_v38  ;;  %v20397_v44 = vld [vmem:[%s25696_s5 + $0x240] ss:$16 sps:$4 sm:$0xff]   ;;  %v20405_v38 = vld [vmem:[%s25696_s5 + $0x284] ss:$16 sps:$4 sm:$0xff]  }
 0x3e2   :  { %7915 = vst [vmem:[#allocation3 + $0x48] sm:$0xff] %v7878_v8  ;;  %11144 = vmatpush1.bf16.msra.mxu1 %v20355_v39  ;;  %19317 = vmatprep.mubr.msk.bf16.mxu0 %vm590_vm4, %v9782_v60  ;;  %v20399_v39 = vld [vmem:[%s25696_s5 + $0x244] ss:$16 sps:$4 sm:$0xff]   ;;  %v20400_v49 = vld [vmem:[%s25696_s5 + $0x260] ss:$16 sps:$4 sm:$0xff]  }
 0x3e3   :  { %11145 = vmatprep.subr.bf16.mxu1 %v20360_v57  ;;  %19322 = vmatpush3.bf16.msra.mxu0 %v20364_v54  ;;  %v9894_v54 = vrot.slane %v9881_v7, 7  ;;  %v20410_v57 = vld [vmem:[%s25694_s3 + $0x104] ss:$0 sps:$4 sm:$0x33]   ;;  %v11216_v60 = vld [vmem:[#allocation3 + $0x20] sm:$0x3] }
 0x3e4   :  { %20053 = vmatprep.subr.msk.bf16.mxu0 %vm2354_vm5, %v20368_v18  ;;  %v10192_v18 = vld [vmem:[#allocation2 + $0x70] sm:$0xfe]  ;;  %v10230_v8 = vsel %vm2354_vm5, %v20410_v57, 0  ;;  %v11218_v30 = vmax.f32 %v11216_v60, %v11217_v27  ;;  %v10422_v60 = vrot.slane %v23981_v43, 3 }
 0x3e5   :  { %v9895_v19 = vsel %vm3214_vm11, %v9892_v37, %v9894_v54  ;;  %v20424_v37 = vld [vmem:[%s25694_s3 + $0x110] ss:$0 sps:$4 sm:$0x33]   ;;  %v20417_v54 = vld [vmem:[%s25696_s5 + $0x208] ss:$16 sps:$4 sm:$0xff]  }
 0x3e6   :  { %11146 = vmatpush1.bf16.msra.mxu1 %v20358_v50  ;;  %v19103_v11 = vpop.f32.mrb[168].mxu1  ;;  %v20420_v50 = vld [vmem:[%s25694_s3 + $0x108] sm:$0xff]   ;;  %v10339_v7 = vsel %vm2354_vm5, %v20424_v37, 0 }
 0x3e7   :  { %v7891_v41 = vpop.f32.mrb[169].mxu1  ;;  %11172 = vmatprep.subr.bf16.mxu1 %v20363_v16  ;;  %19324 = vmatpush3.bf16.msra.mxu0 %v9918_v47  ;;  %v20403_v16 = vld [vmem:[%s25696_s5 + $0x280] ss:$16 sps:$4 sm:$0xff]   ;;  %v10201_v47 = vrot.slane %v10192_v18, 1  ;;  %v10093_v11 = vld [vmem:[#allocation2 + $0x88] sm:$0xf] }
 0x3e8   :  { %7918 = vst [vmem:[#allocation3 + $0x60] sm:$0xff] %v7891_v41  ;;  %v19104_v28 = vpop.f32.mrb[170].mxu1  ;;  %19333 = vmatprep.subr.bf16.mxu0 %v20378_v48  ;;  %v11215_v41 = vmax.f32 %v11213_v5, %v11214_v6  ;;  %v10413_v18 = vld [vmem:[#allocation2 + $0x88] sm:$0x7f] }
 0x3e9   :  { %7921 = vst [vmem:[#allocation3 + $0x78] sm:$0xff] %v19104_v28  ;;  %11164 = vmatmul.mubr.bf16.vlgmr.msra.gmra.mrb[180].mxu1 %v23870_v52  ;;  %v7894_v56 = vpop.f32.mrb[171].mxu1  ;;  %19318 = vmatmul.mubr.msk.bf16.gmra.mrb[168].mxu0 %vm590_vm4, %v9784_v0  ;;  %v10204_v0 = vrot.slane %v23981_v43, 1  ;;  %v10424_v27 = vrot.slane %v10413_v18, 3  ;;  %v20491_v18 = vld [vmem:[%s25696_s5 + $0x30c] ss:$16 sps:$4 sm:$0xff]  }
 0x3ea   :  { %7919 = vst [vmem:[#allocation3 + $0x68] sm:$0xff] %v7894_v56  ;;  %11173 = vmatpush1.bf16.msra.mxu1 %v20361_v23  ;;  %19325 = vmatprep.mubr.msk.bf16.mxu0 %vm590_vm4, %v9889_v45  ;;  %v10203_v23 = vsel %vm2323_vm7, %v10201_v47, %v10202_v25  ;;  %v11219_v28 = vmax.f32 %v11215_v41, %v11218_v30  ;;  %v10206_v56 = vrot.slane %v10193_v55, 1  ;;  %v20411_v45 = vld [vmem:[%s25696_s5 + $0x2c0] ss:$16 sps:$4 sm:$0xff]   ;;  %v20442_v47 = vld [vmem:[%s25696_s5 + $0x2e8] ss:$16 sps:$4 sm:$0xff]  }
 0x3eb   :  { %11174 = vmatprep.subr.bf16.mxu1 %v20367_v61  ;;  %11204 = vmatprep.mubr.bf16.mxu1 %v21139_v59  ;;  %v20413_v61 = vld [vmem:[%s25696_s5 + $0x2c4] ss:$16 sps:$4 sm:$0xff]   ;;  %v10205_v4 = vsel %vm2323_vm7, %v10202_v25, %v10204_v0  ;;  %v20444_v25 = vld [vmem:[%s25696_s5 + $0x2ec] ss:$16 sps:$4 sm:$0xff]   ;;  %v10425_v6 = vsel %vm98_vm1, %v10422_v60, %v10424_v27  ;;  %v20446_v41 = vld [vmem:[%s25696_s5 + $0x300] ss:$16 sps:$4 sm:$0xff]  }
 0x3ec   :  { %v20449_v5 = vld [vmem:[%s25694_s3 + $0x128] ss:$0 sps:$4 sm:$0x33]   ;;  %v10521_v30 = vld [vmem:[#allocation2 + $0x70] sm:$0xf0] }
 0x3ed   :  { %v20452_v55 = vld [vmem:[%s25696_s5 + $0x324] ss:$16 sps:$4 sm:$0xff]  }
 0x3ee   :  { %11175 = vmatpush1.bf16.msra.mxu1 %v20365_v42  ;;  %v20416_v42 = vld [vmem:[%s25696_s5 + $0x2e4] ss:$16 sps:$4 sm:$0xff]  }
 0x3ef   :  { %11176 = vmatprep.subr.bf16.mxu1 %v20371_v22  ;;  %v11220_v22 = vadd.f32 %v23668_v2, %v11219_v28  ;;  %v20450_v28 = vld [vmem:[%s25696_s5 + $0x320] ss:$16 sps:$4 sm:$0xff]  }
 0x3f1   :  { %19326 = vmatmul.mubr.msk.bf16.vlgmr.msra.gmra.mrb[164].mxu0 %vm590_vm4, %v9891_v35  ;;  %v11221_v35 = vmax.f32 %v11220_v22, 0.0  ;;  %v20456_v22 = vld [vmem:[%s25696_s5 + $0x608] ss:$16 sps:$4 sm:$0xff]  }
 0x3f2   :  { %11177 = vmatpush1.bf16.msra.mxu1 %v20369_v15  ;;  %19329 = vmatprep.mubr.msk.bf16.mxu0 %vm590_vm4, %v9893_v14  ;;  %v10207_v15 = vsel %vm2323_vm7, %v10204_v0, %v10206_v56  ;;  %v10303_v14 = vld [vmem:[#allocation2 + $0x70] sm:$0xfc] }
 0x3f3   :  { %11178 = vmatprep.subr.bf16.mxu1 %v20374_v51  ;;  %19334 = vmatpush3.bf16.msra.mxu0 %v20378_v48  ;;  %v20409_v48 = vld [vmem:[%s25696_s5 + $0x2a4] ss:$16 sps:$4 sm:$0xff]   ;;  %v20414_v51 = vld [vmem:[%s25696_s5 + $0x2e0] ss:$16 sps:$4 sm:$0xff]  }
 0x3f4   :  { %20054 = vmatprep.subr.msk.bf16.mxu0 %vm2354_vm5, %v20382_v29  ;;  %v20419_v29 = vld [vmem:[%s25696_s5 + $0x20c] ss:$16 sps:$4 sm:$0xff]   ;;  %v20455_v0 = vld [vmem:[%s25696_s5 + $0x344] ss:$16 sps:$4 sm:$0xff]  }
 0x3f6   :  { %11179 = vmatpush1.bf16.msra.mxu1 %v20372_v63  ;;  %v20434_v63 = vld [vmem:[%s25694_s3 + $0x114] sm:$0xff]  }
 0x3f7   :  { %11180 = vmatprep.subr.bf16.mxu1 %v20377_v13  ;;  %19336 = vmatpush3.bf16.msra.mxu0 %v10017_v62  ;;  %v10311_v13 = vrot.slane %v23744_v21, 2  ;;  %v24042_v62 = vpack.c.bf16 %v11221_v35, %v11221_v35  ;;  %v20459_v35 = vld [vmem:[%s25696_s5 + $0x360] ss:$16 sps:$4 sm:$0xff]  }
 0x3f8   :  { %19345 = vmatprep.subr.bf16.mxu0 %v20392_v10 }
 0x3f9   :  { %19330 = vmatmul.mubr.msk.bf16.gmra.mrb[168].mxu0 %vm590_vm4, %v9895_v19  ;;  %v20421_v19 = vld [vmem:[%s25696_s5 + $0x228] ss:$16 sps:$4 sm:$0xff]  }
 0x3fa   :  { %11181 = vmatpush1.bf16.msra.mxu1 %v20375_v40  ;;  %19337 = vmatprep.mubr.msk.bf16.mxu0 %vm590_vm4, %v23721_v26  ;;  %v20396_v26 = vld [vmem:[%s25694_s3 + $0xf8] ss:$0 sps:$4 sm:$0x33]   ;;  %v20423_v40 = vld [vmem:[%s25696_s5 + $0x22c] ss:$16 sps:$4 sm:$0xff]  }
 0x3fb   :  { %11182 = vmatprep.subr.bf16.mxu1 %v20381_v1  ;;  %v10119_v58 = vsel %vm2354_vm5, %v20396_v26, 0 }
 0x3fe   :  { %11183 = vmatpush1.bf16.msra.mxu1 %v20379_v24  ;;  %v10304_v24 = vld [vmem:[#allocation2 + $0x88] sm:$0x3f] }
 0x3ff   :  { %11184 = vmatprep.subr.bf16.mxu1 %v20385_v46  ;;  %v20427_v46 = vld [vmem:[%s25696_s5 + $0x24c] ss:$16 sps:$4 sm:$0xff]  }
 0x401   :  { %19338 = vmatmul.mubr.msk.bf16.vlgmr.msra.gmra.mrb[164].mxu0 %vm590_vm4, %v23697_v9 }
 0x402   :  { %11185 = vmatpush1.bf16.msra.mxu1 %v20383_v33  ;;  %19341 = vmatprep.mubr.msk.bf16.mxu0 %vm590_vm4, %v23744_v21  ;;  %v10313_v33 = vrot.slane %v23981_v43, 2 }
 0x403   :  { %11186 = vmatprep.subr.bf16.mxu1 %v20388_v17  ;;  %19346 = vmatpush3.bf16.msra.mxu0 %v20392_v10  ;;  %v10310_v10 = vrot.slane %v10303_v14, 2  ;;  %v10315_v17 = vrot.slane %v10304_v24, 2  ;;  %v20470_v14 = vld [vmem:[%s25696_s5 + $0x64c] ss:$16 sps:$4 sm:$0xff]  }
 0x404   :  { %20055 = vmatprep.subr.msk.bf16.mxu0 %vm2354_vm5, %v20396_v26  ;;  %v20425_v26 = vld [vmem:[%s25696_s5 + $0x248] ss:$16 sps:$4 sm:$0xff]  }
 0x405   :  { %v10312_v1 = vsel %vm2520_vm8, %v10310_v10, %v10311_v13  ;;  %v11503_v10 = vld [vmem:[#allocation3 + $0xe] sm:$0x3] }
 0x406   :  { %11187 = vmatpush1.bf16.msra.mxu1 %v20386_v32  ;;  %v20430_v32 = vld [vmem:[%s25696_s5 + $0x26c] ss:$16 sps:$4 sm:$0xff]  }
 0x407   :  { %11416 = vmatprep.subr.bf16.mxu1 %v20391_v31  ;;  %19348 = vmatpush3.bf16.msra.mxu0 %v10119_v58  ;;  %v10314_v31 = vsel %vm2520_vm8, %v10311_v13, %v10313_v33  ;;  %v20438_v58 = vld [vmem:[%s25694_s3 + $0x11c] ss:$0 sps:$4 sm:$0x33]  }
 0x408   :  { %19357 = vmatprep.subr.bf16.mxu0 %v20406_v3  ;;  %v11502_v13 = vld [vmem:[#allocation3 + $0xc] sm:$0x3] }
 0x409   :  { %11205 = vmatmul.mubr.bf16.vlgmr.msra.gmra.mrb[184].mxu1 %v23870_v52  ;;  %19342 = vmatmul.mubr.msk.bf16.gmra.mrb[168].mxu0 %vm590_vm4, %v9991_v36  ;;  %v20407_v52 = vld [vmem:[%s25696_s5 + $0x2a0] ss:$16 sps:$4 sm:$0xff]   ;;  %v11504_v24 = vmax.f32 %v11502_v13, %v11503_v10  ;;  %v12659_v13 = vld [vmem:[#allocation3 + $0x3e] sm:$0x3]  ;;  %v20528_v10 = vld [vmem:[%s25696_s5 + $0x788] ss:$16 sps:$4 sm:$0xff]  }
 0x40a   :  { %11417 = vmatpush1.bf16.msra.mxu1 %v20389_v20  ;;  %19349 = vmatprep.mubr.msk.bf16.mxu0 %vm590_vm4, %v23697_v9  ;;  %v20402_v9 = vld [vmem:[%s25696_s5 + $0x264] ss:$16 sps:$4 sm:$0xff]   ;;  %v20428_v20 = vld [vmem:[%s25696_s5 + $0x268] ss:$16 sps:$4 sm:$0xff]  }
 0x40b   :  { %11418 = vmatprep.subr.bf16.mxu1 %v20395_v34  ;;  %11448 = vmatprep.mubr.bf16.mxu1 %v21139_v59  ;;  %v20433_v34 = vld [vmem:[%s25696_s5 + $0x28c] ss:$16 sps:$4 sm:$0xff]   ;;  %v10412_v36 = vld [vmem:[#allocation2 + $0x70] sm:$0xf8] }
 0x40e   :  { %11419 = vmatpush1.bf16.msra.mxu1 %v20393_v53  ;;  %v10448_v53 = vsel %vm2354_vm5, %v20438_v58, 0 }
 0x40f   :  { %11420 = vmatprep.subr.bf16.mxu1 %v20399_v39  ;;  %v20445_v39 = vld [vmem:[%s25694_s3 + $0x120] sm:$0xff]  }
 0x411   :  { %19350 = vmatmul.mubr.msk.bf16.vlgmr.msra.gmra.mrb[164].mxu0 %vm590_vm4, %v23744_v21 }
 0x412   :  { %11421 = vmatpush1.bf16.msra.mxu1 %v20397_v44  ;;  %19353 = vmatprep.mubr.msk.bf16.mxu0 %vm590_vm4, %v23981_v43  ;;  %v10420_v44 = vrot.slane %v23744_v21, 3  ;;  %v20435_v21 = vld [vmem:[%s25696_s5 + $0x2a8] ss:$16 sps:$4 sm:$0xff]  }
 0x413   :  { %11422 = vmatprep.subr.bf16.mxu1 %v20402_v9  ;;  %19358 = vmatpush3.bf16.msra.mxu0 %v20406_v3  ;;  %v10316_v3 = vsel %vm2520_vm8, %v10313_v33, %v10315_v17  ;;  %v20431_v9 = vld [vmem:[%s25696_s5 + $0x288] ss:$16 sps:$4 sm:$0xff]  }
 0x414   :  { %20056 = vmatprep.subr.msk.bf16.mxu0 %vm2354_vm5, %v20410_v57  ;;  %v10419_v57 = vrot.slane %v10412_v36, 3  ;;  %v20474_v33 = vld [vmem:[%s25696_s5 + $0x668] ss:$16 sps:$4 sm:$0xff]  }
 0x415   :  { %v12370_v36 = vld [vmem:[#allocation3 + $0x3a] sm:$0x3] }
 0x416   :  { %11423 = vmatpush1.bf16.msra.mxu1 %v20400_v49  ;;  %v20437_v49 = vld [vmem:[%s25696_s5 + $0x2ac] ss:$16 sps:$4 sm:$0xff]  }
 0x417   :  { %11424 = vmatprep.subr.bf16.mxu1 %v20405_v38  ;;  %19360 = vmatpush3.bf16.msra.mxu0 %v10230_v8  ;;  %v10421_v38 = vsel %vm98_vm1, %v10419_v57, %v10420_v44  ;;  %v20441_v8 = vld [vmem:[%s25696_s5 + $0x2cc] ss:$16 sps:$4 sm:$0xff]  }
 0x418   :  { %19369 = vmatprep.subr.bf16.mxu0 %v20420_v50 }
 0x419   :  { %19354 = vmatmul.mubr.msk.bf16.gmra.mrb[168].mxu0 %vm590_vm4, %v10093_v11  ;;  %v10557_v11 = vsel %vm2354_vm5, %v20449_v5, 0 }
 0x41a   :  { %11425 = vmatpush1.bf16.msra.mxu1 %v20403_v16  ;;  %19361 = vmatprep.mubr.msk.bf16.mxu0 %vm590_vm4, %v10203_v23  ;;  %v10423_v16 = vsel %vm98_vm1, %v10420_v44, %v10422_v60  ;;  %v20458_v23 = vld [vmem:[%s25696_s5 + $0x60c] ss:$16 sps:$4 sm:$0xff]  }
 0x41b   :  { %11426 = vmatprep.subr.bf16.mxu1 %v20409_v48  ;;  %v20448_v48 = vld [vmem:[%s25696_s5 + $0x304] ss:$16 sps:$4 sm:$0xff]  }
 0x41e   :  { %11427 = vmatpush1.bf16.msra.mxu1 %v20407_v52  ;;  %v10528_v52 = vrot.slane %v10521_v30, 4  ;;  %v20503_v30 = vld [vmem:[%s25696_s5 + $0x34c] ss:$16 sps:$4 sm:$0xff]  }
 0x41f   :  { %11428 = vmatprep.subr.bf16.mxu1 %v20413_v61 }
 0x420   :  { %v10530_v61 = vsel %vm97_vm0, %v10528_v52, %v23750_v12 }
 0x421   :  { %19362 = vmatmul.mubr.msk.bf16.vlgmr.msra.gmra.mrb[164].mxu0 %vm590_vm4, %v10205_v4 }
 0x422   :  { %11429 = vmatpush1.bf16.msra.mxu1 %v20411_v45  ;;  %19365 = vmatprep.mubr.msk.bf16.mxu0 %vm590_vm4, %v10207_v15  ;;  %v10531_v45 = vrot.slane %v23981_v43, 4  ;;  %v20464_v43 = vld [vmem:[%s25696_s5 + $0x62c] ss:$16 sps:$4 sm:$0xff]  }
 0x423   :  { %11430 = vmatprep.subr.bf16.mxu1 %v20416_v42  ;;  %19370 = vmatpush3.bf16.msra.mxu0 %v20420_v50  ;;  %v20439_v50 = vld [vmem:[%s25696_s5 + $0x2c8] ss:$16 sps:$4 sm:$0xff]   ;;  %v20453_v42 = vld [vmem:[%s25696_s5 + $0x340] ss:$16 sps:$4 sm:$0xff]  }
 0x424   :  { %20057 = vmatprep.subr.msk.bf16.mxu0 %vm2354_vm5, %v20424_v37  ;;  %v20461_v37 = vld [vmem:[%s25696_s5 + $0x364] ss:$16 sps:$4 sm:$0xff]   ;;  %v10532_v15 = vsel %vm97_vm0, %v23750_v12, %v10531_v45 }
 0x425   :  { %v20467_v12 = vld [vmem:[%s25696_s5 + $0x384] ss:$16 sps:$4 sm:$0xff]  }
 0x426   :  { %11431 = vmatpush1.bf16.msra.mxu1 %v20414_v51 }
 0x427   :  { %11457 = vmatprep.subr.bf16.mxu1 %v20419_v29  ;;  %19372 = vmatpush3.bf16.msra.mxu0 %v10339_v7  ;;  %v20462_v29 = vld [vmem:[%s25696_s5 + $0x628] ss:$16 sps:$4 sm:$0xff]   ;;  %v11505_v7 = vld [vmem:[#allocation3 + $0x24] sm:$0x3] }
 0x428   :  { %19381 = vmatprep.subr.bf16.mxu0 %v20434_v63 }
 0x429   :  { %11449 = vmatmul.mubr.bf16.vlgmr.msra.gmra.mrb[188].mxu1 %v24042_v62  ;;  %19366 = vmatmul.mubr.msk.bf16.gmra.mrb[168].mxu0 %vm590_vm4, %v10206_v56  ;;  %v10522_v56 = vld [vmem:[#allocation2 + $0x88] sm:$0xff] }
 0x42a   :  { %11458 = vmatpush1.bf16.msra.mxu1 %v20417_v54  ;;  %19373 = vmatprep.mubr.msk.bf16.mxu0 %vm590_vm4, %v10312_v1  ;;  %v10533_v4 = vrot.slane %v10522_v56, 4  ;;  %v20465_v54 = vld [vmem:[%s25696_s5 + $0x380] ss:$16 sps:$4 sm:$0xff]   ;;  %v20476_v1 = vld [vmem:[%s25696_s5 + $0x66c] ss:$16 sps:$4 sm:$0xff]  }
 0x42b   :  { %11459 = vmatprep.subr.bf16.mxu1 %v20423_v40  ;;  %11489 = vmatprep.mubr.bf16.mxu1 %v21139_v59  ;;  %v20473_v40 = vld [vmem:[%s25696_s5 + $0x3a4] ss:$16 sps:$4 sm:$0xff]   ;;  %v20515_v56 = vld [vmem:[%s25696_s5 + $0x38c] ss:$16 sps:$4 sm:$0xff]  }
 0x42c   :  { %v10534_v51 = vsel %vm97_vm0, %v10531_v45, %v10533_v4  ;;  %v20518_v45 = vld [vmem:[%s25696_s5 + $0x74c] ss:$16 sps:$4 sm:$0xff]  }
 0x42e   :  { %11460 = vmatpush1.bf16.msra.mxu1 %v20421_v19 }
 0x42f   :  { %11461 = vmatprep.subr.bf16.mxu1 %v20427_v46  ;;  %v20471_v46 = vld [vmem:[%s25696_s5 + $0x3a0] ss:$16 sps:$4 sm:$0xff]  }
 0x431   :  { %19374 = vmatmul.mubr.msk.bf16.vlgmr.msra.gmra.mrb[164].mxu0 %vm590_vm4, %v10314_v31  ;;  %v12372_v31 = vld [vmem:[#allocation3 + $0x50] sm:$0x3] }
 0x432   :  { %11462 = vmatpush1.bf16.msra.mxu1 %v20425_v26  ;;  %19377 = vmatprep.mubr.msk.bf16.mxu0 %vm590_vm4, %v10316_v3  ;;  %v20482_v26 = vld [vmem:[%s25696_s5 + $0x68c] ss:$16 sps:$4 sm:$0xff]   ;;  %v12369_v3 = vld [vmem:[#allocation3 + $0x38] sm:$0x3] }
 0x433   :  { %11463 = vmatprep.subr.bf16.mxu1 %v20430_v32  ;;  %19382 = vmatpush3.bf16.msra.mxu0 %v20434_v63  ;;  %v11506_v63 = vld [vmem:[#allocation3 + $0x26] sm:$0x3]  ;;  %v12371_v57 = vmax.f32 %v12369_v3, %v12370_v36  ;;  %v20540_v3 = vld [vmem:[%s25696_s5 + $0x7c8] ss:$16 sps:$4 sm:$0xff]   ;;  %v24347_v36 = vld [vmem:[%s25695_s4] ss:$0 sm:$0xff] }
 0x434   :  { %20058 = vmatprep.subr.msk.bf16.mxu0 %vm2354_vm5, %v20438_v58  ;;  %v11507_v19 = vmax.f32 %v11505_v7, %v11506_v63  ;;  %v12373_v58 = vld [vmem:[#allocation3 + $0x52] sm:$0x3]  ;;  %v12658_v63 = vld [vmem:[#allocation3 + $0x3c] sm:$0x3] }
 0x436   :  { %11464 = vmatpush1.bf16.msra.mxu1 %v20428_v20  ;;  %v11508_v32 = vmax.f32 %v11504_v24, %v11507_v19  ;;  %v20477_v20 = vld [vmem:[%s25696_s5 + $0x3c0] ss:$16 sps:$4 sm:$0xff]   ;;  %v20536_v19 = vld [vmem:[%s25696_s5 + $0x7ac] ss:$16 sps:$4 sm:$0xff]  }
 0x437   :  { %11465 = vmatprep.subr.bf16.mxu1 %v20433_v34  ;;  %19384 = vmatpush3.bf16.msra.mxu0 %v10448_v53  ;;  %v20480_v34 = vld [vmem:[%s25696_s5 + $0x688] ss:$16 sps:$4 sm:$0xff]   ;;  %v20485_v53 = vld [vmem:[%s25696_s5 + $0x3e4] ss:$16 sps:$4 sm:$0xff]  }
 0x438   :  { %19393 = vmatprep.subr.bf16.mxu0 %v20445_v39  ;;  %v11509_v44 = vadd.f32 %v23668_v2, %v11508_v32  ;;  %v20542_v32 = vld [vmem:[%s25696_s5 + $0x7cc] ss:$16 sps:$4 sm:$0xff]  }
 0x439   :  { %19378 = vmatmul.mubr.msk.bf16.gmra.mrb[168].mxu0 %vm590_vm4, %v10315_v17  ;;  %v20479_v17 = vld [vmem:[%s25696_s5 + $0x3c4] ss:$16 sps:$4 sm:$0xff]  }
 0x43a   :  { %11466 = vmatpush1.bf16.msra.mxu1 %v20431_v9  ;;  %19385 = vmatprep.mubr.msk.bf16.mxu0 %vm590_vm4, %v10421_v38  ;;  %v12374_v9 = vmax.f32 %v12372_v31, %v12373_v58  ;;  %v20486_v38 = vld [vmem:[%s25696_s5 + $0x6a8] ss:$16 sps:$4 sm:$0xff]   ;;  %v20537_v58 = vld [vmem:[%s25696_s5 + $0x400] ss:$16 sps:$4 sm:$0xff]  }
 0x43b   :  { %11467 = vmatprep.subr.bf16.mxu1 %v20437_v49  ;;  %v20483_v49 = vld [vmem:[%s25696_s5 + $0x3e0] ss:$16 sps:$4 sm:$0xff]  }
 0x43c   :  { %v12375_v60 = vmax.f32 %v12371_v57, %v12374_v9  ;;  %v20551_v9 = vld [vmem:[%s25696_s5 + $0x444] ss:$16 sps:$4 sm:$0xff]  }
 0x43e   :  { %11468 = vmatpush1.bf16.msra.mxu1 %v20435_v21  ;;  %v11510_v21 = vmax.f32 %v11509_v44, 0.0  ;;  %v20546_v44 = vld [vmem:[%s25696_s5 + $0x7e8] ss:$16 sps:$4 sm:$0xff]  }
 0x43f   :  { %11469 = vmatprep.subr.bf16.mxu1 %v20441_v8  ;;  %v20494_v8 = vld [vmem:[%s25696_s5 + $0x6cc] ss:$16 sps:$4 sm:$0xff]  }
 0x441   :  { %19386 = vmatmul.mubr.msk.bf16.vlgmr.msra.gmra.mrb[164].mxu0 %vm590_vm4, %v10423_v16  ;;  %v20497_v16 = vld [vmem:[%s25696_s5 + $0x32c] ss:$16 sps:$4 sm:$0xff]  }
 0x442   :  { %11470 = vmatpush1.bf16.msra.mxu1 %v20439_v50  ;;  %19389 = vmatprep.mubr.msk.bf16.mxu0 %vm590_vm4, %v10425_v6  ;;  %v20492_v50 = vld [vmem:[%s25696_s5 + $0x6c8] ss:$16 sps:$4 sm:$0xff]   ;;  %v12376_v6 = vadd.f32 %v23668_v2, %v12375_v60  ;;  %v20506_v2 = vld [vmem:[%s25696_s5 + $0x70c] ss:$16 sps:$4 sm:$0xff]  }
 0x443   :  { %11471 = vmatprep.subr.bf16.mxu1 %v20444_v25  ;;  %19394 = vmatpush3.bf16.msra.mxu0 %v20445_v39  ;;  %v20488_v39 = vld [vmem:[%s25696_s5 + $0x6ac] ss:$16 sps:$4 sm:$0xff]   ;;  %v24229_v25 = vpack.c.bf16 %v11510_v21, %v11510_v21  ;;  %v20552_v21 = vld [vmem:[%s25696_s5 + $0x808] ss:$16 sps:$4 sm:$0xff]  }
 0x444   :  { %20059 = vmatprep.subr.msk.bf16.mxu0 %vm2354_vm5, %v20449_v5  ;;  %v20500_v5 = vld [vmem:[%s25696_s5 + $0x6ec] ss:$16 sps:$4 sm:$0xff]  }
 0x445   :  { %v20560_v60 = vld [vmem:[%s25696_s5 + $0x82c] ss:$16 sps:$4 sm:$0xff]  }
 0x446   :  { %11472 = vmatpush1.bf16.msra.mxu1 %v20442_v47  ;;  %v20495_v47 = vld [vmem:[%s25696_s5 + $0x328] ss:$16 sps:$4 sm:$0xff]  }
 0x447   :  { %11705 = vmatprep.subr.bf16.mxu1 %v20448_v48  ;;  %19396 = vmatpush3.bf16.msra.mxu0 %v10557_v11  ;;  %v20498_v48 = vld [vmem:[%s25696_s5 + $0x6e8] ss:$16 sps:$4 sm:$0xff]   ;;  %v12377_v11 = vmax.f32 %v12376_v6, 0.0 }
 0x448   :  { %12613 = vmatprep.subr.bf16.mxu0 %v20458_v23  ;;  %v20501_v23 = vld [vmem:[%s25696_s5 + $0x348] ss:$16 sps:$4 sm:$0xff]  }
 0x449   :  { %11490 = vmatmul.mubr.bf16.vlgmr.msra.gmra.mrb[192].mxu1 %v24042_v62  ;;  %19390 = vmatmul.mubr.msk.bf16.gmra.mrb[168].mxu0 %vm590_vm4, %v10424_v27  ;;  %v20468_v62 = vld [vmem:[%s25696_s5 + $0x648] ss:$16 sps:$4 sm:$0xff]   ;;  %v24258_v52 = vpack.c.bf16 %v12377_v11, %v12377_v11  ;;  %v11792_v11 = vld [vmem:[#allocation3 + $0x32] sm:$0x3] }
 0x44a   :  { %11706 = vmatpush1.bf16.msra.mxu1 %v20446_v41  ;;  %19397 = vmatprep.mubr.msk.bf16.mxu0 %vm590_vm4, %v10530_v61  ;;  %v20489_v27 = vld [vmem:[%s25696_s5 + $0x308] ss:$16 sps:$4 sm:$0xff]   ;;  %v20512_v61 = vld [vmem:[%s25696_s5 + $0x72c] ss:$16 sps:$4 sm:$0xff]  }
 0x44b   :  { %11707 = vmatprep.subr.bf16.mxu1 %v20452_v55  ;;  %11737 = vmatprep.mubr.bf16.mxu1 %v21139_v59  ;;  %v20504_v41 = vld [vmem:[%s25696_s5 + $0x708] ss:$16 sps:$4 sm:$0xff]   ;;  %v20509_v55 = vld [vmem:[%s25696_s5 + $0x36c] ss:$16 sps:$4 sm:$0xff]  }
 0x44c   :  { %v11795_v6 = vld [vmem:[#allocation3 + $0x4a] sm:$0x3] }
 0x44e   :  { %11708 = vmatpush1.bf16.msra.mxu1 %v20450_v28  ;;  %v20507_v28 = vld [vmem:[%s25696_s5 + $0x368] ss:$16 sps:$4 sm:$0xff]  }
 0x44f   :  { %11709 = vmatprep.subr.bf16.mxu1 %v20455_v0  ;;  %v20510_v0 = vld [vmem:[%s25696_s5 + $0x728] ss:$16 sps:$4 sm:$0xff]  }
 0x451   :  { %19398 = vmatmul.mubr.msk.bf16.vlgmr.msra.gmra.mrb[164].mxu0 %vm590_vm4, %v10532_v15  ;;  %v20519_v15 = vld [vmem:[%s25696_s5 + $0x3a8] ss:$16 sps:$4 sm:$0xff]  }
 0x452   :  { %11710 = vmatpush1.bf16.msra.mxu1 %v20453_v42  ;;  %12614 = vmatpush1.bf16.msra.mxu0 %v20456_v22  ;;  %v20513_v42 = vld [vmem:[%s25696_s5 + $0x388] ss:$16 sps:$4 sm:$0xff]  }
 0x453   :  { %19401 = vmatprep.mubr.msk.bf16.mxu0 %vm590_vm4, %v10534_v51  ;;  %11711 = vmatprep.subr.bf16.mxu1 %v20461_v37  ;;  %v20516_v22 = vld [vmem:[%s25696_s5 + $0x748] ss:$16 sps:$4 sm:$0xff]   ;;  %v20524_v37 = vld [vmem:[%s25696_s5 + $0x76c] ss:$16 sps:$4 sm:$0xff]  }
 0x454   :  { %12615 = vmatprep.subr.bf16.mxu0 %v20464_v43  ;;  %v20522_v43 = vld [vmem:[%s25696_s5 + $0x768] ss:$16 sps:$4 sm:$0xff]   ;;  %v20527_v51 = vld [vmem:[%s25696_s5 + $0x3cc] ss:$16 sps:$4 sm:$0xff]  }
 0x456   :  { %11712 = vmatpush1.bf16.msra.mxu1 %v20459_v35  ;;  %12616 = vmatpush1.bf16.msra.mxu0 %v20462_v29  ;;  %v20530_v35 = vld [vmem:[%s25696_s5 + $0x78c] ss:$16 sps:$4 sm:$0xff]  }
 0x457   :  { %11713 = vmatprep.subr.bf16.mxu1 %v20467_v12  ;;  %12617 = vmatprep.subr.bf16.mxu0 %v20470_v14  ;;  %v12661_v12 = vld [vmem:[#allocation3 + $0x54] sm:$0x3]  ;;  %v12662_v14 = vld [vmem:[#allocation3 + $0x56] sm:$0x3] }
 0x458   :  { %v12663_v24 = vmax.f32 %v12661_v12, %v12662_v14  ;;  %v20576_v12 = vld [vmem:[%s25696_s5 + $0x888] ss:$16 sps:$4 sm:$0xff]  }
 0x459   :  { %19402 = vmatmul.mubr.msk.bf16.gmra.mrb[168].mxu0 %vm590_vm4, %v10533_v4  ;;  %v20521_v4 = vld [vmem:[%s25696_s5 + $0x3ac] ss:$16 sps:$4 sm:$0xff]  }
 0x45a   :  { %11714 = vmatpush1.bf16.msra.mxu1 %v20465_v54  ;;  %12618 = vmatpush1.bf16.msra.mxu0 %v20468_v62  ;;  %v20525_v62 = vld [vmem:[%s25696_s5 + $0x3c8] ss:$16 sps:$4 sm:$0xff]  }
 0x45b   :  { %11715 = vmatprep.subr.bf16.mxu1 %v20473_v40  ;;  %12619 = vmatprep.subr.bf16.mxu0 %v20476_v1  ;;  %v20533_v1 = vld [vmem:[%s25696_s5 + $0x3ec] ss:$16 sps:$4 sm:$0xff]  }
 0x45c   :  { %12645 = vmatprep.mubr.bf16.mxu0 %v21139_v59 }
 0x45e   :  { %11716 = vmatpush1.bf16.msra.mxu1 %v20471_v46  ;;  %12620 = vmatpush1.bf16.msra.mxu0 %v20474_v33  ;;  %v12660_v46 = vmax.f32 %v12658_v63, %v12659_v13  ;;  %v20531_v33 = vld [vmem:[%s25696_s5 + $0x3e8] ss:$16 sps:$4 sm:$0xff]   ;;  %v20581_v63 = vld [vmem:[%s25696_s5 + $0x4e4] ss:$16 sps:$4 sm:$0xff]   ;;  %v20584_v13 = vld [vmem:[%s25696_s5 + $0x8ac] ss:$16 sps:$4 sm:$0xff]  }
 0x45f   :  { %11717 = vmatprep.subr.bf16.mxu1 %v20479_v17  ;;  %12621 = vmatprep.subr.bf16.mxu0 %v20482_v26  ;;  %v20534_v17 = vld [vmem:[%s25696_s5 + $0x7a8] ss:$16 sps:$4 sm:$0xff]   ;;  %v20539_v26 = vld [vmem:[%s25696_s5 + $0x404] ss:$16 sps:$4 sm:$0xff]  }
 0x460   :  { %v12664_v31 = vmax.f32 %v12660_v46, %v12663_v24  ;;  %v20587_v24 = vld [vmem:[%s25696_s5 + $0x40c] ss:$16 sps:$4 sm:$0xff]  }
 0x461   :  { %v20590_v46 = vld [vmem:[%s25696_s5 + $0x8cc] ss:$16 sps:$4 sm:$0xff]  }
 0x462   :  { %11718 = vmatpush1.bf16.msra.mxu1 %v20477_v20  ;;  %12622 = vmatpush1.bf16.msra.mxu0 %v20480_v34  ;;  %v20545_v20 = vld [vmem:[%s25696_s5 + $0x424] ss:$16 sps:$4 sm:$0xff]   ;;  %v20548_v34 = vld [vmem:[%s25696_s5 + $0x7ec] ss:$16 sps:$4 sm:$0xff]  }
 0x463   :  { %11719 = vmatprep.subr.bf16.mxu1 %v20485_v53  ;;  %12623 = vmatprep.subr.bf16.mxu0 %v20488_v39  ;;  %v12665_v53 = vadd.f32 %v24347_v36, %v12664_v31  ;;  %v20543_v39 = vld [vmem:[%s25696_s5 + $0x420] ss:$16 sps:$4 sm:$0xff]   ;;  %v20593_v31 = vld [vmem:[%s25696_s5 + $0x42c] ss:$16 sps:$4 sm:$0xff]  }
 0x465   :  { %v12666_v57 = vmax.f32 %v12665_v53, 0.0  ;;  %v20599_v53 = vld [vmem:[%s25696_s5 + $0x44c] ss:$16 sps:$4 sm:$0xff]  }
 0x466   :  { %11720 = vmatpush1.bf16.msra.mxu1 %v20483_v49  ;;  %12624 = vmatpush1.bf16.msra.mxu0 %v20486_v38  ;;  %v20554_v49 = vld [vmem:[%s25696_s5 + $0x80c] ss:$16 sps:$4 sm:$0xff]   ;;  %v20549_v38 = vld [vmem:[%s25696_s5 + $0x440] ss:$16 sps:$4 sm:$0xff]  }
 0x467   :  { %11746 = vmatprep.subr.bf16.mxu1 %v20491_v18  ;;  %12625 = vmatprep.subr.bf16.mxu0 %v20494_v8  ;;  %v24370_v18 = vpack.c.bf16 %v12666_v57, %v12666_v57  ;;  %v20557_v8 = vld [vmem:[%s25696_s5 + $0x464] ss:$16 sps:$4 sm:$0xff]   ;;  %v20600_v57 = vld [vmem:[%s25696_s5 + $0x908] ss:$16 sps:$4 sm:$0xff]  }
 0x469   :  { %11738 = vmatmul.mubr.bf16.vlgmr.msra.gmra.mrb[196].mxu1 %v24229_v25 }
 0x46a   :  { %11747 = vmatpush1.bf16.msra.mxu1 %v20489_v27  ;;  %12626 = vmatpush1.bf16.msra.mxu0 %v20492_v50  ;;  %v20555_v27 = vld [vmem:[%s25696_s5 + $0x460] ss:$16 sps:$4 sm:$0xff]   ;;  %v20558_v50 = vld [vmem:[%s25696_s5 + $0x828] ss:$16 sps:$4 sm:$0xff]  }
 0x46b   :  { %11748 = vmatprep.subr.bf16.mxu1 %v20497_v16  ;;  %12627 = vmatprep.subr.bf16.mxu0 %v20500_v5  ;;  %v20566_v16 = vld [vmem:[%s25696_s5 + $0x84c] ss:$16 sps:$4 sm:$0xff]   ;;  %v11794_v5 = vld [vmem:[#allocation3 + $0x48] sm:$0x3] }
 0x46c   :  { %11778 = vmatprep.mubr.bf16.mxu1 %v21139_v59 }
 0x46e   :  { %11749 = vmatpush1.bf16.msra.mxu1 %v20495_v47  ;;  %12628 = vmatpush1.bf16.msra.mxu0 %v20498_v48  ;;  %v11791_v47 = vld [vmem:[#allocation3 + $0x30] sm:$0x3] }
 0x46f   :  { %11750 = vmatprep.subr.bf16.mxu1 %v20503_v30  ;;  %12902 = vmatprep.subr.bf16.mxu0 %v20506_v2  ;;  %v20561_v48 = vld [vmem:[%s25696_s5 + $0x480] ss:$16 sps:$4 sm:$0xff]   ;;  %v20564_v30 = vld [vmem:[%s25696_s5 + $0x848] ss:$16 sps:$4 sm:$0xff]   ;;  %v20569_v2 = vld [vmem:[%s25696_s5 + $0x4a4] ss:$16 sps:$4 sm:$0xff]  }
 0x471   :  { %12646 = vmatmul.mubr.bf16.vlgmr.msra.gmra.mrb[172].mxu0 %v24258_v52 }
 0x472   :  { %11751 = vmatpush1.bf16.msra.mxu1 %v20501_v23  ;;  %12903 = vmatpush1.bf16.msra.mxu0 %v20504_v41  ;;  %v20572_v23 = vld [vmem:[%s25696_s5 + $0x86c] ss:$16 sps:$4 sm:$0xff]   ;;  %v11796_v41 = vmax.f32 %v11794_v5, %v11795_v6 }
 0x473   :  { %11752 = vmatprep.subr.bf16.mxu1 %v20509_v55  ;;  %12904 = vmatprep.subr.bf16.mxu0 %v20512_v61  ;;  %v11793_v55 = vmax.f32 %v11791_v47, %v11792_v11  ;;  %v20567_v61 = vld [vmem:[%s25696_s5 + $0x4a0] ss:$16 sps:$4 sm:$0xff]   ;;  %v20617_v5 = vld [vmem:[%s25696_s5 + $0x4ac] ss:$16 sps:$4 sm:$0xff]   ;;  %v20615_v47 = vld [vmem:[%s25696_s5 + $0x4a8] ss:$16 sps:$4 sm:$0xff]  }
 0x474   :  { %12934 = vmatprep.mubr.bf16.mxu0 %v21139_v59  ;;  %v20620_v6 = vld [vmem:[%s25696_s5 + $0x96c] ss:$16 sps:$4 sm:$0xff]  }
 0x475   :  { %v20623_v11 = vld [vmem:[%s25696_s5 + $0x4cc] ss:$16 sps:$4 sm:$0xff]  }
 0x476   :  { %11753 = vmatpush1.bf16.msra.mxu1 %v20507_v28  ;;  %12905 = vmatpush1.bf16.msra.mxu0 %v20510_v0  ;;  %v20570_v28 = vld [vmem:[%s25696_s5 + $0x868] ss:$16 sps:$4 sm:$0xff]   ;;  %v12947_v0 = vld [vmem:[#allocation3 + $0x60] sm:$0x3] }
 0x477   :  { %11754 = vmatprep.subr.bf16.mxu1 %v20515_v56  ;;  %12906 = vmatprep.subr.bf16.mxu0 %v20518_v45  ;;  %v20575_v56 = vld [vmem:[%s25696_s5 + $0x4c4] ss:$16 sps:$4 sm:$0xff]   ;;  %v20578_v45 = vld [vmem:[%s25696_s5 + $0x88c] ss:$16 sps:$4 sm:$0xff]  }
 0x47a   :  { %11755 = vmatpush1.bf16.msra.mxu1 %v20513_v42  ;;  %12907 = vmatpush1.bf16.msra.mxu0 %v20516_v22  ;;  %v11797_v42 = vmax.f32 %v11793_v55, %v11796_v41  ;;  %v12948_v22 = vld [vmem:[#allocation3 + $0x62] sm:$0x3]  ;;  %v13239_v55 = vld [vmem:[#allocation3 + $0x7c] sm:$0x3] }
 0x47b   :  { %11756 = vmatprep.subr.bf16.mxu1 %v20521_v4  ;;  %12908 = vmatprep.subr.bf16.mxu0 %v20524_v37  ;;  %v12950_v37 = vld [vmem:[#allocation3 + $0x78] sm:$0x3] }
 0x47c   :  { %v24304_v29 = vpop.f32.mrb[172].mxu1 }
 0x47d   :  { %v24306_v7 = vpop.f32.mrb[173].mxu1 }
 0x47e   :  { %11757 = vmatpush1.bf16.msra.mxu1 %v20519_v15  ;;  %12909 = vmatpush1.bf16.msra.mxu0 %v20522_v43  ;;  %v10927_v54 = vpop.f32.mrb[174].mxu1  ;;  %v12951_v15 = vld [vmem:[#allocation3 + $0x7a] sm:$0x3] }
 0x47f   :  { %v10928_v40 = vpop.f32.mrb[175].mxu1  ;;  %11758 = vmatprep.subr.bf16.mxu1 %v20527_v51  ;;  %12910 = vmatprep.subr.bf16.mxu0 %v20530_v35  ;;  %v20573_v35 = vld [vmem:[%s25696_s5 + $0x4c0] ss:$16 sps:$4 sm:$0xff]   ;;  %v11798_v54 = vadd.f32 %v24347_v36, %v11797_v42  ;;  %v20621_v42 = vld [vmem:[%s25696_s5 + $0x4c8] ss:$16 sps:$4 sm:$0xff]  }
 0x480   :  { %v20579_v40 = vld [vmem:[%s25696_s5 + $0x4e0] ss:$16 sps:$4 sm:$0xff]  }
 0x482   :  { %11759 = vmatpush1.bf16.msra.mxu1 %v20525_v62  ;;  %12911 = vmatpush1.bf16.msra.mxu0 %v20528_v10  ;;  %v12949_v62 = vmax.f32 %v12947_v0, %v12948_v22  ;;  %v12952_v10 = vmax.f32 %v12950_v37, %v12951_v15  ;;  %v20624_v22 = vld [vmem:[%s25696_s5 + $0x988] ss:$16 sps:$4 sm:$0xff]  }
 0x483   :  { %11760 = vmatprep.subr.bf16.mxu1 %v20533_v1  ;;  %12912 = vmatprep.subr.bf16.mxu0 %v20536_v19  ;;  %v20582_v1 = vld [vmem:[%s25696_s5 + $0x8a8] ss:$16 sps:$4 sm:$0xff]   ;;  %v11799_v19 = vmax.f32 %v11798_v54, 0.0  ;;  %v20633_v54 = vld [vmem:[%s25696_s5 + $0x500] ss:$16 sps:$4 sm:$0xff]  }
 0x486   :  { %11761 = vmatpush1.bf16.msra.mxu1 %v20531_v33  ;;  %12913 = vmatpush1.bf16.msra.mxu0 %v20534_v17  ;;  %v12953_v33 = vmax.f32 %v12949_v62, %v12952_v10  ;;  %v20585_v17 = vld [vmem:[%s25696_s5 + $0x408] ss:$16 sps:$4 sm:$0xff]   ;;  %v20641_v10 = vld [vmem:[%s25696_s5 + $0x524] ss:$16 sps:$4 sm:$0xff]  }
 0x487   :  { %11994 = vmatprep.subr.bf16.mxu1 %v20539_v26  ;;  %12914 = vmatprep.subr.bf16.mxu0 %v20542_v32  ;;  %v20588_v26 = vld [vmem:[%s25696_s5 + $0x8c8] ss:$16 sps:$4 sm:$0xff]   ;;  %v24451_v32 = vpack.c.bf16 %v11799_v19, %v11799_v19  ;;  %v20639_v19 = vld [vmem:[%s25696_s5 + $0x520] ss:$16 sps:$4 sm:$0xff]  }
 0x488   :  { %v20636_v62 = vld [vmem:[%s25696_s5 + $0x9c8] ss:$16 sps:$4 sm:$0xff]  }
 0x489   :  { %11779 = vmatmul.mubr.bf16.vlgmr.msra.gmra.mrb[200].mxu1 %v24229_v25  ;;  %v20563_v25 = vld [vmem:[%s25696_s5 + $0x484] ss:$16 sps:$4 sm:$0xff]  }
 0x48a   :  { %11995 = vmatpush1.bf16.msra.mxu1 %v20537_v58  ;;  %12915 = vmatpush1.bf16.msra.mxu0 %v20540_v3  ;;  %v20596_v58 = vld [vmem:[%s25696_s5 + $0x8ec] ss:$16 sps:$4 sm:$0xff]   ;;  %v12954_v3 = vadd.f32 %v24347_v36, %v12953_v33 }
 0x48b   :  { %11996 = vmatprep.subr.bf16.mxu1 %v20545_v20  ;;  %12916 = vmatprep.subr.bf16.mxu0 %v20548_v34  ;;  %v20591_v20 = vld [vmem:[%s25696_s5 + $0x428] ss:$16 sps:$4 sm:$0xff]  }
 0x48c   :  { %12026 = vmatprep.mubr.bf16.mxu1 %v21139_v59  ;;  %v20594_v34 = vld [vmem:[%s25696_s5 + $0x8e8] ss:$16 sps:$4 sm:$0xff]  }
 0x48e   :  { %11997 = vmatpush1.bf16.msra.mxu1 %v20543_v39  ;;  %12917 = vmatpush1.bf16.msra.mxu0 %v20546_v44  ;;  %v12955_v39 = vmax.f32 %v12954_v3, 0.0  ;;  %v20602_v44 = vld [vmem:[%s25696_s5 + $0x90c] ss:$16 sps:$4 sm:$0xff]  }
 0x48f   :  { %11998 = vmatprep.subr.bf16.mxu1 %v20551_v9  ;;  %13191 = vmatprep.subr.bf16.mxu0 %v20554_v49  ;;  %v20597_v9 = vld [vmem:[%s25696_s5 + $0x448] ss:$16 sps:$4 sm:$0xff]   ;;  %v20707_v3 = vld [vmem:[%s25696_s5 + $0xa2c] ss:$16 sps:$4 sm:$0xff]  }
 0x490   :  { %v24480_v49 = vpack.c.bf16 %v12955_v39, %v12955_v39  ;;  %v20713_v39 = vld [vmem:[%s25696_s5 + $0xa4c] ss:$16 sps:$4 sm:$0xff]  }
 0x491   :  { %12935 = vmatmul.mubr.bf16.vlgmr.msra.gmra.mrb[176].mxu0 %v24370_v18 }
 0x492   :  { %11999 = vmatpush1.bf16.msra.mxu1 %v20549_v38  ;;  %13192 = vmatpush1.bf16.msra.mxu0 %v20552_v21  ;;  %v20605_v38 = vld [vmem:[%s25696_s5 + $0x46c] ss:$16 sps:$4 sm:$0xff]  }
 0x493   :  { %12000 = vmatprep.subr.bf16.mxu1 %v20557_v8  ;;  %13193 = vmatprep.subr.bf16.mxu0 %v20560_v60  ;;  %v20608_v21 = vld [vmem:[%s25696_s5 + $0x92c] ss:$16 sps:$4 sm:$0xff]   ;;  %v20603_v8 = vld [vmem:[%s25696_s5 + $0x468] ss:$16 sps:$4 sm:$0xff]  }
 0x494   :  { %13223 = vmatprep.mubr.bf16.mxu0 %v21139_v59  ;;  %v20606_v60 = vld [vmem:[%s25696_s5 + $0x928] ss:$16 sps:$4 sm:$0xff]  }
 0x496   :  { %12001 = vmatpush1.bf16.msra.mxu1 %v20555_v27  ;;  %13194 = vmatpush1.bf16.msra.mxu0 %v20558_v50  ;;  %v20611_v27 = vld [vmem:[%s25696_s5 + $0x48c] ss:$16 sps:$4 sm:$0xff]  }
 0x497   :  { %12002 = vmatprep.subr.bf16.mxu1 %v20563_v25  ;;  %13195 = vmatprep.subr.bf16.mxu0 %v20566_v16  ;;  %v20614_v50 = vld [vmem:[%s25696_s5 + $0x94c] ss:$16 sps:$4 sm:$0xff]   ;;  %v20609_v25 = vld [vmem:[%s25696_s5 + $0x488] ss:$16 sps:$4 sm:$0xff]  }
 0x498   :  { %v20612_v16 = vld [vmem:[%s25696_s5 + $0x948] ss:$16 sps:$4 sm:$0xff]  }
 0x49a   :  { %12003 = vmatpush1.bf16.msra.mxu1 %v20561_v48  ;;  %13196 = vmatpush1.bf16.msra.mxu0 %v20564_v30  ;;  %v20618_v48 = vld [vmem:[%s25696_s5 + $0x968] ss:$16 sps:$4 sm:$0xff]   ;;  %v13236_v30 = vld [vmem:[#allocation3 + $0x64] sm:$0x3] }
 0x49b   :  { %12004 = vmatprep.subr.bf16.mxu1 %v20569_v2  ;;  %13197 = vmatprep.subr.bf16.mxu0 %v20572_v23  ;;  %v20626_v2 = vld [vmem:[%s25696_s5 + $0x98c] ss:$16 sps:$4 sm:$0xff]   ;;  %v13237_v23 = vld [vmem:[#allocation3 + $0x66] sm:$0x3] }
 0x49c   :  { %v24416_v4 = vpop.f32.mrb[176].mxu1  ;;  %v13238_v15 = vmax.f32 %v13236_v30, %v13237_v23 }
 0x49d   :  { %v24418_v43 = vpop.f32.mrb[177].mxu1 }
 0x49e   :  { %v10968_v51 = vpop.f32.mrb[178].mxu1  ;;  %12005 = vmatpush1.bf16.msra.mxu1 %v20567_v61  ;;  %13198 = vmatpush1.bf16.msra.mxu0 %v20570_v28  ;;  %v13240_v61 = vld [vmem:[#allocation3 + $0x7e] sm:$0x3] }
 0x49f   :  { %v10969_v14 = vpop.f32.mrb[179].mxu1  ;;  %12006 = vmatprep.subr.bf16.mxu1 %v20575_v56  ;;  %13199 = vmatprep.subr.bf16.mxu0 %v20578_v45  ;;  %v13241_v51 = vmax.f32 %v13239_v55, %v13240_v61  ;;  %v20657_v55 = vld [vmem:[%s25696_s5 + $0x5c0] ss:$16 sps:$4 sm:$0xff]   ;;  %v20723_v61 = vld [vmem:[%s25696_s5 + $0xa88] ss:$16 sps:$4 sm:$0xff]  }
 0x4a0   :  { %v20635_v14 = vld [vmem:[%s25696_s5 + $0x504] ss:$16 sps:$4 sm:$0xff]  }
 0x4a2   :  { %12007 = vmatpush1.bf16.msra.mxu1 %v20573_v35  ;;  %13200 = vmatpush1.bf16.msra.mxu0 %v20576_v12  ;;  %v20627_v35 = vld [vmem:[%s25696_s5 + $0x4e8] ss:$16 sps:$4 sm:$0xff]  }
 0x4a3   :  { %12008 = vmatprep.subr.bf16.mxu1 %v20581_v63  ;;  %13201 = vmatprep.subr.bf16.mxu0 %v20584_v13  ;;  %v20630_v12 = vld [vmem:[%s25696_s5 + $0x9a8] ss:$16 sps:$4 sm:$0xff]   ;;  %v20638_v63 = vld [vmem:[%s25696_s5 + $0x9cc] ss:$16 sps:$4 sm:$0xff]   ;;  %v13242_v13 = vmax.f32 %v13238_v15, %v13241_v51 }
 0x4a4   :  { %v20663_v15 = vld [vmem:[%s25696_s5 + $0x508] ss:$16 sps:$4 sm:$0xff]  }
 0x4a6   :  { %12009 = vmatpush1.bf16.msra.mxu1 %v20579_v40  ;;  %13202 = vmatpush1.bf16.msra.mxu0 %v20582_v1  ;;  %v20644_v40 = vld [vmem:[%s25696_s5 + $0x9ec] ss:$16 sps:$4 sm:$0xff]   ;;  %v13243_v1 = vadd.f32 %v24347_v36, %v13242_v13 }
 0x4a7   :  { %12035 = vmatprep.subr.bf16.mxu1 %v20587_v24  ;;  %13203 = vmatprep.subr.bf16.mxu0 %v20590_v46  ;;  %v20642_v24 = vld [vmem:[%s25696_s5 + $0x9e8] ss:$16 sps:$4 sm:$0xff]   ;;  %v20647_v46 = vld [vmem:[%s25696_s5 + $0x544] ss:$16 sps:$4 sm:$0xff]   ;;  %v20671_v13 = vld [vmem:[%s25696_s5 + $0x54c] ss:$16 sps:$4 sm:$0xff]  }
 0x4a8   :  { %v13244_v33 = vmax.f32 %v13243_v1, 0.0  ;;  %v20672_v1 = vld [vmem:[%s25696_s5 + $0x568] ss:$16 sps:$4 sm:$0xff]  }
 0x4a9   :  { %12027 = vmatmul.mubr.bf16.vlgmr.msra.gmra.mrb[204].mxu1 %v24451_v32 }
 0x4aa   :  { %12036 = vmatpush1.bf16.msra.mxu1 %v20585_v17  ;;  %13204 = vmatpush1.bf16.msra.mxu0 %v20588_v26  ;;  %v20701_v17 = vld [vmem:[%s25696_s5 + $0xa0c] ss:$16 sps:$4 sm:$0xff]   ;;  %v20645_v26 = vld [vmem:[%s25696_s5 + $0x540] ss:$16 sps:$4 sm:$0xff]  }
 0x4ab   :  { %12037 = vmatprep.subr.bf16.mxu1 %v20593_v31  ;;  %13205 = vmatprep.subr.bf16.mxu0 %v20596_v58  ;;  %v24589_v31 = vpack.c.bf16 %v13244_v33, %v13244_v33  ;;  %v20650_v58 = vld [vmem:[%s25696_s5 + $0x564] ss:$16 sps:$4 sm:$0xff]   ;;  %v20678_v33 = vld [vmem:[%s25696_s5 + $0x5a8] ss:$16 sps:$4 sm:$0xff]  }
 0x4ac   :  { %12067 = vmatprep.mubr.bf16.mxu1 %v21139_v59 }
 0x4ae   :  { %12038 = vmatpush1.bf16.msra.mxu1 %v20591_v20  ;;  %13206 = vmatpush1.bf16.msra.mxu0 %v20594_v34  ;;  %v20648_v20 = vld [vmem:[%s25696_s5 + $0x560] ss:$16 sps:$4 sm:$0xff]   ;;  %v20705_v34 = vld [vmem:[%s25696_s5 + $0xa28] ss:$16 sps:$4 sm:$0xff]  }
 0x4af   :  { %12039 = vmatprep.subr.bf16.mxu1 %v20599_v53  ;;  %13480 = vmatprep.subr.bf16.mxu0 %v20602_v44  ;;  %v20653_v53 = vld [vmem:[%s25696_s5 + $0x584] ss:$16 sps:$4 sm:$0xff]   ;;  %v12083_v44 = vld [vmem:[#allocation3 + $0x4c] sm:$0x3] }
 0x4b1   :  { %13224 = vmatmul.mubr.bf16.vlgmr.msra.gmra.mrb[180].mxu0 %v24480_v49 }
 0x4b2   :  { %12040 = vmatpush1.bf16.msra.mxu1 %v20597_v9  ;;  %13481 = vmatpush1.bf16.msra.mxu0 %v20600_v57  ;;  %v12084_v9 = vld [vmem:[#allocation3 + $0x4e] sm:$0x3]  ;;  %v12080_v57 = vld [vmem:[#allocation3 + $0x34] sm:$0x3] }
 0x4b3   :  { %12041 = vmatprep.subr.bf16.mxu1 %v20605_v38  ;;  %13482 = vmatprep.subr.bf16.mxu0 %v20608_v21  ;;  %v20651_v38 = vld [vmem:[%s25696_s5 + $0x580] ss:$16 sps:$4 sm:$0xff]   ;;  %v12081_v21 = vld [vmem:[#allocation3 + $0x36] sm:$0x3] }
 0x4b4   :  { %13512 = vmatprep.mubr.bf16.mxu0 %v21139_v59 }
 0x4b6   :  { %12042 = vmatpush1.bf16.msra.mxu1 %v20603_v8  ;;  %13483 = vmatpush1.bf16.msra.mxu0 %v20606_v60  ;;  %v20711_v8 = vld [vmem:[%s25696_s5 + $0xa48] ss:$16 sps:$4 sm:$0xff]   ;;  %v20656_v60 = vld [vmem:[%s25696_s5 + $0x5a4] ss:$16 sps:$4 sm:$0xff]  }
 0x4b7   :  { %12043 = vmatprep.subr.bf16.mxu1 %v20611_v27  ;;  %13484 = vmatprep.subr.bf16.mxu0 %v20614_v50  ;;  %v12085_v27 = vmax.f32 %v12083_v44, %v12084_v9  ;;  %v20719_v50 = vld [vmem:[%s25696_s5 + $0xa6c] ss:$16 sps:$4 sm:$0xff]   ;;  %v20687_v44 = vld [vmem:[%s25696_s5 + $0x600] ss:$16 sps:$4 sm:$0xff]   ;;  %v20692_v9 = vld [vmem:[%s25696_s5 + $0x624] ss:$16 sps:$4 sm:$0xff]  }
 0x4ba   :  { %12044 = vmatpush1.bf16.msra.mxu1 %v20609_v25  ;;  %13485 = vmatpush1.bf16.msra.mxu0 %v20612_v16  ;;  %v12082_v25 = vmax.f32 %v12080_v57, %v12081_v21  ;;  %v20654_v16 = vld [vmem:[%s25696_s5 + $0x5a0] ss:$16 sps:$4 sm:$0xff]  }
 0x4bb   :  { %12045 = vmatprep.subr.bf16.mxu1 %v20617_v5  ;;  %13486 = vmatprep.subr.bf16.mxu0 %v20620_v6  ;;  %v20717_v5 = vld [vmem:[%s25696_s5 + $0xa68] ss:$16 sps:$4 sm:$0xff]   ;;  %v20659_v6 = vld [vmem:[%s25696_s5 + $0x5c4] ss:$16 sps:$4 sm:$0xff]   ;;  %v20690_v57 = vld [vmem:[%s25696_s5 + $0x620] ss:$16 sps:$4 sm:$0xff]  }
 0x4bc   :  { %v11165_v41 = vpop.f32.mrb[180].mxu1  ;;  %v20693_v21 = vld [vmem:[%s25696_s5 + $0x640] ss:$16 sps:$4 sm:$0xff]  }
 0x4bd   :  { %v24527_v28 = vadd.f32 %v11165_v41, %v24304_v29  ;;  %v11167_v0 = vpop.f32.mrb[181].mxu1  ;;  %v20629_v29 = vld [vmem:[%s25696_s5 + $0x4ec] ss:$16 sps:$4 sm:$0xff]  }
 0x4be   :  { %v24530_v56 = vadd.f32 %v11167_v0, %v24306_v7  ;;  %v11169_v45 = vpop.f32.mrb[182].mxu1  ;;  %12046 = vmatpush1.bf16.msra.mxu1 %v20615_v47  ;;  %13487 = vmatpush1.bf16.msra.mxu0 %v20618_v48  ;;  %v20632_v7 = vld [vmem:[%s25696_s5 + $0x9ac] ss:$16 sps:$4 sm:$0xff]   ;;  %v12086_v47 = vmax.f32 %v12082_v25, %v12085_v27  ;;  %v20704_v27 = vld [vmem:[%s25696_s5 + $0x684] ss:$16 sps:$4 sm:$0xff]  }
 0x4bf   :  { %v11170_v37 = vpop.f32.mrb[183].mxu1  ;;  %12047 = vmatprep.subr.bf16.mxu1 %v20623_v11  ;;  %13488 = vmatprep.subr.bf16.mxu0 %v20626_v2  ;;  %v20725_v48 = vld [vmem:[%s25696_s5 + $0xa8c] ss:$16 sps:$4 sm:$0xff]   ;;  %v20710_v25 = vld [vmem:[%s25696_s5 + $0x6a4] ss:$16 sps:$4 sm:$0xff]  }
 0x4c0   :  { %v20731_v45 = vld [vmem:[%s25696_s5 + $0xaac] ss:$16 sps:$4 sm:$0xff]  }
 0x4c2   :  { %12048 = vmatpush1.bf16.msra.mxu1 %v20621_v42  ;;  %13489 = vmatpush1.bf16.msra.mxu0 %v20624_v22  ;;  %v20660_v42 = vld [vmem:[%s25696_s5 + $0x5e0] ss:$16 sps:$4 sm:$0xff]   ;;  %v20729_v22 = vld [vmem:[%s25696_s5 + $0xaa8] ss:$16 sps:$4 sm:$0xff]  }
 0x4c3   :  { %12049 = vmatprep.subr.bf16.mxu1 %v20629_v29  ;;  %13490 = vmatprep.subr.bf16.mxu0 %v20632_v7  ;;  %v20665_v29 = vld [vmem:[%s25696_s5 + $0x50c] ss:$16 sps:$4 sm:$0xff]  }
 0x4c4   :  { %v20737_v7 = vld [vmem:[%s25696_s5 + $0xacc] ss:$16 sps:$4 sm:$0xff]  }
 0x4c6   :  { %12050 = vmatpush1.bf16.msra.mxu1 %v20627_v35  ;;  %13491 = vmatpush1.bf16.msra.mxu0 %v20630_v12  ;;  %v20668_v35 = vld [vmem:[%s25696_s5 + $0x52c] ss:$16 sps:$4 sm:$0xff]   ;;  %v20735_v12 = vld [vmem:[%s25696_s5 + $0xac8] ss:$16 sps:$4 sm:$0xff]  }
 0x4c7   :  { %12283 = vmatprep.subr.bf16.mxu1 %v20635_v14  ;;  %13492 = vmatprep.subr.bf16.mxu0 %v20638_v63  ;;  %v20743_v14 = vld [vmem:[%s25696_s5 + $0xaec] ss:$16 sps:$4 sm:$0xff]   ;;  %v20666_v63 = vld [vmem:[%s25696_s5 + $0x528] ss:$16 sps:$4 sm:$0xff]  }
 0x4c9   :  { %12068 = vmatmul.mubr.bf16.vlgmr.msra.gmra.mrb[208].mxu1 %v24451_v32  ;;  %v20699_v32 = vld [vmem:[%s25696_s5 + $0xa08] ss:$16 sps:$4 sm:$0xff]  }
 0x4ca   :  { %12284 = vmatpush1.bf16.msra.mxu1 %v20633_v54  ;;  %13493 = vmatpush1.bf16.msra.mxu0 %v20636_v62  ;;  %v20741_v54 = vld [vmem:[%s25696_s5 + $0xae8] ss:$16 sps:$4 sm:$0xff]   ;;  %v20749_v62 = vld [vmem:[%s25696_s5 + $0xb0c] ss:$16 sps:$4 sm:$0xff]  }
 0x4cb   :  { %12285 = vmatprep.subr.bf16.mxu1 %v20641_v10  ;;  %13494 = vmatprep.subr.bf16.mxu0 %v20644_v40  ;;  %v20669_v10 = vld [vmem:[%s25696_s5 + $0x548] ss:$16 sps:$4 sm:$0xff]   ;;  %v20674_v40 = vld [vmem:[%s25696_s5 + $0x56c] ss:$16 sps:$4 sm:$0xff]  }
 0x4cc   :  { %12315 = vmatprep.mubr.bf16.mxu1 %v21139_v59 }
 0x4ce   :  { %12286 = vmatpush1.bf16.msra.mxu1 %v20639_v19  ;;  %13495 = vmatpush1.bf16.msra.mxu0 %v20642_v24  ;;  %v20677_v19 = vld [vmem:[%s25696_s5 + $0x58c] ss:$16 sps:$4 sm:$0xff]   ;;  %v20675_v24 = vld [vmem:[%s25696_s5 + $0x588] ss:$16 sps:$4 sm:$0xff]  }
 0x4cf   :  { %12287 = vmatprep.subr.bf16.mxu1 %v20647_v46  ;;  %13769 = vmatprep.subr.bf16.mxu0 %v20701_v17  ;;  %v20680_v46 = vld [vmem:[%s25696_s5 + $0x5ac] ss:$16 sps:$4 sm:$0xff]  }
 0x4d0   :  { %v20683_v17 = vld [vmem:[%s25696_s5 + $0x5cc] ss:$16 sps:$4 sm:$0xff]  }
 0x4d1   :  { %13513 = vmatmul.mubr.bf16.vlgmr.msra.gmra.mrb[184].mxu0 %v24589_v31 }
 0x4d2   :  { %12288 = vmatpush1.bf16.msra.mxu1 %v20645_v26  ;;  %13770 = vmatpush1.bf16.msra.mxu0 %v20699_v32 }
 0x4d3   :  { %12289 = vmatprep.subr.bf16.mxu1 %v20650_v58  ;;  %13771 = vmatprep.subr.bf16.mxu0 %v20707_v3 }
 0x4d4   :  { %13801 = vmatprep.mubr.bf16.mxu0 %v21139_v59 }
 0x4d6   :  { %12290 = vmatpush1.bf16.msra.mxu1 %v20648_v20  ;;  %13772 = vmatpush1.bf16.msra.mxu0 %v20705_v34  ;;  %v20681_v34 = vld [vmem:[%s25696_s5 + $0x5c8] ss:$16 sps:$4 sm:$0xff]  }
 0x4d7   :  { %12291 = vmatprep.subr.bf16.mxu1 %v20653_v53  ;;  %13773 = vmatprep.subr.bf16.mxu0 %v20713_v39  ;;  %v20686_v39 = vld [vmem:[%s25696_s5 + $0x5ec] ss:$16 sps:$4 sm:$0xff]  }
 0x4da   :  { %12292 = vmatpush1.bf16.msra.mxu1 %v20651_v38  ;;  %13774 = vmatpush1.bf16.msra.mxu0 %v20711_v8  ;;  %v20695_v38 = vld [vmem:[%s25696_s5 + $0x644] ss:$16 sps:$4 sm:$0xff]  }
 0x4db   :  { %12293 = vmatprep.subr.bf16.mxu1 %v20656_v60  ;;  %13775 = vmatprep.subr.bf16.mxu0 %v20719_v50  ;;  %v20698_v8 = vld [vmem:[%s25696_s5 + $0x664] ss:$16 sps:$4 sm:$0xff]   ;;  %v20696_v60 = vld [vmem:[%s25696_s5 + $0x660] ss:$16 sps:$4 sm:$0xff]  }
 0x4dc   :  { %v11206_v30 = vpop.f32.mrb[184].mxu1  ;;  %v20702_v50 = vld [vmem:[%s25696_s5 + $0x680] ss:$16 sps:$4 sm:$0xff]  }
 0x4dd   :  { %v24636_v11 = vadd.f32 %v11206_v30, %v24416_v4  ;;  %v11208_v2 = vpop.f32.mrb[185].mxu1  ;;  %v20662_v4 = vld [vmem:[%s25696_s5 + $0x5e4] ss:$16 sps:$4 sm:$0xff]  }
 0x4de   :  { %v24639_v23 = vadd.f32 %v11208_v2, %v24418_v43  ;;  %v11210_v41 = vpop.f32.mrb[186].mxu1  ;;  %12294 = vmatpush1.bf16.msra.mxu1 %v20654_v16  ;;  %13776 = vmatpush1.bf16.msra.mxu0 %v20717_v5  ;;  %v12087_v43 = vadd.f32 %v24347_v36, %v12086_v47  ;;  %v20708_v16 = vld [vmem:[%s25696_s5 + $0x6a0] ss:$16 sps:$4 sm:$0xff]   ;;  %v20716_v5 = vld [vmem:[%s25696_s5 + $0x6c4] ss:$16 sps:$4 sm:$0xff]  }
 0x4df   :  { %v11211_v0 = vpop.f32.mrb[187].mxu1  ;;  %12295 = vmatprep.subr.bf16.mxu1 %v20659_v6  ;;  %13777 = vmatprep.subr.bf16.mxu0 %v20725_v48  ;;  %v20714_v41 = vld [vmem:[%s25696_s5 + $0x6c0] ss:$16 sps:$4 sm:$0xff]  }
 0x4e0   :  { %v12088_v37 = vmax.f32 %v12087_v43, 0.0 }
 0x4e2   :  { %12296 = vmatpush1.bf16.msra.mxu1 %v20657_v55  ;;  %13778 = vmatpush1.bf16.msra.mxu0 %v20723_v61  ;;  %v12089_v51 = vpack.c.bf16 %v12088_v37, %v12088_v37  ;;  %v20722_v61 = vld [vmem:[%s25696_s5 + $0x6e4] ss:$16 sps:$4 sm:$0xff]   ;;  %v20732_v37 = vld [vmem:[%s25696_s5 + $0x720] ss:$16 sps:$4 sm:$0xff]  }
 0x4e3   :  { %12297 = vmatprep.subr.bf16.mxu1 %v20662_v4  ;;  %13779 = vmatprep.subr.bf16.mxu0 %v20731_v45  ;;  %v20726_v45 = vld [vmem:[%s25696_s5 + $0x700] ss:$16 sps:$4 sm:$0xff]  }
 0x4e6   :  { %12298 = vmatpush1.bf16.msra.mxu1 %v20660_v42  ;;  %13780 = vmatpush1.bf16.msra.mxu0 %v20729_v22  ;;  %v20734_v22 = vld [vmem:[%s25696_s5 + $0x724] ss:$16 sps:$4 sm:$0xff]  }
 0x4e7   :  { %12324 = vmatprep.subr.bf16.mxu1 %v20665_v29  ;;  %13781 = vmatprep.subr.bf16.mxu0 %v20737_v7  ;;  %v20740_v29 = vld [vmem:[%s25696_s5 + $0x744] ss:$16 sps:$4 sm:$0xff]   ;;  %v13525_v7 = vld [vmem:[#allocation3 + $0x68] sm:$0x3] }
 0x4e9   :  { %12316 = vmatmul.mubr.bf16.vlgmr.msra.gmra.mrb[212].mxu1 %v12089_v51 }
 0x4ea   :  { %12325 = vmatpush1.bf16.msra.mxu1 %v20663_v15  ;;  %12356 = vmatprep.mubr.bf16.mxu1 %v21139_v59  ;;  %v13526_v15 = vld [vmem:[#allocation3 + $0x6a] sm:$0x3] }
 0x4eb   :  { %12326 = vmatprep.subr.bf16.mxu1 %v20668_v35  ;;  %13782 = vmatpush1.bf16.msra.mxu0 %v20735_v12 }
 0x4ec   :  { %13783 = vmatprep.subr.bf16.mxu0 %v20743_v14 }
 0x4ee   :  { %12327 = vmatpush1.bf16.msra.mxu1 %v20666_v63  ;;  %v20738_v63 = vld [vmem:[%s25696_s5 + $0x740] ss:$16 sps:$4 sm:$0xff]  }
 0x4ef   :  { %12328 = vmatprep.subr.bf16.mxu1 %v20671_v13  ;;  %13784 = vmatpush1.bf16.msra.mxu0 %v20741_v54  ;;  %v13527_v13 = vmax.f32 %v13525_v7, %v13526_v15  ;;  %v20783_v15 = vld [vmem:[%s25696_s5 + $0xbc8] ss:$16 sps:$4 sm:$0xff]  }
 0x4f0   :  { %14058 = vmatprep.subr.bf16.mxu0 %v20749_v62 }
 0x4f2   :  { %12329 = vmatpush1.bf16.msra.mxu1 %v20669_v10  ;;  %v20746_v10 = vld [vmem:[%s25696_s5 + $0x764] ss:$16 sps:$4 sm:$0xff]  }
 0x4f3   :  { %12330 = vmatprep.subr.bf16.mxu1 %v20674_v40 }
 0x4f6   :  { %12331 = vmatpush1.bf16.msra.mxu1 %v20672_v1  ;;  %v20744_v1 = vld [vmem:[%s25696_s5 + $0x760] ss:$16 sps:$4 sm:$0xff]  }
 0x4f7   :  { %12332 = vmatprep.subr.bf16.mxu1 %v20677_v19 }
 0x4fa   :  { %12333 = vmatpush1.bf16.msra.mxu1 %v20675_v24  ;;  %v20752_v24 = vld [vmem:[%s25696_s5 + $0x784] ss:$16 sps:$4 sm:$0xff]  }
 0x4fb   :  { %12334 = vmatprep.subr.bf16.mxu1 %v20680_v46 }
 0x4fc   :  { %v11450_v26 = vpop.f32.mrb[188].mxu1 }
 0x4fd   :  { %v24716_v32 = vadd.f32 %v11450_v26, %v24527_v28  ;;  %v11452_v58 = vpop.f32.mrb[189].mxu1  ;;  %v20684_v28 = vld [vmem:[%s25696_s5 + $0x5e8] ss:$16 sps:$4 sm:$0xff]  }
 0x4fe   :  { %v24719_v3 = vadd.f32 %v11452_v58, %v24530_v56  ;;  %v11454_v20 = vpop.f32.mrb[190].mxu1  ;;  %12335 = vmatpush1.bf16.msra.mxu1 %v20678_v33  ;;  %v20689_v56 = vld [vmem:[%s25696_s5 + $0x604] ss:$16 sps:$4 sm:$0xff]   ;;  %v20747_v33 = vld [vmem:[%s25696_s5 + $0xb08] ss:$16 sps:$4 sm:$0xff]  }
 0x4ff   :  { %v11455_v53 = vpop.f32.mrb[191].mxu1  ;;  %12336 = vmatprep.subr.bf16.mxu1 %v20683_v17  ;;  %v20750_v17 = vld [vmem:[%s25696_s5 + $0x780] ss:$16 sps:$4 sm:$0xff]   ;;  %v20755_v58 = vld [vmem:[%s25696_s5 + $0xb2c] ss:$16 sps:$4 sm:$0xff]  }
 0x500   :  { %v20758_v20 = vld [vmem:[%s25696_s5 + $0x7a4] ss:$16 sps:$4 sm:$0xff]   ;;  %v20756_v53 = vld [vmem:[%s25696_s5 + $0x7a0] ss:$16 sps:$4 sm:$0xff]  }
 0x502   :  { %12337 = vmatpush1.bf16.msra.mxu1 %v20681_v34  ;;  %v20753_v34 = vld [vmem:[%s25696_s5 + $0xb28] ss:$16 sps:$4 sm:$0xff]  }
 0x503   :  { %12338 = vmatprep.subr.bf16.mxu1 %v20686_v39  ;;  %v20761_v39 = vld [vmem:[%s25696_s5 + $0xb4c] ss:$16 sps:$4 sm:$0xff]  }
 0x506   :  { %12339 = vmatpush1.bf16.msra.mxu1 %v20684_v28  ;;  %v20764_v28 = vld [vmem:[%s25696_s5 + $0x7c4] ss:$16 sps:$4 sm:$0xff]  }
 0x507   :  { %12572 = vmatprep.subr.bf16.mxu1 %v20689_v56 }
 0x509   :  { %12357 = vmatmul.mubr.bf16.vlgmr.msra.gmra.mrb[216].mxu1 %v12089_v51 }
 0x50a   :  { %12573 = vmatpush1.bf16.msra.mxu1 %v20687_v44  ;;  %12604 = vmatprep.mubr.bf16.mxu1 %v21139_v59 }
 0x50b   :  { %12574 = vmatprep.subr.bf16.mxu1 %v20692_v9 }
 0x50e   :  { %12575 = vmatpush1.bf16.msra.mxu1 %v20690_v57  ;;  %v20759_v57 = vld [vmem:[%s25696_s5 + $0xb48] ss:$16 sps:$4 sm:$0xff]  }
 0x50f   :  { %12576 = vmatprep.subr.bf16.mxu1 %v20695_v38 }
 0x512   :  { %12577 = vmatpush1.bf16.msra.mxu1 %v20693_v21 }
 0x513   :  { %12578 = vmatprep.subr.bf16.mxu1 %v20698_v8  ;;  %v20762_v8 = vld [vmem:[%s25696_s5 + $0x7c0] ss:$16 sps:$4 sm:$0xff]  }
 0x516   :  { %12579 = vmatpush1.bf16.msra.mxu1 %v20696_v60 }
 0x517   :  { %12580 = vmatprep.subr.bf16.mxu1 %v20704_v27  ;;  %v20770_v27 = vld [vmem:[%s25696_s5 + $0x7e4] ss:$16 sps:$4 sm:$0xff]  }
 0x51a   :  { %12581 = vmatpush1.bf16.msra.mxu1 %v20702_v50  ;;  %v20768_v50 = vld [vmem:[%s25696_s5 + $0x7e0] ss:$16 sps:$4 sm:$0xff]  }
 0x51b   :  { %12582 = vmatprep.subr.bf16.mxu1 %v20710_v25  ;;  %v20773_v25 = vld [vmem:[%s25696_s5 + $0xb8c] ss:$16 sps:$4 sm:$0xff]  }
 0x51c   :  { %v11491_v6 = vpop.f32.mrb[192].mxu1 }
 0x51d   :  { %v24771_v47 = vadd.f32 %v11491_v6, %v24636_v11  ;;  %v11493_v48 = vpop.f32.mrb[193].mxu1  ;;  %v20720_v11 = vld [vmem:[%s25696_s5 + $0x6e0] ss:$16 sps:$4 sm:$0xff]  }
 0x51e   :  { %v24774_v30 = vadd.f32 %v11493_v48, %v24639_v23  ;;  %v11495_v2 = vpop.f32.mrb[194].mxu1  ;;  %12583 = vmatpush1.bf16.msra.mxu1 %v20708_v16  ;;  %v20728_v23 = vld [vmem:[%s25696_s5 + $0x704] ss:$16 sps:$4 sm:$0xff]  }
 0x51f   :  { %v11496_v55 = vpop.f32.mrb[195].mxu1  ;;  %12584 = vmatprep.subr.bf16.mxu1 %v20716_v5  ;;  %v20776_v16 = vld [vmem:[%s25696_s5 + $0x804] ss:$16 sps:$4 sm:$0xff]   ;;  %v13814_v2 = vld [vmem:[#allocation3 + $0x6c] sm:$0x3] }
 0x520   :  { %v20771_v55 = vld [vmem:[%s25696_s5 + $0xb88] ss:$16 sps:$4 sm:$0xff]  }
 0x522   :  { %12585 = vmatpush1.bf16.msra.mxu1 %v20714_v41 }
 0x523   :  { %12586 = vmatprep.subr.bf16.mxu1 %v20722_v61  ;;  %v13815_v61 = vld [vmem:[#allocation3 + $0x6e] sm:$0x3] }
 0x524   :  { %v19399_v0 = vpop.f32.mrb[164].mxu0 }
 0x525   :  { %10632 = vst [vmem:[#allocation3 + $0x90] sm:$0xff] %v19399_v0  ;;  %v10593_v4 = vpop.f32.mrb[165].mxu0  ;;  %v20779_v0 = vld [vmem:[%s25696_s5 + $0xbac] ss:$16 sps:$4 sm:$0xff]  }
 0x526   :  { %10630 = vst [vmem:[#allocation3 + $0x80] sm:$0xff] %v10593_v4  ;;  %12587 = vmatpush1.bf16.msra.mxu1 %v20720_v11  ;;  %v19400_v43 = vpop.f32.mrb[166].mxu0 }
 0x527   :  { %10633 = vst [vmem:[#allocation3 + $0x98] sm:$0xff] %v19400_v43  ;;  %v10596_v42 = vpop.f32.mrb[167].mxu0  ;;  %12861 = vmatprep.subr.bf16.mxu1 %v20728_v23  ;;  %v20774_v23 = vld [vmem:[%s25696_s5 + $0x800] ss:$16 sps:$4 sm:$0xff]  }
 0x528   :  { %v13816_v42 = vmax.f32 %v13814_v2, %v13815_v61  ;;  %v20822_v2 = vld [vmem:[%s25696_s5 + $0x900] ss:$16 sps:$4 sm:$0xff]  }
 0x529   :  { %12605 = vmatmul.mubr.bf16.vlgmr.msra.gmra.mrb[220].mxu1 %v24258_v52 }
 0x52a   :  { %12862 = vmatpush1.bf16.msra.mxu1 %v20726_v45  ;;  %12893 = vmatprep.mubr.bf16.mxu1 %v21139_v59  ;;  %v20782_v45 = vld [vmem:[%s25696_s5 + $0x824] ss:$16 sps:$4 sm:$0xff]  }
 0x52b   :  { %12863 = vmatprep.subr.bf16.mxu1 %v20734_v22  ;;  %v20777_v22 = vld [vmem:[%s25696_s5 + $0xba8] ss:$16 sps:$4 sm:$0xff]  }
 0x52c   :  { %v19403_v51 = vpop.f32.mrb[168].mxu0 }
 0x52d   :  { %10636 = vst [vmem:[#allocation3 + $0xb0] sm:$0xff] %v19403_v51  ;;  %v10609_v35 = vpop.f32.mrb[169].mxu0  ;;  %v13528_v12 = vld [vmem:[#allocation3 + $0x80] sm:$0x3]  ;;  %v13529_v14 = vld [vmem:[#allocation3 + $0x82] sm:$0x3] }
 0x52e   :  { %12864 = vmatpush1.bf16.msra.mxu1 %v20732_v37  ;;  %v19404_v52 = vpop.f32.mrb[170].mxu0  ;;  %v13530_v54 = vmax.f32 %v13528_v12, %v13529_v14  ;;  %v13817_v5 = vld [vmem:[#allocation3 + $0x84] sm:$0x3]  ;;  %v13818_v6 = vld [vmem:[#allocation3 + $0x86] sm:$0x3] }
 0x52f   :  { %v10612_v62 = vpop.f32.mrb[171].mxu0  ;;  %12865 = vmatprep.subr.bf16.mxu1 %v20740_v29  ;;  %v13819_v4 = vmax.f32 %v13817_v5, %v13818_v6  ;;  %v20780_v37 = vld [vmem:[%s25696_s5 + $0x820] ss:$16 sps:$4 sm:$0xff]   ;;  %v20785_v29 = vld [vmem:[%s25696_s5 + $0xbcc] ss:$16 sps:$4 sm:$0xff]  }
 0x530   :  { %10635 = vst [vmem:[#allocation3 + $0xa8] sm:$0xff] %v10612_v62  ;;  %v13531_v40 = vmax.f32 %v13527_v13, %v13530_v54  ;;  %v20786_v51 = vld [vmem:[%s25696_s5 + $0x840] ss:$16 sps:$4 sm:$0xff]   ;;  %v20791_v35 = vld [vmem:[%s25696_s5 + $0xbec] ss:$16 sps:$4 sm:$0xff]  }
 0x531   :  { %v13820_v7 = vmax.f32 %v13816_v42, %v13819_v4  ;;  %v20794_v14 = vld [vmem:[%s25696_s5 + $0x864] ss:$16 sps:$4 sm:$0xff]   ;;  %v20789_v52 = vld [vmem:[%s25696_s5 + $0xbe8] ss:$16 sps:$4 sm:$0xff]   ;;  %v14104_v5 = vld [vmem:[#allocation3 + $0x92] sm:$0x3] }
 0x532   :  { %12866 = vmatpush1.bf16.msra.mxu1 %v20738_v63  ;;  %v13532_v19 = vadd.f32 %v24347_v36, %v13531_v40  ;;  %v20792_v63 = vld [vmem:[%s25696_s5 + $0x860] ss:$16 sps:$4 sm:$0xff]   ;;  %v20800_v54 = vld [vmem:[%s25696_s5 + $0x884] ss:$16 sps:$4 sm:$0xff]   ;;  %v20795_v62 = vld [vmem:[%s25696_s5 + $0xc08] ss:$16 sps:$4 sm:$0xff]  }
 0x533   :  { %12867 = vmatprep.subr.bf16.mxu1 %v20746_v10  ;;  %v13821_v12 = vadd.f32 %v24347_v36, %v13820_v7  ;;  %v20797_v36 = vld [vmem:[%s25696_s5 + $0xc0c] ss:$16 sps:$4 sm:$0xff]   ;;  %v20798_v40 = vld [vmem:[%s25696_s5 + $0x880] ss:$16 sps:$4 sm:$0xff]   ;;  %v20825_v4 = vld [vmem:[%s25696_s5 + $0xca8] ss:$16 sps:$4 sm:$0xff]  }
 0x534   :  { %v13533_v46 = vmax.f32 %v13532_v19, 0.0  ;;  %v20806_v19 = vld [vmem:[%s25696_s5 + $0x8a4] ss:$16 sps:$4 sm:$0xff]   ;;  %v25028_v7 = vld [vmem:[%s25695_s4] ss:$0 sm:$0xff] }
 0x535   :  { %v13822_v13 = vmax.f32 %v13821_v12, 0.0 }
 0x536   :  { %12868 = vmatpush1.bf16.msra.mxu1 %v20744_v1  ;;  %v24821_v26 = vpack.c.bf16 %v13533_v46, %v13533_v46  ;;  %v20803_v1 = vld [vmem:[%s25696_s5 + $0xc2c] ss:$16 sps:$4 sm:$0xff]   ;;  %v20804_v46 = vld [vmem:[%s25696_s5 + $0x8a0] ss:$16 sps:$4 sm:$0xff]  }
 0x537   :  { %12869 = vmatprep.subr.bf16.mxu1 %v20752_v24  ;;  %v24931_v10 = vpack.c.bf16 %v13822_v13, %v13822_v13  ;;  %v20801_v24 = vld [vmem:[%s25696_s5 + $0xc28] ss:$16 sps:$4 sm:$0xff]  }
 0x538   :  { %13802 = vmatmul.mubr.bf16.vlgmr.msra.gmra.mrb[188].mxu0 %v24821_v26 }
 0x539   :  { %14059 = vmatpush1.bf16.msra.mxu0 %v20747_v33  ;;  %14090 = vmatprep.mubr.bf16.mxu0 %v21139_v59  ;;  %v20809_v33 = vld [vmem:[%s25696_s5 + $0xc4c] ss:$16 sps:$4 sm:$0xff]  }
 0x53a   :  { %12870 = vmatpush1.bf16.msra.mxu1 %v20750_v17  ;;  %14060 = vmatprep.subr.bf16.mxu0 %v20755_v58  ;;  %v20812_v17 = vld [vmem:[%s25696_s5 + $0x8c4] ss:$16 sps:$4 sm:$0xff]  }
 0x53b   :  { %12871 = vmatprep.subr.bf16.mxu1 %v20758_v20 }
 0x53c   :  { %v11739_v56 = vpop.f32.mrb[196].mxu1 }
 0x53d   :  { %v24844_v44 = vadd.f32 %v11739_v56, %v24716_v32  ;;  %v11741_v9 = vpop.f32.mrb[197].mxu1  ;;  %14061 = vmatpush1.bf16.msra.mxu0 %v20753_v34  ;;  %v20767_v32 = vld [vmem:[%s25696_s5 + $0xb6c] ss:$16 sps:$4 sm:$0xff]   ;;  %v20810_v56 = vld [vmem:[%s25696_s5 + $0x8c0] ss:$16 sps:$4 sm:$0xff]  }
 0x53e   :  { %v24850_v38 = vadd.f32 %v11741_v9, %v24719_v3  ;;  %v11743_v21 = vpop.f32.mrb[198].mxu1  ;;  %12872 = vmatpush1.bf16.msra.mxu1 %v20756_v53  ;;  %14062 = vmatprep.subr.bf16.mxu0 %v20761_v39  ;;  %v20765_v3 = vld [vmem:[%s25696_s5 + $0xb68] ss:$16 sps:$4 sm:$0xff]  }
 0x53f   :  { %v11744_v60 = vpop.f32.mrb[199].mxu1  ;;  %12873 = vmatprep.subr.bf16.mxu1 %v20764_v28  ;;  %v20807_v53 = vld [vmem:[%s25696_s5 + $0xc48] ss:$16 sps:$4 sm:$0xff]   ;;  %v20816_v21 = vld [vmem:[%s25696_s5 + $0x8e0] ss:$16 sps:$4 sm:$0xff]  }
 0x540   :  { %v14106_v60 = vld [vmem:[#allocation3 + $0xa8] sm:$0x3] }
 0x541   :  { %14063 = vmatpush1.bf16.msra.mxu0 %v20759_v57  ;;  %v20818_v57 = vld [vmem:[%s25696_s5 + $0x8e4] ss:$16 sps:$4 sm:$0xff]  }
 0x542   :  { %12874 = vmatpush1.bf16.msra.mxu1 %v20762_v8  ;;  %14064 = vmatprep.subr.bf16.mxu0 %v20767_v32  ;;  %v20821_v8 = vld [vmem:[%s25696_s5 + $0xc8c] ss:$16 sps:$4 sm:$0xff]   ;;  %v20824_v32 = vld [vmem:[%s25696_s5 + $0x904] ss:$16 sps:$4 sm:$0xff]  }
 0x543   :  { %12875 = vmatprep.subr.bf16.mxu1 %v20770_v27  ;;  %v14107_v27 = vld [vmem:[#allocation3 + $0xaa] sm:$0x3] }
 0x544   :  { %v24873_v48 = vpop.f32.mrb[172].mxu0  ;;  %v14108_v61 = vmax.f32 %v14106_v60, %v14107_v27  ;;  %v20867_v60 = vld [vmem:[%s25696_s5 + $0xd88] ss:$16 sps:$4 sm:$0xff]  }
 0x545   :  { %v24875_v41 = vpop.f32.mrb[173].mxu0  ;;  %14065 = vmatpush1.bf16.msra.mxu0 %v20765_v3 }
 0x546   :  { %v12651_v11 = vpop.f32.mrb[174].mxu0  ;;  %12876 = vmatpush1.bf16.msra.mxu1 %v20768_v50  ;;  %14066 = vmatprep.subr.bf16.mxu0 %v20773_v25  ;;  %v20819_v50 = vld [vmem:[%s25696_s5 + $0xc88] ss:$16 sps:$4 sm:$0xff]  }
 0x547   :  { %v12652_v43 = vpop.f32.mrb[175].mxu0  ;;  %13150 = vmatprep.subr.bf16.mxu1 %v20776_v16  ;;  %v14103_v16 = vld [vmem:[#allocation3 + $0x90] sm:$0x3] }
 0x548   :  { %v20828_v43 = vld [vmem:[%s25696_s5 + $0x920] ss:$16 sps:$4 sm:$0xff]  }
 0x549   :  { %12894 = vmatmul.mubr.bf16.vlgmr.msra.gmra.mrb[224].mxu1 %v24370_v18  ;;  %14067 = vmatpush1.bf16.msra.mxu0 %v20771_v55  ;;  %v20788_v18 = vld [vmem:[%s25696_s5 + $0x844] ss:$16 sps:$4 sm:$0xff]   ;;  %v20827_v55 = vld [vmem:[%s25696_s5 + $0xcac] ss:$16 sps:$4 sm:$0xff]  }
 0x54a   :  { %13151 = vmatpush1.bf16.msra.mxu1 %v20774_v23  ;;  %14068 = vmatprep.subr.bf16.mxu0 %v20779_v0  ;;  %v20830_v23 = vld [vmem:[%s25696_s5 + $0x924] ss:$16 sps:$4 sm:$0xff]   ;;  %v14105_v0 = vmax.f32 %v14103_v16, %v14104_v5 }
 0x54b   :  { %13152 = vmatprep.subr.bf16.mxu1 %v20782_v45  ;;  %13182 = vmatprep.mubr.bf16.mxu1 %v21139_v59  ;;  %v20833_v45 = vld [vmem:[%s25696_s5 + $0xccc] ss:$16 sps:$4 sm:$0xff]   ;;  %v14393_v16 = vld [vmem:[#allocation3 + $0x96] sm:$0x3] }
 0x54c   :  { %v14109_v42 = vmax.f32 %v14105_v0, %v14108_v61  ;;  %v20873_v0 = vld [vmem:[%s25696_s5 + $0xda8] ss:$16 sps:$4 sm:$0xff]  }
 0x54d   :  { %14069 = vmatpush1.bf16.msra.mxu0 %v20777_v22  ;;  %v20831_v22 = vld [vmem:[%s25696_s5 + $0xcc8] ss:$16 sps:$4 sm:$0xff]  }
 0x54e   :  { %13153 = vmatpush1.bf16.msra.mxu1 %v20780_v37  ;;  %14070 = vmatprep.subr.bf16.mxu0 %v20785_v29  ;;  %v20834_v37 = vld [vmem:[%s25696_s5 + $0x940] ss:$16 sps:$4 sm:$0xff]   ;;  %v20839_v29 = vld [vmem:[%s25696_s5 + $0xcec] ss:$16 sps:$4 sm:$0xff]  }
 0x54f   :  { %13154 = vmatprep.subr.bf16.mxu1 %v20788_v18  ;;  %v14110_v18 = vadd.f32 %v25028_v7, %v14109_v42  ;;  %v20879_v42 = vld [vmem:[%s25696_s5 + $0xdc8] ss:$16 sps:$4 sm:$0xff]  }
 0x551   :  { %14071 = vmatpush1.bf16.msra.mxu0 %v20783_v15  ;;  %v20842_v15 = vld [vmem:[%s25696_s5 + $0x964] ss:$16 sps:$4 sm:$0xff]   ;;  %v14111_v12 = vmax.f32 %v14110_v18, 0.0  ;;  %v20885_v18 = vld [vmem:[%s25696_s5 + $0xde8] ss:$16 sps:$4 sm:$0xff]  }
 0x552   :  { %13155 = vmatpush1.bf16.msra.mxu1 %v20786_v51  ;;  %14072 = vmatprep.subr.bf16.mxu0 %v20791_v35  ;;  %v20837_v51 = vld [vmem:[%s25696_s5 + $0xce8] ss:$16 sps:$4 sm:$0xff]   ;;  %v20840_v35 = vld [vmem:[%s25696_s5 + $0x960] ss:$16 sps:$4 sm:$0xff]  }
 0x553   :  { %13156 = vmatprep.subr.bf16.mxu1 %v20794_v14  ;;  %v20845_v14 = vld [vmem:[%s25696_s5 + $0xd0c] ss:$16 sps:$4 sm:$0xff]   ;;  %v25049_v13 = vpack.c.bf16 %v14111_v12, %v14111_v12  ;;  %v20896_v12 = vld [vmem:[%s25696_s5 + $0xa84] ss:$16 sps:$4 sm:$0xff]  }
 0x555   :  { %14073 = vmatpush1.bf16.msra.mxu0 %v20789_v52  ;;  %v20848_v52 = vld [vmem:[%s25696_s5 + $0x984] ss:$16 sps:$4 sm:$0xff]  }
 0x556   :  { %13157 = vmatpush1.bf16.msra.mxu1 %v20792_v63  ;;  %14347 = vmatprep.subr.bf16.mxu0 %v20797_v36  ;;  %v20843_v63 = vld [vmem:[%s25696_s5 + $0xd08] ss:$16 sps:$4 sm:$0xff]   ;;  %v20846_v36 = vld [vmem:[%s25696_s5 + $0x980] ss:$16 sps:$4 sm:$0xff]  }
 0x557   :  { %13158 = vmatprep.subr.bf16.mxu1 %v20800_v54  ;;  %v20851_v54 = vld [vmem:[%s25696_s5 + $0xd2c] ss:$16 sps:$4 sm:$0xff]  }
 0x558   :  { %14091 = vmatmul.mubr.bf16.vlgmr.msra.gmra.mrb[192].mxu0 %v24931_v10 }
 0x559   :  { %14348 = vmatpush1.bf16.msra.mxu0 %v20795_v62  ;;  %14379 = vmatprep.mubr.bf16.mxu0 %v21139_v59  ;;  %v20854_v62 = vld [vmem:[%s25696_s5 + $0x9a4] ss:$16 sps:$4 sm:$0xff]  }
 0x55a   :  { %13159 = vmatpush1.bf16.msra.mxu1 %v20798_v40  ;;  %14349 = vmatprep.subr.bf16.mxu0 %v20803_v1  ;;  %v20849_v40 = vld [vmem:[%s25696_s5 + $0xd28] ss:$16 sps:$4 sm:$0xff]   ;;  %v20852_v1 = vld [vmem:[%s25696_s5 + $0x9a0] ss:$16 sps:$4 sm:$0xff]  }
 0x55b   :  { %13160 = vmatprep.subr.bf16.mxu1 %v20806_v19  ;;  %v20857_v19 = vld [vmem:[%s25696_s5 + $0xd4c] ss:$16 sps:$4 sm:$0xff]  }
 0x55c   :  { %v11780_v58 = vpop.f32.mrb[200].mxu1 }
 0x55d   :  { %v24957_v20 = vadd.f32 %v11780_v58, %v24771_v47  ;;  %v11782_v34 = vpop.f32.mrb[201].mxu1  ;;  %14350 = vmatpush1.bf16.msra.mxu0 %v20801_v24  ;;  %v20815_v47 = vld [vmem:[%s25696_s5 + $0xc6c] ss:$16 sps:$4 sm:$0xff]   ;;  %v20860_v24 = vld [vmem:[%s25696_s5 + $0x9c4] ss:$16 sps:$4 sm:$0xff]  }
 0x55e   :  { %v24963_v39 = vadd.f32 %v11782_v34, %v24774_v30  ;;  %v11784_v28 = vpop.f32.mrb[202].mxu1  ;;  %13161 = vmatpush1.bf16.msra.mxu1 %v20804_v46  ;;  %14351 = vmatprep.subr.bf16.mxu0 %v20809_v33  ;;  %v20813_v30 = vld [vmem:[%s25696_s5 + $0xc68] ss:$16 sps:$4 sm:$0xff]  }
 0x55f   :  { %v11785_v9 = vpop.f32.mrb[203].mxu1  ;;  %13162 = vmatprep.subr.bf16.mxu1 %v20812_v17  ;;  %v20855_v58 = vld [vmem:[%s25696_s5 + $0xd48] ss:$16 sps:$4 sm:$0xff]   ;;  %v20858_v28 = vld [vmem:[%s25696_s5 + $0x9c0] ss:$16 sps:$4 sm:$0xff]  }
 0x560   :  { %v20864_v9 = vld [vmem:[%s25696_s5 + $0x9e0] ss:$16 sps:$4 sm:$0xff]  }
 0x561   :  { %14352 = vmatpush1.bf16.msra.mxu0 %v20807_v53 }
 0x562   :  { %13163 = vmatpush1.bf16.msra.mxu1 %v20810_v56  ;;  %14353 = vmatprep.subr.bf16.mxu0 %v20815_v47  ;;  %v20866_v47 = vld [vmem:[%s25696_s5 + $0x9e4] ss:$16 sps:$4 sm:$0xff]  }
 0x563   :  { %13164 = vmatprep.subr.bf16.mxu1 %v20818_v57  ;;  %v20869_v57 = vld [vmem:[%s25696_s5 + $0xd8c] ss:$16 sps:$4 sm:$0xff]  }
 0x564   :  { %v24986_v3 = vpop.f32.mrb[176].mxu0 }
 0x565   :  { %v24991_v25 = vpop.f32.mrb[177].mxu0  ;;  %14354 = vmatpush1.bf16.msra.mxu0 %v20813_v30  ;;  %v20872_v30 = vld [vmem:[%s25696_s5 + $0xa04] ss:$16 sps:$4 sm:$0xff]  }
 0x566   :  { %v12940_v6 = vpop.f32.mrb[178].mxu0  ;;  %13165 = vmatpush1.bf16.msra.mxu1 %v20816_v21  ;;  %14355 = vmatprep.subr.bf16.mxu0 %v20821_v8  ;;  %v14395_v21 = vld [vmem:[#allocation3 + $0xac] sm:$0x3]  ;;  %v14396_v8 = vld [vmem:[#allocation3 + $0xae] sm:$0x3] }
 0x567   :  { %v12941_v11 = vpop.f32.mrb[179].mxu0  ;;  %13439 = vmatprep.subr.bf16.mxu1 %v20824_v32  ;;  %v20870_v6 = vld [vmem:[%s25696_s5 + $0xa00] ss:$16 sps:$4 sm:$0xff]  }
 0x568   :  { %v20878_v11 = vld [vmem:[%s25696_s5 + $0xa24] ss:$16 sps:$4 sm:$0xff]  }
 0x569   :  { %13183 = vmatmul.mubr.bf16.vlgmr.msra.gmra.mrb[228].mxu1 %v24480_v49  ;;  %14356 = vmatpush1.bf16.msra.mxu0 %v20819_v50  ;;  %v20836_v49 = vld [vmem:[%s25696_s5 + $0x944] ss:$16 sps:$4 sm:$0xff]  }
 0x56a   :  { %13440 = vmatpush1.bf16.msra.mxu1 %v20822_v2  ;;  %14357 = vmatprep.subr.bf16.mxu0 %v20827_v55  ;;  %v14392_v50 = vld [vmem:[#allocation3 + $0x94] sm:$0x3]  ;;  %v20875_v2 = vld [vmem:[%s25696_s5 + $0xdac] ss:$16 sps:$4 sm:$0xff]   ;;  %v14397_v55 = vmax.f32 %v14395_v21, %v14396_v8  ;;  %v14685_v21 = vld [vmem:[#allocation3 + $0xb2] sm:$0x3] }
 0x56b   :  { %13441 = vmatprep.subr.bf16.mxu1 %v20830_v23  ;;  %13471 = vmatprep.mubr.bf16.mxu1 %v21139_v59  ;;  %v14394_v23 = vmax.f32 %v14392_v50, %v14393_v16  ;;  %v14681_v16 = vld [vmem:[#allocation3 + $0x98] sm:$0x3] }
 0x56d   :  { %14358 = vmatpush1.bf16.msra.mxu0 %v20825_v4  ;;  %v20876_v4 = vld [vmem:[%s25696_s5 + $0xa20] ss:$16 sps:$4 sm:$0xff]  }
 0x56e   :  { %13442 = vmatpush1.bf16.msra.mxu1 %v20828_v43  ;;  %14359 = vmatprep.subr.bf16.mxu0 %v20833_v45  ;;  %v20881_v43 = vld [vmem:[%s25696_s5 + $0xdcc] ss:$16 sps:$4 sm:$0xff]   ;;  %v14398_v45 = vmax.f32 %v14394_v23, %v14397_v55  ;;  %v20926_v23 = vld [vmem:[%s25696_s5 + $0xb24] ss:$16 sps:$4 sm:$0xff]  }
 0x56f   :  { %13443 = vmatprep.subr.bf16.mxu1 %v20836_v49  ;;  %v20882_v49 = vld [vmem:[%s25696_s5 + $0xa40] ss:$16 sps:$4 sm:$0xff]   ;;  %v20923_v55 = vld [vmem:[%s25696_s5 + $0xeac] ss:$16 sps:$4 sm:$0xff]  }
 0x571   :  { %14360 = vmatpush1.bf16.msra.mxu0 %v20831_v22  ;;  %v20887_v22 = vld [vmem:[%s25696_s5 + $0xdec] ss:$16 sps:$4 sm:$0xff]  }
 0x572   :  { %13444 = vmatpush1.bf16.msra.mxu1 %v20834_v37  ;;  %14361 = vmatprep.subr.bf16.mxu0 %v20839_v29  ;;  %v14399_v37 = vadd.f32 %v25028_v7, %v14398_v45  ;;  %v20890_v29 = vld [vmem:[%s25696_s5 + $0xa64] ss:$16 sps:$4 sm:$0xff]   ;;  %v20929_v45 = vld [vmem:[%s25696_s5 + $0xecc] ss:$16 sps:$4 sm:$0xff]  }
 0x573   :  { %13445 = vmatprep.subr.bf16.mxu1 %v20842_v15  ;;  %v20888_v15 = vld [vmem:[%s25696_s5 + $0xa60] ss:$16 sps:$4 sm:$0xff]  }
 0x575   :  { %14362 = vmatpush1.bf16.msra.mxu0 %v20837_v51  ;;  %v14400_v51 = vmax.f32 %v14399_v37, 0.0 }
 0x576   :  { %13446 = vmatpush1.bf16.msra.mxu1 %v20840_v35  ;;  %14636 = vmatprep.subr.bf16.mxu0 %v20845_v14  ;;  %v20893_v35 = vld [vmem:[%s25696_s5 + $0xe0c] ss:$16 sps:$4 sm:$0xff]   ;;  %v20891_v14 = vld [vmem:[%s25696_s5 + $0xe08] ss:$16 sps:$4 sm:$0xff]  }
 0x577   :  { %13447 = vmatprep.subr.bf16.mxu1 %v20848_v52  ;;  %v25162_v52 = vpack.c.bf16 %v14400_v51, %v14400_v51 }
 0x578   :  { %14380 = vmatmul.mubr.bf16.vlgmr.msra.gmra.mrb[196].mxu0 %v25049_v13 }
 0x579   :  { %14637 = vmatpush1.bf16.msra.mxu0 %v20843_v63  ;;  %14668 = vmatprep.mubr.bf16.mxu0 %v21139_v59  ;;  %v20894_v63 = vld [vmem:[%s25696_s5 + $0xa80] ss:$16 sps:$4 sm:$0xff]  }
 0x57a   :  { %13448 = vmatpush1.bf16.msra.mxu1 %v20846_v36  ;;  %14638 = vmatprep.subr.bf16.mxu0 %v20851_v54  ;;  %v20899_v36 = vld [vmem:[%s25696_s5 + $0xe2c] ss:$16 sps:$4 sm:$0xff]   ;;  %v20902_v54 = vld [vmem:[%s25696_s5 + $0xaa4] ss:$16 sps:$4 sm:$0xff]  }
 0x57b   :  { %13449 = vmatprep.subr.bf16.mxu1 %v20854_v62  ;;  %v20897_v62 = vld [vmem:[%s25696_s5 + $0xe28] ss:$16 sps:$4 sm:$0xff]  }
 0x57c   :  { %v12028_v46 = vpop.f32.mrb[204].mxu1 }
 0x57d   :  { %v25075_v33 = vadd.f32 %v12028_v46, %v24844_v44  ;;  %v12030_v17 = vpop.f32.mrb[205].mxu1  ;;  %14639 = vmatpush1.bf16.msra.mxu0 %v20849_v40  ;;  %v20863_v44 = vld [vmem:[%s25696_s5 + $0xd6c] ss:$16 sps:$4 sm:$0xff]   ;;  %v20900_v40 = vld [vmem:[%s25696_s5 + $0xaa0] ss:$16 sps:$4 sm:$0xff]  }
 0x57e   :  { %v25081_v34 = vadd.f32 %v12030_v17, %v24850_v38  ;;  %v12032_v53 = vpop.f32.mrb[206].mxu1  ;;  %13450 = vmatpush1.bf16.msra.mxu1 %v20852_v1  ;;  %14640 = vmatprep.subr.bf16.mxu0 %v20857_v19  ;;  %v20861_v38 = vld [vmem:[%s25696_s5 + $0xd68] ss:$16 sps:$4 sm:$0xff]   ;;  %v20905_v1 = vld [vmem:[%s25696_s5 + $0xe4c] ss:$16 sps:$4 sm:$0xff]  }
 0x57f   :  { %v12033_v56 = vpop.f32.mrb[207].mxu1  ;;  %13451 = vmatprep.subr.bf16.mxu1 %v20860_v24  ;;  %v20908_v19 = vld [vmem:[%s25696_s5 + $0xac4] ss:$16 sps:$4 sm:$0xff]  }
 0x581   :  { %14641 = vmatpush1.bf16.msra.mxu0 %v20855_v58  ;;  %v20903_v58 = vld [vmem:[%s25696_s5 + $0xe48] ss:$16 sps:$4 sm:$0xff]  }
 0x582   :  { %13452 = vmatpush1.bf16.msra.mxu1 %v20858_v28  ;;  %14642 = vmatprep.subr.bf16.mxu0 %v20863_v44  ;;  %v20906_v44 = vld [vmem:[%s25696_s5 + $0xac0] ss:$16 sps:$4 sm:$0xff]  }
 0x583   :  { %13453 = vmatprep.subr.bf16.mxu1 %v20866_v47  ;;  %v20914_v47 = vld [vmem:[%s25696_s5 + $0xae4] ss:$16 sps:$4 sm:$0xff]  }
 0x584   :  { %v25104_v32 = vpop.f32.mrb[180].mxu0 }
 0x585   :  { %v25109_v27 = vpop.f32.mrb[181].mxu0  ;;  %14643 = vmatpush1.bf16.msra.mxu0 %v20861_v38  ;;  %v20912_v38 = vld [vmem:[%s25696_s5 + $0xae0] ss:$16 sps:$4 sm:$0xff]  }
 0x586   :  { %v13229_v5 = vpop.f32.mrb[182].mxu0  ;;  %13454 = vmatpush1.bf16.msra.mxu1 %v20864_v9  ;;  %14644 = vmatprep.subr.bf16.mxu0 %v20869_v57  ;;  %v20917_v9 = vld [vmem:[%s25696_s5 + $0xe8c] ss:$16 sps:$4 sm:$0xff]   ;;  %v20920_v57 = vld [vmem:[%s25696_s5 + $0xb04] ss:$16 sps:$4 sm:$0xff]  }
 0x587   :  { %v13230_v61 = vpop.f32.mrb[183].mxu0  ;;  %13728 = vmatprep.subr.bf16.mxu1 %v20872_v30  ;;  %v14684_v30 = vld [vmem:[#allocation3 + $0xb0] sm:$0x3]  ;;  %v14682_v5 = vld [vmem:[#allocation3 + $0x9a] sm:$0x3] }
 0x588   :  { %v14686_v61 = vmax.f32 %v14684_v30, %v14685_v21  ;;  %v20968_v30 = vld [vmem:[%s25696_s5 + $0xc04] ss:$16 sps:$4 sm:$0xff]  }
 0x589   :  { %13472 = vmatmul.mubr.bf16.vlgmr.msra.gmra.mrb[232].mxu1 %v24589_v31  ;;  %14645 = vmatpush1.bf16.msra.mxu0 %v20867_v60  ;;  %v20884_v31 = vld [vmem:[%s25696_s5 + $0xa44] ss:$16 sps:$4 sm:$0xff]   ;;  %v20915_v60 = vld [vmem:[%s25696_s5 + $0xe88] ss:$16 sps:$4 sm:$0xff]  }
 0x58a   :  { %13729 = vmatpush1.bf16.msra.mxu1 %v20870_v6  ;;  %14646 = vmatprep.subr.bf16.mxu0 %v20875_v2  ;;  %v20918_v2 = vld [vmem:[%s25696_s5 + $0xb00] ss:$16 sps:$4 sm:$0xff]   ;;  %v14973_v21 = vld [vmem:[#allocation3 + $0xb4] sm:$0x3] }
 0x58b   :  { %13730 = vmatprep.subr.bf16.mxu1 %v20878_v11  ;;  %13760 = vmatprep.mubr.bf16.mxu1 %v21139_v59 }
 0x58d   :  { %14647 = vmatpush1.bf16.msra.mxu0 %v20873_v0  ;;  %v14683_v0 = vmax.f32 %v14681_v16, %v14682_v5  ;;  %v20963_v16 = vld [vmem:[%s25696_s5 + $0xf88] ss:$16 sps:$4 sm:$0xff]   ;;  %v14970_v5 = vld [vmem:[#allocation3 + $0x9c] sm:$0x3] }
 0x58e   :  { %13731 = vmatpush1.bf16.msra.mxu1 %v20876_v4  ;;  %14648 = vmatprep.subr.bf16.mxu0 %v20881_v43  ;;  %v20921_v4 = vld [vmem:[%s25696_s5 + $0xea8] ss:$16 sps:$4 sm:$0xff]   ;;  %v20924_v43 = vld [vmem:[%s25696_s5 + $0xb20] ss:$16 sps:$4 sm:$0xff]  }
 0x58f   :  { %13732 = vmatprep.subr.bf16.mxu1 %v20884_v31  ;;  %v14687_v31 = vmax.f32 %v14683_v0, %v14686_v61  ;;  %v20969_v0 = vld [vmem:[%s25696_s5 + $0xfa8] ss:$16 sps:$4 sm:$0xff]  }
 0x591   :  { %14649 = vmatpush1.bf16.msra.mxu0 %v20879_v42  ;;  %v20927_v42 = vld [vmem:[%s25696_s5 + $0xec8] ss:$16 sps:$4 sm:$0xff]   ;;  %v14688_v37 = vadd.f32 %v25028_v7, %v14687_v31 }
 0x592   :  { %13733 = vmatpush1.bf16.msra.mxu1 %v20882_v49  ;;  %14650 = vmatprep.subr.bf16.mxu0 %v20887_v22  ;;  %v20930_v49 = vld [vmem:[%s25696_s5 + $0xb40] ss:$16 sps:$4 sm:$0xff]   ;;  %v20935_v22 = vld [vmem:[%s25696_s5 + $0xeec] ss:$16 sps:$4 sm:$0xff]   ;;  %v20975_v31 = vld [vmem:[%s25696_s5 + $0xfc8] ss:$16 sps:$4 sm:$0xff]  }
 0x593   :  { %13734 = vmatprep.subr.bf16.mxu1 %v20890_v29  ;;  %v20938_v29 = vld [vmem:[%s25696_s5 + $0xb64] ss:$16 sps:$4 sm:$0xff]   ;;  %v14689_v51 = vmax.f32 %v14688_v37, 0.0  ;;  %v20981_v37 = vld [vmem:[%s25696_s5 + $0xfe8] ss:$16 sps:$4 sm:$0xff]  }
 0x595   :  { %14651 = vmatpush1.bf16.msra.mxu0 %v20885_v18  ;;  %v20933_v18 = vld [vmem:[%s25696_s5 + $0xee8] ss:$16 sps:$4 sm:$0xff]  }
 0x596   :  { %13735 = vmatpush1.bf16.msra.mxu1 %v20888_v15  ;;  %14925 = vmatprep.subr.bf16.mxu0 %v20893_v35  ;;  %v20936_v15 = vld [vmem:[%s25696_s5 + $0xb60] ss:$16 sps:$4 sm:$0xff]   ;;  %v20941_v35 = vld [vmem:[%s25696_s5 + $0xf0c] ss:$16 sps:$4 sm:$0xff]  }
 0x597   :  { %13736 = vmatprep.subr.bf16.mxu1 %v20896_v12  ;;  %v20944_v12 = vld [vmem:[%s25696_s5 + $0xb84] ss:$16 sps:$4 sm:$0xff]  }
 0x598   :  { %14669 = vmatmul.mubr.bf16.vlgmr.msra.gmra.mrb[200].mxu0 %v25162_v52 }
 0x599   :  { %14926 = vmatpush1.bf16.msra.mxu0 %v20891_v14  ;;  %14957 = vmatprep.mubr.bf16.mxu0 %v21139_v59  ;;  %v20939_v14 = vld [vmem:[%s25696_s5 + $0xf08] ss:$16 sps:$4 sm:$0xff]  }
 0x59a   :  { %13737 = vmatpush1.bf16.msra.mxu1 %v20894_v63  ;;  %14927 = vmatprep.subr.bf16.mxu0 %v20899_v36  ;;  %v25275_v63 = vpack.c.bf16 %v14689_v51, %v14689_v51  ;;  %v20942_v36 = vld [vmem:[%s25696_s5 + $0xb80] ss:$16 sps:$4 sm:$0xff]  }
 0x59b   :  { %13738 = vmatprep.subr.bf16.mxu1 %v20902_v54  ;;  %v20947_v54 = vld [vmem:[%s25696_s5 + $0xf2c] ss:$16 sps:$4 sm:$0xff]   ;;  %v20987_v51 = vld [vmem:[%s25696_s5 + $0xc80] ss:$16 sps:$4 sm:$0xff]  }
 0x59c   :  { %v12069_v24 = vpop.f32.mrb[208].mxu1 }
 0x59d   :  { %v25188_v46 = vadd.f32 %v12069_v24, %v24957_v20  ;;  %v12071_v17 = vpop.f32.mrb[209].mxu1  ;;  %14928 = vmatpush1.bf16.msra.mxu0 %v20897_v62  ;;  %v20911_v20 = vld [vmem:[%s25696_s5 + $0xe6c] ss:$16 sps:$4 sm:$0xff]   ;;  %v20950_v62 = vld [vmem:[%s25696_s5 + $0xba4] ss:$16 sps:$4 sm:$0xff]  }
 0x59e   :  { %v25194_v53 = vadd.f32 %v12071_v17, %v24963_v39  ;;  %v12073_v28 = vpop.f32.mrb[210].mxu1  ;;  %13739 = vmatpush1.bf16.msra.mxu1 %v20900_v40  ;;  %14929 = vmatprep.subr.bf16.mxu0 %v20905_v1  ;;  %v20909_v39 = vld [vmem:[%s25696_s5 + $0xe68] ss:$16 sps:$4 sm:$0xff]   ;;  %v20948_v1 = vld [vmem:[%s25696_s5 + $0xba0] ss:$16 sps:$4 sm:$0xff]  }
 0x59f   :  { %v12074_v56 = vpop.f32.mrb[211].mxu1  ;;  %13740 = vmatprep.subr.bf16.mxu1 %v20908_v19  ;;  %v20945_v40 = vld [vmem:[%s25696_s5 + $0xf28] ss:$16 sps:$4 sm:$0xff]   ;;  %v20953_v19 = vld [vmem:[%s25696_s5 + $0xf4c] ss:$16 sps:$4 sm:$0xff]  }
 0x5a0   :  { %v20956_v24 = vld [vmem:[%s25696_s5 + $0xbc4] ss:$16 sps:$4 sm:$0xff]  }
 0x5a1   :  { %14930 = vmatpush1.bf16.msra.mxu0 %v20903_v58 }
 0x5a2   :  { %13741 = vmatpush1.bf16.msra.mxu1 %v20906_v44  ;;  %14931 = vmatprep.subr.bf16.mxu0 %v20911_v20  ;;  %v20951_v44 = vld [vmem:[%s25696_s5 + $0xf48] ss:$16 sps:$4 sm:$0xff]  }
 0x5a3   :  { %13742 = vmatprep.subr.bf16.mxu1 %v20914_v47  ;;  %v20954_v47 = vld [vmem:[%s25696_s5 + $0xbc0] ss:$16 sps:$4 sm:$0xff]  }
 0x5a4   :  { %v25217_v8 = vpop.f32.mrb[184].mxu0 }
 0x5a5   :  { %v25222_v50 = vpop.f32.mrb[185].mxu0  ;;  %14932 = vmatpush1.bf16.msra.mxu0 %v20909_v39 }
 0x5a6   :  { %v13518_v6 = vpop.f32.mrb[186].mxu0  ;;  %13743 = vmatpush1.bf16.msra.mxu1 %v20912_v38  ;;  %14933 = vmatprep.subr.bf16.mxu0 %v20917_v9  ;;  %v20962_v38 = vld [vmem:[%s25696_s5 + $0xbe4] ss:$16 sps:$4 sm:$0xff]   ;;  %v20960_v9 = vld [vmem:[%s25696_s5 + $0xbe0] ss:$16 sps:$4 sm:$0xff]  }
 0x5a7   :  { %v13519_v11 = vpop.f32.mrb[187].mxu0  ;;  %14017 = vmatprep.subr.bf16.mxu1 %v20920_v57  ;;  %v20965_v57 = vld [vmem:[%s25696_s5 + $0xf8c] ss:$16 sps:$4 sm:$0xff]  }
 0x5a8   :  { %v14971_v6 = vld [vmem:[#allocation3 + $0x9e] sm:$0x3]  ;;  %v20974_v11 = vld [vmem:[%s25696_s5 + $0xc24] ss:$16 sps:$4 sm:$0xff]  }
 0x5a9   :  { %13761 = vmatmul.mubr.bf16.vlgmr.msra.gmra.mrb[236].mxu1 %v24821_v26  ;;  %14934 = vmatpush1.bf16.msra.mxu0 %v20915_v60  ;;  %v20932_v26 = vld [vmem:[%s25696_s5 + $0xb44] ss:$16 sps:$4 sm:$0xff]  }
 0x5aa   :  { %14018 = vmatpush1.bf16.msra.mxu1 %v20918_v2  ;;  %14935 = vmatprep.subr.bf16.mxu0 %v20923_v55  ;;  %v14974_v60 = vld [vmem:[#allocation3 + $0xb6] sm:$0x3]  ;;  %v20966_v2 = vld [vmem:[%s25696_s5 + $0xc00] ss:$16 sps:$4 sm:$0xff]   ;;  %v20971_v55 = vld [vmem:[%s25696_s5 + $0xfac] ss:$16 sps:$4 sm:$0xff]  }
 0x5ab   :  { %14019 = vmatprep.subr.bf16.mxu1 %v20926_v23  ;;  %14049 = vmatprep.mubr.bf16.mxu1 %v21139_v59  ;;  %v14975_v61 = vmax.f32 %v14973_v21, %v14974_v60  ;;  %v14972_v23 = vmax.f32 %v14970_v5, %v14971_v6 }
 0x5ad   :  { %14936 = vmatpush1.bf16.msra.mxu0 %v20921_v4  ;;  %v20972_v4 = vld [vmem:[%s25696_s5 + $0xc20] ss:$16 sps:$4 sm:$0xff]  }
 0x5ae   :  { %14020 = vmatpush1.bf16.msra.mxu1 %v20924_v43  ;;  %14937 = vmatprep.subr.bf16.mxu0 %v20929_v45  ;;  %v20977_v43 = vld [vmem:[%s25696_s5 + $0xfcc] ss:$16 sps:$4 sm:$0xff]   ;;  %v14976_v45 = vmax.f32 %v14972_v23, %v14975_v61  ;;  %v21022_v61 = vld [vmem:[%s25696_s5 + $0xde4] ss:$16 sps:$4 sm:$0xff]  }
 0x5af   :  { %14021 = vmatprep.subr.bf16.mxu1 %v20932_v26  ;;  %v20978_v26 = vld [vmem:[%s25696_s5 + $0xc40] ss:$16 sps:$4 sm:$0xff]   ;;  %v21028_v23 = vld [vmem:[%s25696_s5 + $0xe24] ss:$16 sps:$4 sm:$0xff]  }
 0x5b1   :  { %14938 = vmatpush1.bf16.msra.mxu0 %v20927_v42  ;;  %v20983_v42 = vld [vmem:[%s25696_s5 + $0xfec] ss:$16 sps:$4 sm:$0xff]  }
 0x5b2   :  { %14022 = vmatpush1.bf16.msra.mxu1 %v20930_v49  ;;  %14939 = vmatprep.subr.bf16.mxu0 %v20935_v22  ;;  %v14977_v49 = vadd.f32 %v25028_v7, %v14976_v45  ;;  %v20986_v22 = vld [vmem:[%s25696_s5 + $0xc64] ss:$16 sps:$4 sm:$0xff]  }
 0x5b3   :  { %14023 = vmatprep.subr.bf16.mxu1 %v20938_v29  ;;  %v20984_v29 = vld [vmem:[%s25696_s5 + $0xc60] ss:$16 sps:$4 sm:$0xff]   ;;  %v20989_v7 = vld [vmem:[%s25696_s5 + $0xc84] ss:$16 sps:$4 sm:$0xff]  }
 0x5b5   :  { %14940 = vmatpush1.bf16.msra.mxu0 %v20933_v18  ;;  %v14978_v18 = vmax.f32 %v14977_v49, 0.0  ;;  %v21071_v49 = vld [vmem:[%s25698_s7 + $0xc0] sm:$0xff]  }
 0x5b6   :  { %14024 = vmatpush1.bf16.msra.mxu1 %v20936_v15  ;;  %15214 = vmatprep.subr.bf16.mxu0 %v20941_v35  ;;  %v20992_v35 = vld [vmem:[%s25696_s5 + $0xca4] ss:$16 sps:$4 sm:$0xff]  }
 0x5b7   :  { %14025 = vmatprep.subr.bf16.mxu1 %v20944_v12  ;;  %v25378_v15 = vpack.c.bf16 %v14978_v18, %v14978_v18  ;;  %v20990_v12 = vld [vmem:[%s25696_s5 + $0xca0] ss:$16 sps:$4 sm:$0xff]   ;;  %v21074_v18 = vld [vmem:[%s25698_s7 + $0x88] sm:$0xff]  }
 0x5b8   :  { %14958 = vmatmul.mubr.bf16.vlgmr.msra.gmra.mrb[204].mxu0 %v25275_v63 }
 0x5b9   :  { %15215 = vmatpush1.bf16.msra.mxu0 %v20939_v14  ;;  %15246 = vmatprep.mubr.bf16.mxu0 %v21139_v59  ;;  %v20995_v14 = vld [vmem:[%s25696_s5 + $0xcc4] ss:$16 sps:$4 sm:$0xff]  }
 0x5ba   :  { %14026 = vmatpush1.bf16.msra.mxu1 %v20942_v36  ;;  %15216 = vmatprep.subr.bf16.mxu0 %v20947_v54 }
 0x5bb   :  { %14027 = vmatprep.subr.bf16.mxu1 %v20950_v62 }
 0x5bc   :  { %v12317_v17 = vpop.f32.mrb[212].mxu1 }
 0x5bd   :  { %v25301_v58 = vadd.f32 %v12317_v17, %v25075_v33  ;;  %v12319_v28 = vpop.f32.mrb[213].mxu1  ;;  %15217 = vmatpush1.bf16.msra.mxu0 %v20945_v40  ;;  %v20959_v33 = vld [vmem:[%s25696_s5 + $0xf6c] ss:$16 sps:$4 sm:$0xff]  }
 0x5be   :  { %v25307_v20 = vadd.f32 %v12319_v28, %v25081_v34  ;;  %v12321_v56 = vpop.f32.mrb[214].mxu1  ;;  %14028 = vmatpush1.bf16.msra.mxu1 %v20948_v1  ;;  %15218 = vmatprep.subr.bf16.mxu0 %v20953_v19  ;;  %v20957_v34 = vld [vmem:[%s25696_s5 + $0xf68] ss:$16 sps:$4 sm:$0xff]   ;;  %v20993_v19 = vld [vmem:[%s25696_s5 + $0xcc0] ss:$16 sps:$4 sm:$0xff]  }
 0x5bf   :  { %v12322_v39 = vpop.f32.mrb[215].mxu1  ;;  %14029 = vmatprep.subr.bf16.mxu1 %v20956_v24  ;;  %v20998_v28 = vld [vmem:[%s25696_s5 + $0xce4] ss:$16 sps:$4 sm:$0xff]   ;;  %v20996_v56 = vld [vmem:[%s25696_s5 + $0xce0] ss:$16 sps:$4 sm:$0xff]  }
 0x5c0   :  { %v21004_v39 = vld [vmem:[%s25696_s5 + $0xd24] ss:$16 sps:$4 sm:$0xff]  }
 0x5c1   :  { %15219 = vmatpush1.bf16.msra.mxu0 %v20951_v44 }
 0x5c2   :  { %14030 = vmatpush1.bf16.msra.mxu1 %v20954_v47  ;;  %15220 = vmatprep.subr.bf16.mxu0 %v20959_v33 }
 0x5c3   :  { %14031 = vmatprep.subr.bf16.mxu1 %v20962_v38  ;;  %v21013_v38 = vld [vmem:[%s25696_s5 + $0xd84] ss:$16 sps:$4 sm:$0xff]  }
 0x5c5   :  { %15221 = vmatpush1.bf16.msra.mxu0 %v20957_v34  ;;  %v21011_v34 = vld [vmem:[%s25696_s5 + $0xd80] ss:$16 sps:$4 sm:$0xff]  }
 0x5c6   :  { %14032 = vmatpush1.bf16.msra.mxu1 %v20960_v9  ;;  %15222 = vmatprep.subr.bf16.mxu0 %v20965_v57  ;;  %v21016_v9 = vld [vmem:[%s25696_s5 + $0xda4] ss:$16 sps:$4 sm:$0xff]   ;;  %v21014_v57 = vld [vmem:[%s25696_s5 + $0xda0] ss:$16 sps:$4 sm:$0xff]  }
 0x5c7   :  { %14306 = vmatprep.subr.bf16.mxu1 %v20968_v30  ;;  %v21019_v30 = vld [vmem:[%s25696_s5 + $0xdc4] ss:$16 sps:$4 sm:$0xff]  }
 0x5c9   :  { %14050 = vmatmul.mubr.bf16.vlgmr.msra.gmra.mrb[240].mxu1 %v24931_v10  ;;  %15223 = vmatpush1.bf16.msra.mxu0 %v20963_v16  ;;  %v20980_v10 = vld [vmem:[%s25696_s5 + $0xc44] ss:$16 sps:$4 sm:$0xff]  }
 0x5ca   :  { %14307 = vmatpush1.bf16.msra.mxu1 %v20966_v2  ;;  %15224 = vmatprep.subr.bf16.mxu0 %v20971_v55  ;;  %v21017_v2 = vld [vmem:[%s25696_s5 + $0xdc0] ss:$16 sps:$4 sm:$0xff]  }
 0x5cb   :  { %14308 = vmatprep.subr.bf16.mxu1 %v20974_v11  ;;  %14338 = vmatprep.mubr.bf16.mxu1 %v21139_v59  ;;  %v21023_v11 = vld [vmem:[%s25696_s5 + $0xe00] ss:$16 sps:$4 sm:$0xff]  }
 0x5cd   :  { %15225 = vmatpush1.bf16.msra.mxu0 %v20969_v0  ;;  %v21026_v0 = vld [vmem:[%s25696_s5 + $0xe20] ss:$16 sps:$4 sm:$0xff]  }
 0x5ce   :  { %14309 = vmatpush1.bf16.msra.mxu1 %v20972_v4  ;;  %15226 = vmatprep.subr.bf16.mxu0 %v20977_v43  ;;  %v21031_v43 = vld [vmem:[%s25696_s5 + $0xe44] ss:$16 sps:$4 sm:$0xff]  }
 0x5cf   :  { %14310 = vmatprep.subr.bf16.mxu1 %v20980_v10 }
 0x5d1   :  { %15227 = vmatpush1.bf16.msra.mxu0 %v20975_v31 }
 0x5d2   :  { %14311 = vmatpush1.bf16.msra.mxu1 %v20978_v26  ;;  %15228 = vmatprep.subr.bf16.mxu0 %v20983_v42 }
 0x5d3   :  { %14312 = vmatprep.subr.bf16.mxu1 %v20986_v22  ;;  %v21072_v22 = vld [vmem:[%s25698_s7 + $0x80] sm:$0xff]  }
 0x5d5   :  { %15229 = vmatpush1.bf16.msra.mxu0 %v20981_v37  ;;  %v21073_v37 = vld [vmem:[%s25698_s7 + $0xc8] sm:$0xff]  }
 0x5d6   :  { %14313 = vmatpush1.bf16.msra.mxu1 %v20984_v29  ;;  %v21034_v29 = vld [vmem:[%s25696_s5 + $0xe64] ss:$16 sps:$4 sm:$0xff]   ;;  %18099 = vmatprep.subr.bf16.mxu0 %v21071_v49 }
 0x5d7   :  { %14314 = vmatprep.subr.bf16.mxu1 %v20989_v7  ;;  %v21032_v7 = vld [vmem:[%s25696_s5 + $0xe60] ss:$16 sps:$4 sm:$0xff]  }
 0x5d8   :  { %15247 = vmatmul.mubr.bf16.vlgmr.msra.gmra.mrb[208].mxu0 %v25378_v15 }
 0x5d9   :  { %18100 = vmatpush3.bf16.msra.mxu0 %v21072_v22 }
 0x5da   :  { %14315 = vmatpush1.bf16.msra.mxu1 %v20987_v51  ;;  %18101 = vmatprep.subr.bf16.mxu0 %v21073_v37  ;;  %v21037_v51 = vld [vmem:[%s25696_s5 + $0xe84] ss:$16 sps:$4 sm:$0xff]  }
 0x5db   :  { %14316 = vmatprep.subr.bf16.mxu1 %v20992_v35  ;;  %v21035_v35 = vld [vmem:[%s25696_s5 + $0xe80] ss:$16 sps:$4 sm:$0xff]  }
 0x5dc   :  { %v12358_v36 = vpop.f32.mrb[216].mxu1 }
 0x5dd   :  { %v12367_v54 = vadd.f32 %v12358_v36, %v25188_v46  ;;  %v12360_v62 = vpop.f32.mrb[217].mxu1  ;;  %18102 = vmatpush3.bf16.msra.mxu0 %v21074_v18  ;;  %v21043_v36 = vld [vmem:[%s25696_s5 + $0xec4] ss:$16 sps:$4 sm:$0xff]  }
 0x5de   :  { %v12368_v40 = vadd.f32 %v12360_v62, %v25194_v53  ;;  %v12362_v1 = vpop.f32.mrb[218].mxu1  ;;  %14317 = vmatpush1.bf16.msra.mxu1 %v20990_v12  ;;  %v21040_v12 = vld [vmem:[%s25696_s5 + $0xea4] ss:$16 sps:$4 sm:$0xff]  }
 0x5df   :  { %v12656_v24 = vadd.f32 %v24873_v48, %v12367_v54  ;;  %v12363_v17 = vpop.f32.mrb[219].mxu1  ;;  %14318 = vmatprep.subr.bf16.mxu1 %v20995_v14  ;;  %v21001_v48 = vld [vmem:[%s25696_s5 + $0xd04] ss:$16 sps:$4 sm:$0xff]   ;;  %v21038_v14 = vld [vmem:[%s25696_s5 + $0xea0] ss:$16 sps:$4 sm:$0xff]  }
 0x5e0   :  { %v12657_v44 = vadd.f32 %v24875_v41, %v12368_v40  ;;  %v21075_v17 = vld [vmem:[%s25698_s7 + $0xd0] sm:$0xff]  }
 0x5e1   :  { %v12945_v46 = vadd.f32 %v24986_v3, %v12656_v24  ;;  %v20999_v3 = vld [vmem:[%s25696_s5 + $0xd00] ss:$16 sps:$4 sm:$0xff]   ;;  %18103 = vmatprep.subr.bf16.mxu0 %v21075_v17 }
 0x5e2   :  { %v12946_v53 = vadd.f32 %v24991_v25, %v12657_v44  ;;  %14319 = vmatpush1.bf16.msra.mxu1 %v20993_v19  ;;  %v21041_v24 = vld [vmem:[%s25696_s5 + $0xec0] ss:$16 sps:$4 sm:$0xff]   ;;  %v21046_v44 = vld [vmem:[%s25696_s5 + $0xee4] ss:$16 sps:$4 sm:$0xff]  }
 0x5e3   :  { %14320 = vmatprep.subr.bf16.mxu1 %v20998_v28  ;;  %v13234_v47 = vadd.f32 %v25104_v32, %v12945_v46  ;;  %v21002_v32 = vld [vmem:[%s25696_s5 + $0xd20] ss:$16 sps:$4 sm:$0xff]  }
 0x5e4   :  { %v13235_v33 = vadd.f32 %v25109_v27, %v12946_v53  ;;  %v21007_v27 = vld [vmem:[%s25696_s5 + $0xd44] ss:$16 sps:$4 sm:$0xff]   ;;  %v21077_v53 = vld [vmem:[%s25698_s7 + $0xd8] sm:$0xff]  }
 0x5e5   :  { %v13523_v41 = vadd.f32 %v25217_v8, %v13234_v47  ;;  %v21005_v8 = vld [vmem:[%s25696_s5 + $0xd40] ss:$16 sps:$4 sm:$0xff]  }
 0x5e6   :  { %14321 = vmatpush1.bf16.msra.mxu1 %v20996_v56  ;;  %v13524_v25 = vadd.f32 %v25222_v50, %v13235_v33  ;;  %v21008_v50 = vld [vmem:[%s25696_s5 + $0xd60] ss:$16 sps:$4 sm:$0xff]   ;;  %v21078_v56 = vld [vmem:[%s25698_s7 + $0x98] sm:$0xff]   ;;  %v21049_v33 = vld [vmem:[%s25696_s5 + $0xf04] ss:$16 sps:$4 sm:$0xff]  }
 0x5e7   :  { %14595 = vmatprep.subr.bf16.mxu1 %v21001_v48  ;;  %v21076_v46 = vld [vmem:[%s25698_s7 + $0x90] sm:$0xff]   ;;  %v21079_v47 = vld [vmem:[%s25698_s7 + $0xe0] sm:$0xff]  }
 0x5e8   :  { %18104 = vmatpush3.bf16.msra.mxu0 %v21076_v46  ;;  %v21044_v48 = vld [vmem:[%s25696_s5 + $0xee0] ss:$16 sps:$4 sm:$0xff]  }
 0x5e9   :  { %14339 = vmatmul.mubr.bf16.vlgmr.msra.gmra.mrb[244].mxu1 %v25049_v13  ;;  %v21010_v13 = vld [vmem:[%s25696_s5 + $0xd64] ss:$16 sps:$4 sm:$0xff]   ;;  %18105 = vmatprep.subr.bf16.mxu0 %v21077_v53 }
 0x5ea   :  { %14596 = vmatpush1.bf16.msra.mxu1 %v20999_v3  ;;  %14627 = vmatprep.mubr.bf16.mxu1 %v21139_v59  ;;  %v21047_v3 = vld [vmem:[%s25696_s5 + $0xf00] ss:$16 sps:$4 sm:$0xff]  }
 0x5eb   :  { %14597 = vmatprep.subr.bf16.mxu1 %v21004_v39  ;;  %v21081_v39 = vld [vmem:[%s25698_s7 + $0xe8] sm:$0xff]   ;;  %v21087_v46 = vld [vmem:[%s25698_s7 + $0x40] sm:$0xff]  }
 0x5ec   :  { %18106 = vmatpush3.bf16.msra.mxu0 %v21078_v56  ;;  %v21088_v53 = vld [vmem:[%s25698_s7] sm:$0xff]   ;;  %v21089_v56 = vld [vmem:[%s25698_s7 + $0x48] sm:$0xff]  }
 0x5ed   :  { %18107 = vmatprep.subr.bf16.mxu0 %v21079_v47  ;;  %v21091_v47 = vld [vmem:[%s25698_s7 + $0x50] sm:$0xff]  }
 0x5ee   :  { %14598 = vmatpush1.bf16.msra.mxu1 %v21002_v32  ;;  %v21050_v32 = vld [vmem:[%s25696_s5 + $0xf20] ss:$16 sps:$4 sm:$0xff]  }
 0x5ef   :  { %14599 = vmatprep.subr.bf16.mxu1 %v21007_v27 }
 0x5f2   :  { %14600 = vmatpush1.bf16.msra.mxu1 %v21005_v8  ;;  %v21055_v8 = vld [vmem:[%s25696_s5 + $0xf44] ss:$16 sps:$4 sm:$0xff]  }
 0x5f3   :  { %14601 = vmatprep.subr.bf16.mxu1 %v21010_v13 }
 0x5f6   :  { %14602 = vmatpush1.bf16.msra.mxu1 %v21008_v50 }
 0x5f7   :  { %14603 = vmatprep.subr.bf16.mxu1 %v21013_v38 }
 0x5fa   :  { %14604 = vmatpush1.bf16.msra.mxu1 %v21011_v34 }
 0x5fb   :  { %14605 = vmatprep.subr.bf16.mxu1 %v21016_v9  ;;  %v21053_v9 = vld [vmem:[%s25696_s5 + $0xf40] ss:$16 sps:$4 sm:$0xff]  }
 0x5fc   :  { %v12606_v21 = vpop.f32.mrb[220].mxu1 }
 0x5fd   :  { %v12654_v60 = vadd.f32 %v12606_v21, %v25301_v58  ;;  %v12608_v16 = vpop.f32.mrb[221].mxu1  ;;  %v21020_v58 = vld [vmem:[%s25696_s5 + $0xde0] ss:$16 sps:$4 sm:$0xff]   ;;  %v21061_v21 = vld [vmem:[%s25696_s5 + $0xf84] ss:$16 sps:$4 sm:$0xff]  }
 0x5fe   :  { %v12655_v5 = vadd.f32 %v12608_v16, %v25307_v20  ;;  %v12610_v6 = vpop.f32.mrb[222].mxu1  ;;  %14606 = vmatpush1.bf16.msra.mxu1 %v21014_v57  ;;  %v21025_v20 = vld [vmem:[%s25696_s5 + $0xe04] ss:$16 sps:$4 sm:$0xff]   ;;  %v21056_v57 = vld [vmem:[%s25696_s5 + $0xf60] ss:$16 sps:$4 sm:$0xff]  }
 0x5ff   :  { %v12611_v55 = vpop.f32.mrb[223].mxu1  ;;  %14607 = vmatprep.subr.bf16.mxu1 %v21019_v30  ;;  %v21082_v30 = vld [vmem:[%s25698_s7 + $0xa8] sm:$0xff]   ;;  %v21084_v16 = vld [vmem:[%s25698_s7 + $0xb0] sm:$0xff]  }
 0x600   :  { %v21059_v6 = vld [vmem:[%s25696_s5 + $0xf80] ss:$16 sps:$4 sm:$0xff]   ;;  %v21086_v55 = vld [vmem:[%s25698_s7 + $0xb8] sm:$0xff]  }
 0x602   :  { %14608 = vmatpush1.bf16.msra.mxu1 %v21017_v2  ;;  %v21064_v2 = vld [vmem:[%s25696_s5 + $0xfa4] ss:$16 sps:$4 sm:$0xff]  }
 0x603   :  { %14609 = vmatprep.subr.bf16.mxu1 %v21022_v61  ;;  %v21062_v61 = vld [vmem:[%s25696_s5 + $0xfa0] ss:$16 sps:$4 sm:$0xff]  }
 0x606   :  { %14610 = vmatpush1.bf16.msra.mxu1 %v21020_v58  ;;  %v21067_v58 = vld [vmem:[%s25696_s5 + $0xfc4] ss:$16 sps:$4 sm:$0xff]  }
 0x607   :  { %14884 = vmatprep.subr.bf16.mxu1 %v21025_v20 }
 0x609   :  { %14628 = vmatmul.mubr.bf16.vlgmr.msra.gmra.mrb[248].mxu1 %v25162_v52  ;;  %v21029_v52 = vld [vmem:[%s25696_s5 + $0xe40] ss:$16 sps:$4 sm:$0xff]  }
 0x60a   :  { %14885 = vmatpush1.bf16.msra.mxu1 %v21023_v11  ;;  %14916 = vmatprep.mubr.bf16.mxu1 %v21139_v59 }
 0x60b   :  { %v13803_v4 = vpop.f32.mrb[188].mxu0  ;;  %14886 = vmatprep.subr.bf16.mxu1 %v21028_v23 }
 0x60c   :  { %v25481_v45 = vadd.f32 %v13803_v4, %v13523_v41  ;;  %v13805_v10 = vpop.f32.mrb[189].mxu0  ;;  %v21080_v41 = vld [vmem:[%s25698_s7 + $0xa0] sm:$0xff]  }
 0x60d   :  { %v25483_v31 = vadd.f32 %v13805_v10, %v13524_v25  ;;  %v13807_v26 = vpop.f32.mrb[190].mxu0  ;;  %v21052_v25 = vld [vmem:[%s25696_s5 + $0xf24] ss:$16 sps:$4 sm:$0xff]   ;;  %18108 = vmatpush3.bf16.msra.mxu0 %v21080_v41  ;;  %v21093_v41 = vld [vmem:[%s25698_s7 + $0x58] sm:$0xff]  }
 0x60e   :  { %14887 = vmatpush1.bf16.msra.mxu1 %v21026_v0  ;;  %v13808_v42 = vpop.f32.mrb[191].mxu0  ;;  %18109 = vmatprep.subr.bf16.mxu0 %v21081_v39  ;;  %v21070_v10 = vld [vmem:[%s25696_s5 + $0xfe4] ss:$16 sps:$4 sm:$0xff]  }
 0x60f   :  { %14888 = vmatprep.subr.bf16.mxu1 %v21031_v43  ;;  %v21065_v43 = vld [vmem:[%s25696_s5 + $0xfc0] ss:$16 sps:$4 sm:$0xff]  }
 0x610   :  { %v21095_v39 = vld [vmem:[%s25698_s7 + $0x60] sm:$0xff]  }
 0x611   :  { %18110 = vmatpush3.bf16.msra.mxu0 %v21082_v30 }
 0x612   :  { %14889 = vmatpush1.bf16.msra.mxu1 %v21029_v52 }
 0x613   :  { %14890 = vmatprep.subr.bf16.mxu1 %v21034_v29 }
 0x616   :  { %14891 = vmatpush1.bf16.msra.mxu1 %v21032_v7 }
 0x617   :  { %14892 = vmatprep.subr.bf16.mxu1 %v21037_v51 }
 0x61a   :  { %14893 = vmatpush1.bf16.msra.mxu1 %v21035_v35 }
 0x61b   :  { %14894 = vmatprep.subr.bf16.mxu1 %v21040_v12 }
 0x61c   :  { %v12895_v54 = vpop.f32.mrb[224].mxu1 }
 0x61d   :  { %v25521_v62 = vadd.f32 %v12895_v54, %v12654_v60  ;;  %v12897_v40 = vpop.f32.mrb[225].mxu1  ;;  %v21083_v60 = vld [vmem:[%s25698_s7 + $0xf0] sm:$0xff]  }
 0x61e   :  { %v25523_v1 = vadd.f32 %v12897_v40, %v12655_v5  ;;  %v12899_v19 = vpop.f32.mrb[226].mxu1  ;;  %14895 = vmatpush1.bf16.msra.mxu1 %v21038_v14  ;;  %18111 = vmatprep.subr.bf16.mxu0 %v21083_v60  ;;  %v21085_v5 = vld [vmem:[%s25698_s7 + $0xf8] sm:$0xff]  }
 0x61f   :  { %v12900_v28 = vpop.f32.mrb[227].mxu1  ;;  %14896 = vmatprep.subr.bf16.mxu1 %v21043_v36  ;;  %18112 = vmatpush3.bf16.msra.mxu0 %v21084_v16 }
 0x620   :  { %18113 = vmatprep.subr.bf16.mxu0 %v21085_v5  ;;  %v21098_v5 = vld [vmem:[%s25698_s7 + $0x28] sm:$0xff]  }
 0x622   :  { %14897 = vmatpush1.bf16.msra.mxu1 %v21041_v24 }
 0x623   :  { %14898 = vmatprep.subr.bf16.mxu1 %v21046_v44  ;;  %18114 = vmatpush3.bf16.msra.mxu0 %v21086_v55 }
 0x626   :  { %14899 = vmatpush1.bf16.msra.mxu1 %v21044_v48  ;;  %v21090_v48 = vld [vmem:[%s25698_s7 + $0x8] sm:$0xff]  }
 0x627   :  { %15173 = vmatprep.subr.bf16.mxu1 %v21049_v33  ;;  %v21092_v33 = vld [vmem:[%s25698_s7 + $0x10] sm:$0xff]  }
 0x629   :  { %14917 = vmatmul.mubr.bf16.vlgmr.msra.gmra.mrb[252].mxu1 %v25275_v63 }
 0x62a   :  { %15174 = vmatpush1.bf16.msra.mxu1 %v21047_v3  ;;  %15205 = vmatprep.mubr.bf16.mxu1 %v21139_v59  ;;  %v21058_v59 = vld [vmem:[%s25696_s5 + $0xf64] ss:$16 sps:$4 sm:$0xff]   ;;  %v21094_v3 = vld [vmem:[%s25698_s7 + $0x18] sm:$0xff]  }
 0x62b   :  { %v14092_v27 = vpop.f32.mrb[192].mxu0  ;;  %15175 = vmatprep.subr.bf16.mxu1 %v21052_v25 }
 0x62c   :  { %v14101_v13 = vadd.f32 %v14092_v27, %v25481_v45  ;;  %v14094_v50 = vpop.f32.mrb[193].mxu0 }
 0x62d   :  { %v14102_v63 = vadd.f32 %v14094_v50, %v25483_v31  ;;  %v14096_v38 = vpop.f32.mrb[194].mxu0  ;;  %v21068_v31 = vld [vmem:[%s25696_s5 + $0xfe0] ss:$16 sps:$4 sm:$0xff]  }
 0x62e   :  { %v14097_v34 = vpop.f32.mrb[195].mxu0  ;;  %15176 = vmatpush1.bf16.msra.mxu1 %v21050_v32  ;;  %v21097_v38 = vld [vmem:[%s25698_s7 + $0x68] sm:$0xff]  }
 0x62f   :  { %15177 = vmatprep.subr.bf16.mxu1 %v21055_v8 }
 0x632   :  { %15178 = vmatpush1.bf16.msra.mxu1 %v21053_v9 }
 0x633   :  { %15179 = vmatprep.subr.bf16.mxu1 %v21058_v59 }
 0x636   :  { %15180 = vmatpush1.bf16.msra.mxu1 %v21056_v57 }
 0x637   :  { %15181 = vmatprep.subr.bf16.mxu1 %v21061_v21  ;;  %v15261_v21 = vlaneseq }
 0x639   :  { %v15262_v16 = vshrl.u32 %v15261_v21, 7 }
 0x63a   :  { %15182 = vmatpush1.bf16.msra.mxu1 %v21059_v6  ;;  %v21099_v6 = vld [vmem:[%s25698_s7 + $0x70] sm:$0xff]  }
 0x63b   :  { %15183 = vmatprep.subr.bf16.mxu1 %v21064_v2  ;;  %v21100_v2 = vld [vmem:[%s25698_s7 + $0x30] sm:$0xff]   ;;  %v15271_v55 = vsub.s32 2, %v15262_v16 }
 0x63c   :  { %v13184_v20 = vpop.f32.mrb[228].mxu1 }
 0x63d   :  { %v13232_v11 = vadd.f32 %v13184_v20, %v25521_v62  ;;  %v13186_v23 = vpop.f32.mrb[229].mxu1  ;;  %v15275_v20 = vsub.s32 3, %v15262_v16 }
 0x63e   :  { %v13233_v0 = vadd.f32 %v13186_v23, %v25523_v1  ;;  %v13188_v4 = vpop.f32.mrb[230].mxu1  ;;  %15184 = vmatpush1.bf16.msra.mxu1 %v21062_v61  ;;  %v21101_v61 = vld [vmem:[%s25698_s7 + $0x78] sm:$0xff]  }
 0x63f   :  { %v13189_v45 = vpop.f32.mrb[231].mxu1  ;;  %15185 = vmatprep.subr.bf16.mxu1 %v21067_v58  ;;  %v15259_v58 = vld [vmem:[%s25697_s6] sm:$0xf] }
 0x640   :  { %v15272_v23 = vrot.slane %v15259_v58, %v15271_v55  ;;  %v15276_v4 = vrot.slane %v15259_v58, %v15275_v20 }
 0x642   :  { %15186 = vmatpush1.bf16.msra.mxu1 %v21065_v43 }
 0x643   :  { %15187 = vmatprep.subr.bf16.mxu1 %v21070_v10 }
 0x646   :  { %15188 = vmatpush1.bf16.msra.mxu1 %v21068_v31 }
 0x647   :  { %18077 = vmatprep.subr.bf16.mxu1 %v21087_v46 }
 0x649   :  { %15206 = vmatmul.mubr.bf16.vlgmr.msra.gmra.mrb[0].mxu1 %v25378_v15 }
 0x64a   :  { %18078 = vmatpush3.bf16.msra.mxu1 %v21088_v53  ;;  %v15263_v53 = vsub.s32 0, %v15262_v16 }
 0x64b   :  { %v14381_v26 = vpop.f32.mrb[196].mxu0  ;;  %18079 = vmatprep.subr.bf16.mxu1 %v21089_v56  ;;  %v15267_v56 = vsub.s32 1, %v15262_v16 }
 0x64c   :  { %v14390_v52 = vadd.f32 %v14381_v26, %v14101_v13  ;;  %v14383_v42 = vpop.f32.mrb[197].mxu0 }
 0x64d   :  { %v14391_v49 = vadd.f32 %v14383_v42, %v14102_v63  ;;  %v14385_v22 = vpop.f32.mrb[198].mxu0  ;;  %v21096_v63 = vld [vmem:[%s25698_s7 + $0x20] sm:$0xff]  }
 0x64e   :  { %v14386_v37 = vpop.f32.mrb[199].mxu0  ;;  %18080 = vmatpush3.bf16.msra.mxu1 %v21090_v48  ;;  %v15264_v48 = vrot.slane %v15259_v58, %v15263_v53 }
 0x64f   :  { %18081 = vmatprep.subr.bf16.mxu1 %v21091_v47 }
 0x652   :  { %18082 = vmatpush3.bf16.msra.mxu1 %v21092_v33  ;;  %v15268_v33 = vrot.slane %v15259_v58, %v15267_v56 }
 0x653   :  { %18083 = vmatprep.subr.bf16.mxu1 %v21093_v41 }
 0x656   :  { %18084 = vmatpush3.bf16.msra.mxu1 %v21094_v3 }
 0x657   :  { %18085 = vmatprep.subr.bf16.mxu1 %v21095_v39 }
 0x65a   :  { %18086 = vmatpush3.bf16.msra.mxu1 %v21096_v63 }
 0x65b   :  { %18087 = vmatprep.subr.bf16.mxu1 %v21097_v38 }
 0x65c   :  { %v13473_v29 = vpop.f32.mrb[232].mxu1 }
 0x65d   :  { %v13521_v18 = vadd.f32 %v13473_v29, %v13232_v11  ;;  %v13475_v7 = vpop.f32.mrb[233].mxu1  ;;  %v21102_v11 = vld [vmem:[%s25698_s7 + $0x38] sm:$0xff]  }
 0x65e   :  { %v13522_v51 = vadd.f32 %v13475_v7, %v13233_v0  ;;  %v13477_v35 = vpop.f32.mrb[234].mxu1  ;;  %18088 = vmatpush3.bf16.msra.mxu1 %v21098_v5 }
 0x65f   :  { %v13478_v12 = vpop.f32.mrb[235].mxu1  ;;  %18089 = vmatprep.subr.bf16.mxu1 %v21099_v6 }
 0x662   :  { %18090 = vmatpush3.bf16.msra.mxu1 %v21100_v2 }
 0x663   :  { %18091 = vmatprep.subr.bf16.mxu1 %v21101_v61 }
 0x666   :  { %18092 = vmatpush3.bf16.msra.mxu1 %v21102_v11 }
 0x66b   :  { %v14670_v14 = vpop.f32.mrb[200].mxu0 }
 0x66c   :  { %v14679_v36 = vadd.f32 %v14670_v14, %v14390_v52  ;;  %v14672_v54 = vpop.f32.mrb[201].mxu0 }
 0x66d   :  { %v14680_v62 = vadd.f32 %v14672_v54, %v14391_v49  ;;  %v14674_v40 = vpop.f32.mrb[202].mxu0 }
 0x66e   :  { %v14675_v1 = vpop.f32.mrb[203].mxu0 }
 0x67c   :  { %v13762_v19 = vpop.f32.mrb[236].mxu1 }
 0x67d   :  { %v13810_v15 = vadd.f32 %v13762_v19, %v13521_v18  ;;  %v13764_v24 = vpop.f32.mrb[237].mxu1 }
 0x67e   :  { %v13811_v17 = vadd.f32 %v13764_v24, %v13522_v51  ;;  %v13766_v28 = vpop.f32.mrb[238].mxu1 }
 0x67f   :  { %v13767_v44 = vpop.f32.mrb[239].mxu1 }
 0x68b   :  { %v14959_v25 = vpop.f32.mrb[204].mxu0 }
 0x68c   :  { %v14968_v32 = vadd.f32 %v14959_v25, %v14679_v36  ;;  %v14961_v27 = vpop.f32.mrb[205].mxu0 }
 0x68d   :  { %v14969_v8 = vadd.f32 %v14961_v27, %v14680_v62  ;;  %v14963_v13 = vpop.f32.mrb[206].mxu0 }
 0x68e   :  { %v14964_v50 = vpop.f32.mrb[207].mxu0 }
 0x69c   :  { %v14051_v34 = vpop.f32.mrb[240].mxu1 }
 0x69d   :  { %v14099_v9 = vadd.f32 %v14051_v34, %v13810_v15  ;;  %v14053_v59 = vpop.f32.mrb[241].mxu1 }
 0x69e   :  { %v14100_v57 = vadd.f32 %v14053_v59, %v13811_v17  ;;  %v14055_v30 = vpop.f32.mrb[242].mxu1 }
 0x69f   :  { %v14056_v60 = vpop.f32.mrb[243].mxu1 }
 0x6a0   :  { %v17482_v60 = vld [vmem:[%s25699_s8] ss:$0 sm:$0xff] }
 0x6ab   :  { %v15248_v0 = vpop.f32.mrb[208].mxu0 }
 0x6ac   :  { %v15257_v43 = vadd.f32 %v15248_v0, %v14968_v32  ;;  %v15250_v45 = vpop.f32.mrb[209].mxu0 }
 0x6ad   :  { %v15258_v10 = vadd.f32 %v15250_v45, %v14969_v8  ;;  %v15252_v31 = vpop.f32.mrb[210].mxu0 }
 0x6ae   :  { %v15283_v26 = vadd.f32 %v15272_v23, %v15257_v43  ;;  %v15253_v52 = vpop.f32.mrb[211].mxu0 }
 0x6af   :  { %v15284_v42 = vadd.f32 %v15276_v4, %v15258_v10 }
 0x6b0   :  { %v15287_v49 = vmax.f32 %v15283_v26, 0.0 }
 0x6b1   :  { %v15288_v22 = vmax.f32 %v15284_v42, 0.0 }
 0x6b2   :  { %v15291_v29 = vpack.c.bf16 %v15287_v49, %v15287_v49 }
 0x6b3   :  { %v15292_v37 = vpack.c.bf16 %v15288_v22, %v15288_v22 }
 0x6b5   :  { %15628 = vmatprep.mubr.bf16.mxu0 %v15292_v37 }
 0x6b6   :  { %15629 = vmatmul.mubr.bf16.vlgmr.msra.gmra.mrb[212].mxu0 %v15291_v29 }
 0x6bc   :  { %v14340_v18 = vpop.f32.mrb[244].mxu1 }
 0x6bd   :  { %v14388_v7 = vadd.f32 %v14340_v18, %v14099_v9  ;;  %v14342_v51 = vpop.f32.mrb[245].mxu1 }
 0x6be   :  { %v14389_v35 = vadd.f32 %v14342_v51, %v14100_v57  ;;  %v14344_v12 = vpop.f32.mrb[246].mxu1 }
 0x6bf   :  { %v14345_v14 = vpop.f32.mrb[247].mxu1 }
 0x6dc   :  { %v14629_v36 = vpop.f32.mrb[248].mxu1 }
 0x6dd   :  { %v14677_v54 = vadd.f32 %v14629_v36, %v14388_v7  ;;  %v14631_v62 = vpop.f32.mrb[249].mxu1 }
 0x6de   :  { %v14678_v40 = vadd.f32 %v14631_v62, %v14389_v35  ;;  %v14633_v1 = vpop.f32.mrb[250].mxu1 }
 0x6df   :  { %v14634_v19 = vpop.f32.mrb[251].mxu1 }
 0x6fc   :  { %v14918_v15 = vpop.f32.mrb[252].mxu1 }
 0x6fd   :  { %v14966_v24 = vadd.f32 %v14918_v15, %v14677_v54  ;;  %v14920_v17 = vpop.f32.mrb[253].mxu1 }
 0x6fe   :  { %v14967_v28 = vadd.f32 %v14920_v17, %v14678_v40  ;;  %v14922_v44 = vpop.f32.mrb[254].mxu1 }
 0x6ff   :  { %v14923_v46 = vpop.f32.mrb[255].mxu1 }
 0x71c   :  { %v15207_v47 = vpop.f32.mrb[0].mxu1 }
 0x71d   :  { %v15255_v41 = vadd.f32 %v15207_v47, %v14966_v24  ;;  %v15209_v3 = vpop.f32.mrb[1].mxu1 }
 0x71e   :  { %v15256_v25 = vadd.f32 %v15209_v3, %v14967_v28  ;;  %v15211_v39 = vpop.f32.mrb[2].mxu1 }
 0x71f   :  { %v15281_v32 = vadd.f32 %v15264_v48, %v15255_v41  ;;  %v15212_v27 = vpop.f32.mrb[3].mxu1 }
 0x720   :  { %v15282_v8 = vadd.f32 %v15268_v33, %v15256_v25 }
 0x721   :  { %v15285_v13 = vmax.f32 %v15281_v32, 0.0 }
 0x722   :  { %v15286_v50 = vmax.f32 %v15282_v8, 0.0 }
 0x723   :  { %v15289_v38 = vpack.c.bf16 %v15285_v13, %v15285_v13 }
 0x724   :  { %v15290_v63 = vpack.c.bf16 %v15286_v50, %v15286_v50 }
 0x726   :  { %15588 = vmatprep.mubr.bf16.mxu1 %v15290_v63 }
 0x727   :  { %15589 = vmatmul.mubr.bf16.vlgmr.msra.gmra.mrb[4].mxu1 %v15289_v38 }
 0x789   :  { %v18115_v34 = vpop.f32.mrb[212].mxu0 }
 0x78a   :  { %v18116_v9 = vpop.f32.mrb[213].mxu0 }
 0x78b   :  { %v18117_v59 = vadd.f32 %v18116_v9, %v18115_v34  ;;  %v18118_v57 = vpop.f32.mrb[214].mxu0 }
 0x78c   :  { %v18119_v30 = vpop.f32.mrb[215].mxu0 }
 0x7fa   :  { %v18093_v21 = vpop.f32.mrb[4].mxu1 }
 0x7fb   :  { %v18094_v16 = vpop.f32.mrb[5].mxu1 }
 0x7fc   :  { %v18095_v5 = vadd.f32 %v18094_v16, %v18093_v21  ;;  %v18096_v6 = vpop.f32.mrb[6].mxu1 }
 0x7fd   :  { %v18097_v2 = vpop.f32.mrb[7].mxu1 }
 0x7fe   :  { %v15591_v55 = vadd.f32 %v18095_v5, %v17482_v60 }
 0x800   :  { %v15631_v61 = vadd.f32 %v18117_v59, %v15591_v55 }
 0x802   :  { %15636 = vst [vmem:[#allocation4] sm:$0x3] %v15631_v61 }
 0x803   :  { %21123 = shalt.err (!%p21120_p4)
}
 0x804   :  { %s21124_s8 = scalar_lea.hbm %s25700_s9, 32 }
 0x805   :  { %p21125_p5 = scmp.ne.s32.totalorder %s25700_s9, %s21124_s8  ;;  %p21128_p6 = scmp.lt.u32.totalorder %s21124_s8, %s25700_s9 }
 0x807   :  { %p21130_p7 = pnand %p21128_p6, %p21125_p5 }
 0x809   :  { %21133 = shalt.err (!%p21130_p7)
}
 0x80a   :  { %15646 = dma.vmem_to_hbm [thread:$0]  %s15644_s25, 32, %s25700_s9, [#allocation5]  }
 0x80b   :  { %21134 = dma.done.wait [#allocation5], 32  }
 0x80c   :  { %21135 = vsyncadd [#allocation5], 4294967264 }
 0x80d   :  { %15650 = vsyncpa [#allocation5], 1 }

</bundles_post_ra>
